<compile_context>
chip_gen: v7x
topology: tpu7x:2x2x1
jax: 0.10.0
libtpu: 0.0.40
codegen_flags: <defaults>
</compile_context>

<pallas_src>
import jax
import jax.numpy as jnp
from jax.experimental import pallas as pl
from jax.experimental.pallas import tpu as pltpu

# ---- scaled-down config (original: pool->224, 2048-ch feats, fc 2048/1024/512/256/2)
N_BATCH = 2
IN_CH   = 3
IMG_HW  = 18                      # input spatial, divisible by POOL_HW
POOL_HW = 9                       # AdaptiveAvgPool2d target (scaled from 224)
C_FEAT  = 128                     # backbone feature channels (scaled from 2048)
FC_DIMS = (128, 64, 32, 16, 2)    # scaled from (2048, 1024, 512, 256, 2)
FC_PAD  = 128                     # FC lane padding (== C_FEAT)
BN_EPS  = 1e-5

_SPATIALS  = (POOL_HW, POOL_HW - 2, POOL_HW - 4, POOL_HW - 6)   # 9, 7, 5, 3
_IN_ROWS   = ((N_BATCH * POOL_HW * POOL_HW + 7) // 8) * 8        # 168
_M_MAX     = N_BATCH * (POOL_HW - 2) ** 2                        # 98
_ACT_ROWS  = ((_M_MAX + 7) // 8) * 8                             # 104
_OUT_ROWS  = max(8, ((N_BATCH + 7) // 8) * 8)                    # 8

_VMEM = pl.BlockSpec(memory_space=pltpu.MemorySpace.VMEM)  # whole array in VMEM


# --------------------------------------------------------------------------
# Fused Pallas kernel: stem + conv1..3 (im2col, one matmul/layer) + FC head
# --------------------------------------------------------------------------
def _fused_forward_kernel(x_ref, conv_w_ref, conv_b_ref, fc_w_ref, fc_b_ref,
                          wf_ref, bf_ref, o_ref, im2col, act_a, act_b, fcrows):
    """Whole forward pass; every operand is a whole-array VMEM ref.

    x_ref    : (_IN_ROWS, C_FEAT) bf16   pooled input, row = b*P*P + h*P + w,
                                         channels zero-padded 3 -> C_FEAT
    conv_w   : (4, 9*C_FEAT, C_FEAT) bf16  im2col conv weights, BN scale folded in
    conv_b   : (4, 1, C_FEAT) f32          folded BN shift (incl. conv bias)
    fc_w     : (3, FC_PAD, FC_PAD) bf16    lane-padded FC weights, BN scale folded
    fc_b     : (3, 1, FC_PAD) f32
    wf / bf  : (FC_PAD, FC_PAD) bf16 / (1, FC_PAD) f32   final Linear
    o_ref    : (_OUT_ROWS, FC_PAD) f32     row/lane-padded logits
    im2col   : (_ACT_ROWS, 9*C_FEAT) bf16  per-layer im2col scratch
    act_a/b  : (_ACT_ROWS, C_FEAT) bf16    ping-pong activation scratch (row layout)
    fcrows   : (_OUT_ROWS, FC_PAD) f32     row-padded flattened features
    """
    srcs = (x_ref, act_a, act_b, act_a)
    dsts = (act_a, act_b, act_a, None)
    feat = None

    # ---- stem + conv1..3: 3x3 valid conv + folded BN (shift only) + ReLU.
    # Per layer: assemble the whole-layer im2col block with lane-dense
    # 128-wide slab copies, then ONE bf16 matmul with K = 9*C_FEAT = 1152.
    for li in range(4):
        sp = _SPATIALS[li]
        o_sp = sp - 2
        m = N_BATCH * o_sp * o_sp
        src = srcs[li]
        for b in range(N_BATCH):
            src_base = b * sp * sp
            dst_base = b * o_sp * o_sp
            for oh in range(o_sp):
                drow = dst_base + oh * o_sp
                for di in range(3):
                    for dj in range(3):
                        tap = di * 3 + dj
                        srow = src_base + (oh + di) * sp + dj
                        im2col[drow:drow + o_sp,
                               tap * C_FEAT:(tap + 1) * C_FEAT] = \
                            src[srow:srow + o_sp, :]
        y = jnp.dot(im2col[0:m, :], conv_w_ref[li],
                    preferred_element_type=jnp.float32)        # (m, C_FEAT) f32
        y = jnp.maximum(y + conv_b_ref[li], 0.0)               # BN shift + ReLU
        if li < 3:
            dsts[li][0:m, :] = y.astype(jnp.bfloat16)          # single bf16 store
        else:
            feat = y                                           # (N, C_FEAT); 1x1 spatial
                                                               # -> flatten == identity

    # ---- Flatten: one 2-row store into the row-padded FC buffer.
    fcrows[...] = jnp.zeros(fcrows.shape, jnp.float32)
    fcrows[0:N_BATCH, :] = feat

    # ---- FC head: 3 x (Linear + folded-BN shift + ReLU) + final Linear, all
    # padded to FC_PAD lanes so every matmul and the final store are full-width.
    h = fcrows[...]
    for i in range(3):
        z = jnp.dot(h.astype(jnp.bfloat16), fc_w_ref[i],
                    preferred_element_type=jnp.float32)
        h = jnp.maximum(z + fc_b_ref[i], 0.0)
    o_ref[...] = (jnp.dot(h.astype(jnp.bfloat16), wf_ref[...],
                          preferred_element_type=jnp.float32) + bf_ref[...])


# --------------------------------------------------------------------------
# Wrapper-side layout plumbing (pure XLA) and parameter folding
# --------------------------------------------------------------------------
def _pool_to_rows(x_nchw):
    """AdaptiveAvgPool2d((P, P)) for the evenly-divisible case + NHWC transpose
    + channel pad to C_FEAT + flatten to the kernel's (rows, C_FEAT) bf16 slab."""
    n, c, h, w = x_nchw.shape
    assert h % POOL_HW == 0 and w % POOL_HW == 0
    kh, kw = h // POOL_HW, w // POOL_HW
    x = x_nchw.reshape(n, c, POOL_HW, kh, POOL_HW, kw).mean(axis=(3, 5))  # (N,C,P,P)
    x = jnp.transpose(x, (0, 2, 3, 1))                                    # NHWC
    rows = x.reshape(n * POOL_HW * POOL_HW, c)
    rows = jnp.pad(rows, ((0, _IN_ROWS - rows.shape[0]), (0, C_FEAT - c)))
    return rows.astype(jnp.bfloat16)                                      # (_IN_ROWS,128)


def prepare_params(params):
    """Fold eval-mode BN (scale into weight columns, in f32, before bf16 cast),
    build dense im2col conv weights (stem channel-padded to C_FEAT), lane-pad
    the FC head, and pre-cast matmul operands to bf16.  Done once."""
    def bn_fold(p):
        scale = p["gamma"] / jnp.sqrt(p["var"] + BN_EPS)
        shift = p["beta"] + (p["b"] - p["mean"]) * scale
        return scale, shift

    w_list, b_list = [], []
    for name in ("stem", "conv1", "conv2", "conv3"):
        p = params[name]
        scale, shift = bn_fold(p)
        w = p["w"] * scale[None, None, None, :]                 # fold scale (f32)
        cin = w.shape[2]
        w_pad = jnp.zeros((3, 3, C_FEAT, C_FEAT), jnp.float32).at[:, :, :cin, :].set(w)
        w_list.append(w_pad.reshape(9 * C_FEAT, C_FEAT).astype(jnp.bfloat16))
        b_list.append(shift)
    conv_w = jnp.stack(w_list)                                  # (4, 9*C_FEAT, C_FEAT)
    conv_b = jnp.stack(b_list)[:, None, :]                      # (4, 1, C_FEAT) f32

    # NOTE: FC weights are stored (in, out); transpose when loading real
    # PyTorch checkpoints (nn.Linear stores (out, in)).
    def pad_mat(w):
        fin, fout = w.shape
        return (jnp.zeros((FC_PAD, FC_PAD), jnp.float32)
                .at[:fin, :fout].set(w).astype(jnp.bfloat16))

    def pad_vec(v):
        return jnp.zeros((FC_PAD,), jnp.float32).at[:v.shape[0]].set(v)

    fw, fb = [], []
    for name in ("fc1", "fc2", "fc3"):
        p = params[name]
        scale, shift = bn_fold(p)
        fw.append(pad_mat(p["w"] * scale[None, :]))             # fold scale (f32)
        fb.append(pad_vec(shift))
    fc_w = jnp.stack(fw)                                        # (3, FC_PAD, FC_PAD)
    fc_b = jnp.stack(fb)[:, None, :]                            # (3, 1, FC_PAD) f32
    wf = pad_mat(params["fcf"]["w"])
    bf = pad_vec(params["fcf"]["b"])[None, :]                   # (1, FC_PAD) f32

    return dict(conv_w=conv_w, conv_b=conv_b, fc_w=fc_w, fc_b=fc_b, wf=wf, bf=bf)


# --------------------------------------------------------------------------
# Full forward (mirrors predictive_ControlNet.forward)
# --------------------------------------------------------------------------
@jax.jit
def predictive_controlnet_forward(segmented_img_nchw, prep):
    n, c, h, w = segmented_img_nchw.shape
    assert (n, c, h, w) == (N_BATCH, IN_CH, IMG_HW, IMG_HW)
    x_rows = _pool_to_rows(segmented_img_nchw)                  # layout plumbing only
    out_pad = pl.pallas_call(
        _fused_forward_kernel,
        out_shape=jax.ShapeDtypeStruct((_OUT_ROWS, FC_PAD), jnp.float32),
        in_specs=[_VMEM] * 7,
        out_specs=_VMEM,
        scratch_shapes=[
            pltpu.VMEM((_ACT_ROWS, 9 * C_FEAT), jnp.bfloat16),  # im2col block
            pltpu.VMEM((_ACT_ROWS, C_FEAT), jnp.bfloat16),      # act ping
            pltpu.VMEM((_ACT_ROWS, C_FEAT), jnp.bfloat16),      # act pong
            pltpu.VMEM((_OUT_ROWS, FC_PAD), jnp.float32),       # fc rows
        ],
    )(x_rows, prep["conv_w"], prep["conv_b"],
      prep["fc_w"], prep["fc_b"], prep["wf"], prep["bf"])
    return out_pad[:n, :FC_DIMS[-1]]                            # (N, 2)


# --------------------------------------------------------------------------
# Deterministic parameter init (synthetic; no checkpoint loading)
# --------------------------------------------------------------------------
def _conv_block_params(key, cin, cout):
    k = jax.random.split(key, 6)
    return dict(
        w=0.05 * jax.random.normal(k[0], (3, 3, cin, cout), jnp.float32),
        b=0.05 * jax.random.normal(k[1], (cout,), jnp.float32),
        gamma=1.0 + 0.1 * jax.random.normal(k[2], (cout,), jnp.float32),
        beta=0.05 * jax.random.normal(k[3], (cout,), jnp.float32),
        mean=0.05 * jax.random.normal(k[4], (cout,), jnp.float32),
        var=jax.random.uniform(k[5], (cout,), jnp.float32, 0.5, 1.5),
    )


def _fc_block_params(key, fin, fout):
    k = jax.random.split(key, 6)
    return dict(
        w=0.05 * jax.random.normal(k[0], (fin, fout), jnp.float32),
        b=0.05 * jax.random.normal(k[1], (fout,), jnp.float32),
        gamma=1.0 + 0.1 * jax.random.normal(k[2], (fout,), jnp.float32),
        beta=0.05 * jax.random.normal(k[3], (fout,), jnp.float32),
        mean=0.05 * jax.random.normal(k[4], (fout,), jnp.float32),
        var=jax.random.uniform(k[5], (fout,), jnp.float32, 0.5, 1.5),
    )


def init_params(key):
    k = jax.random.split(key, 8)
    kf = jax.random.split(k[7], 2)
    return {
        "stem":  _conv_block_params(k[0], IN_CH, C_FEAT),   # ResNet50 stand-in
        "conv1": _conv_block_params(k[1], C_FEAT, C_FEAT),
        "conv2": _conv_block_params(k[2], C_FEAT, C_FEAT),
        "conv3": _conv_block_params(k[3], C_FEAT, C_FEAT),
        "fc1":   _fc_block_params(k[4], FC_DIMS[0], FC_DIMS[1]),
        "fc2":   _fc_block_params(k[5], FC_DIMS[1], FC_DIMS[2]),
        "fc3":   _fc_block_params(k[6], FC_DIMS[2], FC_DIMS[3]),
        "fcf": {
            "w": 0.05 * jax.random.normal(kf[0], (FC_DIMS[3], FC_DIMS[4]), jnp.float32),
            "b": 0.05 * jax.random.normal(kf[1], (FC_DIMS[4],), jnp.float32),
        },
    }


if __name__ == "__main__":
    key = jax.random.PRNGKey(0)
    kx, kp = jax.random.split(key)
    x = jax.random.normal(kx, (N_BATCH, IN_CH, IMG_HW, IMG_HW), jnp.float32)
    params = init_params(kp)
    prep = prepare_params(params)                           # one-time fold/pack
    out = predictive_controlnet_forward(x, prep)
    out = jax.block_until_ready(out)
    assert out.shape == (N_BATCH, 2) and out.dtype == jnp.float32
    assert bool(jnp.all(jnp.isfinite(out)))
    print("KERNEL_OK")
</pallas_src>

<mosaic_0001>
module attributes {stable_mosaic.version = 11 : i64} {
  func.func @_fused_forward_kernel(%arg0: memref<168x128xbf16, #tpu.memory_space<vmem>>, %arg1: memref<4x1152x128xbf16, #tpu.memory_space<vmem>>, %arg2: memref<4x1x128xf32, #tpu.memory_space<vmem>>, %arg3: memref<3x128x128xbf16, #tpu.memory_space<vmem>>, %arg4: memref<3x1x128xf32, #tpu.memory_space<vmem>>, %arg5: memref<128x128xbf16, #tpu.memory_space<vmem>>, %arg6: memref<1x128xf32, #tpu.memory_space<vmem>>, %arg7: memref<8x128xf32, #tpu.memory_space<vmem>>, %arg8: memref<104x1152xbf16, #tpu.memory_space<vmem>>, %arg9: memref<104x128xbf16, #tpu.memory_space<vmem>>, %arg10: memref<104x128xbf16, #tpu.memory_space<vmem>>, %arg11: memref<8x128xf32, #tpu.memory_space<vmem>>) attributes {dimension_semantics = [], scalar_prefetch = 0 : i64, scratch_operands = 4 : i64, tpu.core_type = #tpu.core_type<tc>} {
    %c0 = arith.constant 0 : index
    %c0_0 = arith.constant 0 : index
    %0 = vector.load %arg0[%c0, %c0_0] : memref<168x128xbf16, #tpu.memory_space<vmem>>, vector<7x128xbf16>
    %c0_1 = arith.constant 0 : index
    %c0_2 = arith.constant 0 : index
    %1 = vector.load %arg8[%c0_1, %c0_2] : memref<104x1152xbf16, #tpu.memory_space<vmem>>, vector<7x128xbf16>
    tpu.vector_store %arg8[%c0_1, %c0_2], %0 {strides = array<i32>} : memref<104x1152xbf16, #tpu.memory_space<vmem>>, vector<7x128xbf16>,
    %c1 = arith.constant 1 : index
    %c0_3 = arith.constant 0 : index
    %2 = vector.load %arg0[%c1, %c0_3] : memref<168x128xbf16, #tpu.memory_space<vmem>>, vector<7x128xbf16>
    %c0_4 = arith.constant 0 : index
    %c128 = arith.constant 128 : index
    %3 = vector.load %arg8[%c0_4, %c128] : memref<104x1152xbf16, #tpu.memory_space<vmem>>, vector<7x128xbf16>
    tpu.vector_store %arg8[%c0_4, %c128], %2 {strides = array<i32>} : memref<104x1152xbf16, #tpu.memory_space<vmem>>, vector<7x128xbf16>,
    %c2 = arith.constant 2 : index
    %c0_5 = arith.constant 0 : index
    %4 = vector.load %arg0[%c2, %c0_5] : memref<168x128xbf16, #tpu.memory_space<vmem>>, vector<7x128xbf16>
    %c0_6 = arith.constant 0 : index
    %c256 = arith.constant 256 : index
    %5 = vector.load %arg8[%c0_6, %c256] : memref<104x1152xbf16, #tpu.memory_space<vmem>>, vector<7x128xbf16>
    tpu.vector_store %arg8[%c0_6, %c256], %4 {strides = array<i32>} : memref<104x1152xbf16, #tpu.memory_space<vmem>>, vector<7x128xbf16>,
    %c9 = arith.constant 9 : index
    %c0_7 = arith.constant 0 : index
    %6 = vector.load %arg0[%c9, %c0_7] : memref<168x128xbf16, #tpu.memory_space<vmem>>, vector<7x128xbf16>
    %c0_8 = arith.constant 0 : index
    %c384 = arith.constant 384 : index
    %7 = vector.load %arg8[%c0_8, %c384] : memref<104x1152xbf16, #tpu.memory_space<vmem>>, vector<7x128xbf16>
    tpu.vector_store %arg8[%c0_8, %c384], %6 {strides = array<i32>} : memref<104x1152xbf16, #tpu.memory_space<vmem>>, vector<7x128xbf16>,
    %c10 = arith.constant 10 : index
    %c0_9 = arith.constant 0 : index
    %8 = vector.load %arg0[%c10, %c0_9] : memref<168x128xbf16, #tpu.memory_space<vmem>>, vector<7x128xbf16>
    %c0_10 = arith.constant 0 : index
    %c512 = arith.constant 512 : index
    %9 = vector.load %arg8[%c0_10, %c512] : memref<104x1152xbf16, #tpu.memory_space<vmem>>, vector<7x128xbf16>
    tpu.vector_store %arg8[%c0_10, %c512], %8 {strides = array<i32>} : memref<104x1152xbf16, #tpu.memory_space<vmem>>, vector<7x128xbf16>,
    %c11 = arith.constant 11 : index
    %c0_11 = arith.constant 0 : index
    %10 = vector.load %arg0[%c11, %c0_11] : memref<168x128xbf16, #tpu.memory_space<vmem>>, vector<7x128xbf16>
    %c0_12 = arith.constant 0 : index
    %c640 = arith.constant 640 : index
    %11 = vector.load %arg8[%c0_12, %c640] : memref<104x1152xbf16, #tpu.memory_space<vmem>>, vector<7x128xbf16>
    tpu.vector_store %arg8[%c0_12, %c640], %10 {strides = array<i32>} : memref<104x1152xbf16, #tpu.memory_space<vmem>>, vector<7x128xbf16>,
    %c18 = arith.constant 18 : index
    %c0_13 = arith.constant 0 : index
    %12 = vector.load %arg0[%c18, %c0_13] : memref<168x128xbf16, #tpu.memory_space<vmem>>, vector<7x128xbf16>
    %c0_14 = arith.constant 0 : index
    %c768 = arith.constant 768 : index
    %13 = vector.load %arg8[%c0_14, %c768] : memref<104x1152xbf16, #tpu.memory_space<vmem>>, vector<7x128xbf16>
    tpu.vector_store %arg8[%c0_14, %c768], %12 {strides = array<i32>} : memref<104x1152xbf16, #tpu.memory_space<vmem>>, vector<7x128xbf16>,
    %c19 = arith.constant 19 : index
    %c0_15 = arith.constant 0 : index
    %14 = vector.load %arg0[%c19, %c0_15] : memref<168x128xbf16, #tpu.memory_space<vmem>>, vector<7x128xbf16>
    %c0_16 = arith.constant 0 : index
    %c896 = arith.constant 896 : index
    %15 = vector.load %arg8[%c0_16, %c896] : memref<104x1152xbf16, #tpu.memory_space<vmem>>, vector<7x128xbf16>
    tpu.vector_store %arg8[%c0_16, %c896], %14 {strides = array<i32>} : memref<104x1152xbf16, #tpu.memory_space<vmem>>, vector<7x128xbf16>,
    %c20 = arith.constant 20 : index
    %c0_17 = arith.constant 0 : index
    %16 = vector.load %arg0[%c20, %c0_17] : memref<168x128xbf16, #tpu.memory_space<vmem>>, vector<7x128xbf16>
    %c0_18 = arith.constant 0 : index
    %c1024 = arith.constant 1024 : index
    %17 = vector.load %arg8[%c0_18, %c1024] : memref<104x1152xbf16, #tpu.memory_space<vmem>>, vector<7x128xbf16>
    tpu.vector_store %arg8[%c0_18, %c1024], %16 {strides = array<i32>} : memref<104x1152xbf16, #tpu.memory_space<vmem>>, vector<7x128xbf16>,
    %c9_19 = arith.constant 9 : index
    %c0_20 = arith.constant 0 : index
    %18 = vector.load %arg0[%c9_19, %c0_20] : memref<168x128xbf16, #tpu.memory_space<vmem>>, vector<7x128xbf16>
    %c7 = arith.constant 7 : index
    %c0_21 = arith.constant 0 : index
    %19 = vector.load %arg8[%c7, %c0_21] : memref<104x1152xbf16, #tpu.memory_space<vmem>>, vector<7x128xbf16>
    tpu.vector_store %arg8[%c7, %c0_21], %18 {strides = array<i32>} : memref<104x1152xbf16, #tpu.memory_space<vmem>>, vector<7x128xbf16>,
    %c10_22 = arith.constant 10 : index
    %c0_23 = arith.constant 0 : index
    %20 = vector.load %arg0[%c10_22, %c0_23] : memref<168x128xbf16, #tpu.memory_space<vmem>>, vector<7x128xbf16>
    %c7_24 = arith.constant 7 : index
    %c128_25 = arith.constant 128 : index
    %21 = vector.load %arg8[%c7_24, %c128_25] : memref<104x1152xbf16, #tpu.memory_space<vmem>>, vector<7x128xbf16>
    tpu.vector_store %arg8[%c7_24, %c128_25], %20 {strides = array<i32>} : memref<104x1152xbf16, #tpu.memory_space<vmem>>, vector<7x128xbf16>,
    %c11_26 = arith.constant 11 : index
    %c0_27 = arith.constant 0 : index
    %22 = vector.load %arg0[%c11_26, %c0_27] : memref<168x128xbf16, #tpu.memory_space<vmem>>, vector<7x128xbf16>
    %c7_28 = arith.constant 7 : index
    %c256_29 = arith.constant 256 : index
    %23 = vector.load %arg8[%c7_28, %c256_29] : memref<104x1152xbf16, #tpu.memory_space<vmem>>, vector<7x128xbf16>
    tpu.vector_store %arg8[%c7_28, %c256_29], %22 {strides = array<i32>} : memref<104x1152xbf16, #tpu.memory_space<vmem>>, vector<7x128xbf16>,
    %c18_30 = arith.constant 18 : index
    %c0_31 = arith.constant 0 : index
    %24 = vector.load %arg0[%c18_30, %c0_31] : memref<168x128xbf16, #tpu.memory_space<vmem>>, vector<7x128xbf16>
    %c7_32 = arith.constant 7 : index
    %c384_33 = arith.constant 384 : index
    %25 = vector.load %arg8[%c7_32, %c384_33] : memref<104x1152xbf16, #tpu.memory_space<vmem>>, vector<7x128xbf16>
    tpu.vector_store %arg8[%c7_32, %c384_33], %24 {strides = array<i32>} : memref<104x1152xbf16, #tpu.memory_space<vmem>>, vector<7x128xbf16>,
    %c19_34 = arith.constant 19 : index
    %c0_35 = arith.constant 0 : index
    %26 = vector.load %arg0[%c19_34, %c0_35] : memref<168x128xbf16, #tpu.memory_space<vmem>>, vector<7x128xbf16>
    %c7_36 = arith.constant 7 : index
    %c512_37 = arith.constant 512 : index
    %27 = vector.load %arg8[%c7_36, %c512_37] : memref<104x1152xbf16, #tpu.memory_space<vmem>>, vector<7x128xbf16>
    tpu.vector_store %arg8[%c7_36, %c512_37], %26 {strides = array<i32>} : memref<104x1152xbf16, #tpu.memory_space<vmem>>, vector<7x128xbf16>,
    %c20_38 = arith.constant 20 : index
    %c0_39 = arith.constant 0 : index
    %28 = vector.load %arg0[%c20_38, %c0_39] : memref<168x128xbf16, #tpu.memory_space<vmem>>, vector<7x128xbf16>
    %c7_40 = arith.constant 7 : index
    %c640_41 = arith.constant 640 : index
    %29 = vector.load %arg8[%c7_40, %c640_41] : memref<104x1152xbf16, #tpu.memory_space<vmem>>, vector<7x128xbf16>
    tpu.vector_store %arg8[%c7_40, %c640_41], %28 {strides = array<i32>} : memref<104x1152xbf16, #tpu.memory_space<vmem>>, vector<7x128xbf16>,
    %c27 = arith.constant 27 : index
    %c0_42 = arith.constant 0 : index
    %30 = vector.load %arg0[%c27, %c0_42] : memref<168x128xbf16, #tpu.memory_space<vmem>>, vector<7x128xbf16>
    %c7_43 = arith.constant 7 : index
    %c768_44 = arith.constant 768 : index
    %31 = vector.load %arg8[%c7_43, %c768_44] : memref<104x1152xbf16, #tpu.memory_space<vmem>>, vector<7x128xbf16>
    tpu.vector_store %arg8[%c7_43, %c768_44], %30 {strides = array<i32>} : memref<104x1152xbf16, #tpu.memory_space<vmem>>, vector<7x128xbf16>,
    %c28 = arith.constant 28 : index
    %c0_45 = arith.constant 0 : index
    %32 = vector.load %arg0[%c28, %c0_45] : memref<168x128xbf16, #tpu.memory_space<vmem>>, vector<7x128xbf16>
    %c7_46 = arith.constant 7 : index
    %c896_47 = arith.constant 896 : index
    %33 = vector.load %arg8[%c7_46, %c896_47] : memref<104x1152xbf16, #tpu.memory_space<vmem>>, vector<7x128xbf16>
    tpu.vector_store %arg8[%c7_46, %c896_47], %32 {strides = array<i32>} : memref<104x1152xbf16, #tpu.memory_space<vmem>>, vector<7x128xbf16>,
    %c29 = arith.constant 29 : index
    %c0_48 = arith.constant 0 : index
    %34 = vector.load %arg0[%c29, %c0_48] : memref<168x128xbf16, #tpu.memory_space<vmem>>, vector<7x128xbf16>
    %c7_49 = arith.constant 7 : index
    %c1024_50 = arith.constant 1024 : index
    %35 = vector.load %arg8[%c7_49, %c1024_50] : memref<104x1152xbf16, #tpu.memory_space<vmem>>, vector<7x128xbf16>
    tpu.vector_store %arg8[%c7_49, %c1024_50], %34 {strides = array<i32>} : memref<104x1152xbf16, #tpu.memory_space<vmem>>, vector<7x128xbf16>,
    %c18_51 = arith.constant 18 : index
    %c0_52 = arith.constant 0 : index
    %36 = vector.load %arg0[%c18_51, %c0_52] : memref<168x128xbf16, #tpu.memory_space<vmem>>, vector<7x128xbf16>
    %c14 = arith.constant 14 : index
    %c0_53 = arith.constant 0 : index
    %37 = vector.load %arg8[%c14, %c0_53] : memref<104x1152xbf16, #tpu.memory_space<vmem>>, vector<7x128xbf16>
    tpu.vector_store %arg8[%c14, %c0_53], %36 {strides = array<i32>} : memref<104x1152xbf16, #tpu.memory_space<vmem>>, vector<7x128xbf16>,
    %c19_54 = arith.constant 19 : index
    %c0_55 = arith.constant 0 : index
    %38 = vector.load %arg0[%c19_54, %c0_55] : memref<168x128xbf16, #tpu.memory_space<vmem>>, vector<7x128xbf16>
    %c14_56 = arith.constant 14 : index
    %c128_57 = arith.constant 128 : index
    %39 = vector.load %arg8[%c14_56, %c128_57] : memref<104x1152xbf16, #tpu.memory_space<vmem>>, vector<7x128xbf16>
    tpu.vector_store %arg8[%c14_56, %c128_57], %38 {strides = array<i32>} : memref<104x1152xbf16, #tpu.memory_space<vmem>>, vector<7x128xbf16>,
    %c20_58 = arith.constant 20 : index
    %c0_59 = arith.constant 0 : index
    %40 = vector.load %arg0[%c20_58, %c0_59] : memref<168x128xbf16, #tpu.memory_space<vmem>>, vector<7x128xbf16>
    %c14_60 = arith.constant 14 : index
    %c256_61 = arith.constant 256 : index
    %41 = vector.load %arg8[%c14_60, %c256_61] : memref<104x1152xbf16, #tpu.memory_space<vmem>>, vector<7x128xbf16>
    tpu.vector_store %arg8[%c14_60, %c256_61], %40 {strides = array<i32>} : memref<104x1152xbf16, #tpu.memory_space<vmem>>, vector<7x128xbf16>,
    %c27_62 = arith.constant 27 : index
    %c0_63 = arith.constant 0 : index
    %42 = vector.load %arg0[%c27_62, %c0_63] : memref<168x128xbf16, #tpu.memory_space<vmem>>, vector<7x128xbf16>
    %c14_64 = arith.constant 14 : index
    %c384_65 = arith.constant 384 : index
    %43 = vector.load %arg8[%c14_64, %c384_65] : memref<104x1152xbf16, #tpu.memory_space<vmem>>, vector<7x128xbf16>
    tpu.vector_store %arg8[%c14_64, %c384_65], %42 {strides = array<i32>} : memref<104x1152xbf16, #tpu.memory_space<vmem>>, vector<7x128xbf16>,
    %c28_66 = arith.constant 28 : index
    %c0_67 = arith.constant 0 : index
    %44 = vector.load %arg0[%c28_66, %c0_67] : memref<168x128xbf16, #tpu.memory_space<vmem>>, vector<7x128xbf16>
    %c14_68 = arith.constant 14 : index
    %c512_69 = arith.constant 512 : index
    %45 = vector.load %arg8[%c14_68, %c512_69] : memref<104x1152xbf16, #tpu.memory_space<vmem>>, vector<7x128xbf16>
    tpu.vector_store %arg8[%c14_68, %c512_69], %44 {strides = array<i32>} : memref<104x1152xbf16, #tpu.memory_space<vmem>>, vector<7x128xbf16>,
    %c29_70 = arith.constant 29 : index
    %c0_71 = arith.constant 0 : index
    %46 = vector.load %arg0[%c29_70, %c0_71] : memref<168x128xbf16, #tpu.memory_space<vmem>>, vector<7x128xbf16>
    %c14_72 = arith.constant 14 : index
    %c640_73 = arith.constant 640 : index
    %47 = vector.load %arg8[%c14_72, %c640_73] : memref<104x1152xbf16, #tpu.memory_space<vmem>>, vector<7x128xbf16>
    tpu.vector_store %arg8[%c14_72, %c640_73], %46 {strides = array<i32>} : memref<104x1152xbf16, #tpu.memory_space<vmem>>, vector<7x128xbf16>,
    %c36 = arith.constant 36 : index
    %c0_74 = arith.constant 0 : index
    %48 = vector.load %arg0[%c36, %c0_74] : memref<168x128xbf16, #tpu.memory_space<vmem>>, vector<7x128xbf16>
    %c14_75 = arith.constant 14 : index
    %c768_76 = arith.constant 768 : index
    %49 = vector.load %arg8[%c14_75, %c768_76] : memref<104x1152xbf16, #tpu.memory_space<vmem>>, vector<7x128xbf16>
    tpu.vector_store %arg8[%c14_75, %c768_76], %48 {strides = array<i32>} : memref<104x1152xbf16, #tpu.memory_space<vmem>>, vector<7x128xbf16>,
    %c37 = arith.constant 37 : index
    %c0_77 = arith.constant 0 : index
    %50 = vector.load %arg0[%c37, %c0_77] : memref<168x128xbf16, #tpu.memory_space<vmem>>, vector<7x128xbf16>
    %c14_78 = arith.constant 14 : index
    %c896_79 = arith.constant 896 : index
    %51 = vector.load %arg8[%c14_78, %c896_79] : memref<104x1152xbf16, #tpu.memory_space<vmem>>, vector<7x128xbf16>
    tpu.vector_store %arg8[%c14_78, %c896_79], %50 {strides = array<i32>} : memref<104x1152xbf16, #tpu.memory_space<vmem>>, vector<7x128xbf16>,
    %c38 = arith.constant 38 : index
    %c0_80 = arith.constant 0 : index
    %52 = vector.load %arg0[%c38, %c0_80] : memref<168x128xbf16, #tpu.memory_space<vmem>>, vector<7x128xbf16>
    %c14_81 = arith.constant 14 : index
    %c1024_82 = arith.constant 1024 : index
    %53 = vector.load %arg8[%c14_81, %c1024_82] : memref<104x1152xbf16, #tpu.memory_space<vmem>>, vector<7x128xbf16>
    tpu.vector_store %arg8[%c14_81, %c1024_82], %52 {strides = array<i32>} : memref<104x1152xbf16, #tpu.memory_space<vmem>>, vector<7x128xbf16>,
    %c27_83 = arith.constant 27 : index
    %c0_84 = arith.constant 0 : index
    %54 = vector.load %arg0[%c27_83, %c0_84] : memref<168x128xbf16, #tpu.memory_space<vmem>>, vector<7x128xbf16>
    %c21 = arith.constant 21 : index
    %c0_85 = arith.constant 0 : index
    %55 = vector.load %arg8[%c21, %c0_85] : memref<104x1152xbf16, #tpu.memory_space<vmem>>, vector<7x128xbf16>
    tpu.vector_store %arg8[%c21, %c0_85], %54 {strides = array<i32>} : memref<104x1152xbf16, #tpu.memory_space<vmem>>, vector<7x128xbf16>,
    %c28_86 = arith.constant 28 : index
    %c0_87 = arith.constant 0 : index
    %56 = vector.load %arg0[%c28_86, %c0_87] : memref<168x128xbf16, #tpu.memory_space<vmem>>, vector<7x128xbf16>
    %c21_88 = arith.constant 21 : index
    %c128_89 = arith.constant 128 : index
    %57 = vector.load %arg8[%c21_88, %c128_89] : memref<104x1152xbf16, #tpu.memory_space<vmem>>, vector<7x128xbf16>
    tpu.vector_store %arg8[%c21_88, %c128_89], %56 {strides = array<i32>} : memref<104x1152xbf16, #tpu.memory_space<vmem>>, vector<7x128xbf16>,
    %c29_90 = arith.constant 29 : index
    %c0_91 = arith.constant 0 : index
    %58 = vector.load %arg0[%c29_90, %c0_91] : memref<168x128xbf16, #tpu.memory_space<vmem>>, vector<7x128xbf16>
    %c21_92 = arith.constant 21 : index
    %c256_93 = arith.constant 256 : index
    %59 = vector.load %arg8[%c21_92, %c256_93] : memref<104x1152xbf16, #tpu.memory_space<vmem>>, vector<7x128xbf16>
    tpu.vector_store %arg8[%c21_92, %c256_93], %58 {strides = array<i32>} : memref<104x1152xbf16, #tpu.memory_space<vmem>>, vector<7x128xbf16>,
    %c36_94 = arith.constant 36 : index
    %c0_95 = arith.constant 0 : index
    %60 = vector.load %arg0[%c36_94, %c0_95] : memref<168x128xbf16, #tpu.memory_space<vmem>>, vector<7x128xbf16>
    %c21_96 = arith.constant 21 : index
    %c384_97 = arith.constant 384 : index
    %61 = vector.load %arg8[%c21_96, %c384_97] : memref<104x1152xbf16, #tpu.memory_space<vmem>>, vector<7x128xbf16>
    tpu.vector_store %arg8[%c21_96, %c384_97], %60 {strides = array<i32>} : memref<104x1152xbf16, #tpu.memory_space<vmem>>, vector<7x128xbf16>,
    %c37_98 = arith.constant 37 : index
    %c0_99 = arith.constant 0 : index
    %62 = vector.load %arg0[%c37_98, %c0_99] : memref<168x128xbf16, #tpu.memory_space<vmem>>, vector<7x128xbf16>
    %c21_100 = arith.constant 21 : index
    %c512_101 = arith.constant 512 : index
    %63 = vector.load %arg8[%c21_100, %c512_101] : memref<104x1152xbf16, #tpu.memory_space<vmem>>, vector<7x128xbf16>
    tpu.vector_store %arg8[%c21_100, %c512_101], %62 {strides = array<i32>} : memref<104x1152xbf16, #tpu.memory_space<vmem>>, vector<7x128xbf16>,
    %c38_102 = arith.constant 38 : index
    %c0_103 = arith.constant 0 : index
    %64 = vector.load %arg0[%c38_102, %c0_103] : memref<168x128xbf16, #tpu.memory_space<vmem>>, vector<7x128xbf16>
    %c21_104 = arith.constant 21 : index
    %c640_105 = arith.constant 640 : index
    %65 = vector.load %arg8[%c21_104, %c640_105] : memref<104x1152xbf16, #tpu.memory_space<vmem>>, vector<7x128xbf16>
    tpu.vector_store %arg8[%c21_104, %c640_105], %64 {strides = array<i32>} : memref<104x1152xbf16, #tpu.memory_space<vmem>>, vector<7x128xbf16>,
    %c45 = arith.constant 45 : index
    %c0_106 = arith.constant 0 : index
    %66 = vector.load %arg0[%c45, %c0_106] : memref<168x128xbf16, #tpu.memory_space<vmem>>, vector<7x128xbf16>
    %c21_107 = arith.constant 21 : index
    %c768_108 = arith.constant 768 : index
    %67 = vector.load %arg8[%c21_107, %c768_108] : memref<104x1152xbf16, #tpu.memory_space<vmem>>, vector<7x128xbf16>
    tpu.vector_store %arg8[%c21_107, %c768_108], %66 {strides = array<i32>} : memref<104x1152xbf16, #tpu.memory_space<vmem>>, vector<7x128xbf16>,
    %c46 = arith.constant 46 : index
    %c0_109 = arith.constant 0 : index
    %68 = vector.load %arg0[%c46, %c0_109] : memref<168x128xbf16, #tpu.memory_space<vmem>>, vector<7x128xbf16>
    %c21_110 = arith.constant 21 : index
    %c896_111 = arith.constant 896 : index
    %69 = vector.load %arg8[%c21_110, %c896_111] : memref<104x1152xbf16, #tpu.memory_space<vmem>>, vector<7x128xbf16>
    tpu.vector_store %arg8[%c21_110, %c896_111], %68 {strides = array<i32>} : memref<104x1152xbf16, #tpu.memory_space<vmem>>, vector<7x128xbf16>,
    %c47 = arith.constant 47 : index
    %c0_112 = arith.constant 0 : index
    %70 = vector.load %arg0[%c47, %c0_112] : memref<168x128xbf16, #tpu.memory_space<vmem>>, vector<7x128xbf16>
    %c21_113 = arith.constant 21 : index
    %c1024_114 = arith.constant 1024 : index
    %71 = vector.load %arg8[%c21_113, %c1024_114] : memref<104x1152xbf16, #tpu.memory_space<vmem>>, vector<7x128xbf16>
    tpu.vector_store %arg8[%c21_113, %c1024_114], %70 {strides = array<i32>} : memref<104x1152xbf16, #tpu.memory_space<vmem>>, vector<7x128xbf16>,
    %c36_115 = arith.constant 36 : index
    %c0_116 = arith.constant 0 : index
    %72 = vector.load %arg0[%c36_115, %c0_116] : memref<168x128xbf16, #tpu.memory_space<vmem>>, vector<7x128xbf16>
    %c28_117 = arith.constant 28 : index
    %c0_118 = arith.constant 0 : index
    %73 = vector.load %arg8[%c28_117, %c0_118] : memref<104x1152xbf16, #tpu.memory_space<vmem>>, vector<7x128xbf16>
    tpu.vector_store %arg8[%c28_117, %c0_118], %72 {strides = array<i32>} : memref<104x1152xbf16, #tpu.memory_space<vmem>>, vector<7x128xbf16>,
    %c37_119 = arith.constant 37 : index
    %c0_120 = arith.constant 0 : index
    %74 = vector.load %arg0[%c37_119, %c0_120] : memref<168x128xbf16, #tpu.memory_space<vmem>>, vector<7x128xbf16>
    %c28_121 = arith.constant 28 : index
    %c128_122 = arith.constant 128 : index
    %75 = vector.load %arg8[%c28_121, %c128_122] : memref<104x1152xbf16, #tpu.memory_space<vmem>>, vector<7x128xbf16>
    tpu.vector_store %arg8[%c28_121, %c128_122], %74 {strides = array<i32>} : memref<104x1152xbf16, #tpu.memory_space<vmem>>, vector<7x128xbf16>,
    %c38_123 = arith.constant 38 : index
    %c0_124 = arith.constant 0 : index
    %76 = vector.load %arg0[%c38_123, %c0_124] : memref<168x128xbf16, #tpu.memory_space<vmem>>, vector<7x128xbf16>
    %c28_125 = arith.constant 28 : index
    %c256_126 = arith.constant 256 : index
    %77 = vector.load %arg8[%c28_125, %c256_126] : memref<104x1152xbf16, #tpu.memory_space<vmem>>, vector<7x128xbf16>
    tpu.vector_store %arg8[%c28_125, %c256_126], %76 {strides = array<i32>} : memref<104x1152xbf16, #tpu.memory_space<vmem>>, vector<7x128xbf16>,
    %c45_127 = arith.constant 45 : index
    %c0_128 = arith.constant 0 : index
    %78 = vector.load %arg0[%c45_127, %c0_128] : memref<168x128xbf16, #tpu.memory_space<vmem>>, vector<7x128xbf16>
    %c28_129 = arith.constant 28 : index
    %c384_130 = arith.constant 384 : index
    %79 = vector.load %arg8[%c28_129, %c384_130] : memref<104x1152xbf16, #tpu.memory_space<vmem>>, vector<7x128xbf16>
    tpu.vector_store %arg8[%c28_129, %c384_130], %78 {strides = array<i32>} : memref<104x1152xbf16, #tpu.memory_space<vmem>>, vector<7x128xbf16>,
    %c46_131 = arith.constant 46 : index
    %c0_132 = arith.constant 0 : index
    %80 = vector.load %arg0[%c46_131, %c0_132] : memref<168x128xbf16, #tpu.memory_space<vmem>>, vector<7x128xbf16>
    %c28_133 = arith.constant 28 : index
    %c512_134 = arith.constant 512 : index
    %81 = vector.load %arg8[%c28_133, %c512_134] : memref<104x1152xbf16, #tpu.memory_space<vmem>>, vector<7x128xbf16>
    tpu.vector_store %arg8[%c28_133, %c512_134], %80 {strides = array<i32>} : memref<104x1152xbf16, #tpu.memory_space<vmem>>, vector<7x128xbf16>,
    %c47_135 = arith.constant 47 : index
    %c0_136 = arith.constant 0 : index
    %82 = vector.load %arg0[%c47_135, %c0_136] : memref<168x128xbf16, #tpu.memory_space<vmem>>, vector<7x128xbf16>
    %c28_137 = arith.constant 28 : index
    %c640_138 = arith.constant 640 : index
    %83 = vector.load %arg8[%c28_137, %c640_138] : memref<104x1152xbf16, #tpu.memory_space<vmem>>, vector<7x128xbf16>
    tpu.vector_store %arg8[%c28_137, %c640_138], %82 {strides = array<i32>} : memref<104x1152xbf16, #tpu.memory_space<vmem>>, vector<7x128xbf16>,
    %c54 = arith.constant 54 : index
    %c0_139 = arith.constant 0 : index
    %84 = vector.load %arg0[%c54, %c0_139] : memref<168x128xbf16, #tpu.memory_space<vmem>>, vector<7x128xbf16>
    %c28_140 = arith.constant 28 : index
    %c768_141 = arith.constant 768 : index
    %85 = vector.load %arg8[%c28_140, %c768_141] : memref<104x1152xbf16, #tpu.memory_space<vmem>>, vector<7x128xbf16>
    tpu.vector_store %arg8[%c28_140, %c768_141], %84 {strides = array<i32>} : memref<104x1152xbf16, #tpu.memory_space<vmem>>, vector<7x128xbf16>,
    %c55 = arith.constant 55 : index
    %c0_142 = arith.constant 0 : index
    %86 = vector.load %arg0[%c55, %c0_142] : memref<168x128xbf16, #tpu.memory_space<vmem>>, vector<7x128xbf16>
    %c28_143 = arith.constant 28 : index
    %c896_144 = arith.constant 896 : index
    %87 = vector.load %arg8[%c28_143, %c896_144] : memref<104x1152xbf16, #tpu.memory_space<vmem>>, vector<7x128xbf16>
    tpu.vector_store %arg8[%c28_143, %c896_144], %86 {strides = array<i32>} : memref<104x1152xbf16, #tpu.memory_space<vmem>>, vector<7x128xbf16>,
    %c56 = arith.constant 56 : index
    %c0_145 = arith.constant 0 : index
    %88 = vector.load %arg0[%c56, %c0_145] : memref<168x128xbf16, #tpu.memory_space<vmem>>, vector<7x128xbf16>
    %c28_146 = arith.constant 28 : index
    %c1024_147 = arith.constant 1024 : index
    %89 = vector.load %arg8[%c28_146, %c1024_147] : memref<104x1152xbf16, #tpu.memory_space<vmem>>, vector<7x128xbf16>
    tpu.vector_store %arg8[%c28_146, %c1024_147], %88 {strides = array<i32>} : memref<104x1152xbf16, #tpu.memory_space<vmem>>, vector<7x128xbf16>,
    %c45_148 = arith.constant 45 : index
    %c0_149 = arith.constant 0 : index
    %90 = vector.load %arg0[%c45_148, %c0_149] : memref<168x128xbf16, #tpu.memory_space<vmem>>, vector<7x128xbf16>
    %c35 = arith.constant 35 : index
    %c0_150 = arith.constant 0 : index
    %91 = vector.load %arg8[%c35, %c0_150] : memref<104x1152xbf16, #tpu.memory_space<vmem>>, vector<7x128xbf16>
    tpu.vector_store %arg8[%c35, %c0_150], %90 {strides = array<i32>} : memref<104x1152xbf16, #tpu.memory_space<vmem>>, vector<7x128xbf16>,
    %c46_151 = arith.constant 46 : index
    %c0_152 = arith.constant 0 : index
    %92 = vector.load %arg0[%c46_151, %c0_152] : memref<168x128xbf16, #tpu.memory_space<vmem>>, vector<7x128xbf16>
    %c35_153 = arith.constant 35 : index
    %c128_154 = arith.constant 128 : index
    %93 = vector.load %arg8[%c35_153, %c128_154] : memref<104x1152xbf16, #tpu.memory_space<vmem>>, vector<7x128xbf16>
    tpu.vector_store %arg8[%c35_153, %c128_154], %92 {strides = array<i32>} : memref<104x1152xbf16, #tpu.memory_space<vmem>>, vector<7x128xbf16>,
    %c47_155 = arith.constant 47 : index
    %c0_156 = arith.constant 0 : index
    %94 = vector.load %arg0[%c47_155, %c0_156] : memref<168x128xbf16, #tpu.memory_space<vmem>>, vector<7x128xbf16>
    %c35_157 = arith.constant 35 : index
    %c256_158 = arith.constant 256 : index
    %95 = vector.load %arg8[%c35_157, %c256_158] : memref<104x1152xbf16, #tpu.memory_space<vmem>>, vector<7x128xbf16>
    tpu.vector_store %arg8[%c35_157, %c256_158], %94 {strides = array<i32>} : memref<104x1152xbf16, #tpu.memory_space<vmem>>, vector<7x128xbf16>,
    %c54_159 = arith.constant 54 : index
    %c0_160 = arith.constant 0 : index
    %96 = vector.load %arg0[%c54_159, %c0_160] : memref<168x128xbf16, #tpu.memory_space<vmem>>, vector<7x128xbf16>
    %c35_161 = arith.constant 35 : index
    %c384_162 = arith.constant 384 : index
    %97 = vector.load %arg8[%c35_161, %c384_162] : memref<104x1152xbf16, #tpu.memory_space<vmem>>, vector<7x128xbf16>
    tpu.vector_store %arg8[%c35_161, %c384_162], %96 {strides = array<i32>} : memref<104x1152xbf16, #tpu.memory_space<vmem>>, vector<7x128xbf16>,
    %c55_163 = arith.constant 55 : index
    %c0_164 = arith.constant 0 : index
    %98 = vector.load %arg0[%c55_163, %c0_164] : memref<168x128xbf16, #tpu.memory_space<vmem>>, vector<7x128xbf16>
    %c35_165 = arith.constant 35 : index
    %c512_166 = arith.constant 512 : index
    %99 = vector.load %arg8[%c35_165, %c512_166] : memref<104x1152xbf16, #tpu.memory_space<vmem>>, vector<7x128xbf16>
    tpu.vector_store %arg8[%c35_165, %c512_166], %98 {strides = array<i32>} : memref<104x1152xbf16, #tpu.memory_space<vmem>>, vector<7x128xbf16>,
    %c56_167 = arith.constant 56 : index
    %c0_168 = arith.constant 0 : index
    %100 = vector.load %arg0[%c56_167, %c0_168] : memref<168x128xbf16, #tpu.memory_space<vmem>>, vector<7x128xbf16>
    %c35_169 = arith.constant 35 : index
    %c640_170 = arith.constant 640 : index
    %101 = vector.load %arg8[%c35_169, %c640_170] : memref<104x1152xbf16, #tpu.memory_space<vmem>>, vector<7x128xbf16>
    tpu.vector_store %arg8[%c35_169, %c640_170], %100 {strides = array<i32>} : memref<104x1152xbf16, #tpu.memory_space<vmem>>, vector<7x128xbf16>,
    %c63 = arith.constant 63 : index
    %c0_171 = arith.constant 0 : index
    %102 = vector.load %arg0[%c63, %c0_171] : memref<168x128xbf16, #tpu.memory_space<vmem>>, vector<7x128xbf16>
    %c35_172 = arith.constant 35 : index
    %c768_173 = arith.constant 768 : index
    %103 = vector.load %arg8[%c35_172, %c768_173] : memref<104x1152xbf16, #tpu.memory_space<vmem>>, vector<7x128xbf16>
    tpu.vector_store %arg8[%c35_172, %c768_173], %102 {strides = array<i32>} : memref<104x1152xbf16, #tpu.memory_space<vmem>>, vector<7x128xbf16>,
    %c64 = arith.constant 64 : index
    %c0_174 = arith.constant 0 : index
    %104 = vector.load %arg0[%c64, %c0_174] : memref<168x128xbf16, #tpu.memory_space<vmem>>, vector<7x128xbf16>
    %c35_175 = arith.constant 35 : index
    %c896_176 = arith.constant 896 : index
    %105 = vector.load %arg8[%c35_175, %c896_176] : memref<104x1152xbf16, #tpu.memory_space<vmem>>, vector<7x128xbf16>
    tpu.vector_store %arg8[%c35_175, %c896_176], %104 {strides = array<i32>} : memref<104x1152xbf16, #tpu.memory_space<vmem>>, vector<7x128xbf16>,
    %c65 = arith.constant 65 : index
    %c0_177 = arith.constant 0 : index
    %106 = vector.load %arg0[%c65, %c0_177] : memref<168x128xbf16, #tpu.memory_space<vmem>>, vector<7x128xbf16>
    %c35_178 = arith.constant 35 : index
    %c1024_179 = arith.constant 1024 : index
    %107 = vector.load %arg8[%c35_178, %c1024_179] : memref<104x1152xbf16, #tpu.memory_space<vmem>>, vector<7x128xbf16>
    tpu.vector_store %arg8[%c35_178, %c1024_179], %106 {strides = array<i32>} : memref<104x1152xbf16, #tpu.memory_space<vmem>>, vector<7x128xbf16>,
    %c54_180 = arith.constant 54 : index
    %c0_181 = arith.constant 0 : index
    %108 = vector.load %arg0[%c54_180, %c0_181] : memref<168x128xbf16, #tpu.memory_space<vmem>>, vector<7x128xbf16>
    %c42 = arith.constant 42 : index
    %c0_182 = arith.constant 0 : index
    %109 = vector.load %arg8[%c42, %c0_182] : memref<104x1152xbf16, #tpu.memory_space<vmem>>, vector<7x128xbf16>
    tpu.vector_store %arg8[%c42, %c0_182], %108 {strides = array<i32>} : memref<104x1152xbf16, #tpu.memory_space<vmem>>, vector<7x128xbf16>,
    %c55_183 = arith.constant 55 : index
    %c0_184 = arith.constant 0 : index
    %110 = vector.load %arg0[%c55_183, %c0_184] : memref<168x128xbf16, #tpu.memory_space<vmem>>, vector<7x128xbf16>
    %c42_185 = arith.constant 42 : index
    %c128_186 = arith.constant 128 : index
    %111 = vector.load %arg8[%c42_185, %c128_186] : memref<104x1152xbf16, #tpu.memory_space<vmem>>, vector<7x128xbf16>
    tpu.vector_store %arg8[%c42_185, %c128_186], %110 {strides = array<i32>} : memref<104x1152xbf16, #tpu.memory_space<vmem>>, vector<7x128xbf16>,
    %c56_187 = arith.constant 56 : index
    %c0_188 = arith.constant 0 : index
    %112 = vector.load %arg0[%c56_187, %c0_188] : memref<168x128xbf16, #tpu.memory_space<vmem>>, vector<7x128xbf16>
    %c42_189 = arith.constant 42 : index
    %c256_190 = arith.constant 256 : index
    %113 = vector.load %arg8[%c42_189, %c256_190] : memref<104x1152xbf16, #tpu.memory_space<vmem>>, vector<7x128xbf16>
    tpu.vector_store %arg8[%c42_189, %c256_190], %112 {strides = array<i32>} : memref<104x1152xbf16, #tpu.memory_space<vmem>>, vector<7x128xbf16>,
    %c63_191 = arith.constant 63 : index
    %c0_192 = arith.constant 0 : index
    %114 = vector.load %arg0[%c63_191, %c0_192] : memref<168x128xbf16, #tpu.memory_space<vmem>>, vector<7x128xbf16>
    %c42_193 = arith.constant 42 : index
    %c384_194 = arith.constant 384 : index
    %115 = vector.load %arg8[%c42_193, %c384_194] : memref<104x1152xbf16, #tpu.memory_space<vmem>>, vector<7x128xbf16>
    tpu.vector_store %arg8[%c42_193, %c384_194], %114 {strides = array<i32>} : memref<104x1152xbf16, #tpu.memory_space<vmem>>, vector<7x128xbf16>,
    %c64_195 = arith.constant 64 : index
    %c0_196 = arith.constant 0 : index
    %116 = vector.load %arg0[%c64_195, %c0_196] : memref<168x128xbf16, #tpu.memory_space<vmem>>, vector<7x128xbf16>
    %c42_197 = arith.constant 42 : index
    %c512_198 = arith.constant 512 : index
    %117 = vector.load %arg8[%c42_197, %c512_198] : memref<104x1152xbf16, #tpu.memory_space<vmem>>, vector<7x128xbf16>
    tpu.vector_store %arg8[%c42_197, %c512_198], %116 {strides = array<i32>} : memref<104x1152xbf16, #tpu.memory_space<vmem>>, vector<7x128xbf16>,
    %c65_199 = arith.constant 65 : index
    %c0_200 = arith.constant 0 : index
    %118 = vector.load %arg0[%c65_199, %c0_200] : memref<168x128xbf16, #tpu.memory_space<vmem>>, vector<7x128xbf16>
    %c42_201 = arith.constant 42 : index
    %c640_202 = arith.constant 640 : index
    %119 = vector.load %arg8[%c42_201, %c640_202] : memref<104x1152xbf16, #tpu.memory_space<vmem>>, vector<7x128xbf16>
    tpu.vector_store %arg8[%c42_201, %c640_202], %118 {strides = array<i32>} : memref<104x1152xbf16, #tpu.memory_space<vmem>>, vector<7x128xbf16>,
    %c72 = arith.constant 72 : index
    %c0_203 = arith.constant 0 : index
    %120 = vector.load %arg0[%c72, %c0_203] : memref<168x128xbf16, #tpu.memory_space<vmem>>, vector<7x128xbf16>
    %c42_204 = arith.constant 42 : index
    %c768_205 = arith.constant 768 : index
    %121 = vector.load %arg8[%c42_204, %c768_205] : memref<104x1152xbf16, #tpu.memory_space<vmem>>, vector<7x128xbf16>
    tpu.vector_store %arg8[%c42_204, %c768_205], %120 {strides = array<i32>} : memref<104x1152xbf16, #tpu.memory_space<vmem>>, vector<7x128xbf16>,
    %c73 = arith.constant 73 : index
    %c0_206 = arith.constant 0 : index
    %122 = vector.load %arg0[%c73, %c0_206] : memref<168x128xbf16, #tpu.memory_space<vmem>>, vector<7x128xbf16>
    %c42_207 = arith.constant 42 : index
    %c896_208 = arith.constant 896 : index
    %123 = vector.load %arg8[%c42_207, %c896_208] : memref<104x1152xbf16, #tpu.memory_space<vmem>>, vector<7x128xbf16>
    tpu.vector_store %arg8[%c42_207, %c896_208], %122 {strides = array<i32>} : memref<104x1152xbf16, #tpu.memory_space<vmem>>, vector<7x128xbf16>,
    %c74 = arith.constant 74 : index
    %c0_209 = arith.constant 0 : index
    %124 = vector.load %arg0[%c74, %c0_209] : memref<168x128xbf16, #tpu.memory_space<vmem>>, vector<7x128xbf16>
    %c42_210 = arith.constant 42 : index
    %c1024_211 = arith.constant 1024 : index
    %125 = vector.load %arg8[%c42_210, %c1024_211] : memref<104x1152xbf16, #tpu.memory_space<vmem>>, vector<7x128xbf16>
    tpu.vector_store %arg8[%c42_210, %c1024_211], %124 {strides = array<i32>} : memref<104x1152xbf16, #tpu.memory_space<vmem>>, vector<7x128xbf16>,
    %c81 = arith.constant 81 : index
    %c0_212 = arith.constant 0 : index
    %126 = vector.load %arg0[%c81, %c0_212] : memref<168x128xbf16, #tpu.memory_space<vmem>>, vector<7x128xbf16>
    %c49 = arith.constant 49 : index
    %c0_213 = arith.constant 0 : index
    %127 = vector.load %arg8[%c49, %c0_213] : memref<104x1152xbf16, #tpu.memory_space<vmem>>, vector<7x128xbf16>
    tpu.vector_store %arg8[%c49, %c0_213], %126 {strides = array<i32>} : memref<104x1152xbf16, #tpu.memory_space<vmem>>, vector<7x128xbf16>,
    %c82 = arith.constant 82 : index
    %c0_214 = arith.constant 0 : index
    %128 = vector.load %arg0[%c82, %c0_214] : memref<168x128xbf16, #tpu.memory_space<vmem>>, vector<7x128xbf16>
    %c49_215 = arith.constant 49 : index
    %c128_216 = arith.constant 128 : index
    %129 = vector.load %arg8[%c49_215, %c128_216] : memref<104x1152xbf16, #tpu.memory_space<vmem>>, vector<7x128xbf16>
    tpu.vector_store %arg8[%c49_215, %c128_216], %128 {strides = array<i32>} : memref<104x1152xbf16, #tpu.memory_space<vmem>>, vector<7x128xbf16>,
    %c83 = arith.constant 83 : index
    %c0_217 = arith.constant 0 : index
    %130 = vector.load %arg0[%c83, %c0_217] : memref<168x128xbf16, #tpu.memory_space<vmem>>, vector<7x128xbf16>
    %c49_218 = arith.constant 49 : index
    %c256_219 = arith.constant 256 : index
    %131 = vector.load %arg8[%c49_218, %c256_219] : memref<104x1152xbf16, #tpu.memory_space<vmem>>, vector<7x128xbf16>
    tpu.vector_store %arg8[%c49_218, %c256_219], %130 {strides = array<i32>} : memref<104x1152xbf16, #tpu.memory_space<vmem>>, vector<7x128xbf16>,
    %c90 = arith.constant 90 : index
    %c0_220 = arith.constant 0 : index
    %132 = vector.load %arg0[%c90, %c0_220] : memref<168x128xbf16, #tpu.memory_space<vmem>>, vector<7x128xbf16>
    %c49_221 = arith.constant 49 : index
    %c384_222 = arith.constant 384 : index
    %133 = vector.load %arg8[%c49_221, %c384_222] : memref<104x1152xbf16, #tpu.memory_space<vmem>>, vector<7x128xbf16>
    tpu.vector_store %arg8[%c49_221, %c384_222], %132 {strides = array<i32>} : memref<104x1152xbf16, #tpu.memory_space<vmem>>, vector<7x128xbf16>,
    %c91 = arith.constant 91 : index
    %c0_223 = arith.constant 0 : index
    %134 = vector.load %arg0[%c91, %c0_223] : memref<168x128xbf16, #tpu.memory_space<vmem>>, vector<7x128xbf16>
    %c49_224 = arith.constant 49 : index
    %c512_225 = arith.constant 512 : index
    %135 = vector.load %arg8[%c49_224, %c512_225] : memref<104x1152xbf16, #tpu.memory_space<vmem>>, vector<7x128xbf16>
    tpu.vector_store %arg8[%c49_224, %c512_225], %134 {strides = array<i32>} : memref<104x1152xbf16, #tpu.memory_space<vmem>>, vector<7x128xbf16>,
    %c92 = arith.constant 92 : index
    %c0_226 = arith.constant 0 : index
    %136 = vector.load %arg0[%c92, %c0_226] : memref<168x128xbf16, #tpu.memory_space<vmem>>, vector<7x128xbf16>
    %c49_227 = arith.constant 49 : index
    %c640_228 = arith.constant 640 : index
    %137 = vector.load %arg8[%c49_227, %c640_228] : memref<104x1152xbf16, #tpu.memory_space<vmem>>, vector<7x128xbf16>
    tpu.vector_store %arg8[%c49_227, %c640_228], %136 {strides = array<i32>} : memref<104x1152xbf16, #tpu.memory_space<vmem>>, vector<7x128xbf16>,
    %c99 = arith.constant 99 : index
    %c0_229 = arith.constant 0 : index
    %138 = vector.load %arg0[%c99, %c0_229] : memref<168x128xbf16, #tpu.memory_space<vmem>>, vector<7x128xbf16>
    %c49_230 = arith.constant 49 : index
    %c768_231 = arith.constant 768 : index
    %139 = vector.load %arg8[%c49_230, %c768_231] : memref<104x1152xbf16, #tpu.memory_space<vmem>>, vector<7x128xbf16>
    tpu.vector_store %arg8[%c49_230, %c768_231], %138 {strides = array<i32>} : memref<104x1152xbf16, #tpu.memory_space<vmem>>, vector<7x128xbf16>,
    %c100 = arith.constant 100 : index
    %c0_232 = arith.constant 0 : index
    %140 = vector.load %arg0[%c100, %c0_232] : memref<168x128xbf16, #tpu.memory_space<vmem>>, vector<7x128xbf16>
    %c49_233 = arith.constant 49 : index
    %c896_234 = arith.constant 896 : index
    %141 = vector.load %arg8[%c49_233, %c896_234] : memref<104x1152xbf16, #tpu.memory_space<vmem>>, vector<7x128xbf16>
    tpu.vector_store %arg8[%c49_233, %c896_234], %140 {strides = array<i32>} : memref<104x1152xbf16, #tpu.memory_space<vmem>>, vector<7x128xbf16>,
    %c101 = arith.constant 101 : index
    %c0_235 = arith.constant 0 : index
    %142 = vector.load %arg0[%c101, %c0_235] : memref<168x128xbf16, #tpu.memory_space<vmem>>, vector<7x128xbf16>
    %c49_236 = arith.constant 49 : index
    %c1024_237 = arith.constant 1024 : index
    %143 = vector.load %arg8[%c49_236, %c1024_237] : memref<104x1152xbf16, #tpu.memory_space<vmem>>, vector<7x128xbf16>
    tpu.vector_store %arg8[%c49_236, %c1024_237], %142 {strides = array<i32>} : memref<104x1152xbf16, #tpu.memory_space<vmem>>, vector<7x128xbf16>,
    %c90_238 = arith.constant 90 : index
    %c0_239 = arith.constant 0 : index
    %144 = vector.load %arg0[%c90_238, %c0_239] : memref<168x128xbf16, #tpu.memory_space<vmem>>, vector<7x128xbf16>
    %c56_240 = arith.constant 56 : index
    %c0_241 = arith.constant 0 : index
    %145 = vector.load %arg8[%c56_240, %c0_241] : memref<104x1152xbf16, #tpu.memory_space<vmem>>, vector<7x128xbf16>
    tpu.vector_store %arg8[%c56_240, %c0_241], %144 {strides = array<i32>} : memref<104x1152xbf16, #tpu.memory_space<vmem>>, vector<7x128xbf16>,
    %c91_242 = arith.constant 91 : index
    %c0_243 = arith.constant 0 : index
    %146 = vector.load %arg0[%c91_242, %c0_243] : memref<168x128xbf16, #tpu.memory_space<vmem>>, vector<7x128xbf16>
    %c56_244 = arith.constant 56 : index
    %c128_245 = arith.constant 128 : index
    %147 = vector.load %arg8[%c56_244, %c128_245] : memref<104x1152xbf16, #tpu.memory_space<vmem>>, vector<7x128xbf16>
    tpu.vector_store %arg8[%c56_244, %c128_245], %146 {strides = array<i32>} : memref<104x1152xbf16, #tpu.memory_space<vmem>>, vector<7x128xbf16>,
    %c92_246 = arith.constant 92 : index
    %c0_247 = arith.constant 0 : index
    %148 = vector.load %arg0[%c92_246, %c0_247] : memref<168x128xbf16, #tpu.memory_space<vmem>>, vector<7x128xbf16>
    %c56_248 = arith.constant 56 : index
    %c256_249 = arith.constant 256 : index
    %149 = vector.load %arg8[%c56_248, %c256_249] : memref<104x1152xbf16, #tpu.memory_space<vmem>>, vector<7x128xbf16>
    tpu.vector_store %arg8[%c56_248, %c256_249], %148 {strides = array<i32>} : memref<104x1152xbf16, #tpu.memory_space<vmem>>, vector<7x128xbf16>,
    %c99_250 = arith.constant 99 : index
    %c0_251 = arith.constant 0 : index
    %150 = vector.load %arg0[%c99_250, %c0_251] : memref<168x128xbf16, #tpu.memory_space<vmem>>, vector<7x128xbf16>
    %c56_252 = arith.constant 56 : index
    %c384_253 = arith.constant 384 : index
    %151 = vector.load %arg8[%c56_252, %c384_253] : memref<104x1152xbf16, #tpu.memory_space<vmem>>, vector<7x128xbf16>
    tpu.vector_store %arg8[%c56_252, %c384_253], %150 {strides = array<i32>} : memref<104x1152xbf16, #tpu.memory_space<vmem>>, vector<7x128xbf16>,
    %c100_254 = arith.constant 100 : index
    %c0_255 = arith.constant 0 : index
    %152 = vector.load %arg0[%c100_254, %c0_255] : memref<168x128xbf16, #tpu.memory_space<vmem>>, vector<7x128xbf16>
    %c56_256 = arith.constant 56 : index
    %c512_257 = arith.constant 512 : index
    %153 = vector.load %arg8[%c56_256, %c512_257] : memref<104x1152xbf16, #tpu.memory_space<vmem>>, vector<7x128xbf16>
    tpu.vector_store %arg8[%c56_256, %c512_257], %152 {strides = array<i32>} : memref<104x1152xbf16, #tpu.memory_space<vmem>>, vector<7x128xbf16>,
    %c101_258 = arith.constant 101 : index
    %c0_259 = arith.constant 0 : index
    %154 = vector.load %arg0[%c101_258, %c0_259] : memref<168x128xbf16, #tpu.memory_space<vmem>>, vector<7x128xbf16>
    %c56_260 = arith.constant 56 : index
    %c640_261 = arith.constant 640 : index
    %155 = vector.load %arg8[%c56_260, %c640_261] : memref<104x1152xbf16, #tpu.memory_space<vmem>>, vector<7x128xbf16>
    tpu.vector_store %arg8[%c56_260, %c640_261], %154 {strides = array<i32>} : memref<104x1152xbf16, #tpu.memory_space<vmem>>, vector<7x128xbf16>,
    %c108 = arith.constant 108 : index
    %c0_262 = arith.constant 0 : index
    %156 = vector.load %arg0[%c108, %c0_262] : memref<168x128xbf16, #tpu.memory_space<vmem>>, vector<7x128xbf16>
    %c56_263 = arith.constant 56 : index
    %c768_264 = arith.constant 768 : index
    %157 = vector.load %arg8[%c56_263, %c768_264] : memref<104x1152xbf16, #tpu.memory_space<vmem>>, vector<7x128xbf16>
    tpu.vector_store %arg8[%c56_263, %c768_264], %156 {strides = array<i32>} : memref<104x1152xbf16, #tpu.memory_space<vmem>>, vector<7x128xbf16>,
    %c109 = arith.constant 109 : index
    %c0_265 = arith.constant 0 : index
    %158 = vector.load %arg0[%c109, %c0_265] : memref<168x128xbf16, #tpu.memory_space<vmem>>, vector<7x128xbf16>
    %c56_266 = arith.constant 56 : index
    %c896_267 = arith.constant 896 : index
    %159 = vector.load %arg8[%c56_266, %c896_267] : memref<104x1152xbf16, #tpu.memory_space<vmem>>, vector<7x128xbf16>
    tpu.vector_store %arg8[%c56_266, %c896_267], %158 {strides = array<i32>} : memref<104x1152xbf16, #tpu.memory_space<vmem>>, vector<7x128xbf16>,
    %c110 = arith.constant 110 : index
    %c0_268 = arith.constant 0 : index
    %160 = vector.load %arg0[%c110, %c0_268] : memref<168x128xbf16, #tpu.memory_space<vmem>>, vector<7x128xbf16>
    %c56_269 = arith.constant 56 : index
    %c1024_270 = arith.constant 1024 : index
    %161 = vector.load %arg8[%c56_269, %c1024_270] : memref<104x1152xbf16, #tpu.memory_space<vmem>>, vector<7x128xbf16>
    tpu.vector_store %arg8[%c56_269, %c1024_270], %160 {strides = array<i32>} : memref<104x1152xbf16, #tpu.memory_space<vmem>>, vector<7x128xbf16>,
    %c99_271 = arith.constant 99 : index
    %c0_272 = arith.constant 0 : index
    %162 = vector.load %arg0[%c99_271, %c0_272] : memref<168x128xbf16, #tpu.memory_space<vmem>>, vector<7x128xbf16>
    %c63_273 = arith.constant 63 : index
    %c0_274 = arith.constant 0 : index
    %163 = vector.load %arg8[%c63_273, %c0_274] : memref<104x1152xbf16, #tpu.memory_space<vmem>>, vector<7x128xbf16>
    tpu.vector_store %arg8[%c63_273, %c0_274], %162 {strides = array<i32>} : memref<104x1152xbf16, #tpu.memory_space<vmem>>, vector<7x128xbf16>,
    %c100_275 = arith.constant 100 : index
    %c0_276 = arith.constant 0 : index
    %164 = vector.load %arg0[%c100_275, %c0_276] : memref<168x128xbf16, #tpu.memory_space<vmem>>, vector<7x128xbf16>
    %c63_277 = arith.constant 63 : index
    %c128_278 = arith.constant 128 : index
    %165 = vector.load %arg8[%c63_277, %c128_278] : memref<104x1152xbf16, #tpu.memory_space<vmem>>, vector<7x128xbf16>
    tpu.vector_store %arg8[%c63_277, %c128_278], %164 {strides = array<i32>} : memref<104x1152xbf16, #tpu.memory_space<vmem>>, vector<7x128xbf16>,
    %c101_279 = arith.constant 101 : index
    %c0_280 = arith.constant 0 : index
    %166 = vector.load %arg0[%c101_279, %c0_280] : memref<168x128xbf16, #tpu.memory_space<vmem>>, vector<7x128xbf16>
    %c63_281 = arith.constant 63 : index
    %c256_282 = arith.constant 256 : index
    %167 = vector.load %arg8[%c63_281, %c256_282] : memref<104x1152xbf16, #tpu.memory_space<vmem>>, vector<7x128xbf16>
    tpu.vector_store %arg8[%c63_281, %c256_282], %166 {strides = array<i32>} : memref<104x1152xbf16, #tpu.memory_space<vmem>>, vector<7x128xbf16>,
    %c108_283 = arith.constant 108 : index
    %c0_284 = arith.constant 0 : index
    %168 = vector.load %arg0[%c108_283, %c0_284] : memref<168x128xbf16, #tpu.memory_space<vmem>>, vector<7x128xbf16>
    %c63_285 = arith.constant 63 : index
    %c384_286 = arith.constant 384 : index
    %169 = vector.load %arg8[%c63_285, %c384_286] : memref<104x1152xbf16, #tpu.memory_space<vmem>>, vector<7x128xbf16>
    tpu.vector_store %arg8[%c63_285, %c384_286], %168 {strides = array<i32>} : memref<104x1152xbf16, #tpu.memory_space<vmem>>, vector<7x128xbf16>,
    %c109_287 = arith.constant 109 : index
    %c0_288 = arith.constant 0 : index
    %170 = vector.load %arg0[%c109_287, %c0_288] : memref<168x128xbf16, #tpu.memory_space<vmem>>, vector<7x128xbf16>
    %c63_289 = arith.constant 63 : index
    %c512_290 = arith.constant 512 : index
    %171 = vector.load %arg8[%c63_289, %c512_290] : memref<104x1152xbf16, #tpu.memory_space<vmem>>, vector<7x128xbf16>
    tpu.vector_store %arg8[%c63_289, %c512_290], %170 {strides = array<i32>} : memref<104x1152xbf16, #tpu.memory_space<vmem>>, vector<7x128xbf16>,
    %c110_291 = arith.constant 110 : index
    %c0_292 = arith.constant 0 : index
    %172 = vector.load %arg0[%c110_291, %c0_292] : memref<168x128xbf16, #tpu.memory_space<vmem>>, vector<7x128xbf16>
    %c63_293 = arith.constant 63 : index
    %c640_294 = arith.constant 640 : index
    %173 = vector.load %arg8[%c63_293, %c640_294] : memref<104x1152xbf16, #tpu.memory_space<vmem>>, vector<7x128xbf16>
    tpu.vector_store %arg8[%c63_293, %c640_294], %172 {strides = array<i32>} : memref<104x1152xbf16, #tpu.memory_space<vmem>>, vector<7x128xbf16>,
    %c117 = arith.constant 117 : index
    %c0_295 = arith.constant 0 : index
    %174 = vector.load %arg0[%c117, %c0_295] : memref<168x128xbf16, #tpu.memory_space<vmem>>, vector<7x128xbf16>
    %c63_296 = arith.constant 63 : index
    %c768_297 = arith.constant 768 : index
    %175 = vector.load %arg8[%c63_296, %c768_297] : memref<104x1152xbf16, #tpu.memory_space<vmem>>, vector<7x128xbf16>
    tpu.vector_store %arg8[%c63_296, %c768_297], %174 {strides = array<i32>} : memref<104x1152xbf16, #tpu.memory_space<vmem>>, vector<7x128xbf16>,
    %c118 = arith.constant 118 : index
    %c0_298 = arith.constant 0 : index
    %176 = vector.load %arg0[%c118, %c0_298] : memref<168x128xbf16, #tpu.memory_space<vmem>>, vector<7x128xbf16>
    %c63_299 = arith.constant 63 : index
    %c896_300 = arith.constant 896 : index
    %177 = vector.load %arg8[%c63_299, %c896_300] : memref<104x1152xbf16, #tpu.memory_space<vmem>>, vector<7x128xbf16>
    tpu.vector_store %arg8[%c63_299, %c896_300], %176 {strides = array<i32>} : memref<104x1152xbf16, #tpu.memory_space<vmem>>, vector<7x128xbf16>,
    %c119 = arith.constant 119 : index
    %c0_301 = arith.constant 0 : index
    %178 = vector.load %arg0[%c119, %c0_301] : memref<168x128xbf16, #tpu.memory_space<vmem>>, vector<7x128xbf16>
    %c63_302 = arith.constant 63 : index
    %c1024_303 = arith.constant 1024 : index
    %179 = vector.load %arg8[%c63_302, %c1024_303] : memref<104x1152xbf16, #tpu.memory_space<vmem>>, vector<7x128xbf16>
    tpu.vector_store %arg8[%c63_302, %c1024_303], %178 {strides = array<i32>} : memref<104x1152xbf16, #tpu.memory_space<vmem>>, vector<7x128xbf16>,
    %c108_304 = arith.constant 108 : index
    %c0_305 = arith.constant 0 : index
    %180 = vector.load %arg0[%c108_304, %c0_305] : memref<168x128xbf16, #tpu.memory_space<vmem>>, vector<7x128xbf16>
    %c70 = arith.constant 70 : index
    %c0_306 = arith.constant 0 : index
    %181 = vector.load %arg8[%c70, %c0_306] : memref<104x1152xbf16, #tpu.memory_space<vmem>>, vector<7x128xbf16>
    tpu.vector_store %arg8[%c70, %c0_306], %180 {strides = array<i32>} : memref<104x1152xbf16, #tpu.memory_space<vmem>>, vector<7x128xbf16>,
    %c109_307 = arith.constant 109 : index
    %c0_308 = arith.constant 0 : index
    %182 = vector.load %arg0[%c109_307, %c0_308] : memref<168x128xbf16, #tpu.memory_space<vmem>>, vector<7x128xbf16>
    %c70_309 = arith.constant 70 : index
    %c128_310 = arith.constant 128 : index
    %183 = vector.load %arg8[%c70_309, %c128_310] : memref<104x1152xbf16, #tpu.memory_space<vmem>>, vector<7x128xbf16>
    tpu.vector_store %arg8[%c70_309, %c128_310], %182 {strides = array<i32>} : memref<104x1152xbf16, #tpu.memory_space<vmem>>, vector<7x128xbf16>,
    %c110_311 = arith.constant 110 : index
    %c0_312 = arith.constant 0 : index
    %184 = vector.load %arg0[%c110_311, %c0_312] : memref<168x128xbf16, #tpu.memory_space<vmem>>, vector<7x128xbf16>
    %c70_313 = arith.constant 70 : index
    %c256_314 = arith.constant 256 : index
    %185 = vector.load %arg8[%c70_313, %c256_314] : memref<104x1152xbf16, #tpu.memory_space<vmem>>, vector<7x128xbf16>
    tpu.vector_store %arg8[%c70_313, %c256_314], %184 {strides = array<i32>} : memref<104x1152xbf16, #tpu.memory_space<vmem>>, vector<7x128xbf16>,
    %c117_315 = arith.constant 117 : index
    %c0_316 = arith.constant 0 : index
    %186 = vector.load %arg0[%c117_315, %c0_316] : memref<168x128xbf16, #tpu.memory_space<vmem>>, vector<7x128xbf16>
    %c70_317 = arith.constant 70 : index
    %c384_318 = arith.constant 384 : index
    %187 = vector.load %arg8[%c70_317, %c384_318] : memref<104x1152xbf16, #tpu.memory_space<vmem>>, vector<7x128xbf16>
    tpu.vector_store %arg8[%c70_317, %c384_318], %186 {strides = array<i32>} : memref<104x1152xbf16, #tpu.memory_space<vmem>>, vector<7x128xbf16>,
    %c118_319 = arith.constant 118 : index
    %c0_320 = arith.constant 0 : index
    %188 = vector.load %arg0[%c118_319, %c0_320] : memref<168x128xbf16, #tpu.memory_space<vmem>>, vector<7x128xbf16>
    %c70_321 = arith.constant 70 : index
    %c512_322 = arith.constant 512 : index
    %189 = vector.load %arg8[%c70_321, %c512_322] : memref<104x1152xbf16, #tpu.memory_space<vmem>>, vector<7x128xbf16>
    tpu.vector_store %arg8[%c70_321, %c512_322], %188 {strides = array<i32>} : memref<104x1152xbf16, #tpu.memory_space<vmem>>, vector<7x128xbf16>,
    %c119_323 = arith.constant 119 : index
    %c0_324 = arith.constant 0 : index
    %190 = vector.load %arg0[%c119_323, %c0_324] : memref<168x128xbf16, #tpu.memory_space<vmem>>, vector<7x128xbf16>
    %c70_325 = arith.constant 70 : index
    %c640_326 = arith.constant 640 : index
    %191 = vector.load %arg8[%c70_325, %c640_326] : memref<104x1152xbf16, #tpu.memory_space<vmem>>, vector<7x128xbf16>
    tpu.vector_store %arg8[%c70_325, %c640_326], %190 {strides = array<i32>} : memref<104x1152xbf16, #tpu.memory_space<vmem>>, vector<7x128xbf16>,
    %c126 = arith.constant 126 : index
    %c0_327 = arith.constant 0 : index
    %192 = vector.load %arg0[%c126, %c0_327] : memref<168x128xbf16, #tpu.memory_space<vmem>>, vector<7x128xbf16>
    %c70_328 = arith.constant 70 : index
    %c768_329 = arith.constant 768 : index
    %193 = vector.load %arg8[%c70_328, %c768_329] : memref<104x1152xbf16, #tpu.memory_space<vmem>>, vector<7x128xbf16>
    tpu.vector_store %arg8[%c70_328, %c768_329], %192 {strides = array<i32>} : memref<104x1152xbf16, #tpu.memory_space<vmem>>, vector<7x128xbf16>,
    %c127 = arith.constant 127 : index
    %c0_330 = arith.constant 0 : index
    %194 = vector.load %arg0[%c127, %c0_330] : memref<168x128xbf16, #tpu.memory_space<vmem>>, vector<7x128xbf16>
    %c70_331 = arith.constant 70 : index
    %c896_332 = arith.constant 896 : index
    %195 = vector.load %arg8[%c70_331, %c896_332] : memref<104x1152xbf16, #tpu.memory_space<vmem>>, vector<7x128xbf16>
    tpu.vector_store %arg8[%c70_331, %c896_332], %194 {strides = array<i32>} : memref<104x1152xbf16, #tpu.memory_space<vmem>>, vector<7x128xbf16>,
    %c128_333 = arith.constant 128 : index
    %c0_334 = arith.constant 0 : index
    %196 = vector.load %arg0[%c128_333, %c0_334] : memref<168x128xbf16, #tpu.memory_space<vmem>>, vector<7x128xbf16>
    %c70_335 = arith.constant 70 : index
    %c1024_336 = arith.constant 1024 : index
    %197 = vector.load %arg8[%c70_335, %c1024_336] : memref<104x1152xbf16, #tpu.memory_space<vmem>>, vector<7x128xbf16>
    tpu.vector_store %arg8[%c70_335, %c1024_336], %196 {strides = array<i32>} : memref<104x1152xbf16, #tpu.memory_space<vmem>>, vector<7x128xbf16>,
    %c117_337 = arith.constant 117 : index
    %c0_338 = arith.constant 0 : index
    %198 = vector.load %arg0[%c117_337, %c0_338] : memref<168x128xbf16, #tpu.memory_space<vmem>>, vector<7x128xbf16>
    %c77 = arith.constant 77 : index
    %c0_339 = arith.constant 0 : index
    %199 = vector.load %arg8[%c77, %c0_339] : memref<104x1152xbf16, #tpu.memory_space<vmem>>, vector<7x128xbf16>
    tpu.vector_store %arg8[%c77, %c0_339], %198 {strides = array<i32>} : memref<104x1152xbf16, #tpu.memory_space<vmem>>, vector<7x128xbf16>,
    %c118_340 = arith.constant 118 : index
    %c0_341 = arith.constant 0 : index
    %200 = vector.load %arg0[%c118_340, %c0_341] : memref<168x128xbf16, #tpu.memory_space<vmem>>, vector<7x128xbf16>
    %c77_342 = arith.constant 77 : index
    %c128_343 = arith.constant 128 : index
    %201 = vector.load %arg8[%c77_342, %c128_343] : memref<104x1152xbf16, #tpu.memory_space<vmem>>, vector<7x128xbf16>
    tpu.vector_store %arg8[%c77_342, %c128_343], %200 {strides = array<i32>} : memref<104x1152xbf16, #tpu.memory_space<vmem>>, vector<7x128xbf16>,
    %c119_344 = arith.constant 119 : index
    %c0_345 = arith.constant 0 : index
    %202 = vector.load %arg0[%c119_344, %c0_345] : memref<168x128xbf16, #tpu.memory_space<vmem>>, vector<7x128xbf16>
    %c77_346 = arith.constant 77 : index
    %c256_347 = arith.constant 256 : index
    %203 = vector.load %arg8[%c77_346, %c256_347] : memref<104x1152xbf16, #tpu.memory_space<vmem>>, vector<7x128xbf16>
    tpu.vector_store %arg8[%c77_346, %c256_347], %202 {strides = array<i32>} : memref<104x1152xbf16, #tpu.memory_space<vmem>>, vector<7x128xbf16>,
    %c126_348 = arith.constant 126 : index
    %c0_349 = arith.constant 0 : index
    %204 = vector.load %arg0[%c126_348, %c0_349] : memref<168x128xbf16, #tpu.memory_space<vmem>>, vector<7x128xbf16>
    %c77_350 = arith.constant 77 : index
    %c384_351 = arith.constant 384 : index
    %205 = vector.load %arg8[%c77_350, %c384_351] : memref<104x1152xbf16, #tpu.memory_space<vmem>>, vector<7x128xbf16>
    tpu.vector_store %arg8[%c77_350, %c384_351], %204 {strides = array<i32>} : memref<104x1152xbf16, #tpu.memory_space<vmem>>, vector<7x128xbf16>,
    %c127_352 = arith.constant 127 : index
    %c0_353 = arith.constant 0 : index
    %206 = vector.load %arg0[%c127_352, %c0_353] : memref<168x128xbf16, #tpu.memory_space<vmem>>, vector<7x128xbf16>
    %c77_354 = arith.constant 77 : index
    %c512_355 = arith.constant 512 : index
    %207 = vector.load %arg8[%c77_354, %c512_355] : memref<104x1152xbf16, #tpu.memory_space<vmem>>, vector<7x128xbf16>
    tpu.vector_store %arg8[%c77_354, %c512_355], %206 {strides = array<i32>} : memref<104x1152xbf16, #tpu.memory_space<vmem>>, vector<7x128xbf16>,
    %c128_356 = arith.constant 128 : index
    %c0_357 = arith.constant 0 : index
    %208 = vector.load %arg0[%c128_356, %c0_357] : memref<168x128xbf16, #tpu.memory_space<vmem>>, vector<7x128xbf16>
    %c77_358 = arith.constant 77 : index
    %c640_359 = arith.constant 640 : index
    %209 = vector.load %arg8[%c77_358, %c640_359] : memref<104x1152xbf16, #tpu.memory_space<vmem>>, vector<7x128xbf16>
    tpu.vector_store %arg8[%c77_358, %c640_359], %208 {strides = array<i32>} : memref<104x1152xbf16, #tpu.memory_space<vmem>>, vector<7x128xbf16>,
    %c135 = arith.constant 135 : index
    %c0_360 = arith.constant 0 : index
    %210 = vector.load %arg0[%c135, %c0_360] : memref<168x128xbf16, #tpu.memory_space<vmem>>, vector<7x128xbf16>
    %c77_361 = arith.constant 77 : index
    %c768_362 = arith.constant 768 : index
    %211 = vector.load %arg8[%c77_361, %c768_362] : memref<104x1152xbf16, #tpu.memory_space<vmem>>, vector<7x128xbf16>
    tpu.vector_store %arg8[%c77_361, %c768_362], %210 {strides = array<i32>} : memref<104x1152xbf16, #tpu.memory_space<vmem>>, vector<7x128xbf16>,
    %c136 = arith.constant 136 : index
    %c0_363 = arith.constant 0 : index
    %212 = vector.load %arg0[%c136, %c0_363] : memref<168x128xbf16, #tpu.memory_space<vmem>>, vector<7x128xbf16>
    %c77_364 = arith.constant 77 : index
    %c896_365 = arith.constant 896 : index
    %213 = vector.load %arg8[%c77_364, %c896_365] : memref<104x1152xbf16, #tpu.memory_space<vmem>>, vector<7x128xbf16>
    tpu.vector_store %arg8[%c77_364, %c896_365], %212 {strides = array<i32>} : memref<104x1152xbf16, #tpu.memory_space<vmem>>, vector<7x128xbf16>,
    %c137 = arith.constant 137 : index
    %c0_366 = arith.constant 0 : index
    %214 = vector.load %arg0[%c137, %c0_366] : memref<168x128xbf16, #tpu.memory_space<vmem>>, vector<7x128xbf16>
    %c77_367 = arith.constant 77 : index
    %c1024_368 = arith.constant 1024 : index
    %215 = vector.load %arg8[%c77_367, %c1024_368] : memref<104x1152xbf16, #tpu.memory_space<vmem>>, vector<7x128xbf16>
    tpu.vector_store %arg8[%c77_367, %c1024_368], %214 {strides = array<i32>} : memref<104x1152xbf16, #tpu.memory_space<vmem>>, vector<7x128xbf16>,
    %c126_369 = arith.constant 126 : index
    %c0_370 = arith.constant 0 : index
    %216 = vector.load %arg0[%c126_369, %c0_370] : memref<168x128xbf16, #tpu.memory_space<vmem>>, vector<7x128xbf16>
    %c84 = arith.constant 84 : index
    %c0_371 = arith.constant 0 : index
    %217 = vector.load %arg8[%c84, %c0_371] : memref<104x1152xbf16, #tpu.memory_space<vmem>>, vector<7x128xbf16>
    tpu.vector_store %arg8[%c84, %c0_371], %216 {strides = array<i32>} : memref<104x1152xbf16, #tpu.memory_space<vmem>>, vector<7x128xbf16>,
    %c127_372 = arith.constant 127 : index
    %c0_373 = arith.constant 0 : index
    %218 = vector.load %arg0[%c127_372, %c0_373] : memref<168x128xbf16, #tpu.memory_space<vmem>>, vector<7x128xbf16>
    %c84_374 = arith.constant 84 : index
    %c128_375 = arith.constant 128 : index
    %219 = vector.load %arg8[%c84_374, %c128_375] : memref<104x1152xbf16, #tpu.memory_space<vmem>>, vector<7x128xbf16>
    tpu.vector_store %arg8[%c84_374, %c128_375], %218 {strides = array<i32>} : memref<104x1152xbf16, #tpu.memory_space<vmem>>, vector<7x128xbf16>,
    %c128_376 = arith.constant 128 : index
    %c0_377 = arith.constant 0 : index
    %220 = vector.load %arg0[%c128_376, %c0_377] : memref<168x128xbf16, #tpu.memory_space<vmem>>, vector<7x128xbf16>
    %c84_378 = arith.constant 84 : index
    %c256_379 = arith.constant 256 : index
    %221 = vector.load %arg8[%c84_378, %c256_379] : memref<104x1152xbf16, #tpu.memory_space<vmem>>, vector<7x128xbf16>
    tpu.vector_store %arg8[%c84_378, %c256_379], %220 {strides = array<i32>} : memref<104x1152xbf16, #tpu.memory_space<vmem>>, vector<7x128xbf16>,
    %c135_380 = arith.constant 135 : index
    %c0_381 = arith.constant 0 : index
    %222 = vector.load %arg0[%c135_380, %c0_381] : memref<168x128xbf16, #tpu.memory_space<vmem>>, vector<7x128xbf16>
    %c84_382 = arith.constant 84 : index
    %c384_383 = arith.constant 384 : index
    %223 = vector.load %arg8[%c84_382, %c384_383] : memref<104x1152xbf16, #tpu.memory_space<vmem>>, vector<7x128xbf16>
    tpu.vector_store %arg8[%c84_382, %c384_383], %222 {strides = array<i32>} : memref<104x1152xbf16, #tpu.memory_space<vmem>>, vector<7x128xbf16>,
    %c136_384 = arith.constant 136 : index
    %c0_385 = arith.constant 0 : index
    %224 = vector.load %arg0[%c136_384, %c0_385] : memref<168x128xbf16, #tpu.memory_space<vmem>>, vector<7x128xbf16>
    %c84_386 = arith.constant 84 : index
    %c512_387 = arith.constant 512 : index
    %225 = vector.load %arg8[%c84_386, %c512_387] : memref<104x1152xbf16, #tpu.memory_space<vmem>>, vector<7x128xbf16>
    tpu.vector_store %arg8[%c84_386, %c512_387], %224 {strides = array<i32>} : memref<104x1152xbf16, #tpu.memory_space<vmem>>, vector<7x128xbf16>,
    %c137_388 = arith.constant 137 : index
    %c0_389 = arith.constant 0 : index
    %226 = vector.load %arg0[%c137_388, %c0_389] : memref<168x128xbf16, #tpu.memory_space<vmem>>, vector<7x128xbf16>
    %c84_390 = arith.constant 84 : index
    %c640_391 = arith.constant 640 : index
    %227 = vector.load %arg8[%c84_390, %c640_391] : memref<104x1152xbf16, #tpu.memory_space<vmem>>, vector<7x128xbf16>
    tpu.vector_store %arg8[%c84_390, %c640_391], %226 {strides = array<i32>} : memref<104x1152xbf16, #tpu.memory_space<vmem>>, vector<7x128xbf16>,
    %c144 = arith.constant 144 : index
    %c0_392 = arith.constant 0 : index
    %228 = vector.load %arg0[%c144, %c0_392] : memref<168x128xbf16, #tpu.memory_space<vmem>>, vector<7x128xbf16>
    %c84_393 = arith.constant 84 : index
    %c768_394 = arith.constant 768 : index
    %229 = vector.load %arg8[%c84_393, %c768_394] : memref<104x1152xbf16, #tpu.memory_space<vmem>>, vector<7x128xbf16>
    tpu.vector_store %arg8[%c84_393, %c768_394], %228 {strides = array<i32>} : memref<104x1152xbf16, #tpu.memory_space<vmem>>, vector<7x128xbf16>,
    %c145 = arith.constant 145 : index
    %c0_395 = arith.constant 0 : index
    %230 = vector.load %arg0[%c145, %c0_395] : memref<168x128xbf16, #tpu.memory_space<vmem>>, vector<7x128xbf16>
    %c84_396 = arith.constant 84 : index
    %c896_397 = arith.constant 896 : index
    %231 = vector.load %arg8[%c84_396, %c896_397] : memref<104x1152xbf16, #tpu.memory_space<vmem>>, vector<7x128xbf16>
    tpu.vector_store %arg8[%c84_396, %c896_397], %230 {strides = array<i32>} : memref<104x1152xbf16, #tpu.memory_space<vmem>>, vector<7x128xbf16>,
    %c146 = arith.constant 146 : index
    %c0_398 = arith.constant 0 : index
    %232 = vector.load %arg0[%c146, %c0_398] : memref<168x128xbf16, #tpu.memory_space<vmem>>, vector<7x128xbf16>
    %c84_399 = arith.constant 84 : index
    %c1024_400 = arith.constant 1024 : index
    %233 = vector.load %arg8[%c84_399, %c1024_400] : memref<104x1152xbf16, #tpu.memory_space<vmem>>, vector<7x128xbf16>
    tpu.vector_store %arg8[%c84_399, %c1024_400], %232 {strides = array<i32>} : memref<104x1152xbf16, #tpu.memory_space<vmem>>, vector<7x128xbf16>,
    %c135_401 = arith.constant 135 : index
    %c0_402 = arith.constant 0 : index
    %234 = vector.load %arg0[%c135_401, %c0_402] : memref<168x128xbf16, #tpu.memory_space<vmem>>, vector<7x128xbf16>
    %c91_403 = arith.constant 91 : index
    %c0_404 = arith.constant 0 : index
    %235 = vector.load %arg8[%c91_403, %c0_404] : memref<104x1152xbf16, #tpu.memory_space<vmem>>, vector<7x128xbf16>
    tpu.vector_store %arg8[%c91_403, %c0_404], %234 {strides = array<i32>} : memref<104x1152xbf16, #tpu.memory_space<vmem>>, vector<7x128xbf16>,
    %c136_405 = arith.constant 136 : index
    %c0_406 = arith.constant 0 : index
    %236 = vector.load %arg0[%c136_405, %c0_406] : memref<168x128xbf16, #tpu.memory_space<vmem>>, vector<7x128xbf16>
    %c91_407 = arith.constant 91 : index
    %c128_408 = arith.constant 128 : index
    %237 = vector.load %arg8[%c91_407, %c128_408] : memref<104x1152xbf16, #tpu.memory_space<vmem>>, vector<7x128xbf16>
    tpu.vector_store %arg8[%c91_407, %c128_408], %236 {strides = array<i32>} : memref<104x1152xbf16, #tpu.memory_space<vmem>>, vector<7x128xbf16>,
    %c137_409 = arith.constant 137 : index
    %c0_410 = arith.constant 0 : index
    %238 = vector.load %arg0[%c137_409, %c0_410] : memref<168x128xbf16, #tpu.memory_space<vmem>>, vector<7x128xbf16>
    %c91_411 = arith.constant 91 : index
    %c256_412 = arith.constant 256 : index
    %239 = vector.load %arg8[%c91_411, %c256_412] : memref<104x1152xbf16, #tpu.memory_space<vmem>>, vector<7x128xbf16>
    tpu.vector_store %arg8[%c91_411, %c256_412], %238 {strides = array<i32>} : memref<104x1152xbf16, #tpu.memory_space<vmem>>, vector<7x128xbf16>,
    %c144_413 = arith.constant 144 : index
    %c0_414 = arith.constant 0 : index
    %240 = vector.load %arg0[%c144_413, %c0_414] : memref<168x128xbf16, #tpu.memory_space<vmem>>, vector<7x128xbf16>
    %c91_415 = arith.constant 91 : index
    %c384_416 = arith.constant 384 : index
    %241 = vector.load %arg8[%c91_415, %c384_416] : memref<104x1152xbf16, #tpu.memory_space<vmem>>, vector<7x128xbf16>
    tpu.vector_store %arg8[%c91_415, %c384_416], %240 {strides = array<i32>} : memref<104x1152xbf16, #tpu.memory_space<vmem>>, vector<7x128xbf16>,
    %c145_417 = arith.constant 145 : index
    %c0_418 = arith.constant 0 : index
    %242 = vector.load %arg0[%c145_417, %c0_418] : memref<168x128xbf16, #tpu.memory_space<vmem>>, vector<7x128xbf16>
    %c91_419 = arith.constant 91 : index
    %c512_420 = arith.constant 512 : index
    %243 = vector.load %arg8[%c91_419, %c512_420] : memref<104x1152xbf16, #tpu.memory_space<vmem>>, vector<7x128xbf16>
    tpu.vector_store %arg8[%c91_419, %c512_420], %242 {strides = array<i32>} : memref<104x1152xbf16, #tpu.memory_space<vmem>>, vector<7x128xbf16>,
    %c146_421 = arith.constant 146 : index
    %c0_422 = arith.constant 0 : index
    %244 = vector.load %arg0[%c146_421, %c0_422] : memref<168x128xbf16, #tpu.memory_space<vmem>>, vector<7x128xbf16>
    %c91_423 = arith.constant 91 : index
    %c640_424 = arith.constant 640 : index
    %245 = vector.load %arg8[%c91_423, %c640_424] : memref<104x1152xbf16, #tpu.memory_space<vmem>>, vector<7x128xbf16>
    tpu.vector_store %arg8[%c91_423, %c640_424], %244 {strides = array<i32>} : memref<104x1152xbf16, #tpu.memory_space<vmem>>, vector<7x128xbf16>,
    %c153 = arith.constant 153 : index
    %c0_425 = arith.constant 0 : index
    %246 = vector.load %arg0[%c153, %c0_425] : memref<168x128xbf16, #tpu.memory_space<vmem>>, vector<7x128xbf16>
    %c91_426 = arith.constant 91 : index
    %c768_427 = arith.constant 768 : index
    %247 = vector.load %arg8[%c91_426, %c768_427] : memref<104x1152xbf16, #tpu.memory_space<vmem>>, vector<7x128xbf16>
    tpu.vector_store %arg8[%c91_426, %c768_427], %246 {strides = array<i32>} : memref<104x1152xbf16, #tpu.memory_space<vmem>>, vector<7x128xbf16>,
    %c154 = arith.constant 154 : index
    %c0_428 = arith.constant 0 : index
    %248 = vector.load %arg0[%c154, %c0_428] : memref<168x128xbf16, #tpu.memory_space<vmem>>, vector<7x128xbf16>
    %c91_429 = arith.constant 91 : index
    %c896_430 = arith.constant 896 : index
    %249 = vector.load %arg8[%c91_429, %c896_430] : memref<104x1152xbf16, #tpu.memory_space<vmem>>, vector<7x128xbf16>
    tpu.vector_store %arg8[%c91_429, %c896_430], %248 {strides = array<i32>} : memref<104x1152xbf16, #tpu.memory_space<vmem>>, vector<7x128xbf16>,
    %c155 = arith.constant 155 : index
    %c0_431 = arith.constant 0 : index
    %250 = vector.load %arg0[%c155, %c0_431] : memref<168x128xbf16, #tpu.memory_space<vmem>>, vector<7x128xbf16>
    %c91_432 = arith.constant 91 : index
    %c1024_433 = arith.constant 1024 : index
    %251 = vector.load %arg8[%c91_432, %c1024_433] : memref<104x1152xbf16, #tpu.memory_space<vmem>>, vector<7x128xbf16>
    tpu.vector_store %arg8[%c91_432, %c1024_433], %250 {strides = array<i32>} : memref<104x1152xbf16, #tpu.memory_space<vmem>>, vector<7x128xbf16>,
    %c0_434 = arith.constant 0 : index
    %c0_435 = arith.constant 0 : index
    %252 = vector.load %arg8[%c0_434, %c0_435] : memref<104x1152xbf16, #tpu.memory_space<vmem>>, vector<98x1152xbf16>
    %c0_436 = arith.constant 0 : index
    %c0_437 = arith.constant 0 : index
    %c0_438 = arith.constant 0 : index
    %253 = vector.load %arg1[%c0_436, %c0_437, %c0_438] : memref<4x1152x128xbf16, #tpu.memory_space<vmem>>, vector<1x1152x128xbf16>
    %254 = vector.shape_cast %253 : vector<1x1152x128xbf16> to vector<1152x128xbf16>
    %cst = arith.constant dense<0.000000e+00> : vector<98x128xf32>
    %255 = tpu.matmul %252, %254, %cst {dimension_numbers = #tpu.dot_dimension_numbers<[1], [0], [0], [1], [0, 0, 1, 1], [], []>} : vector<98x1152xbf16>, vector<1152x128xbf16>, vector<98x128xf32> -> vector<98x128xf32>
    %c0_439 = arith.constant 0 : index
    %c0_440 = arith.constant 0 : index
    %c0_441 = arith.constant 0 : index
    %256 = vector.load %arg2[%c0_439, %c0_440, %c0_441] : memref<4x1x128xf32, #tpu.memory_space<vmem>>, vector<1x1x128xf32>
    %257 = vector.shape_cast %256 : vector<1x1x128xf32> to vector<1x128xf32>
    %258 = vector.broadcast %257 : vector<1x128xf32> to vector<98x128xf32>
    %259 = arith.addf %255, %258 : vector<98x128xf32>
    %cst_442 = arith.constant 0.000000e+00 : f32
    %260 = vector.broadcast %cst_442 : f32 to vector<98x128xf32>
    %261 = arith.maximumf %259, %260 : vector<98x128xf32>
    %262 = arith.truncf %261 : vector<98x128xf32> to vector<98x128xbf16>
    %c0_443 = arith.constant 0 : index
    %c0_444 = arith.constant 0 : index
    %263 = vector.load %arg9[%c0_443, %c0_444] : memref<104x128xbf16, #tpu.memory_space<vmem>>, vector<98x128xbf16>
    tpu.vector_store %arg9[%c0_443, %c0_444], %262 {strides = array<i32>} : memref<104x128xbf16, #tpu.memory_space<vmem>>, vector<98x128xbf16>,
    %c0_445 = arith.constant 0 : index
    %c0_446 = arith.constant 0 : index
    %264 = vector.load %arg9[%c0_445, %c0_446] : memref<104x128xbf16, #tpu.memory_space<vmem>>, vector<5x128xbf16>
    %c0_447 = arith.constant 0 : index
    %c0_448 = arith.constant 0 : index
    %265 = vector.load %arg8[%c0_447, %c0_448] : memref<104x1152xbf16, #tpu.memory_space<vmem>>, vector<5x128xbf16>
    tpu.vector_store %arg8[%c0_447, %c0_448], %264 {strides = array<i32>} : memref<104x1152xbf16, #tpu.memory_space<vmem>>, vector<5x128xbf16>,
    %c1_449 = arith.constant 1 : index
    %c0_450 = arith.constant 0 : index
    %266 = vector.load %arg9[%c1_449, %c0_450] : memref<104x128xbf16, #tpu.memory_space<vmem>>, vector<5x128xbf16>
    %c0_451 = arith.constant 0 : index
    %c128_452 = arith.constant 128 : index
    %267 = vector.load %arg8[%c0_451, %c128_452] : memref<104x1152xbf16, #tpu.memory_space<vmem>>, vector<5x128xbf16>
    tpu.vector_store %arg8[%c0_451, %c128_452], %266 {strides = array<i32>} : memref<104x1152xbf16, #tpu.memory_space<vmem>>, vector<5x128xbf16>,
    %c2_453 = arith.constant 2 : index
    %c0_454 = arith.constant 0 : index
    %268 = vector.load %arg9[%c2_453, %c0_454] : memref<104x128xbf16, #tpu.memory_space<vmem>>, vector<5x128xbf16>
    %c0_455 = arith.constant 0 : index
    %c256_456 = arith.constant 256 : index
    %269 = vector.load %arg8[%c0_455, %c256_456] : memref<104x1152xbf16, #tpu.memory_space<vmem>>, vector<5x128xbf16>
    tpu.vector_store %arg8[%c0_455, %c256_456], %268 {strides = array<i32>} : memref<104x1152xbf16, #tpu.memory_space<vmem>>, vector<5x128xbf16>,
    %c7_457 = arith.constant 7 : index
    %c0_458 = arith.constant 0 : index
    %270 = vector.load %arg9[%c7_457, %c0_458] : memref<104x128xbf16, #tpu.memory_space<vmem>>, vector<5x128xbf16>
    %c0_459 = arith.constant 0 : index
    %c384_460 = arith.constant 384 : index
    %271 = vector.load %arg8[%c0_459, %c384_460] : memref<104x1152xbf16, #tpu.memory_space<vmem>>, vector<5x128xbf16>
    tpu.vector_store %arg8[%c0_459, %c384_460], %270 {strides = array<i32>} : memref<104x1152xbf16, #tpu.memory_space<vmem>>, vector<5x128xbf16>,
    %c8 = arith.constant 8 : index
    %c0_461 = arith.constant 0 : index
    %272 = vector.load %arg9[%c8, %c0_461] : memref<104x128xbf16, #tpu.memory_space<vmem>>, vector<5x128xbf16>
    %c0_462 = arith.constant 0 : index
    %c512_463 = arith.constant 512 : index
    %273 = vector.load %arg8[%c0_462, %c512_463] : memref<104x1152xbf16, #tpu.memory_space<vmem>>, vector<5x128xbf16>
    tpu.vector_store %arg8[%c0_462, %c512_463], %272 {strides = array<i32>} : memref<104x1152xbf16, #tpu.memory_space<vmem>>, vector<5x128xbf16>,
    %c9_464 = arith.constant 9 : index
    %c0_465 = arith.constant 0 : index
    %274 = vector.load %arg9[%c9_464, %c0_465] : memref<104x128xbf16, #tpu.memory_space<vmem>>, vector<5x128xbf16>
    %c0_466 = arith.constant 0 : index
    %c640_467 = arith.constant 640 : index
    %275 = vector.load %arg8[%c0_466, %c640_467] : memref<104x1152xbf16, #tpu.memory_space<vmem>>, vector<5x128xbf16>
    tpu.vector_store %arg8[%c0_466, %c640_467], %274 {strides = array<i32>} : memref<104x1152xbf16, #tpu.memory_space<vmem>>, vector<5x128xbf16>,
    %c14_468 = arith.constant 14 : index
    %c0_469 = arith.constant 0 : index
    %276 = vector.load %arg9[%c14_468, %c0_469] : memref<104x128xbf16, #tpu.memory_space<vmem>>, vector<5x128xbf16>
    %c0_470 = arith.constant 0 : index
    %c768_471 = arith.constant 768 : index
    %277 = vector.load %arg8[%c0_470, %c768_471] : memref<104x1152xbf16, #tpu.memory_space<vmem>>, vector<5x128xbf16>
    tpu.vector_store %arg8[%c0_470, %c768_471], %276 {strides = array<i32>} : memref<104x1152xbf16, #tpu.memory_space<vmem>>, vector<5x128xbf16>,
    %c15 = arith.constant 15 : index
    %c0_472 = arith.constant 0 : index
    %278 = vector.load %arg9[%c15, %c0_472] : memref<104x128xbf16, #tpu.memory_space<vmem>>, vector<5x128xbf16>
    %c0_473 = arith.constant 0 : index
    %c896_474 = arith.constant 896 : index
    %279 = vector.load %arg8[%c0_473, %c896_474] : memref<104x1152xbf16, #tpu.memory_space<vmem>>, vector<5x128xbf16>
    tpu.vector_store %arg8[%c0_473, %c896_474], %278 {strides = array<i32>} : memref<104x1152xbf16, #tpu.memory_space<vmem>>, vector<5x128xbf16>,
    %c16 = arith.constant 16 : index
    %c0_475 = arith.constant 0 : index
    %280 = vector.load %arg9[%c16, %c0_475] : memref<104x128xbf16, #tpu.memory_space<vmem>>, vector<5x128xbf16>
    %c0_476 = arith.constant 0 : index
    %c1024_477 = arith.constant 1024 : index
    %281 = vector.load %arg8[%c0_476, %c1024_477] : memref<104x1152xbf16, #tpu.memory_space<vmem>>, vector<5x128xbf16>
    tpu.vector_store %arg8[%c0_476, %c1024_477], %280 {strides = array<i32>} : memref<104x1152xbf16, #tpu.memory_space<vmem>>, vector<5x128xbf16>,
    %c7_478 = arith.constant 7 : index
    %c0_479 = arith.constant 0 : index
    %282 = vector.load %arg9[%c7_478, %c0_479] : memref<104x128xbf16, #tpu.memory_space<vmem>>, vector<5x128xbf16>
    %c5 = arith.constant 5 : index
    %c0_480 = arith.constant 0 : index
    %283 = vector.load %arg8[%c5, %c0_480] : memref<104x1152xbf16, #tpu.memory_space<vmem>>, vector<5x128xbf16>
    tpu.vector_store %arg8[%c5, %c0_480], %282 {strides = array<i32>} : memref<104x1152xbf16, #tpu.memory_space<vmem>>, vector<5x128xbf16>,
    %c8_481 = arith.constant 8 : index
    %c0_482 = arith.constant 0 : index
    %284 = vector.load %arg9[%c8_481, %c0_482] : memref<104x128xbf16, #tpu.memory_space<vmem>>, vector<5x128xbf16>
    %c5_483 = arith.constant 5 : index
    %c128_484 = arith.constant 128 : index
    %285 = vector.load %arg8[%c5_483, %c128_484] : memref<104x1152xbf16, #tpu.memory_space<vmem>>, vector<5x128xbf16>
    tpu.vector_store %arg8[%c5_483, %c128_484], %284 {strides = array<i32>} : memref<104x1152xbf16, #tpu.memory_space<vmem>>, vector<5x128xbf16>,
    %c9_485 = arith.constant 9 : index
    %c0_486 = arith.constant 0 : index
    %286 = vector.load %arg9[%c9_485, %c0_486] : memref<104x128xbf16, #tpu.memory_space<vmem>>, vector<5x128xbf16>
    %c5_487 = arith.constant 5 : index
    %c256_488 = arith.constant 256 : index
    %287 = vector.load %arg8[%c5_487, %c256_488] : memref<104x1152xbf16, #tpu.memory_space<vmem>>, vector<5x128xbf16>
    tpu.vector_store %arg8[%c5_487, %c256_488], %286 {strides = array<i32>} : memref<104x1152xbf16, #tpu.memory_space<vmem>>, vector<5x128xbf16>,
    %c14_489 = arith.constant 14 : index
    %c0_490 = arith.constant 0 : index
    %288 = vector.load %arg9[%c14_489, %c0_490] : memref<104x128xbf16, #tpu.memory_space<vmem>>, vector<5x128xbf16>
    %c5_491 = arith.constant 5 : index
    %c384_492 = arith.constant 384 : index
    %289 = vector.load %arg8[%c5_491, %c384_492] : memref<104x1152xbf16, #tpu.memory_space<vmem>>, vector<5x128xbf16>
    tpu.vector_store %arg8[%c5_491, %c384_492], %288 {strides = array<i32>} : memref<104x1152xbf16, #tpu.memory_space<vmem>>, vector<5x128xbf16>,
    %c15_493 = arith.constant 15 : index
    %c0_494 = arith.constant 0 : index
    %290 = vector.load %arg9[%c15_493, %c0_494] : memref<104x128xbf16, #tpu.memory_space<vmem>>, vector<5x128xbf16>
    %c5_495 = arith.constant 5 : index
    %c512_496 = arith.constant 512 : index
    %291 = vector.load %arg8[%c5_495, %c512_496] : memref<104x1152xbf16, #tpu.memory_space<vmem>>, vector<5x128xbf16>
    tpu.vector_store %arg8[%c5_495, %c512_496], %290 {strides = array<i32>} : memref<104x1152xbf16, #tpu.memory_space<vmem>>, vector<5x128xbf16>,
    %c16_497 = arith.constant 16 : index
    %c0_498 = arith.constant 0 : index
    %292 = vector.load %arg9[%c16_497, %c0_498] : memref<104x128xbf16, #tpu.memory_space<vmem>>, vector<5x128xbf16>
    %c5_499 = arith.constant 5 : index
    %c640_500 = arith.constant 640 : index
    %293 = vector.load %arg8[%c5_499, %c640_500] : memref<104x1152xbf16, #tpu.memory_space<vmem>>, vector<5x128xbf16>
    tpu.vector_store %arg8[%c5_499, %c640_500], %292 {strides = array<i32>} : memref<104x1152xbf16, #tpu.memory_space<vmem>>, vector<5x128xbf16>,
    %c21_501 = arith.constant 21 : index
    %c0_502 = arith.constant 0 : index
    %294 = vector.load %arg9[%c21_501, %c0_502] : memref<104x128xbf16, #tpu.memory_space<vmem>>, vector<5x128xbf16>
    %c5_503 = arith.constant 5 : index
    %c768_504 = arith.constant 768 : index
    %295 = vector.load %arg8[%c5_503, %c768_504] : memref<104x1152xbf16, #tpu.memory_space<vmem>>, vector<5x128xbf16>
    tpu.vector_store %arg8[%c5_503, %c768_504], %294 {strides = array<i32>} : memref<104x1152xbf16, #tpu.memory_space<vmem>>, vector<5x128xbf16>,
    %c22 = arith.constant 22 : index
    %c0_505 = arith.constant 0 : index
    %296 = vector.load %arg9[%c22, %c0_505] : memref<104x128xbf16, #tpu.memory_space<vmem>>, vector<5x128xbf16>
    %c5_506 = arith.constant 5 : index
    %c896_507 = arith.constant 896 : index
    %297 = vector.load %arg8[%c5_506, %c896_507] : memref<104x1152xbf16, #tpu.memory_space<vmem>>, vector<5x128xbf16>
    tpu.vector_store %arg8[%c5_506, %c896_507], %296 {strides = array<i32>} : memref<104x1152xbf16, #tpu.memory_space<vmem>>, vector<5x128xbf16>,
    %c23 = arith.constant 23 : index
    %c0_508 = arith.constant 0 : index
    %298 = vector.load %arg9[%c23, %c0_508] : memref<104x128xbf16, #tpu.memory_space<vmem>>, vector<5x128xbf16>
    %c5_509 = arith.constant 5 : index
    %c1024_510 = arith.constant 1024 : index
    %299 = vector.load %arg8[%c5_509, %c1024_510] : memref<104x1152xbf16, #tpu.memory_space<vmem>>, vector<5x128xbf16>
    tpu.vector_store %arg8[%c5_509, %c1024_510], %298 {strides = array<i32>} : memref<104x1152xbf16, #tpu.memory_space<vmem>>, vector<5x128xbf16>,
    %c14_511 = arith.constant 14 : index
    %c0_512 = arith.constant 0 : index
    %300 = vector.load %arg9[%c14_511, %c0_512] : memref<104x128xbf16, #tpu.memory_space<vmem>>, vector<5x128xbf16>
    %c10_513 = arith.constant 10 : index
    %c0_514 = arith.constant 0 : index
    %301 = vector.load %arg8[%c10_513, %c0_514] : memref<104x1152xbf16, #tpu.memory_space<vmem>>, vector<5x128xbf16>
    tpu.vector_store %arg8[%c10_513, %c0_514], %300 {strides = array<i32>} : memref<104x1152xbf16, #tpu.memory_space<vmem>>, vector<5x128xbf16>,
    %c15_515 = arith.constant 15 : index
    %c0_516 = arith.constant 0 : index
    %302 = vector.load %arg9[%c15_515, %c0_516] : memref<104x128xbf16, #tpu.memory_space<vmem>>, vector<5x128xbf16>
    %c10_517 = arith.constant 10 : index
    %c128_518 = arith.constant 128 : index
    %303 = vector.load %arg8[%c10_517, %c128_518] : memref<104x1152xbf16, #tpu.memory_space<vmem>>, vector<5x128xbf16>
    tpu.vector_store %arg8[%c10_517, %c128_518], %302 {strides = array<i32>} : memref<104x1152xbf16, #tpu.memory_space<vmem>>, vector<5x128xbf16>,
    %c16_519 = arith.constant 16 : index
    %c0_520 = arith.constant 0 : index
    %304 = vector.load %arg9[%c16_519, %c0_520] : memref<104x128xbf16, #tpu.memory_space<vmem>>, vector<5x128xbf16>
    %c10_521 = arith.constant 10 : index
    %c256_522 = arith.constant 256 : index
    %305 = vector.load %arg8[%c10_521, %c256_522] : memref<104x1152xbf16, #tpu.memory_space<vmem>>, vector<5x128xbf16>
    tpu.vector_store %arg8[%c10_521, %c256_522], %304 {strides = array<i32>} : memref<104x1152xbf16, #tpu.memory_space<vmem>>, vector<5x128xbf16>,
    %c21_523 = arith.constant 21 : index
    %c0_524 = arith.constant 0 : index
    %306 = vector.load %arg9[%c21_523, %c0_524] : memref<104x128xbf16, #tpu.memory_space<vmem>>, vector<5x128xbf16>
    %c10_525 = arith.constant 10 : index
    %c384_526 = arith.constant 384 : index
    %307 = vector.load %arg8[%c10_525, %c384_526] : memref<104x1152xbf16, #tpu.memory_space<vmem>>, vector<5x128xbf16>
    tpu.vector_store %arg8[%c10_525, %c384_526], %306 {strides = array<i32>} : memref<104x1152xbf16, #tpu.memory_space<vmem>>, vector<5x128xbf16>,
    %c22_527 = arith.constant 22 : index
    %c0_528 = arith.constant 0 : index
    %308 = vector.load %arg9[%c22_527, %c0_528] : memref<104x128xbf16, #tpu.memory_space<vmem>>, vector<5x128xbf16>
    %c10_529 = arith.constant 10 : index
    %c512_530 = arith.constant 512 : index
    %309 = vector.load %arg8[%c10_529, %c512_530] : memref<104x1152xbf16, #tpu.memory_space<vmem>>, vector<5x128xbf16>
    tpu.vector_store %arg8[%c10_529, %c512_530], %308 {strides = array<i32>} : memref<104x1152xbf16, #tpu.memory_space<vmem>>, vector<5x128xbf16>,
    %c23_531 = arith.constant 23 : index
    %c0_532 = arith.constant 0 : index
    %310 = vector.load %arg9[%c23_531, %c0_532] : memref<104x128xbf16, #tpu.memory_space<vmem>>, vector<5x128xbf16>
    %c10_533 = arith.constant 10 : index
    %c640_534 = arith.constant 640 : index
    %311 = vector.load %arg8[%c10_533, %c640_534] : memref<104x1152xbf16, #tpu.memory_space<vmem>>, vector<5x128xbf16>
    tpu.vector_store %arg8[%c10_533, %c640_534], %310 {strides = array<i32>} : memref<104x1152xbf16, #tpu.memory_space<vmem>>, vector<5x128xbf16>,
    %c28_535 = arith.constant 28 : index
    %c0_536 = arith.constant 0 : index
    %312 = vector.load %arg9[%c28_535, %c0_536] : memref<104x128xbf16, #tpu.memory_space<vmem>>, vector<5x128xbf16>
    %c10_537 = arith.constant 10 : index
    %c768_538 = arith.constant 768 : index
    %313 = vector.load %arg8[%c10_537, %c768_538] : memref<104x1152xbf16, #tpu.memory_space<vmem>>, vector<5x128xbf16>
    tpu.vector_store %arg8[%c10_537, %c768_538], %312 {strides = array<i32>} : memref<104x1152xbf16, #tpu.memory_space<vmem>>, vector<5x128xbf16>,
    %c29_539 = arith.constant 29 : index
    %c0_540 = arith.constant 0 : index
    %314 = vector.load %arg9[%c29_539, %c0_540] : memref<104x128xbf16, #tpu.memory_space<vmem>>, vector<5x128xbf16>
    %c10_541 = arith.constant 10 : index
    %c896_542 = arith.constant 896 : index
    %315 = vector.load %arg8[%c10_541, %c896_542] : memref<104x1152xbf16, #tpu.memory_space<vmem>>, vector<5x128xbf16>
    tpu.vector_store %arg8[%c10_541, %c896_542], %314 {strides = array<i32>} : memref<104x1152xbf16, #tpu.memory_space<vmem>>, vector<5x128xbf16>,
    %c30 = arith.constant 30 : index
    %c0_543 = arith.constant 0 : index
    %316 = vector.load %arg9[%c30, %c0_543] : memref<104x128xbf16, #tpu.memory_space<vmem>>, vector<5x128xbf16>
    %c10_544 = arith.constant 10 : index
    %c1024_545 = arith.constant 1024 : index
    %317 = vector.load %arg8[%c10_544, %c1024_545] : memref<104x1152xbf16, #tpu.memory_space<vmem>>, vector<5x128xbf16>
    tpu.vector_store %arg8[%c10_544, %c1024_545], %316 {strides = array<i32>} : memref<104x1152xbf16, #tpu.memory_space<vmem>>, vector<5x128xbf16>,
    %c21_546 = arith.constant 21 : index
    %c0_547 = arith.constant 0 : index
    %318 = vector.load %arg9[%c21_546, %c0_547] : memref<104x128xbf16, #tpu.memory_space<vmem>>, vector<5x128xbf16>
    %c15_548 = arith.constant 15 : index
    %c0_549 = arith.constant 0 : index
    %319 = vector.load %arg8[%c15_548, %c0_549] : memref<104x1152xbf16, #tpu.memory_space<vmem>>, vector<5x128xbf16>
    tpu.vector_store %arg8[%c15_548, %c0_549], %318 {strides = array<i32>} : memref<104x1152xbf16, #tpu.memory_space<vmem>>, vector<5x128xbf16>,
    %c22_550 = arith.constant 22 : index
    %c0_551 = arith.constant 0 : index
    %320 = vector.load %arg9[%c22_550, %c0_551] : memref<104x128xbf16, #tpu.memory_space<vmem>>, vector<5x128xbf16>
    %c15_552 = arith.constant 15 : index
    %c128_553 = arith.constant 128 : index
    %321 = vector.load %arg8[%c15_552, %c128_553] : memref<104x1152xbf16, #tpu.memory_space<vmem>>, vector<5x128xbf16>
    tpu.vector_store %arg8[%c15_552, %c128_553], %320 {strides = array<i32>} : memref<104x1152xbf16, #tpu.memory_space<vmem>>, vector<5x128xbf16>,
    %c23_554 = arith.constant 23 : index
    %c0_555 = arith.constant 0 : index
    %322 = vector.load %arg9[%c23_554, %c0_555] : memref<104x128xbf16, #tpu.memory_space<vmem>>, vector<5x128xbf16>
    %c15_556 = arith.constant 15 : index
    %c256_557 = arith.constant 256 : index
    %323 = vector.load %arg8[%c15_556, %c256_557] : memref<104x1152xbf16, #tpu.memory_space<vmem>>, vector<5x128xbf16>
    tpu.vector_store %arg8[%c15_556, %c256_557], %322 {strides = array<i32>} : memref<104x1152xbf16, #tpu.memory_space<vmem>>, vector<5x128xbf16>,
    %c28_558 = arith.constant 28 : index
    %c0_559 = arith.constant 0 : index
    %324 = vector.load %arg9[%c28_558, %c0_559] : memref<104x128xbf16, #tpu.memory_space<vmem>>, vector<5x128xbf16>
    %c15_560 = arith.constant 15 : index
    %c384_561 = arith.constant 384 : index
    %325 = vector.load %arg8[%c15_560, %c384_561] : memref<104x1152xbf16, #tpu.memory_space<vmem>>, vector<5x128xbf16>
    tpu.vector_store %arg8[%c15_560, %c384_561], %324 {strides = array<i32>} : memref<104x1152xbf16, #tpu.memory_space<vmem>>, vector<5x128xbf16>,
    %c29_562 = arith.constant 29 : index
    %c0_563 = arith.constant 0 : index
    %326 = vector.load %arg9[%c29_562, %c0_563] : memref<104x128xbf16, #tpu.memory_space<vmem>>, vector<5x128xbf16>
    %c15_564 = arith.constant 15 : index
    %c512_565 = arith.constant 512 : index
    %327 = vector.load %arg8[%c15_564, %c512_565] : memref<104x1152xbf16, #tpu.memory_space<vmem>>, vector<5x128xbf16>
    tpu.vector_store %arg8[%c15_564, %c512_565], %326 {strides = array<i32>} : memref<104x1152xbf16, #tpu.memory_space<vmem>>, vector<5x128xbf16>,
    %c30_566 = arith.constant 30 : index
    %c0_567 = arith.constant 0 : index
    %328 = vector.load %arg9[%c30_566, %c0_567] : memref<104x128xbf16, #tpu.memory_space<vmem>>, vector<5x128xbf16>
    %c15_568 = arith.constant 15 : index
    %c640_569 = arith.constant 640 : index
    %329 = vector.load %arg8[%c15_568, %c640_569] : memref<104x1152xbf16, #tpu.memory_space<vmem>>, vector<5x128xbf16>
    tpu.vector_store %arg8[%c15_568, %c640_569], %328 {strides = array<i32>} : memref<104x1152xbf16, #tpu.memory_space<vmem>>, vector<5x128xbf16>,
    %c35_570 = arith.constant 35 : index
    %c0_571 = arith.constant 0 : index
    %330 = vector.load %arg9[%c35_570, %c0_571] : memref<104x128xbf16, #tpu.memory_space<vmem>>, vector<5x128xbf16>
    %c15_572 = arith.constant 15 : index
    %c768_573 = arith.constant 768 : index
    %331 = vector.load %arg8[%c15_572, %c768_573] : memref<104x1152xbf16, #tpu.memory_space<vmem>>, vector<5x128xbf16>
    tpu.vector_store %arg8[%c15_572, %c768_573], %330 {strides = array<i32>} : memref<104x1152xbf16, #tpu.memory_space<vmem>>, vector<5x128xbf16>,
    %c36_574 = arith.constant 36 : index
    %c0_575 = arith.constant 0 : index
    %332 = vector.load %arg9[%c36_574, %c0_575] : memref<104x128xbf16, #tpu.memory_space<vmem>>, vector<5x128xbf16>
    %c15_576 = arith.constant 15 : index
    %c896_577 = arith.constant 896 : index
    %333 = vector.load %arg8[%c15_576, %c896_577] : memref<104x1152xbf16, #tpu.memory_space<vmem>>, vector<5x128xbf16>
    tpu.vector_store %arg8[%c15_576, %c896_577], %332 {strides = array<i32>} : memref<104x1152xbf16, #tpu.memory_space<vmem>>, vector<5x128xbf16>,
    %c37_578 = arith.constant 37 : index
    %c0_579 = arith.constant 0 : index
    %334 = vector.load %arg9[%c37_578, %c0_579] : memref<104x128xbf16, #tpu.memory_space<vmem>>, vector<5x128xbf16>
    %c15_580 = arith.constant 15 : index
    %c1024_581 = arith.constant 1024 : index
    %335 = vector.load %arg8[%c15_580, %c1024_581] : memref<104x1152xbf16, #tpu.memory_space<vmem>>, vector<5x128xbf16>
    tpu.vector_store %arg8[%c15_580, %c1024_581], %334 {strides = array<i32>} : memref<104x1152xbf16, #tpu.memory_space<vmem>>, vector<5x128xbf16>,
    %c28_582 = arith.constant 28 : index
    %c0_583 = arith.constant 0 : index
    %336 = vector.load %arg9[%c28_582, %c0_583] : memref<104x128xbf16, #tpu.memory_space<vmem>>, vector<5x128xbf16>
    %c20_584 = arith.constant 20 : index
    %c0_585 = arith.constant 0 : index
    %337 = vector.load %arg8[%c20_584, %c0_585] : memref<104x1152xbf16, #tpu.memory_space<vmem>>, vector<5x128xbf16>
    tpu.vector_store %arg8[%c20_584, %c0_585], %336 {strides = array<i32>} : memref<104x1152xbf16, #tpu.memory_space<vmem>>, vector<5x128xbf16>,
    %c29_586 = arith.constant 29 : index
    %c0_587 = arith.constant 0 : index
    %338 = vector.load %arg9[%c29_586, %c0_587] : memref<104x128xbf16, #tpu.memory_space<vmem>>, vector<5x128xbf16>
    %c20_588 = arith.constant 20 : index
    %c128_589 = arith.constant 128 : index
    %339 = vector.load %arg8[%c20_588, %c128_589] : memref<104x1152xbf16, #tpu.memory_space<vmem>>, vector<5x128xbf16>
    tpu.vector_store %arg8[%c20_588, %c128_589], %338 {strides = array<i32>} : memref<104x1152xbf16, #tpu.memory_space<vmem>>, vector<5x128xbf16>,
    %c30_590 = arith.constant 30 : index
    %c0_591 = arith.constant 0 : index
    %340 = vector.load %arg9[%c30_590, %c0_591] : memref<104x128xbf16, #tpu.memory_space<vmem>>, vector<5x128xbf16>
    %c20_592 = arith.constant 20 : index
    %c256_593 = arith.constant 256 : index
    %341 = vector.load %arg8[%c20_592, %c256_593] : memref<104x1152xbf16, #tpu.memory_space<vmem>>, vector<5x128xbf16>
    tpu.vector_store %arg8[%c20_592, %c256_593], %340 {strides = array<i32>} : memref<104x1152xbf16, #tpu.memory_space<vmem>>, vector<5x128xbf16>,
    %c35_594 = arith.constant 35 : index
    %c0_595 = arith.constant 0 : index
    %342 = vector.load %arg9[%c35_594, %c0_595] : memref<104x128xbf16, #tpu.memory_space<vmem>>, vector<5x128xbf16>
    %c20_596 = arith.constant 20 : index
    %c384_597 = arith.constant 384 : index
    %343 = vector.load %arg8[%c20_596, %c384_597] : memref<104x1152xbf16, #tpu.memory_space<vmem>>, vector<5x128xbf16>
    tpu.vector_store %arg8[%c20_596, %c384_597], %342 {strides = array<i32>} : memref<104x1152xbf16, #tpu.memory_space<vmem>>, vector<5x128xbf16>,
    %c36_598 = arith.constant 36 : index
    %c0_599 = arith.constant 0 : index
    %344 = vector.load %arg9[%c36_598, %c0_599] : memref<104x128xbf16, #tpu.memory_space<vmem>>, vector<5x128xbf16>
    %c20_600 = arith.constant 20 : index
    %c512_601 = arith.constant 512 : index
    %345 = vector.load %arg8[%c20_600, %c512_601] : memref<104x1152xbf16, #tpu.memory_space<vmem>>, vector<5x128xbf16>
    tpu.vector_store %arg8[%c20_600, %c512_601], %344 {strides = array<i32>} : memref<104x1152xbf16, #tpu.memory_space<vmem>>, vector<5x128xbf16>,
    %c37_602 = arith.constant 37 : index
    %c0_603 = arith.constant 0 : index
    %346 = vector.load %arg9[%c37_602, %c0_603] : memref<104x128xbf16, #tpu.memory_space<vmem>>, vector<5x128xbf16>
    %c20_604 = arith.constant 20 : index
    %c640_605 = arith.constant 640 : index
    %347 = vector.load %arg8[%c20_604, %c640_605] : memref<104x1152xbf16, #tpu.memory_space<vmem>>, vector<5x128xbf16>
    tpu.vector_store %arg8[%c20_604, %c640_605], %346 {strides = array<i32>} : memref<104x1152xbf16, #tpu.memory_space<vmem>>, vector<5x128xbf16>,
    %c42_606 = arith.constant 42 : index
    %c0_607 = arith.constant 0 : index
    %348 = vector.load %arg9[%c42_606, %c0_607] : memref<104x128xbf16, #tpu.memory_space<vmem>>, vector<5x128xbf16>
    %c20_608 = arith.constant 20 : index
    %c768_609 = arith.constant 768 : index
    %349 = vector.load %arg8[%c20_608, %c768_609] : memref<104x1152xbf16, #tpu.memory_space<vmem>>, vector<5x128xbf16>
    tpu.vector_store %arg8[%c20_608, %c768_609], %348 {strides = array<i32>} : memref<104x1152xbf16, #tpu.memory_space<vmem>>, vector<5x128xbf16>,
    %c43 = arith.constant 43 : index
    %c0_610 = arith.constant 0 : index
    %350 = vector.load %arg9[%c43, %c0_610] : memref<104x128xbf16, #tpu.memory_space<vmem>>, vector<5x128xbf16>
    %c20_611 = arith.constant 20 : index
    %c896_612 = arith.constant 896 : index
    %351 = vector.load %arg8[%c20_611, %c896_612] : memref<104x1152xbf16, #tpu.memory_space<vmem>>, vector<5x128xbf16>
    tpu.vector_store %arg8[%c20_611, %c896_612], %350 {strides = array<i32>} : memref<104x1152xbf16, #tpu.memory_space<vmem>>, vector<5x128xbf16>,
    %c44 = arith.constant 44 : index
    %c0_613 = arith.constant 0 : index
    %352 = vector.load %arg9[%c44, %c0_613] : memref<104x128xbf16, #tpu.memory_space<vmem>>, vector<5x128xbf16>
    %c20_614 = arith.constant 20 : index
    %c1024_615 = arith.constant 1024 : index
    %353 = vector.load %arg8[%c20_614, %c1024_615] : memref<104x1152xbf16, #tpu.memory_space<vmem>>, vector<5x128xbf16>
    tpu.vector_store %arg8[%c20_614, %c1024_615], %352 {strides = array<i32>} : memref<104x1152xbf16, #tpu.memory_space<vmem>>, vector<5x128xbf16>,
    %c49_616 = arith.constant 49 : index
    %c0_617 = arith.constant 0 : index
    %354 = vector.load %arg9[%c49_616, %c0_617] : memref<104x128xbf16, #tpu.memory_space<vmem>>, vector<5x128xbf16>
    %c25 = arith.constant 25 : index
    %c0_618 = arith.constant 0 : index
    %355 = vector.load %arg8[%c25, %c0_618] : memref<104x1152xbf16, #tpu.memory_space<vmem>>, vector<5x128xbf16>
    tpu.vector_store %arg8[%c25, %c0_618], %354 {strides = array<i32>} : memref<104x1152xbf16, #tpu.memory_space<vmem>>, vector<5x128xbf16>,
    %c50 = arith.constant 50 : index
    %c0_619 = arith.constant 0 : index
    %356 = vector.load %arg9[%c50, %c0_619] : memref<104x128xbf16, #tpu.memory_space<vmem>>, vector<5x128xbf16>
    %c25_620 = arith.constant 25 : index
    %c128_621 = arith.constant 128 : index
    %357 = vector.load %arg8[%c25_620, %c128_621] : memref<104x1152xbf16, #tpu.memory_space<vmem>>, vector<5x128xbf16>
    tpu.vector_store %arg8[%c25_620, %c128_621], %356 {strides = array<i32>} : memref<104x1152xbf16, #tpu.memory_space<vmem>>, vector<5x128xbf16>,
    %c51 = arith.constant 51 : index
    %c0_622 = arith.constant 0 : index
    %358 = vector.load %arg9[%c51, %c0_622] : memref<104x128xbf16, #tpu.memory_space<vmem>>, vector<5x128xbf16>
    %c25_623 = arith.constant 25 : index
    %c256_624 = arith.constant 256 : index
    %359 = vector.load %arg8[%c25_623, %c256_624] : memref<104x1152xbf16, #tpu.memory_space<vmem>>, vector<5x128xbf16>
    tpu.vector_store %arg8[%c25_623, %c256_624], %358 {strides = array<i32>} : memref<104x1152xbf16, #tpu.memory_space<vmem>>, vector<5x128xbf16>,
    %c56_625 = arith.constant 56 : index
    %c0_626 = arith.constant 0 : index
    %360 = vector.load %arg9[%c56_625, %c0_626] : memref<104x128xbf16, #tpu.memory_space<vmem>>, vector<5x128xbf16>
    %c25_627 = arith.constant 25 : index
    %c384_628 = arith.constant 384 : index
    %361 = vector.load %arg8[%c25_627, %c384_628] : memref<104x1152xbf16, #tpu.memory_space<vmem>>, vector<5x128xbf16>
    tpu.vector_store %arg8[%c25_627, %c384_628], %360 {strides = array<i32>} : memref<104x1152xbf16, #tpu.memory_space<vmem>>, vector<5x128xbf16>,
    %c57 = arith.constant 57 : index
    %c0_629 = arith.constant 0 : index
    %362 = vector.load %arg9[%c57, %c0_629] : memref<104x128xbf16, #tpu.memory_space<vmem>>, vector<5x128xbf16>
    %c25_630 = arith.constant 25 : index
    %c512_631 = arith.constant 512 : index
    %363 = vector.load %arg8[%c25_630, %c512_631] : memref<104x1152xbf16, #tpu.memory_space<vmem>>, vector<5x128xbf16>
    tpu.vector_store %arg8[%c25_630, %c512_631], %362 {strides = array<i32>} : memref<104x1152xbf16, #tpu.memory_space<vmem>>, vector<5x128xbf16>,
    %c58 = arith.constant 58 : index
    %c0_632 = arith.constant 0 : index
    %364 = vector.load %arg9[%c58, %c0_632] : memref<104x128xbf16, #tpu.memory_space<vmem>>, vector<5x128xbf16>
    %c25_633 = arith.constant 25 : index
    %c640_634 = arith.constant 640 : index
    %365 = vector.load %arg8[%c25_633, %c640_634] : memref<104x1152xbf16, #tpu.memory_space<vmem>>, vector<5x128xbf16>
    tpu.vector_store %arg8[%c25_633, %c640_634], %364 {strides = array<i32>} : memref<104x1152xbf16, #tpu.memory_space<vmem>>, vector<5x128xbf16>,
    %c63_635 = arith.constant 63 : index
    %c0_636 = arith.constant 0 : index
    %366 = vector.load %arg9[%c63_635, %c0_636] : memref<104x128xbf16, #tpu.memory_space<vmem>>, vector<5x128xbf16>
    %c25_637 = arith.constant 25 : index
    %c768_638 = arith.constant 768 : index
    %367 = vector.load %arg8[%c25_637, %c768_638] : memref<104x1152xbf16, #tpu.memory_space<vmem>>, vector<5x128xbf16>
    tpu.vector_store %arg8[%c25_637, %c768_638], %366 {strides = array<i32>} : memref<104x1152xbf16, #tpu.memory_space<vmem>>, vector<5x128xbf16>,
    %c64_639 = arith.constant 64 : index
    %c0_640 = arith.constant 0 : index
    %368 = vector.load %arg9[%c64_639, %c0_640] : memref<104x128xbf16, #tpu.memory_space<vmem>>, vector<5x128xbf16>
    %c25_641 = arith.constant 25 : index
    %c896_642 = arith.constant 896 : index
    %369 = vector.load %arg8[%c25_641, %c896_642] : memref<104x1152xbf16, #tpu.memory_space<vmem>>, vector<5x128xbf16>
    tpu.vector_store %arg8[%c25_641, %c896_642], %368 {strides = array<i32>} : memref<104x1152xbf16, #tpu.memory_space<vmem>>, vector<5x128xbf16>,
    %c65_643 = arith.constant 65 : index
    %c0_644 = arith.constant 0 : index
    %370 = vector.load %arg9[%c65_643, %c0_644] : memref<104x128xbf16, #tpu.memory_space<vmem>>, vector<5x128xbf16>
    %c25_645 = arith.constant 25 : index
    %c1024_646 = arith.constant 1024 : index
    %371 = vector.load %arg8[%c25_645, %c1024_646] : memref<104x1152xbf16, #tpu.memory_space<vmem>>, vector<5x128xbf16>
    tpu.vector_store %arg8[%c25_645, %c1024_646], %370 {strides = array<i32>} : memref<104x1152xbf16, #tpu.memory_space<vmem>>, vector<5x128xbf16>,
    %c56_647 = arith.constant 56 : index
    %c0_648 = arith.constant 0 : index
    %372 = vector.load %arg9[%c56_647, %c0_648] : memref<104x128xbf16, #tpu.memory_space<vmem>>, vector<5x128xbf16>
    %c30_649 = arith.constant 30 : index
    %c0_650 = arith.constant 0 : index
    %373 = vector.load %arg8[%c30_649, %c0_650] : memref<104x1152xbf16, #tpu.memory_space<vmem>>, vector<5x128xbf16>
    tpu.vector_store %arg8[%c30_649, %c0_650], %372 {strides = array<i32>} : memref<104x1152xbf16, #tpu.memory_space<vmem>>, vector<5x128xbf16>,
    %c57_651 = arith.constant 57 : index
    %c0_652 = arith.constant 0 : index
    %374 = vector.load %arg9[%c57_651, %c0_652] : memref<104x128xbf16, #tpu.memory_space<vmem>>, vector<5x128xbf16>
    %c30_653 = arith.constant 30 : index
    %c128_654 = arith.constant 128 : index
    %375 = vector.load %arg8[%c30_653, %c128_654] : memref<104x1152xbf16, #tpu.memory_space<vmem>>, vector<5x128xbf16>
    tpu.vector_store %arg8[%c30_653, %c128_654], %374 {strides = array<i32>} : memref<104x1152xbf16, #tpu.memory_space<vmem>>, vector<5x128xbf16>,
    %c58_655 = arith.constant 58 : index
    %c0_656 = arith.constant 0 : index
    %376 = vector.load %arg9[%c58_655, %c0_656] : memref<104x128xbf16, #tpu.memory_space<vmem>>, vector<5x128xbf16>
    %c30_657 = arith.constant 30 : index
    %c256_658 = arith.constant 256 : index
    %377 = vector.load %arg8[%c30_657, %c256_658] : memref<104x1152xbf16, #tpu.memory_space<vmem>>, vector<5x128xbf16>
    tpu.vector_store %arg8[%c30_657, %c256_658], %376 {strides = array<i32>} : memref<104x1152xbf16, #tpu.memory_space<vmem>>, vector<5x128xbf16>,
    %c63_659 = arith.constant 63 : index
    %c0_660 = arith.constant 0 : index
    %378 = vector.load %arg9[%c63_659, %c0_660] : memref<104x128xbf16, #tpu.memory_space<vmem>>, vector<5x128xbf16>
    %c30_661 = arith.constant 30 : index
    %c384_662 = arith.constant 384 : index
    %379 = vector.load %arg8[%c30_661, %c384_662] : memref<104x1152xbf16, #tpu.memory_space<vmem>>, vector<5x128xbf16>
    tpu.vector_store %arg8[%c30_661, %c384_662], %378 {strides = array<i32>} : memref<104x1152xbf16, #tpu.memory_space<vmem>>, vector<5x128xbf16>,
    %c64_663 = arith.constant 64 : index
    %c0_664 = arith.constant 0 : index
    %380 = vector.load %arg9[%c64_663, %c0_664] : memref<104x128xbf16, #tpu.memory_space<vmem>>, vector<5x128xbf16>
    %c30_665 = arith.constant 30 : index
    %c512_666 = arith.constant 512 : index
    %381 = vector.load %arg8[%c30_665, %c512_666] : memref<104x1152xbf16, #tpu.memory_space<vmem>>, vector<5x128xbf16>
    tpu.vector_store %arg8[%c30_665, %c512_666], %380 {strides = array<i32>} : memref<104x1152xbf16, #tpu.memory_space<vmem>>, vector<5x128xbf16>,
    %c65_667 = arith.constant 65 : index
    %c0_668 = arith.constant 0 : index
    %382 = vector.load %arg9[%c65_667, %c0_668] : memref<104x128xbf16, #tpu.memory_space<vmem>>, vector<5x128xbf16>
    %c30_669 = arith.constant 30 : index
    %c640_670 = arith.constant 640 : index
    %383 = vector.load %arg8[%c30_669, %c640_670] : memref<104x1152xbf16, #tpu.memory_space<vmem>>, vector<5x128xbf16>
    tpu.vector_store %arg8[%c30_669, %c640_670], %382 {strides = array<i32>} : memref<104x1152xbf16, #tpu.memory_space<vmem>>, vector<5x128xbf16>,
    %c70_671 = arith.constant 70 : index
    %c0_672 = arith.constant 0 : index
    %384 = vector.load %arg9[%c70_671, %c0_672] : memref<104x128xbf16, #tpu.memory_space<vmem>>, vector<5x128xbf16>
    %c30_673 = arith.constant 30 : index
    %c768_674 = arith.constant 768 : index
    %385 = vector.load %arg8[%c30_673, %c768_674] : memref<104x1152xbf16, #tpu.memory_space<vmem>>, vector<5x128xbf16>
    tpu.vector_store %arg8[%c30_673, %c768_674], %384 {strides = array<i32>} : memref<104x1152xbf16, #tpu.memory_space<vmem>>, vector<5x128xbf16>,
    %c71 = arith.constant 71 : index
    %c0_675 = arith.constant 0 : index
    %386 = vector.load %arg9[%c71, %c0_675] : memref<104x128xbf16, #tpu.memory_space<vmem>>, vector<5x128xbf16>
    %c30_676 = arith.constant 30 : index
    %c896_677 = arith.constant 896 : index
    %387 = vector.load %arg8[%c30_676, %c896_677] : memref<104x1152xbf16, #tpu.memory_space<vmem>>, vector<5x128xbf16>
    tpu.vector_store %arg8[%c30_676, %c896_677], %386 {strides = array<i32>} : memref<104x1152xbf16, #tpu.memory_space<vmem>>, vector<5x128xbf16>,
    %c72_678 = arith.constant 72 : index
    %c0_679 = arith.constant 0 : index
    %388 = vector.load %arg9[%c72_678, %c0_679] : memref<104x128xbf16, #tpu.memory_space<vmem>>, vector<5x128xbf16>
    %c30_680 = arith.constant 30 : index
    %c1024_681 = arith.constant 1024 : index
    %389 = vector.load %arg8[%c30_680, %c1024_681] : memref<104x1152xbf16, #tpu.memory_space<vmem>>, vector<5x128xbf16>
    tpu.vector_store %arg8[%c30_680, %c1024_681], %388 {strides = array<i32>} : memref<104x1152xbf16, #tpu.memory_space<vmem>>, vector<5x128xbf16>,
    %c63_682 = arith.constant 63 : index
    %c0_683 = arith.constant 0 : index
    %390 = vector.load %arg9[%c63_682, %c0_683] : memref<104x128xbf16, #tpu.memory_space<vmem>>, vector<5x128xbf16>
    %c35_684 = arith.constant 35 : index
    %c0_685 = arith.constant 0 : index
    %391 = vector.load %arg8[%c35_684, %c0_685] : memref<104x1152xbf16, #tpu.memory_space<vmem>>, vector<5x128xbf16>
    tpu.vector_store %arg8[%c35_684, %c0_685], %390 {strides = array<i32>} : memref<104x1152xbf16, #tpu.memory_space<vmem>>, vector<5x128xbf16>,
    %c64_686 = arith.constant 64 : index
    %c0_687 = arith.constant 0 : index
    %392 = vector.load %arg9[%c64_686, %c0_687] : memref<104x128xbf16, #tpu.memory_space<vmem>>, vector<5x128xbf16>
    %c35_688 = arith.constant 35 : index
    %c128_689 = arith.constant 128 : index
    %393 = vector.load %arg8[%c35_688, %c128_689] : memref<104x1152xbf16, #tpu.memory_space<vmem>>, vector<5x128xbf16>
    tpu.vector_store %arg8[%c35_688, %c128_689], %392 {strides = array<i32>} : memref<104x1152xbf16, #tpu.memory_space<vmem>>, vector<5x128xbf16>,
    %c65_690 = arith.constant 65 : index
    %c0_691 = arith.constant 0 : index
    %394 = vector.load %arg9[%c65_690, %c0_691] : memref<104x128xbf16, #tpu.memory_space<vmem>>, vector<5x128xbf16>
    %c35_692 = arith.constant 35 : index
    %c256_693 = arith.constant 256 : index
    %395 = vector.load %arg8[%c35_692, %c256_693] : memref<104x1152xbf16, #tpu.memory_space<vmem>>, vector<5x128xbf16>
    tpu.vector_store %arg8[%c35_692, %c256_693], %394 {strides = array<i32>} : memref<104x1152xbf16, #tpu.memory_space<vmem>>, vector<5x128xbf16>,
    %c70_694 = arith.constant 70 : index
    %c0_695 = arith.constant 0 : index
    %396 = vector.load %arg9[%c70_694, %c0_695] : memref<104x128xbf16, #tpu.memory_space<vmem>>, vector<5x128xbf16>
    %c35_696 = arith.constant 35 : index
    %c384_697 = arith.constant 384 : index
    %397 = vector.load %arg8[%c35_696, %c384_697] : memref<104x1152xbf16, #tpu.memory_space<vmem>>, vector<5x128xbf16>
    tpu.vector_store %arg8[%c35_696, %c384_697], %396 {strides = array<i32>} : memref<104x1152xbf16, #tpu.memory_space<vmem>>, vector<5x128xbf16>,
    %c71_698 = arith.constant 71 : index
    %c0_699 = arith.constant 0 : index
    %398 = vector.load %arg9[%c71_698, %c0_699] : memref<104x128xbf16, #tpu.memory_space<vmem>>, vector<5x128xbf16>
    %c35_700 = arith.constant 35 : index
    %c512_701 = arith.constant 512 : index
    %399 = vector.load %arg8[%c35_700, %c512_701] : memref<104x1152xbf16, #tpu.memory_space<vmem>>, vector<5x128xbf16>
    tpu.vector_store %arg8[%c35_700, %c512_701], %398 {strides = array<i32>} : memref<104x1152xbf16, #tpu.memory_space<vmem>>, vector<5x128xbf16>,
    %c72_702 = arith.constant 72 : index
    %c0_703 = arith.constant 0 : index
    %400 = vector.load %arg9[%c72_702, %c0_703] : memref<104x128xbf16, #tpu.memory_space<vmem>>, vector<5x128xbf16>
    %c35_704 = arith.constant 35 : index
    %c640_705 = arith.constant 640 : index
    %401 = vector.load %arg8[%c35_704, %c640_705] : memref<104x1152xbf16, #tpu.memory_space<vmem>>, vector<5x128xbf16>
    tpu.vector_store %arg8[%c35_704, %c640_705], %400 {strides = array<i32>} : memref<104x1152xbf16, #tpu.memory_space<vmem>>, vector<5x128xbf16>,
    %c77_706 = arith.constant 77 : index
    %c0_707 = arith.constant 0 : index
    %402 = vector.load %arg9[%c77_706, %c0_707] : memref<104x128xbf16, #tpu.memory_space<vmem>>, vector<5x128xbf16>
    %c35_708 = arith.constant 35 : index
    %c768_709 = arith.constant 768 : index
    %403 = vector.load %arg8[%c35_708, %c768_709] : memref<104x1152xbf16, #tpu.memory_space<vmem>>, vector<5x128xbf16>
    tpu.vector_store %arg8[%c35_708, %c768_709], %402 {strides = array<i32>} : memref<104x1152xbf16, #tpu.memory_space<vmem>>, vector<5x128xbf16>,
    %c78 = arith.constant 78 : index
    %c0_710 = arith.constant 0 : index
    %404 = vector.load %arg9[%c78, %c0_710] : memref<104x128xbf16, #tpu.memory_space<vmem>>, vector<5x128xbf16>
    %c35_711 = arith.constant 35 : index
    %c896_712 = arith.constant 896 : index
    %405 = vector.load %arg8[%c35_711, %c896_712] : memref<104x1152xbf16, #tpu.memory_space<vmem>>, vector<5x128xbf16>
    tpu.vector_store %arg8[%c35_711, %c896_712], %404 {strides = array<i32>} : memref<104x1152xbf16, #tpu.memory_space<vmem>>, vector<5x128xbf16>,
    %c79 = arith.constant 79 : index
    %c0_713 = arith.constant 0 : index
    %406 = vector.load %arg9[%c79, %c0_713] : memref<104x128xbf16, #tpu.memory_space<vmem>>, vector<5x128xbf16>
    %c35_714 = arith.constant 35 : index
    %c1024_715 = arith.constant 1024 : index
    %407 = vector.load %arg8[%c35_714, %c1024_715] : memref<104x1152xbf16, #tpu.memory_space<vmem>>, vector<5x128xbf16>
    tpu.vector_store %arg8[%c35_714, %c1024_715], %406 {strides = array<i32>} : memref<104x1152xbf16, #tpu.memory_space<vmem>>, vector<5x128xbf16>,
    %c70_716 = arith.constant 70 : index
    %c0_717 = arith.constant 0 : index
    %408 = vector.load %arg9[%c70_716, %c0_717] : memref<104x128xbf16, #tpu.memory_space<vmem>>, vector<5x128xbf16>
    %c40 = arith.constant 40 : index
    %c0_718 = arith.constant 0 : index
    %409 = vector.load %arg8[%c40, %c0_718] : memref<104x1152xbf16, #tpu.memory_space<vmem>>, vector<5x128xbf16>
    tpu.vector_store %arg8[%c40, %c0_718], %408 {strides = array<i32>} : memref<104x1152xbf16, #tpu.memory_space<vmem>>, vector<5x128xbf16>,
    %c71_719 = arith.constant 71 : index
    %c0_720 = arith.constant 0 : index
    %410 = vector.load %arg9[%c71_719, %c0_720] : memref<104x128xbf16, #tpu.memory_space<vmem>>, vector<5x128xbf16>
    %c40_721 = arith.constant 40 : index
    %c128_722 = arith.constant 128 : index
    %411 = vector.load %arg8[%c40_721, %c128_722] : memref<104x1152xbf16, #tpu.memory_space<vmem>>, vector<5x128xbf16>
    tpu.vector_store %arg8[%c40_721, %c128_722], %410 {strides = array<i32>} : memref<104x1152xbf16, #tpu.memory_space<vmem>>, vector<5x128xbf16>,
    %c72_723 = arith.constant 72 : index
    %c0_724 = arith.constant 0 : index
    %412 = vector.load %arg9[%c72_723, %c0_724] : memref<104x128xbf16, #tpu.memory_space<vmem>>, vector<5x128xbf16>
    %c40_725 = arith.constant 40 : index
    %c256_726 = arith.constant 256 : index
    %413 = vector.load %arg8[%c40_725, %c256_726] : memref<104x1152xbf16, #tpu.memory_space<vmem>>, vector<5x128xbf16>
    tpu.vector_store %arg8[%c40_725, %c256_726], %412 {strides = array<i32>} : memref<104x1152xbf16, #tpu.memory_space<vmem>>, vector<5x128xbf16>,
    %c77_727 = arith.constant 77 : index
    %c0_728 = arith.constant 0 : index
    %414 = vector.load %arg9[%c77_727, %c0_728] : memref<104x128xbf16, #tpu.memory_space<vmem>>, vector<5x128xbf16>
    %c40_729 = arith.constant 40 : index
    %c384_730 = arith.constant 384 : index
    %415 = vector.load %arg8[%c40_729, %c384_730] : memref<104x1152xbf16, #tpu.memory_space<vmem>>, vector<5x128xbf16>
    tpu.vector_store %arg8[%c40_729, %c384_730], %414 {strides = array<i32>} : memref<104x1152xbf16, #tpu.memory_space<vmem>>, vector<5x128xbf16>,
    %c78_731 = arith.constant 78 : index
    %c0_732 = arith.constant 0 : index
    %416 = vector.load %arg9[%c78_731, %c0_732] : memref<104x128xbf16, #tpu.memory_space<vmem>>, vector<5x128xbf16>
    %c40_733 = arith.constant 40 : index
    %c512_734 = arith.constant 512 : index
    %417 = vector.load %arg8[%c40_733, %c512_734] : memref<104x1152xbf16, #tpu.memory_space<vmem>>, vector<5x128xbf16>
    tpu.vector_store %arg8[%c40_733, %c512_734], %416 {strides = array<i32>} : memref<104x1152xbf16, #tpu.memory_space<vmem>>, vector<5x128xbf16>,
    %c79_735 = arith.constant 79 : index
    %c0_736 = arith.constant 0 : index
    %418 = vector.load %arg9[%c79_735, %c0_736] : memref<104x128xbf16, #tpu.memory_space<vmem>>, vector<5x128xbf16>
    %c40_737 = arith.constant 40 : index
    %c640_738 = arith.constant 640 : index
    %419 = vector.load %arg8[%c40_737, %c640_738] : memref<104x1152xbf16, #tpu.memory_space<vmem>>, vector<5x128xbf16>
    tpu.vector_store %arg8[%c40_737, %c640_738], %418 {strides = array<i32>} : memref<104x1152xbf16, #tpu.memory_space<vmem>>, vector<5x128xbf16>,
    %c84_739 = arith.constant 84 : index
    %c0_740 = arith.constant 0 : index
    %420 = vector.load %arg9[%c84_739, %c0_740] : memref<104x128xbf16, #tpu.memory_space<vmem>>, vector<5x128xbf16>
    %c40_741 = arith.constant 40 : index
    %c768_742 = arith.constant 768 : index
    %421 = vector.load %arg8[%c40_741, %c768_742] : memref<104x1152xbf16, #tpu.memory_space<vmem>>, vector<5x128xbf16>
    tpu.vector_store %arg8[%c40_741, %c768_742], %420 {strides = array<i32>} : memref<104x1152xbf16, #tpu.memory_space<vmem>>, vector<5x128xbf16>,
    %c85 = arith.constant 85 : index
    %c0_743 = arith.constant 0 : index
    %422 = vector.load %arg9[%c85, %c0_743] : memref<104x128xbf16, #tpu.memory_space<vmem>>, vector<5x128xbf16>
    %c40_744 = arith.constant 40 : index
    %c896_745 = arith.constant 896 : index
    %423 = vector.load %arg8[%c40_744, %c896_745] : memref<104x1152xbf16, #tpu.memory_space<vmem>>, vector<5x128xbf16>
    tpu.vector_store %arg8[%c40_744, %c896_745], %422 {strides = array<i32>} : memref<104x1152xbf16, #tpu.memory_space<vmem>>, vector<5x128xbf16>,
    %c86 = arith.constant 86 : index
    %c0_746 = arith.constant 0 : index
    %424 = vector.load %arg9[%c86, %c0_746] : memref<104x128xbf16, #tpu.memory_space<vmem>>, vector<5x128xbf16>
    %c40_747 = arith.constant 40 : index
    %c1024_748 = arith.constant 1024 : index
    %425 = vector.load %arg8[%c40_747, %c1024_748] : memref<104x1152xbf16, #tpu.memory_space<vmem>>, vector<5x128xbf16>
    tpu.vector_store %arg8[%c40_747, %c1024_748], %424 {strides = array<i32>} : memref<104x1152xbf16, #tpu.memory_space<vmem>>, vector<5x128xbf16>,
    %c77_749 = arith.constant 77 : index
    %c0_750 = arith.constant 0 : index
    %426 = vector.load %arg9[%c77_749, %c0_750] : memref<104x128xbf16, #tpu.memory_space<vmem>>, vector<5x128xbf16>
    %c45_751 = arith.constant 45 : index
    %c0_752 = arith.constant 0 : index
    %427 = vector.load %arg8[%c45_751, %c0_752] : memref<104x1152xbf16, #tpu.memory_space<vmem>>, vector<5x128xbf16>
    tpu.vector_store %arg8[%c45_751, %c0_752], %426 {strides = array<i32>} : memref<104x1152xbf16, #tpu.memory_space<vmem>>, vector<5x128xbf16>,
    %c78_753 = arith.constant 78 : index
    %c0_754 = arith.constant 0 : index
    %428 = vector.load %arg9[%c78_753, %c0_754] : memref<104x128xbf16, #tpu.memory_space<vmem>>, vector<5x128xbf16>
    %c45_755 = arith.constant 45 : index
    %c128_756 = arith.constant 128 : index
    %429 = vector.load %arg8[%c45_755, %c128_756] : memref<104x1152xbf16, #tpu.memory_space<vmem>>, vector<5x128xbf16>
    tpu.vector_store %arg8[%c45_755, %c128_756], %428 {strides = array<i32>} : memref<104x1152xbf16, #tpu.memory_space<vmem>>, vector<5x128xbf16>,
    %c79_757 = arith.constant 79 : index
    %c0_758 = arith.constant 0 : index
    %430 = vector.load %arg9[%c79_757, %c0_758] : memref<104x128xbf16, #tpu.memory_space<vmem>>, vector<5x128xbf16>
    %c45_759 = arith.constant 45 : index
    %c256_760 = arith.constant 256 : index
    %431 = vector.load %arg8[%c45_759, %c256_760] : memref<104x1152xbf16, #tpu.memory_space<vmem>>, vector<5x128xbf16>
    tpu.vector_store %arg8[%c45_759, %c256_760], %430 {strides = array<i32>} : memref<104x1152xbf16, #tpu.memory_space<vmem>>, vector<5x128xbf16>,
    %c84_761 = arith.constant 84 : index
    %c0_762 = arith.constant 0 : index
    %432 = vector.load %arg9[%c84_761, %c0_762] : memref<104x128xbf16, #tpu.memory_space<vmem>>, vector<5x128xbf16>
    %c45_763 = arith.constant 45 : index
    %c384_764 = arith.constant 384 : index
    %433 = vector.load %arg8[%c45_763, %c384_764] : memref<104x1152xbf16, #tpu.memory_space<vmem>>, vector<5x128xbf16>
    tpu.vector_store %arg8[%c45_763, %c384_764], %432 {strides = array<i32>} : memref<104x1152xbf16, #tpu.memory_space<vmem>>, vector<5x128xbf16>,
    %c85_765 = arith.constant 85 : index
    %c0_766 = arith.constant 0 : index
    %434 = vector.load %arg9[%c85_765, %c0_766] : memref<104x128xbf16, #tpu.memory_space<vmem>>, vector<5x128xbf16>
    %c45_767 = arith.constant 45 : index
    %c512_768 = arith.constant 512 : index
    %435 = vector.load %arg8[%c45_767, %c512_768] : memref<104x1152xbf16, #tpu.memory_space<vmem>>, vector<5x128xbf16>
    tpu.vector_store %arg8[%c45_767, %c512_768], %434 {strides = array<i32>} : memref<104x1152xbf16, #tpu.memory_space<vmem>>, vector<5x128xbf16>,
    %c86_769 = arith.constant 86 : index
    %c0_770 = arith.constant 0 : index
    %436 = vector.load %arg9[%c86_769, %c0_770] : memref<104x128xbf16, #tpu.memory_space<vmem>>, vector<5x128xbf16>
    %c45_771 = arith.constant 45 : index
    %c640_772 = arith.constant 640 : index
    %437 = vector.load %arg8[%c45_771, %c640_772] : memref<104x1152xbf16, #tpu.memory_space<vmem>>, vector<5x128xbf16>
    tpu.vector_store %arg8[%c45_771, %c640_772], %436 {strides = array<i32>} : memref<104x1152xbf16, #tpu.memory_space<vmem>>, vector<5x128xbf16>,
    %c91_773 = arith.constant 91 : index
    %c0_774 = arith.constant 0 : index
    %438 = vector.load %arg9[%c91_773, %c0_774] : memref<104x128xbf16, #tpu.memory_space<vmem>>, vector<5x128xbf16>
    %c45_775 = arith.constant 45 : index
    %c768_776 = arith.constant 768 : index
    %439 = vector.load %arg8[%c45_775, %c768_776] : memref<104x1152xbf16, #tpu.memory_space<vmem>>, vector<5x128xbf16>
    tpu.vector_store %arg8[%c45_775, %c768_776], %438 {strides = array<i32>} : memref<104x1152xbf16, #tpu.memory_space<vmem>>, vector<5x128xbf16>,
    %c92_777 = arith.constant 92 : index
    %c0_778 = arith.constant 0 : index
    %440 = vector.load %arg9[%c92_777, %c0_778] : memref<104x128xbf16, #tpu.memory_space<vmem>>, vector<5x128xbf16>
    %c45_779 = arith.constant 45 : index
    %c896_780 = arith.constant 896 : index
    %441 = vector.load %arg8[%c45_779, %c896_780] : memref<104x1152xbf16, #tpu.memory_space<vmem>>, vector<5x128xbf16>
    tpu.vector_store %arg8[%c45_779, %c896_780], %440 {strides = array<i32>} : memref<104x1152xbf16, #tpu.memory_space<vmem>>, vector<5x128xbf16>,
    %c93 = arith.constant 93 : index
    %c0_781 = arith.constant 0 : index
    %442 = vector.load %arg9[%c93, %c0_781] : memref<104x128xbf16, #tpu.memory_space<vmem>>, vector<5x128xbf16>
    %c45_782 = arith.constant 45 : index
    %c1024_783 = arith.constant 1024 : index
    %443 = vector.load %arg8[%c45_782, %c1024_783] : memref<104x1152xbf16, #tpu.memory_space<vmem>>, vector<5x128xbf16>
    tpu.vector_store %arg8[%c45_782, %c1024_783], %442 {strides = array<i32>} : memref<104x1152xbf16, #tpu.memory_space<vmem>>, vector<5x128xbf16>,
    %c0_784 = arith.constant 0 : index
    %c0_785 = arith.constant 0 : index
    %444 = vector.load %arg8[%c0_784, %c0_785] : memref<104x1152xbf16, #tpu.memory_space<vmem>>, vector<50x1152xbf16>
    %c1_786 = arith.constant 1 : index
    %c0_787 = arith.constant 0 : index
    %c0_788 = arith.constant 0 : index
    %445 = vector.load %arg1[%c1_786, %c0_787, %c0_788] : memref<4x1152x128xbf16, #tpu.memory_space<vmem>>, vector<1x1152x128xbf16>
    %446 = vector.shape_cast %445 : vector<1x1152x128xbf16> to vector<1152x128xbf16>
    %cst_789 = arith.constant dense<0.000000e+00> : vector<50x128xf32>
    %447 = tpu.matmul %444, %446, %cst_789 {dimension_numbers = #tpu.dot_dimension_numbers<[1], [0], [0], [1], [0, 0, 1, 1], [], []>} : vector<50x1152xbf16>, vector<1152x128xbf16>, vector<50x128xf32> -> vector<50x128xf32>
    %c1_790 = arith.constant 1 : index
    %c0_791 = arith.constant 0 : index
    %c0_792 = arith.constant 0 : index
    %448 = vector.load %arg2[%c1_790, %c0_791, %c0_792] : memref<4x1x128xf32, #tpu.memory_space<vmem>>, vector<1x1x128xf32>
    %449 = vector.shape_cast %448 : vector<1x1x128xf32> to vector<1x128xf32>
    %450 = vector.broadcast %449 : vector<1x128xf32> to vector<50x128xf32>
    %451 = arith.addf %447, %450 : vector<50x128xf32>
    %cst_793 = arith.constant 0.000000e+00 : f32
    %452 = vector.broadcast %cst_793 : f32 to vector<50x128xf32>
    %453 = arith.maximumf %451, %452 : vector<50x128xf32>
    %454 = arith.truncf %453 : vector<50x128xf32> to vector<50x128xbf16>
    %c0_794 = arith.constant 0 : index
    %c0_795 = arith.constant 0 : index
    %455 = vector.load %arg10[%c0_794, %c0_795] : memref<104x128xbf16, #tpu.memory_space<vmem>>, vector<50x128xbf16>
    tpu.vector_store %arg10[%c0_794, %c0_795], %454 {strides = array<i32>} : memref<104x128xbf16, #tpu.memory_space<vmem>>, vector<50x128xbf16>,
    %c0_796 = arith.constant 0 : index
    %c0_797 = arith.constant 0 : index
    %456 = vector.load %arg10[%c0_796, %c0_797] : memref<104x128xbf16, #tpu.memory_space<vmem>>, vector<3x128xbf16>
    %c0_798 = arith.constant 0 : index
    %c0_799 = arith.constant 0 : index
    %457 = vector.load %arg8[%c0_798, %c0_799] : memref<104x1152xbf16, #tpu.memory_space<vmem>>, vector<3x128xbf16>
    tpu.vector_store %arg8[%c0_798, %c0_799], %456 {strides = array<i32>} : memref<104x1152xbf16, #tpu.memory_space<vmem>>, vector<3x128xbf16>,
    %c1_800 = arith.constant 1 : index
    %c0_801 = arith.constant 0 : index
    %458 = vector.load %arg10[%c1_800, %c0_801] : memref<104x128xbf16, #tpu.memory_space<vmem>>, vector<3x128xbf16>
    %c0_802 = arith.constant 0 : index
    %c128_803 = arith.constant 128 : index
    %459 = vector.load %arg8[%c0_802, %c128_803] : memref<104x1152xbf16, #tpu.memory_space<vmem>>, vector<3x128xbf16>
    tpu.vector_store %arg8[%c0_802, %c128_803], %458 {strides = array<i32>} : memref<104x1152xbf16, #tpu.memory_space<vmem>>, vector<3x128xbf16>,
    %c2_804 = arith.constant 2 : index
    %c0_805 = arith.constant 0 : index
    %460 = vector.load %arg10[%c2_804, %c0_805] : memref<104x128xbf16, #tpu.memory_space<vmem>>, vector<3x128xbf16>
    %c0_806 = arith.constant 0 : index
    %c256_807 = arith.constant 256 : index
    %461 = vector.load %arg8[%c0_806, %c256_807] : memref<104x1152xbf16, #tpu.memory_space<vmem>>, vector<3x128xbf16>
    tpu.vector_store %arg8[%c0_806, %c256_807], %460 {strides = array<i32>} : memref<104x1152xbf16, #tpu.memory_space<vmem>>, vector<3x128xbf16>,
    %c5_808 = arith.constant 5 : index
    %c0_809 = arith.constant 0 : index
    %462 = vector.load %arg10[%c5_808, %c0_809] : memref<104x128xbf16, #tpu.memory_space<vmem>>, vector<3x128xbf16>
    %c0_810 = arith.constant 0 : index
    %c384_811 = arith.constant 384 : index
    %463 = vector.load %arg8[%c0_810, %c384_811] : memref<104x1152xbf16, #tpu.memory_space<vmem>>, vector<3x128xbf16>
    tpu.vector_store %arg8[%c0_810, %c384_811], %462 {strides = array<i32>} : memref<104x1152xbf16, #tpu.memory_space<vmem>>, vector<3x128xbf16>,
    %c6 = arith.constant 6 : index
    %c0_812 = arith.constant 0 : index
    %464 = vector.load %arg10[%c6, %c0_812] : memref<104x128xbf16, #tpu.memory_space<vmem>>, vector<3x128xbf16>
    %c0_813 = arith.constant 0 : index
    %c512_814 = arith.constant 512 : index
    %465 = vector.load %arg8[%c0_813, %c512_814] : memref<104x1152xbf16, #tpu.memory_space<vmem>>, vector<3x128xbf16>
    tpu.vector_store %arg8[%c0_813, %c512_814], %464 {strides = array<i32>} : memref<104x1152xbf16, #tpu.memory_space<vmem>>, vector<3x128xbf16>,
    %c7_815 = arith.constant 7 : index
    %c0_816 = arith.constant 0 : index
    %466 = vector.load %arg10[%c7_815, %c0_816] : memref<104x128xbf16, #tpu.memory_space<vmem>>, vector<3x128xbf16>
    %c0_817 = arith.constant 0 : index
    %c640_818 = arith.constant 640 : index
    %467 = vector.load %arg8[%c0_817, %c640_818] : memref<104x1152xbf16, #tpu.memory_space<vmem>>, vector<3x128xbf16>
    tpu.vector_store %arg8[%c0_817, %c640_818], %466 {strides = array<i32>} : memref<104x1152xbf16, #tpu.memory_space<vmem>>, vector<3x128xbf16>,
    %c10_819 = arith.constant 10 : index
    %c0_820 = arith.constant 0 : index
    %468 = vector.load %arg10[%c10_819, %c0_820] : memref<104x128xbf16, #tpu.memory_space<vmem>>, vector<3x128xbf16>
    %c0_821 = arith.constant 0 : index
    %c768_822 = arith.constant 768 : index
    %469 = vector.load %arg8[%c0_821, %c768_822] : memref<104x1152xbf16, #tpu.memory_space<vmem>>, vector<3x128xbf16>
    tpu.vector_store %arg8[%c0_821, %c768_822], %468 {strides = array<i32>} : memref<104x1152xbf16, #tpu.memory_space<vmem>>, vector<3x128xbf16>,
    %c11_823 = arith.constant 11 : index
    %c0_824 = arith.constant 0 : index
    %470 = vector.load %arg10[%c11_823, %c0_824] : memref<104x128xbf16, #tpu.memory_space<vmem>>, vector<3x128xbf16>
    %c0_825 = arith.constant 0 : index
    %c896_826 = arith.constant 896 : index
    %471 = vector.load %arg8[%c0_825, %c896_826] : memref<104x1152xbf16, #tpu.memory_space<vmem>>, vector<3x128xbf16>
    tpu.vector_store %arg8[%c0_825, %c896_826], %470 {strides = array<i32>} : memref<104x1152xbf16, #tpu.memory_space<vmem>>, vector<3x128xbf16>,
    %c12 = arith.constant 12 : index
    %c0_827 = arith.constant 0 : index
    %472 = vector.load %arg10[%c12, %c0_827] : memref<104x128xbf16, #tpu.memory_space<vmem>>, vector<3x128xbf16>
    %c0_828 = arith.constant 0 : index
    %c1024_829 = arith.constant 1024 : index
    %473 = vector.load %arg8[%c0_828, %c1024_829] : memref<104x1152xbf16, #tpu.memory_space<vmem>>, vector<3x128xbf16>
    tpu.vector_store %arg8[%c0_828, %c1024_829], %472 {strides = array<i32>} : memref<104x1152xbf16, #tpu.memory_space<vmem>>, vector<3x128xbf16>,
    %c5_830 = arith.constant 5 : index
    %c0_831 = arith.constant 0 : index
    %474 = vector.load %arg10[%c5_830, %c0_831] : memref<104x128xbf16, #tpu.memory_space<vmem>>, vector<3x128xbf16>
    %c3 = arith.constant 3 : index
    %c0_832 = arith.constant 0 : index
    %475 = vector.load %arg8[%c3, %c0_832] : memref<104x1152xbf16, #tpu.memory_space<vmem>>, vector<3x128xbf16>
    tpu.vector_store %arg8[%c3, %c0_832], %474 {strides = array<i32>} : memref<104x1152xbf16, #tpu.memory_space<vmem>>, vector<3x128xbf16>,
    %c6_833 = arith.constant 6 : index
    %c0_834 = arith.constant 0 : index
    %476 = vector.load %arg10[%c6_833, %c0_834] : memref<104x128xbf16, #tpu.memory_space<vmem>>, vector<3x128xbf16>
    %c3_835 = arith.constant 3 : index
    %c128_836 = arith.constant 128 : index
    %477 = vector.load %arg8[%c3_835, %c128_836] : memref<104x1152xbf16, #tpu.memory_space<vmem>>, vector<3x128xbf16>
    tpu.vector_store %arg8[%c3_835, %c128_836], %476 {strides = array<i32>} : memref<104x1152xbf16, #tpu.memory_space<vmem>>, vector<3x128xbf16>,
    %c7_837 = arith.constant 7 : index
    %c0_838 = arith.constant 0 : index
    %478 = vector.load %arg10[%c7_837, %c0_838] : memref<104x128xbf16, #tpu.memory_space<vmem>>, vector<3x128xbf16>
    %c3_839 = arith.constant 3 : index
    %c256_840 = arith.constant 256 : index
    %479 = vector.load %arg8[%c3_839, %c256_840] : memref<104x1152xbf16, #tpu.memory_space<vmem>>, vector<3x128xbf16>
    tpu.vector_store %arg8[%c3_839, %c256_840], %478 {strides = array<i32>} : memref<104x1152xbf16, #tpu.memory_space<vmem>>, vector<3x128xbf16>,
    %c10_841 = arith.constant 10 : index
    %c0_842 = arith.constant 0 : index
    %480 = vector.load %arg10[%c10_841, %c0_842] : memref<104x128xbf16, #tpu.memory_space<vmem>>, vector<3x128xbf16>
    %c3_843 = arith.constant 3 : index
    %c384_844 = arith.constant 384 : index
    %481 = vector.load %arg8[%c3_843, %c384_844] : memref<104x1152xbf16, #tpu.memory_space<vmem>>, vector<3x128xbf16>
    tpu.vector_store %arg8[%c3_843, %c384_844], %480 {strides = array<i32>} : memref<104x1152xbf16, #tpu.memory_space<vmem>>, vector<3x128xbf16>,
    %c11_845 = arith.constant 11 : index
    %c0_846 = arith.constant 0 : index
    %482 = vector.load %arg10[%c11_845, %c0_846] : memref<104x128xbf16, #tpu.memory_space<vmem>>, vector<3x128xbf16>
    %c3_847 = arith.constant 3 : index
    %c512_848 = arith.constant 512 : index
    %483 = vector.load %arg8[%c3_847, %c512_848] : memref<104x1152xbf16, #tpu.memory_space<vmem>>, vector<3x128xbf16>
    tpu.vector_store %arg8[%c3_847, %c512_848], %482 {strides = array<i32>} : memref<104x1152xbf16, #tpu.memory_space<vmem>>, vector<3x128xbf16>,
    %c12_849 = arith.constant 12 : index
    %c0_850 = arith.constant 0 : index
    %484 = vector.load %arg10[%c12_849, %c0_850] : memref<104x128xbf16, #tpu.memory_space<vmem>>, vector<3x128xbf16>
    %c3_851 = arith.constant 3 : index
    %c640_852 = arith.constant 640 : index
    %485 = vector.load %arg8[%c3_851, %c640_852] : memref<104x1152xbf16, #tpu.memory_space<vmem>>, vector<3x128xbf16>
    tpu.vector_store %arg8[%c3_851, %c640_852], %484 {strides = array<i32>} : memref<104x1152xbf16, #tpu.memory_space<vmem>>, vector<3x128xbf16>,
    %c15_853 = arith.constant 15 : index
    %c0_854 = arith.constant 0 : index
    %486 = vector.load %arg10[%c15_853, %c0_854] : memref<104x128xbf16, #tpu.memory_space<vmem>>, vector<3x128xbf16>
    %c3_855 = arith.constant 3 : index
    %c768_856 = arith.constant 768 : index
    %487 = vector.load %arg8[%c3_855, %c768_856] : memref<104x1152xbf16, #tpu.memory_space<vmem>>, vector<3x128xbf16>
    tpu.vector_store %arg8[%c3_855, %c768_856], %486 {strides = array<i32>} : memref<104x1152xbf16, #tpu.memory_space<vmem>>, vector<3x128xbf16>,
    %c16_857 = arith.constant 16 : index
    %c0_858 = arith.constant 0 : index
    %488 = vector.load %arg10[%c16_857, %c0_858] : memref<104x128xbf16, #tpu.memory_space<vmem>>, vector<3x128xbf16>
    %c3_859 = arith.constant 3 : index
    %c896_860 = arith.constant 896 : index
    %489 = vector.load %arg8[%c3_859, %c896_860] : memref<104x1152xbf16, #tpu.memory_space<vmem>>, vector<3x128xbf16>
    tpu.vector_store %arg8[%c3_859, %c896_860], %488 {strides = array<i32>} : memref<104x1152xbf16, #tpu.memory_space<vmem>>, vector<3x128xbf16>,
    %c17 = arith.constant 17 : index
    %c0_861 = arith.constant 0 : index
    %490 = vector.load %arg10[%c17, %c0_861] : memref<104x128xbf16, #tpu.memory_space<vmem>>, vector<3x128xbf16>
    %c3_862 = arith.constant 3 : index
    %c1024_863 = arith.constant 1024 : index
    %491 = vector.load %arg8[%c3_862, %c1024_863] : memref<104x1152xbf16, #tpu.memory_space<vmem>>, vector<3x128xbf16>
    tpu.vector_store %arg8[%c3_862, %c1024_863], %490 {strides = array<i32>} : memref<104x1152xbf16, #tpu.memory_space<vmem>>, vector<3x128xbf16>,
    %c10_864 = arith.constant 10 : index
    %c0_865 = arith.constant 0 : index
    %492 = vector.load %arg10[%c10_864, %c0_865] : memref<104x128xbf16, #tpu.memory_space<vmem>>, vector<3x128xbf16>
    %c6_866 = arith.constant 6 : index
    %c0_867 = arith.constant 0 : index
    %493 = vector.load %arg8[%c6_866, %c0_867] : memref<104x1152xbf16, #tpu.memory_space<vmem>>, vector<3x128xbf16>
    tpu.vector_store %arg8[%c6_866, %c0_867], %492 {strides = array<i32>} : memref<104x1152xbf16, #tpu.memory_space<vmem>>, vector<3x128xbf16>,
    %c11_868 = arith.constant 11 : index
    %c0_869 = arith.constant 0 : index
    %494 = vector.load %arg10[%c11_868, %c0_869] : memref<104x128xbf16, #tpu.memory_space<vmem>>, vector<3x128xbf16>
    %c6_870 = arith.constant 6 : index
    %c128_871 = arith.constant 128 : index
    %495 = vector.load %arg8[%c6_870, %c128_871] : memref<104x1152xbf16, #tpu.memory_space<vmem>>, vector<3x128xbf16>
    tpu.vector_store %arg8[%c6_870, %c128_871], %494 {strides = array<i32>} : memref<104x1152xbf16, #tpu.memory_space<vmem>>, vector<3x128xbf16>,
    %c12_872 = arith.constant 12 : index
    %c0_873 = arith.constant 0 : index
    %496 = vector.load %arg10[%c12_872, %c0_873] : memref<104x128xbf16, #tpu.memory_space<vmem>>, vector<3x128xbf16>
    %c6_874 = arith.constant 6 : index
    %c256_875 = arith.constant 256 : index
    %497 = vector.load %arg8[%c6_874, %c256_875] : memref<104x1152xbf16, #tpu.memory_space<vmem>>, vector<3x128xbf16>
    tpu.vector_store %arg8[%c6_874, %c256_875], %496 {strides = array<i32>} : memref<104x1152xbf16, #tpu.memory_space<vmem>>, vector<3x128xbf16>,
    %c15_876 = arith.constant 15 : index
    %c0_877 = arith.constant 0 : index
    %498 = vector.load %arg10[%c15_876, %c0_877] : memref<104x128xbf16, #tpu.memory_space<vmem>>, vector<3x128xbf16>
    %c6_878 = arith.constant 6 : index
    %c384_879 = arith.constant 384 : index
    %499 = vector.load %arg8[%c6_878, %c384_879] : memref<104x1152xbf16, #tpu.memory_space<vmem>>, vector<3x128xbf16>
    tpu.vector_store %arg8[%c6_878, %c384_879], %498 {strides = array<i32>} : memref<104x1152xbf16, #tpu.memory_space<vmem>>, vector<3x128xbf16>,
    %c16_880 = arith.constant 16 : index
    %c0_881 = arith.constant 0 : index
    %500 = vector.load %arg10[%c16_880, %c0_881] : memref<104x128xbf16, #tpu.memory_space<vmem>>, vector<3x128xbf16>
    %c6_882 = arith.constant 6 : index
    %c512_883 = arith.constant 512 : index
    %501 = vector.load %arg8[%c6_882, %c512_883] : memref<104x1152xbf16, #tpu.memory_space<vmem>>, vector<3x128xbf16>
    tpu.vector_store %arg8[%c6_882, %c512_883], %500 {strides = array<i32>} : memref<104x1152xbf16, #tpu.memory_space<vmem>>, vector<3x128xbf16>,
    %c17_884 = arith.constant 17 : index
    %c0_885 = arith.constant 0 : index
    %502 = vector.load %arg10[%c17_884, %c0_885] : memref<104x128xbf16, #tpu.memory_space<vmem>>, vector<3x128xbf16>
    %c6_886 = arith.constant 6 : index
    %c640_887 = arith.constant 640 : index
    %503 = vector.load %arg8[%c6_886, %c640_887] : memref<104x1152xbf16, #tpu.memory_space<vmem>>, vector<3x128xbf16>
    tpu.vector_store %arg8[%c6_886, %c640_887], %502 {strides = array<i32>} : memref<104x1152xbf16, #tpu.memory_space<vmem>>, vector<3x128xbf16>,
    %c20_888 = arith.constant 20 : index
    %c0_889 = arith.constant 0 : index
    %504 = vector.load %arg10[%c20_888, %c0_889] : memref<104x128xbf16, #tpu.memory_space<vmem>>, vector<3x128xbf16>
    %c6_890 = arith.constant 6 : index
    %c768_891 = arith.constant 768 : index
    %505 = vector.load %arg8[%c6_890, %c768_891] : memref<104x1152xbf16, #tpu.memory_space<vmem>>, vector<3x128xbf16>
    tpu.vector_store %arg8[%c6_890, %c768_891], %504 {strides = array<i32>} : memref<104x1152xbf16, #tpu.memory_space<vmem>>, vector<3x128xbf16>,
    %c21_892 = arith.constant 21 : index
    %c0_893 = arith.constant 0 : index
    %506 = vector.load %arg10[%c21_892, %c0_893] : memref<104x128xbf16, #tpu.memory_space<vmem>>, vector<3x128xbf16>
    %c6_894 = arith.constant 6 : index
    %c896_895 = arith.constant 896 : index
    %507 = vector.load %arg8[%c6_894, %c896_895] : memref<104x1152xbf16, #tpu.memory_space<vmem>>, vector<3x128xbf16>
    tpu.vector_store %arg8[%c6_894, %c896_895], %506 {strides = array<i32>} : memref<104x1152xbf16, #tpu.memory_space<vmem>>, vector<3x128xbf16>,
    %c22_896 = arith.constant 22 : index
    %c0_897 = arith.constant 0 : index
    %508 = vector.load %arg10[%c22_896, %c0_897] : memref<104x128xbf16, #tpu.memory_space<vmem>>, vector<3x128xbf16>
    %c6_898 = arith.constant 6 : index
    %c1024_899 = arith.constant 1024 : index
    %509 = vector.load %arg8[%c6_898, %c1024_899] : memref<104x1152xbf16, #tpu.memory_space<vmem>>, vector<3x128xbf16>
    tpu.vector_store %arg8[%c6_898, %c1024_899], %508 {strides = array<i32>} : memref<104x1152xbf16, #tpu.memory_space<vmem>>, vector<3x128xbf16>,
    %c25_900 = arith.constant 25 : index
    %c0_901 = arith.constant 0 : index
    %510 = vector.load %arg10[%c25_900, %c0_901] : memref<104x128xbf16, #tpu.memory_space<vmem>>, vector<3x128xbf16>
    %c9_902 = arith.constant 9 : index
    %c0_903 = arith.constant 0 : index
    %511 = vector.load %arg8[%c9_902, %c0_903] : memref<104x1152xbf16, #tpu.memory_space<vmem>>, vector<3x128xbf16>
    tpu.vector_store %arg8[%c9_902, %c0_903], %510 {strides = array<i32>} : memref<104x1152xbf16, #tpu.memory_space<vmem>>, vector<3x128xbf16>,
    %c26 = arith.constant 26 : index
    %c0_904 = arith.constant 0 : index
    %512 = vector.load %arg10[%c26, %c0_904] : memref<104x128xbf16, #tpu.memory_space<vmem>>, vector<3x128xbf16>
    %c9_905 = arith.constant 9 : index
    %c128_906 = arith.constant 128 : index
    %513 = vector.load %arg8[%c9_905, %c128_906] : memref<104x1152xbf16, #tpu.memory_space<vmem>>, vector<3x128xbf16>
    tpu.vector_store %arg8[%c9_905, %c128_906], %512 {strides = array<i32>} : memref<104x1152xbf16, #tpu.memory_space<vmem>>, vector<3x128xbf16>,
    %c27_907 = arith.constant 27 : index
    %c0_908 = arith.constant 0 : index
    %514 = vector.load %arg10[%c27_907, %c0_908] : memref<104x128xbf16, #tpu.memory_space<vmem>>, vector<3x128xbf16>
    %c9_909 = arith.constant 9 : index
    %c256_910 = arith.constant 256 : index
    %515 = vector.load %arg8[%c9_909, %c256_910] : memref<104x1152xbf16, #tpu.memory_space<vmem>>, vector<3x128xbf16>
    tpu.vector_store %arg8[%c9_909, %c256_910], %514 {strides = array<i32>} : memref<104x1152xbf16, #tpu.memory_space<vmem>>, vector<3x128xbf16>,
    %c30_911 = arith.constant 30 : index
    %c0_912 = arith.constant 0 : index
    %516 = vector.load %arg10[%c30_911, %c0_912] : memref<104x128xbf16, #tpu.memory_space<vmem>>, vector<3x128xbf16>
    %c9_913 = arith.constant 9 : index
    %c384_914 = arith.constant 384 : index
    %517 = vector.load %arg8[%c9_913, %c384_914] : memref<104x1152xbf16, #tpu.memory_space<vmem>>, vector<3x128xbf16>
    tpu.vector_store %arg8[%c9_913, %c384_914], %516 {strides = array<i32>} : memref<104x1152xbf16, #tpu.memory_space<vmem>>, vector<3x128xbf16>,
    %c31 = arith.constant 31 : index
    %c0_915 = arith.constant 0 : index
    %518 = vector.load %arg10[%c31, %c0_915] : memref<104x128xbf16, #tpu.memory_space<vmem>>, vector<3x128xbf16>
    %c9_916 = arith.constant 9 : index
    %c512_917 = arith.constant 512 : index
    %519 = vector.load %arg8[%c9_916, %c512_917] : memref<104x1152xbf16, #tpu.memory_space<vmem>>, vector<3x128xbf16>
    tpu.vector_store %arg8[%c9_916, %c512_917], %518 {strides = array<i32>} : memref<104x1152xbf16, #tpu.memory_space<vmem>>, vector<3x128xbf16>,
    %c32 = arith.constant 32 : index
    %c0_918 = arith.constant 0 : index
    %520 = vector.load %arg10[%c32, %c0_918] : memref<104x128xbf16, #tpu.memory_space<vmem>>, vector<3x128xbf16>
    %c9_919 = arith.constant 9 : index
    %c640_920 = arith.constant 640 : index
    %521 = vector.load %arg8[%c9_919, %c640_920] : memref<104x1152xbf16, #tpu.memory_space<vmem>>, vector<3x128xbf16>
    tpu.vector_store %arg8[%c9_919, %c640_920], %520 {strides = array<i32>} : memref<104x1152xbf16, #tpu.memory_space<vmem>>, vector<3x128xbf16>,
    %c35_921 = arith.constant 35 : index
    %c0_922 = arith.constant 0 : index
    %522 = vector.load %arg10[%c35_921, %c0_922] : memref<104x128xbf16, #tpu.memory_space<vmem>>, vector<3x128xbf16>
    %c9_923 = arith.constant 9 : index
    %c768_924 = arith.constant 768 : index
    %523 = vector.load %arg8[%c9_923, %c768_924] : memref<104x1152xbf16, #tpu.memory_space<vmem>>, vector<3x128xbf16>
    tpu.vector_store %arg8[%c9_923, %c768_924], %522 {strides = array<i32>} : memref<104x1152xbf16, #tpu.memory_space<vmem>>, vector<3x128xbf16>,
    %c36_925 = arith.constant 36 : index
    %c0_926 = arith.constant 0 : index
    %524 = vector.load %arg10[%c36_925, %c0_926] : memref<104x128xbf16, #tpu.memory_space<vmem>>, vector<3x128xbf16>
    %c9_927 = arith.constant 9 : index
    %c896_928 = arith.constant 896 : index
    %525 = vector.load %arg8[%c9_927, %c896_928] : memref<104x1152xbf16, #tpu.memory_space<vmem>>, vector<3x128xbf16>
    tpu.vector_store %arg8[%c9_927, %c896_928], %524 {strides = array<i32>} : memref<104x1152xbf16, #tpu.memory_space<vmem>>, vector<3x128xbf16>,
    %c37_929 = arith.constant 37 : index
    %c0_930 = arith.constant 0 : index
    %526 = vector.load %arg10[%c37_929, %c0_930] : memref<104x128xbf16, #tpu.memory_space<vmem>>, vector<3x128xbf16>
    %c9_931 = arith.constant 9 : index
    %c1024_932 = arith.constant 1024 : index
    %527 = vector.load %arg8[%c9_931, %c1024_932] : memref<104x1152xbf16, #tpu.memory_space<vmem>>, vector<3x128xbf16>
    tpu.vector_store %arg8[%c9_931, %c1024_932], %526 {strides = array<i32>} : memref<104x1152xbf16, #tpu.memory_space<vmem>>, vector<3x128xbf16>,
    %c30_933 = arith.constant 30 : index
    %c0_934 = arith.constant 0 : index
    %528 = vector.load %arg10[%c30_933, %c0_934] : memref<104x128xbf16, #tpu.memory_space<vmem>>, vector<3x128xbf16>
    %c12_935 = arith.constant 12 : index
    %c0_936 = arith.constant 0 : index
    %529 = vector.load %arg8[%c12_935, %c0_936] : memref<104x1152xbf16, #tpu.memory_space<vmem>>, vector<3x128xbf16>
    tpu.vector_store %arg8[%c12_935, %c0_936], %528 {strides = array<i32>} : memref<104x1152xbf16, #tpu.memory_space<vmem>>, vector<3x128xbf16>,
    %c31_937 = arith.constant 31 : index
    %c0_938 = arith.constant 0 : index
    %530 = vector.load %arg10[%c31_937, %c0_938] : memref<104x128xbf16, #tpu.memory_space<vmem>>, vector<3x128xbf16>
    %c12_939 = arith.constant 12 : index
    %c128_940 = arith.constant 128 : index
    %531 = vector.load %arg8[%c12_939, %c128_940] : memref<104x1152xbf16, #tpu.memory_space<vmem>>, vector<3x128xbf16>
    tpu.vector_store %arg8[%c12_939, %c128_940], %530 {strides = array<i32>} : memref<104x1152xbf16, #tpu.memory_space<vmem>>, vector<3x128xbf16>,
    %c32_941 = arith.constant 32 : index
    %c0_942 = arith.constant 0 : index
    %532 = vector.load %arg10[%c32_941, %c0_942] : memref<104x128xbf16, #tpu.memory_space<vmem>>, vector<3x128xbf16>
    %c12_943 = arith.constant 12 : index
    %c256_944 = arith.constant 256 : index
    %533 = vector.load %arg8[%c12_943, %c256_944] : memref<104x1152xbf16, #tpu.memory_space<vmem>>, vector<3x128xbf16>
    tpu.vector_store %arg8[%c12_943, %c256_944], %532 {strides = array<i32>} : memref<104x1152xbf16, #tpu.memory_space<vmem>>, vector<3x128xbf16>,
    %c35_945 = arith.constant 35 : index
    %c0_946 = arith.constant 0 : index
    %534 = vector.load %arg10[%c35_945, %c0_946] : memref<104x128xbf16, #tpu.memory_space<vmem>>, vector<3x128xbf16>
    %c12_947 = arith.constant 12 : index
    %c384_948 = arith.constant 384 : index
    %535 = vector.load %arg8[%c12_947, %c384_948] : memref<104x1152xbf16, #tpu.memory_space<vmem>>, vector<3x128xbf16>
    tpu.vector_store %arg8[%c12_947, %c384_948], %534 {strides = array<i32>} : memref<104x1152xbf16, #tpu.memory_space<vmem>>, vector<3x128xbf16>,
    %c36_949 = arith.constant 36 : index
    %c0_950 = arith.constant 0 : index
    %536 = vector.load %arg10[%c36_949, %c0_950] : memref<104x128xbf16, #tpu.memory_space<vmem>>, vector<3x128xbf16>
    %c12_951 = arith.constant 12 : index
    %c512_952 = arith.constant 512 : index
    %537 = vector.load %arg8[%c12_951, %c512_952] : memref<104x1152xbf16, #tpu.memory_space<vmem>>, vector<3x128xbf16>
    tpu.vector_store %arg8[%c12_951, %c512_952], %536 {strides = array<i32>} : memref<104x1152xbf16, #tpu.memory_space<vmem>>, vector<3x128xbf16>,
    %c37_953 = arith.constant 37 : index
    %c0_954 = arith.constant 0 : index
    %538 = vector.load %arg10[%c37_953, %c0_954] : memref<104x128xbf16, #tpu.memory_space<vmem>>, vector<3x128xbf16>
    %c12_955 = arith.constant 12 : index
    %c640_956 = arith.constant 640 : index
    %539 = vector.load %arg8[%c12_955, %c640_956] : memref<104x1152xbf16, #tpu.memory_space<vmem>>, vector<3x128xbf16>
    tpu.vector_store %arg8[%c12_955, %c640_956], %538 {strides = array<i32>} : memref<104x1152xbf16, #tpu.memory_space<vmem>>, vector<3x128xbf16>,
    %c40_957 = arith.constant 40 : index
    %c0_958 = arith.constant 0 : index
    %540 = vector.load %arg10[%c40_957, %c0_958] : memref<104x128xbf16, #tpu.memory_space<vmem>>, vector<3x128xbf16>
    %c12_959 = arith.constant 12 : index
    %c768_960 = arith.constant 768 : index
    %541 = vector.load %arg8[%c12_959, %c768_960] : memref<104x1152xbf16, #tpu.memory_space<vmem>>, vector<3x128xbf16>
    tpu.vector_store %arg8[%c12_959, %c768_960], %540 {strides = array<i32>} : memref<104x1152xbf16, #tpu.memory_space<vmem>>, vector<3x128xbf16>,
    %c41 = arith.constant 41 : index
    %c0_961 = arith.constant 0 : index
    %542 = vector.load %arg10[%c41, %c0_961] : memref<104x128xbf16, #tpu.memory_space<vmem>>, vector<3x128xbf16>
    %c12_962 = arith.constant 12 : index
    %c896_963 = arith.constant 896 : index
    %543 = vector.load %arg8[%c12_962, %c896_963] : memref<104x1152xbf16, #tpu.memory_space<vmem>>, vector<3x128xbf16>
    tpu.vector_store %arg8[%c12_962, %c896_963], %542 {strides = array<i32>} : memref<104x1152xbf16, #tpu.memory_space<vmem>>, vector<3x128xbf16>,
    %c42_964 = arith.constant 42 : index
    %c0_965 = arith.constant 0 : index
    %544 = vector.load %arg10[%c42_964, %c0_965] : memref<104x128xbf16, #tpu.memory_space<vmem>>, vector<3x128xbf16>
    %c12_966 = arith.constant 12 : index
    %c1024_967 = arith.constant 1024 : index
    %545 = vector.load %arg8[%c12_966, %c1024_967] : memref<104x1152xbf16, #tpu.memory_space<vmem>>, vector<3x128xbf16>
    tpu.vector_store %arg8[%c12_966, %c1024_967], %544 {strides = array<i32>} : memref<104x1152xbf16, #tpu.memory_space<vmem>>, vector<3x128xbf16>,
    %c35_968 = arith.constant 35 : index
    %c0_969 = arith.constant 0 : index
    %546 = vector.load %arg10[%c35_968, %c0_969] : memref<104x128xbf16, #tpu.memory_space<vmem>>, vector<3x128xbf16>
    %c15_970 = arith.constant 15 : index
    %c0_971 = arith.constant 0 : index
    %547 = vector.load %arg8[%c15_970, %c0_971] : memref<104x1152xbf16, #tpu.memory_space<vmem>>, vector<3x128xbf16>
    tpu.vector_store %arg8[%c15_970, %c0_971], %546 {strides = array<i32>} : memref<104x1152xbf16, #tpu.memory_space<vmem>>, vector<3x128xbf16>,
    %c36_972 = arith.constant 36 : index
    %c0_973 = arith.constant 0 : index
    %548 = vector.load %arg10[%c36_972, %c0_973] : memref<104x128xbf16, #tpu.memory_space<vmem>>, vector<3x128xbf16>
    %c15_974 = arith.constant 15 : index
    %c128_975 = arith.constant 128 : index
    %549 = vector.load %arg8[%c15_974, %c128_975] : memref<104x1152xbf16, #tpu.memory_space<vmem>>, vector<3x128xbf16>
    tpu.vector_store %arg8[%c15_974, %c128_975], %548 {strides = array<i32>} : memref<104x1152xbf16, #tpu.memory_space<vmem>>, vector<3x128xbf16>,
    %c37_976 = arith.constant 37 : index
    %c0_977 = arith.constant 0 : index
    %550 = vector.load %arg10[%c37_976, %c0_977] : memref<104x128xbf16, #tpu.memory_space<vmem>>, vector<3x128xbf16>
    %c15_978 = arith.constant 15 : index
    %c256_979 = arith.constant 256 : index
    %551 = vector.load %arg8[%c15_978, %c256_979] : memref<104x1152xbf16, #tpu.memory_space<vmem>>, vector<3x128xbf16>
    tpu.vector_store %arg8[%c15_978, %c256_979], %550 {strides = array<i32>} : memref<104x1152xbf16, #tpu.memory_space<vmem>>, vector<3x128xbf16>,
    %c40_980 = arith.constant 40 : index
    %c0_981 = arith.constant 0 : index
    %552 = vector.load %arg10[%c40_980, %c0_981] : memref<104x128xbf16, #tpu.memory_space<vmem>>, vector<3x128xbf16>
    %c15_982 = arith.constant 15 : index
    %c384_983 = arith.constant 384 : index
    %553 = vector.load %arg8[%c15_982, %c384_983] : memref<104x1152xbf16, #tpu.memory_space<vmem>>, vector<3x128xbf16>
    tpu.vector_store %arg8[%c15_982, %c384_983], %552 {strides = array<i32>} : memref<104x1152xbf16, #tpu.memory_space<vmem>>, vector<3x128xbf16>,
    %c41_984 = arith.constant 41 : index
    %c0_985 = arith.constant 0 : index
    %554 = vector.load %arg10[%c41_984, %c0_985] : memref<104x128xbf16, #tpu.memory_space<vmem>>, vector<3x128xbf16>
    %c15_986 = arith.constant 15 : index
    %c512_987 = arith.constant 512 : index
    %555 = vector.load %arg8[%c15_986, %c512_987] : memref<104x1152xbf16, #tpu.memory_space<vmem>>, vector<3x128xbf16>
    tpu.vector_store %arg8[%c15_986, %c512_987], %554 {strides = array<i32>} : memref<104x1152xbf16, #tpu.memory_space<vmem>>, vector<3x128xbf16>,
    %c42_988 = arith.constant 42 : index
    %c0_989 = arith.constant 0 : index
    %556 = vector.load %arg10[%c42_988, %c0_989] : memref<104x128xbf16, #tpu.memory_space<vmem>>, vector<3x128xbf16>
    %c15_990 = arith.constant 15 : index
    %c640_991 = arith.constant 640 : index
    %557 = vector.load %arg8[%c15_990, %c640_991] : memref<104x1152xbf16, #tpu.memory_space<vmem>>, vector<3x128xbf16>
    tpu.vector_store %arg8[%c15_990, %c640_991], %556 {strides = array<i32>} : memref<104x1152xbf16, #tpu.memory_space<vmem>>, vector<3x128xbf16>,
    %c45_992 = arith.constant 45 : index
    %c0_993 = arith.constant 0 : index
    %558 = vector.load %arg10[%c45_992, %c0_993] : memref<104x128xbf16, #tpu.memory_space<vmem>>, vector<3x128xbf16>
    %c15_994 = arith.constant 15 : index
    %c768_995 = arith.constant 768 : index
    %559 = vector.load %arg8[%c15_994, %c768_995] : memref<104x1152xbf16, #tpu.memory_space<vmem>>, vector<3x128xbf16>
    tpu.vector_store %arg8[%c15_994, %c768_995], %558 {strides = array<i32>} : memref<104x1152xbf16, #tpu.memory_space<vmem>>, vector<3x128xbf16>,
    %c46_996 = arith.constant 46 : index
    %c0_997 = arith.constant 0 : index
    %560 = vector.load %arg10[%c46_996, %c0_997] : memref<104x128xbf16, #tpu.memory_space<vmem>>, vector<3x128xbf16>
    %c15_998 = arith.constant 15 : index
    %c896_999 = arith.constant 896 : index
    %561 = vector.load %arg8[%c15_998, %c896_999] : memref<104x1152xbf16, #tpu.memory_space<vmem>>, vector<3x128xbf16>
    tpu.vector_store %arg8[%c15_998, %c896_999], %560 {strides = array<i32>} : memref<104x1152xbf16, #tpu.memory_space<vmem>>, vector<3x128xbf16>,
    %c47_1000 = arith.constant 47 : index
    %c0_1001 = arith.constant 0 : index
    %562 = vector.load %arg10[%c47_1000, %c0_1001] : memref<104x128xbf16, #tpu.memory_space<vmem>>, vector<3x128xbf16>
    %c15_1002 = arith.constant 15 : index
    %c1024_1003 = arith.constant 1024 : index
    %563 = vector.load %arg8[%c15_1002, %c1024_1003] : memref<104x1152xbf16, #tpu.memory_space<vmem>>, vector<3x128xbf16>
    tpu.vector_store %arg8[%c15_1002, %c1024_1003], %562 {strides = array<i32>} : memref<104x1152xbf16, #tpu.memory_space<vmem>>, vector<3x128xbf16>,
    %c0_1004 = arith.constant 0 : index
    %c0_1005 = arith.constant 0 : index
    %564 = vector.load %arg8[%c0_1004, %c0_1005] : memref<104x1152xbf16, #tpu.memory_space<vmem>>, vector<18x1152xbf16>
    %c2_1006 = arith.constant 2 : index
    %c0_1007 = arith.constant 0 : index
    %c0_1008 = arith.constant 0 : index
    %565 = vector.load %arg1[%c2_1006, %c0_1007, %c0_1008] : memref<4x1152x128xbf16, #tpu.memory_space<vmem>>, vector<1x1152x128xbf16>
    %566 = vector.shape_cast %565 : vector<1x1152x128xbf16> to vector<1152x128xbf16>
    %cst_1009 = arith.constant dense<0.000000e+00> : vector<18x128xf32>
    %567 = tpu.matmul %564, %566, %cst_1009 {dimension_numbers = #tpu.dot_dimension_numbers<[1], [0], [0], [1], [0, 0, 1, 1], [], []>} : vector<18x1152xbf16>, vector<1152x128xbf16>, vector<18x128xf32> -> vector<18x128xf32>
    %c2_1010 = arith.constant 2 : index
    %c0_1011 = arith.constant 0 : index
    %c0_1012 = arith.constant 0 : index
    %568 = vector.load %arg2[%c2_1010, %c0_1011, %c0_1012] : memref<4x1x128xf32, #tpu.memory_space<vmem>>, vector<1x1x128xf32>
    %569 = vector.shape_cast %568 : vector<1x1x128xf32> to vector<1x128xf32>
    %570 = vector.broadcast %569 : vector<1x128xf32> to vector<18x128xf32>
    %571 = arith.addf %567, %570 : vector<18x128xf32>
    %cst_1013 = arith.constant 0.000000e+00 : f32
    %572 = vector.broadcast %cst_1013 : f32 to vector<18x128xf32>
    %573 = arith.maximumf %571, %572 : vector<18x128xf32>
    %574 = arith.truncf %573 : vector<18x128xf32> to vector<18x128xbf16>
    %c0_1014 = arith.constant 0 : index
    %c0_1015 = arith.constant 0 : index
    %575 = vector.load %arg9[%c0_1014, %c0_1015] : memref<104x128xbf16, #tpu.memory_space<vmem>>, vector<18x128xbf16>
    tpu.vector_store %arg9[%c0_1014, %c0_1015], %574 {strides = array<i32>} : memref<104x128xbf16, #tpu.memory_space<vmem>>, vector<18x128xbf16>,
    %c0_1016 = arith.constant 0 : index
    %c0_1017 = arith.constant 0 : index
    %576 = vector.load %arg9[%c0_1016, %c0_1017] : memref<104x128xbf16, #tpu.memory_space<vmem>>, vector<1x128xbf16>
    %c0_1018 = arith.constant 0 : index
    %c0_1019 = arith.constant 0 : index
    %577 = vector.load %arg8[%c0_1018, %c0_1019] : memref<104x1152xbf16, #tpu.memory_space<vmem>>, vector<1x128xbf16>
    tpu.vector_store %arg8[%c0_1018, %c0_1019], %576 {strides = array<i32>} : memref<104x1152xbf16, #tpu.memory_space<vmem>>, vector<1x128xbf16>,
    %c1_1020 = arith.constant 1 : index
    %c0_1021 = arith.constant 0 : index
    %578 = vector.load %arg9[%c1_1020, %c0_1021] : memref<104x128xbf16, #tpu.memory_space<vmem>>, vector<1x128xbf16>
    %c0_1022 = arith.constant 0 : index
    %c128_1023 = arith.constant 128 : index
    %579 = vector.load %arg8[%c0_1022, %c128_1023] : memref<104x1152xbf16, #tpu.memory_space<vmem>>, vector<1x128xbf16>
    tpu.vector_store %arg8[%c0_1022, %c128_1023], %578 {strides = array<i32>} : memref<104x1152xbf16, #tpu.memory_space<vmem>>, vector<1x128xbf16>,
    %c2_1024 = arith.constant 2 : index
    %c0_1025 = arith.constant 0 : index
    %580 = vector.load %arg9[%c2_1024, %c0_1025] : memref<104x128xbf16, #tpu.memory_space<vmem>>, vector<1x128xbf16>
    %c0_1026 = arith.constant 0 : index
    %c256_1027 = arith.constant 256 : index
    %581 = vector.load %arg8[%c0_1026, %c256_1027] : memref<104x1152xbf16, #tpu.memory_space<vmem>>, vector<1x128xbf16>
    tpu.vector_store %arg8[%c0_1026, %c256_1027], %580 {strides = array<i32>} : memref<104x1152xbf16, #tpu.memory_space<vmem>>, vector<1x128xbf16>,
    %c3_1028 = arith.constant 3 : index
    %c0_1029 = arith.constant 0 : index
    %582 = vector.load %arg9[%c3_1028, %c0_1029] : memref<104x128xbf16, #tpu.memory_space<vmem>>, vector<1x128xbf16>
    %c0_1030 = arith.constant 0 : index
    %c384_1031 = arith.constant 384 : index
    %583 = vector.load %arg8[%c0_1030, %c384_1031] : memref<104x1152xbf16, #tpu.memory_space<vmem>>, vector<1x128xbf16>
    tpu.vector_store %arg8[%c0_1030, %c384_1031], %582 {strides = array<i32>} : memref<104x1152xbf16, #tpu.memory_space<vmem>>, vector<1x128xbf16>,
    %c4 = arith.constant 4 : index
    %c0_1032 = arith.constant 0 : index
    %584 = vector.load %arg9[%c4, %c0_1032] : memref<104x128xbf16, #tpu.memory_space<vmem>>, vector<1x128xbf16>
    %c0_1033 = arith.constant 0 : index
    %c512_1034 = arith.constant 512 : index
    %585 = vector.load %arg8[%c0_1033, %c512_1034] : memref<104x1152xbf16, #tpu.memory_space<vmem>>, vector<1x128xbf16>
    tpu.vector_store %arg8[%c0_1033, %c512_1034], %584 {strides = array<i32>} : memref<104x1152xbf16, #tpu.memory_space<vmem>>, vector<1x128xbf16>,
    %c5_1035 = arith.constant 5 : index
    %c0_1036 = arith.constant 0 : index
    %586 = vector.load %arg9[%c5_1035, %c0_1036] : memref<104x128xbf16, #tpu.memory_space<vmem>>, vector<1x128xbf16>
    %c0_1037 = arith.constant 0 : index
    %c640_1038 = arith.constant 640 : index
    %587 = vector.load %arg8[%c0_1037, %c640_1038] : memref<104x1152xbf16, #tpu.memory_space<vmem>>, vector<1x128xbf16>
    tpu.vector_store %arg8[%c0_1037, %c640_1038], %586 {strides = array<i32>} : memref<104x1152xbf16, #tpu.memory_space<vmem>>, vector<1x128xbf16>,
    %c6_1039 = arith.constant 6 : index
    %c0_1040 = arith.constant 0 : index
    %588 = vector.load %arg9[%c6_1039, %c0_1040] : memref<104x128xbf16, #tpu.memory_space<vmem>>, vector<1x128xbf16>
    %c0_1041 = arith.constant 0 : index
    %c768_1042 = arith.constant 768 : index
    %589 = vector.load %arg8[%c0_1041, %c768_1042] : memref<104x1152xbf16, #tpu.memory_space<vmem>>, vector<1x128xbf16>
    tpu.vector_store %arg8[%c0_1041, %c768_1042], %588 {strides = array<i32>} : memref<104x1152xbf16, #tpu.memory_space<vmem>>, vector<1x128xbf16>,
    %c7_1043 = arith.constant 7 : index
    %c0_1044 = arith.constant 0 : index
    %590 = vector.load %arg9[%c7_1043, %c0_1044] : memref<104x128xbf16, #tpu.memory_space<vmem>>, vector<1x128xbf16>
    %c0_1045 = arith.constant 0 : index
    %c896_1046 = arith.constant 896 : index
    %591 = vector.load %arg8[%c0_1045, %c896_1046] : memref<104x1152xbf16, #tpu.memory_space<vmem>>, vector<1x128xbf16>
    tpu.vector_store %arg8[%c0_1045, %c896_1046], %590 {strides = array<i32>} : memref<104x1152xbf16, #tpu.memory_space<vmem>>, vector<1x128xbf16>,
    %c8_1047 = arith.constant 8 : index
    %c0_1048 = arith.constant 0 : index
    %592 = vector.load %arg9[%c8_1047, %c0_1048] : memref<104x128xbf16, #tpu.memory_space<vmem>>, vector<1x128xbf16>
    %c0_1049 = arith.constant 0 : index
    %c1024_1050 = arith.constant 1024 : index
    %593 = vector.load %arg8[%c0_1049, %c1024_1050] : memref<104x1152xbf16, #tpu.memory_space<vmem>>, vector<1x128xbf16>
    tpu.vector_store %arg8[%c0_1049, %c1024_1050], %592 {strides = array<i32>} : memref<104x1152xbf16, #tpu.memory_space<vmem>>, vector<1x128xbf16>,
    %c9_1051 = arith.constant 9 : index
    %c0_1052 = arith.constant 0 : index
    %594 = vector.load %arg9[%c9_1051, %c0_1052] : memref<104x128xbf16, #tpu.memory_space<vmem>>, vector<1x128xbf16>
    %c1_1053 = arith.constant 1 : index
    %c0_1054 = arith.constant 0 : index
    %595 = vector.load %arg8[%c1_1053, %c0_1054] : memref<104x1152xbf16, #tpu.memory_space<vmem>>, vector<1x128xbf16>
    tpu.vector_store %arg8[%c1_1053, %c0_1054], %594 {strides = array<i32>} : memref<104x1152xbf16, #tpu.memory_space<vmem>>, vector<1x128xbf16>,
    %c10_1055 = arith.constant 10 : index
    %c0_1056 = arith.constant 0 : index
    %596 = vector.load %arg9[%c10_1055, %c0_1056] : memref<104x128xbf16, #tpu.memory_space<vmem>>, vector<1x128xbf16>
    %c1_1057 = arith.constant 1 : index
    %c128_1058 = arith.constant 128 : index
    %597 = vector.load %arg8[%c1_1057, %c128_1058] : memref<104x1152xbf16, #tpu.memory_space<vmem>>, vector<1x128xbf16>
    tpu.vector_store %arg8[%c1_1057, %c128_1058], %596 {strides = array<i32>} : memref<104x1152xbf16, #tpu.memory_space<vmem>>, vector<1x128xbf16>,
    %c11_1059 = arith.constant 11 : index
    %c0_1060 = arith.constant 0 : index
    %598 = vector.load %arg9[%c11_1059, %c0_1060] : memref<104x128xbf16, #tpu.memory_space<vmem>>, vector<1x128xbf16>
    %c1_1061 = arith.constant 1 : index
    %c256_1062 = arith.constant 256 : index
    %599 = vector.load %arg8[%c1_1061, %c256_1062] : memref<104x1152xbf16, #tpu.memory_space<vmem>>, vector<1x128xbf16>
    tpu.vector_store %arg8[%c1_1061, %c256_1062], %598 {strides = array<i32>} : memref<104x1152xbf16, #tpu.memory_space<vmem>>, vector<1x128xbf16>,
    %c12_1063 = arith.constant 12 : index
    %c0_1064 = arith.constant 0 : index
    %600 = vector.load %arg9[%c12_1063, %c0_1064] : memref<104x128xbf16, #tpu.memory_space<vmem>>, vector<1x128xbf16>
    %c1_1065 = arith.constant 1 : index
    %c384_1066 = arith.constant 384 : index
    %601 = vector.load %arg8[%c1_1065, %c384_1066] : memref<104x1152xbf16, #tpu.memory_space<vmem>>, vector<1x128xbf16>
    tpu.vector_store %arg8[%c1_1065, %c384_1066], %600 {strides = array<i32>} : memref<104x1152xbf16, #tpu.memory_space<vmem>>, vector<1x128xbf16>,
    %c13 = arith.constant 13 : index
    %c0_1067 = arith.constant 0 : index
    %602 = vector.load %arg9[%c13, %c0_1067] : memref<104x128xbf16, #tpu.memory_space<vmem>>, vector<1x128xbf16>
    %c1_1068 = arith.constant 1 : index
    %c512_1069 = arith.constant 512 : index
    %603 = vector.load %arg8[%c1_1068, %c512_1069] : memref<104x1152xbf16, #tpu.memory_space<vmem>>, vector<1x128xbf16>
    tpu.vector_store %arg8[%c1_1068, %c512_1069], %602 {strides = array<i32>} : memref<104x1152xbf16, #tpu.memory_space<vmem>>, vector<1x128xbf16>,
    %c14_1070 = arith.constant 14 : index
    %c0_1071 = arith.constant 0 : index
    %604 = vector.load %arg9[%c14_1070, %c0_1071] : memref<104x128xbf16, #tpu.memory_space<vmem>>, vector<1x128xbf16>
    %c1_1072 = arith.constant 1 : index
    %c640_1073 = arith.constant 640 : index
    %605 = vector.load %arg8[%c1_1072, %c640_1073] : memref<104x1152xbf16, #tpu.memory_space<vmem>>, vector<1x128xbf16>
    tpu.vector_store %arg8[%c1_1072, %c640_1073], %604 {strides = array<i32>} : memref<104x1152xbf16, #tpu.memory_space<vmem>>, vector<1x128xbf16>,
    %c15_1074 = arith.constant 15 : index
    %c0_1075 = arith.constant 0 : index
    %606 = vector.load %arg9[%c15_1074, %c0_1075] : memref<104x128xbf16, #tpu.memory_space<vmem>>, vector<1x128xbf16>
    %c1_1076 = arith.constant 1 : index
    %c768_1077 = arith.constant 768 : index
    %607 = vector.load %arg8[%c1_1076, %c768_1077] : memref<104x1152xbf16, #tpu.memory_space<vmem>>, vector<1x128xbf16>
    tpu.vector_store %arg8[%c1_1076, %c768_1077], %606 {strides = array<i32>} : memref<104x1152xbf16, #tpu.memory_space<vmem>>, vector<1x128xbf16>,
    %c16_1078 = arith.constant 16 : index
    %c0_1079 = arith.constant 0 : index
    %608 = vector.load %arg9[%c16_1078, %c0_1079] : memref<104x128xbf16, #tpu.memory_space<vmem>>, vector<1x128xbf16>
    %c1_1080 = arith.constant 1 : index
    %c896_1081 = arith.constant 896 : index
    %609 = vector.load %arg8[%c1_1080, %c896_1081] : memref<104x1152xbf16, #tpu.memory_space<vmem>>, vector<1x128xbf16>
    tpu.vector_store %arg8[%c1_1080, %c896_1081], %608 {strides = array<i32>} : memref<104x1152xbf16, #tpu.memory_space<vmem>>, vector<1x128xbf16>,
    %c17_1082 = arith.constant 17 : index
    %c0_1083 = arith.constant 0 : index
    %610 = vector.load %arg9[%c17_1082, %c0_1083] : memref<104x128xbf16, #tpu.memory_space<vmem>>, vector<1x128xbf16>
    %c1_1084 = arith.constant 1 : index
    %c1024_1085 = arith.constant 1024 : index
    %611 = vector.load %arg8[%c1_1084, %c1024_1085] : memref<104x1152xbf16, #tpu.memory_space<vmem>>, vector<1x128xbf16>
    tpu.vector_store %arg8[%c1_1084, %c1024_1085], %610 {strides = array<i32>} : memref<104x1152xbf16, #tpu.memory_space<vmem>>, vector<1x128xbf16>,
    %c0_1086 = arith.constant 0 : index
    %c0_1087 = arith.constant 0 : index
    %612 = vector.load %arg8[%c0_1086, %c0_1087] : memref<104x1152xbf16, #tpu.memory_space<vmem>>, vector<2x1152xbf16>
    %c3_1088 = arith.constant 3 : index
    %c0_1089 = arith.constant 0 : index
    %c0_1090 = arith.constant 0 : index
    %613 = vector.load %arg1[%c3_1088, %c0_1089, %c0_1090] : memref<4x1152x128xbf16, #tpu.memory_space<vmem>>, vector<1x1152x128xbf16>
    %614 = vector.shape_cast %613 : vector<1x1152x128xbf16> to vector<1152x128xbf16>
    %cst_1091 = arith.constant dense<0.000000e+00> : vector<2x128xf32>
    %615 = tpu.matmul %612, %614, %cst_1091 {dimension_numbers = #tpu.dot_dimension_numbers<[1], [0], [0], [1], [0, 0, 1, 1], [], []>} : vector<2x1152xbf16>, vector<1152x128xbf16>, vector<2x128xf32> -> vector<2x128xf32>
    %c3_1092 = arith.constant 3 : index
    %c0_1093 = arith.constant 0 : index
    %c0_1094 = arith.constant 0 : index
    %616 = vector.load %arg2[%c3_1092, %c0_1093, %c0_1094] : memref<4x1x128xf32, #tpu.memory_space<vmem>>, vector<1x1x128xf32>
    %617 = vector.shape_cast %616 : vector<1x1x128xf32> to vector<1x128xf32>
    %618 = vector.broadcast %617 : vector<1x128xf32> to vector<2x128xf32>
    %619 = arith.addf %615, %618 : vector<2x128xf32>
    %cst_1095 = arith.constant 0.000000e+00 : f32
    %620 = vector.broadcast %cst_1095 : f32 to vector<2x128xf32>
    %621 = arith.maximumf %619, %620 : vector<2x128xf32>
    %cst_1096 = arith.constant 0.000000e+00 : f32
    %622 = vector.broadcast %cst_1096 : f32 to vector<8x128xf32>
    %c0_1097 = arith.constant 0 : index
    %c0_1098 = arith.constant 0 : index
    %623 = vector.load %arg11[%c0_1097, %c0_1098] : memref<8x128xf32, #tpu.memory_space<vmem>>, vector<8x128xf32>
    tpu.vector_store %arg11[%c0_1097, %c0_1098], %622 {strides = array<i32>} : memref<8x128xf32, #tpu.memory_space<vmem>>, vector<8x128xf32>,
    %c0_1099 = arith.constant 0 : index
    %c0_1100 = arith.constant 0 : index
    %624 = vector.load %arg11[%c0_1099, %c0_1100] : memref<8x128xf32, #tpu.memory_space<vmem>>, vector<2x128xf32>
    tpu.vector_store %arg11[%c0_1099, %c0_1100], %621 {strides = array<i32>} : memref<8x128xf32, #tpu.memory_space<vmem>>, vector<2x128xf32>,
    %c0_1101 = arith.constant 0 : index
    %c0_1102 = arith.constant 0 : index
    %625 = vector.load %arg11[%c0_1101, %c0_1102] : memref<8x128xf32, #tpu.memory_space<vmem>>, vector<8x128xf32>
    %626 = arith.truncf %625 : vector<8x128xf32> to vector<8x128xbf16>
    %c0_1103 = arith.constant 0 : index
    %c0_1104 = arith.constant 0 : index
    %c0_1105 = arith.constant 0 : index
    %627 = vector.load %arg3[%c0_1103, %c0_1104, %c0_1105] : memref<3x128x128xbf16, #tpu.memory_space<vmem>>, vector<1x128x128xbf16>
    %628 = vector.shape_cast %627 : vector<1x128x128xbf16> to vector<128x128xbf16>
    %cst_1106 = arith.constant dense<0.000000e+00> : vector<8x128xf32>
    %629 = tpu.matmul %626, %628, %cst_1106 {dimension_numbers = #tpu.dot_dimension_numbers<[1], [0], [0], [1], [0, 0, 1, 1], [], []>} : vector<8x128xbf16>, vector<128x128xbf16>, vector<8x128xf32> -> vector<8x128xf32>
    %c0_1107 = arith.constant 0 : index
    %c0_1108 = arith.constant 0 : index
    %c0_1109 = arith.constant 0 : index
    %630 = vector.load %arg4[%c0_1107, %c0_1108, %c0_1109] : memref<3x1x128xf32, #tpu.memory_space<vmem>>, vector<1x1x128xf32>
    %631 = vector.shape_cast %630 : vector<1x1x128xf32> to vector<1x128xf32>
    %632 = vector.broadcast %631 : vector<1x128xf32> to vector<8x128xf32>
    %633 = arith.addf %629, %632 : vector<8x128xf32>
    %cst_1110 = arith.constant 0.000000e+00 : f32
    %634 = vector.broadcast %cst_1110 : f32 to vector<8x128xf32>
    %635 = arith.maximumf %633, %634 : vector<8x128xf32>
    %636 = arith.truncf %635 : vector<8x128xf32> to vector<8x128xbf16>
    %c1_1111 = arith.constant 1 : index
    %c0_1112 = arith.constant 0 : index
    %c0_1113 = arith.constant 0 : index
    %637 = vector.load %arg3[%c1_1111, %c0_1112, %c0_1113] : memref<3x128x128xbf16, #tpu.memory_space<vmem>>, vector<1x128x128xbf16>
    %638 = vector.shape_cast %637 : vector<1x128x128xbf16> to vector<128x128xbf16>
    %cst_1114 = arith.constant dense<0.000000e+00> : vector<8x128xf32>
    %639 = tpu.matmul %636, %638, %cst_1114 {dimension_numbers = #tpu.dot_dimension_numbers<[1], [0], [0], [1], [0, 0, 1, 1], [], []>} : vector<8x128xbf16>, vector<128x128xbf16>, vector<8x128xf32> -> vector<8x128xf32>
    %c1_1115 = arith.constant 1 : index
    %c0_1116 = arith.constant 0 : index
    %c0_1117 = arith.constant 0 : index
    %640 = vector.load %arg4[%c1_1115, %c0_1116, %c0_1117] : memref<3x1x128xf32, #tpu.memory_space<vmem>>, vector<1x1x128xf32>
    %641 = vector.shape_cast %640 : vector<1x1x128xf32> to vector<1x128xf32>
    %642 = vector.broadcast %641 : vector<1x128xf32> to vector<8x128xf32>
    %643 = arith.addf %639, %642 : vector<8x128xf32>
    %cst_1118 = arith.constant 0.000000e+00 : f32
    %644 = vector.broadcast %cst_1118 : f32 to vector<8x128xf32>
    %645 = arith.maximumf %643, %644 : vector<8x128xf32>
    %646 = arith.truncf %645 : vector<8x128xf32> to vector<8x128xbf16>
    %c2_1119 = arith.constant 2 : index
    %c0_1120 = arith.constant 0 : index
    %c0_1121 = arith.constant 0 : index
    %647 = vector.load %arg3[%c2_1119, %c0_1120, %c0_1121] : memref<3x128x128xbf16, #tpu.memory_space<vmem>>, vector<1x128x128xbf16>
    %648 = vector.shape_cast %647 : vector<1x128x128xbf16> to vector<128x128xbf16>
    %cst_1122 = arith.constant dense<0.000000e+00> : vector<8x128xf32>
    %649 = tpu.matmul %646, %648, %cst_1122 {dimension_numbers = #tpu.dot_dimension_numbers<[1], [0], [0], [1], [0, 0, 1, 1], [], []>} : vector<8x128xbf16>, vector<128x128xbf16>, vector<8x128xf32> -> vector<8x128xf32>
    %c2_1123 = arith.constant 2 : index
    %c0_1124 = arith.constant 0 : index
    %c0_1125 = arith.constant 0 : index
    %650 = vector.load %arg4[%c2_1123, %c0_1124, %c0_1125] : memref<3x1x128xf32, #tpu.memory_space<vmem>>, vector<1x1x128xf32>
    %651 = vector.shape_cast %650 : vector<1x1x128xf32> to vector<1x128xf32>
    %652 = vector.broadcast %651 : vector<1x128xf32> to vector<8x128xf32>
    %653 = arith.addf %649, %652 : vector<8x128xf32>
    %cst_1126 = arith.constant 0.000000e+00 : f32
    %654 = vector.broadcast %cst_1126 : f32 to vector<8x128xf32>
    %655 = arith.maximumf %653, %654 : vector<8x128xf32>
    %656 = arith.truncf %655 : vector<8x128xf32> to vector<8x128xbf16>
    %c0_1127 = arith.constant 0 : index
    %c0_1128 = arith.constant 0 : index
    %657 = vector.load %arg5[%c0_1127, %c0_1128] : memref<128x128xbf16, #tpu.memory_space<vmem>>, vector<128x128xbf16>
    %cst_1129 = arith.constant dense<0.000000e+00> : vector<8x128xf32>
    %658 = tpu.matmul %656, %657, %cst_1129 {dimension_numbers = #tpu.dot_dimension_numbers<[1], [0], [0], [1], [0, 0, 1, 1], [], []>} : vector<8x128xbf16>, vector<128x128xbf16>, vector<8x128xf32> -> vector<8x128xf32>
    %c0_1130 = arith.constant 0 : index
    %c0_1131 = arith.constant 0 : index
    %659 = vector.load %arg6[%c0_1130, %c0_1131] : memref<1x128xf32, #tpu.memory_space<vmem>>, vector<1x128xf32>
    %660 = vector.broadcast %659 : vector<1x128xf32> to vector<8x128xf32>
    %661 = arith.addf %658, %660 : vector<8x128xf32>
    %c0_1132 = arith.constant 0 : index
    %c0_1133 = arith.constant 0 : index
    %662 = vector.load %arg7[%c0_1132, %c0_1133] : memref<8x128xf32, #tpu.memory_space<vmem>>, vector<8x128xf32>
    tpu.vector_store %arg7[%c0_1132, %c0_1133], %661 {strides = array<i32>} : memref<8x128xf32, #tpu.memory_space<vmem>>, vector<8x128xf32>,
    return
  }
}

</mosaic_0001>

<bundles_post_ra>
// kernel: predictive_controlnet_forward.1
= control target key start
LH: loop header
LB: loop body
LE: loop exit
PB: predicated region body
PF: predicated region fallthrough
CT: control target
= control target key end

     0   :  { %12 = vsyncpa [#allocation7], 0  ;;  %s13938_s0 = inlined_call_operand.vmem [shape: bf16[168,128], index: 0, kind: input, shape index: {}]   ;;  %s13939_s1 = inlined_call_operand.hbm [shape: bf16[4,1152,128], index: 1, kind: input, shape index: {}]   ;;  %s13940_s2 = inlined_call_operand.hbm [shape: f32[4,1,128], index: 2, kind: input, shape index: {}]   ;;  %s13941_s3 = inlined_call_operand.vmem [shape: bf16[3,128,128], index: 3, kind: input, shape index: {}]   ;;  %s13942_s4 = inlined_call_operand.hbm [shape: f32[3,1,128], index: 4, kind: input, shape index: {}]   ;;  %s13943_s5 = inlined_call_operand.vmem [shape: bf16[128,128], index: 5, kind: input, shape index: {}]   ;;  %s13944_s6 = inlined_call_operand.hbm [shape: f32[1,128], index: 6, kind: input, shape index: {}]   ;;  %s13945_s7 = inlined_call_operand.vmem [shape: f32[8,128], index: 7, kind: output, shape index: {}]  }
   0x1   :  { %13 = vsyncpa [#allocation9], 0 }
   0x2   :  { %14 = vsyncpa [#allocation12], 0  ;;  %s11208_s24 = smov [#allocation8]   ;;  %s11114_s28 = scalar_lea.hbm %s13940_s2, 64 }
   0x3   :  { %s34_s25 = sshll.u32 %s11208_s24, 4  ;;  %p11115_p0 = scmp.ne.s32.totalorder %s13940_s2, %s11114_s28  ;;  %s35_s25 = int_to_ptr.vmem [resolvable:$true] %s34_s25 }
   0x4   :  { %p11118_p1 = scmp.lt.u32.totalorder %s11114_s28, %s13940_s2 }
   0x6   :  { %p11120_p2 = pnand %p11118_p1, %p11115_p0 }
   0x8   :  { %11123 = shalt.err (!%p11120_p2)
}
   0x9   :  { %s11124_s10 = scalar_lea.vmem %s35_s25, 64  ;;  %p11129_p4 = scmp.lt.s32.totalorder %s35_s25, %s35_s25 }
   0xa   :  { %p11125_p3 = scmp.ne.s32.totalorder %s35_s25, %s11124_s10  ;;  %p11130_p5 = scmp.lt.s32.totalorder %s11124_s10, %s11124_s10 }
   0xc   :  { %p11131_p6 = por %p11130_p5, %p11129_p4 }
   0xe   :  { %p11132_p7 = pnand %p11131_p6, %p11125_p3 }
  0x10   :  { %11135 = shalt.err (!%p11132_p7)
}
  0x11   :  { %s11209_s11 = smov 16   ;;  %s11210_s12 = smov 1  }
  0x12   :  { %40 = dma.hbm_to_vmem [thread:$0]  %s13940_s2, 64, %s35_s25, [#allocation9], %s11209_s11, %s11209_s11, %s11210_s12  }
  0x13   :  { %s11211_s15 = smov [#allocation6]   ;;  %s11136_s19 = scalar_lea.hbm %s13939_s1, 36864 }
  0x14   :  { %s22_s16 = sshll.u32 %s11211_s15, 4  ;;  %p11137_p8 = scmp.ne.s32.totalorder %s13939_s1, %s11136_s19  ;;  %s23_s16 = int_to_ptr.vmem [resolvable:$true] %s22_s16 }
  0x15   :  { %p11140_p9 = scmp.lt.u32.totalorder %s11136_s19, %s13939_s1 }
  0x17   :  { %p11142_p10 = pnand %p11140_p9, %p11137_p8 }
  0x19   :  { %11145 = shalt.err (!%p11142_p10)
}
  0x1a   :  { %s11146_s24 = scalar_lea.vmem %s23_s16, 36864  ;;  %p11151_p12 = scmp.lt.s32.totalorder %s23_s16, %s23_s16 }
  0x1b   :  { %p11147_p11 = scmp.ne.s32.totalorder %s23_s16, %s11146_s24  ;;  %p11152_p13 = scmp.lt.s32.totalorder %s11146_s24, %s11146_s24 }
  0x1d   :  { %p11153_p0 = por %p11152_p13, %p11151_p12 }
  0x1f   :  { %p11154_p1 = pnand %p11153_p0, %p11147_p11 }
  0x21   :  { %11157 = shalt.err (!%p11154_p1)
}
  0x22   :  { %s11212_s2 = smov 64   ;;  %s11213_s25 = smov 4  }
  0x23   :  { %28 = dma.hbm_to_vmem [thread:$0]  %s13939_s1, 36864, %s23_s16, [#allocation7], %s11212_s2, %s11212_s2, %s11213_s25  }
  0x24   :  { %s11214_s28 = smov [#allocation10]   ;;  %s11215_s30 = smov [#allocation11]  }
  0x25   :  { %s48_s29 = sshll.u32 %s11214_s28, 4  ;;  %s63_s8 = sshll.u32 %s11215_s30, 4  ;;  %s49_s29 = int_to_ptr.vmem [resolvable:$true] %s48_s29  ;;  %s64_s8 = int_to_ptr.vmem [resolvable:$true] %s63_s8 }
  0x26   :  { %s11158_s13 = scalar_lea.hbm %s13942_s4, 48 }
  0x27   :  { %p11159_p2 = scmp.ne.s32.totalorder %s13942_s4, %s11158_s13  ;;  %p11162_p3 = scmp.lt.u32.totalorder %s11158_s13, %s13942_s4 }
  0x29   :  { %p11164_p4 = pnand %p11162_p3, %p11159_p2 }
  0x2b   :  { %11167 = shalt.err (!%p11164_p4)
}
  0x2c   :  { %s11168_s1 = scalar_lea.vmem %s49_s29, 48  ;;  %s11172_s16 = scalar_lea.vmem %s49_s29, 64 }
  0x2d   :  { %p11169_p5 = scmp.ne.s32.totalorder %s49_s29, %s11168_s1  ;;  %p11173_p6 = scmp.lt.s32.totalorder %s49_s29, %s49_s29 }
  0x2e   :  { %p11174_p7 = scmp.lt.s32.totalorder %s11172_s16, %s11168_s1 }
  0x30   :  { %p11175_p8 = por %p11174_p7, %p11173_p6 }
  0x32   :  { %p11176_p9 = pnand %p11175_p8, %p11169_p5 }
  0x34   :  { %11179 = shalt.err (!%p11176_p9)
}
  0x35   :  { %54 = dma.hbm_to_vmem [thread:$0]  %s13942_s4, 48, %s49_s29, [#allocation9], %s11209_s11, %s11209_s11, %s11210_s12  }
  0x36   :  { %s11180_s23 = scalar_lea.hbm %s13944_s6, 16 }
  0x37   :  { %p11181_p10 = scmp.ne.s32.totalorder %s13944_s6, %s11180_s23  ;;  %p11184_p11 = scmp.lt.u32.totalorder %s11180_s23, %s13944_s6 }
  0x39   :  { %p11186_p12 = pnand %p11184_p11, %p11181_p10 }
  0x3b   :  { %11189 = shalt.err (!%p11186_p12)
}
  0x3c   :  { %s11190_s27 = scalar_lea.vmem %s64_s8, 16  ;;  %s11194_s28 = scalar_lea.vmem %s64_s8, 32 }
  0x3d   :  { %p11191_p13 = scmp.ne.s32.totalorder %s64_s8, %s11190_s27  ;;  %p11195_p0 = scmp.lt.s32.totalorder %s64_s8, %s64_s8 }
  0x3e   :  { %p11196_p1 = scmp.lt.s32.totalorder %s11194_s28, %s11190_s27 }
  0x40   :  { %p11197_p2 = por %p11196_p1, %p11195_p0 }
  0x42   :  { %p11198_p3 = pnand %p11197_p2, %p11191_p13 }
  0x44   :  { %11201 = shalt.err (!%p11198_p3)
}
  0x45   :  { %66 = dma.hbm_to_vmem [thread:$0]  %s13944_s6, 16, %s64_s8, [#allocation12]  }
  0x46   :  { %11202 = dma.done.wait [#allocation7], 36864  }
  0x47   :  { %11203 = vsyncadd [#allocation7], 4294930432 }
  0x48   :  { %11204 = dma.done.wait [#allocation9], 112  }
  0x49   :  { %11205 = vsyncadd [#allocation9], 4294967184 }
  0x4a   :  { %11206 = dma.done.wait [#allocation12], 16  }
  0x4b   :  { %11207 = vsyncadd [#allocation12], 4294967280  ;;  %v10625_v0 = vld [vmem:[#allocation6 + $0x40] sm:$0xff]   ;;  %v10629_v4 = vld [vmem:[#allocation6 + $0x48] sm:$0xff]   ;;  %vm13947_vm0 = vsmask.f32 3328 }
  0x4c   :  { %v10626_v1 = vld [vmem:[#allocation6] sm:$0xff]   ;;  %9753 = vmatprep.subr.bf16.mxu0 %v10625_v0  ;;  %v10630_v5 = vld [vmem:[#allocation6 + $0x8] sm:$0xff]   ;;  %v10633_v8 = vld [vmem:[#allocation6 + $0x50] sm:$0xff]   ;;  %vm13946_vm1 = vcmask 1043456   ;;  %vm144_vm3 = vsmask.f32 2304 }
  0x4d   :  { %v10627_v2 = vld [vmem:[#allocation6 + $0xc0] sm:$0xff]   ;;  %9754 = vmatpush3.bf16.msra.mxu0 %v10626_v1  ;;  %v10631_v6 = vld [vmem:[#allocation6 + $0xc8] sm:$0xff]   ;;  %v10634_v9 = vld [vmem:[#allocation6 + $0x10] sm:$0xff]   ;;  %vm145_vm4 = vsmask.f32 6416  ;;  %vm13949_vm5 = vcmask 1042432  }
  0x4e   :  { %v10628_v3 = vld [vmem:[#allocation6 + $0x80] sm:$0xff]   ;;  %9811 = vmatprep.subr.bf16.mxu1 %v10627_v2  ;;  %9755 = vmatprep.subr.bf16.mxu0 %v10629_v4  ;;  %v10632_v7 = vld [vmem:[#allocation6 + $0x88] sm:$0xff]   ;;  %v10635_v10 = vld [vmem:[#allocation6 + $0xd0] sm:$0xff]   ;;  %vm226_vm6 = vcmask 1043459   ;;  %vm106_vm7 = vcmask 1046532   ;;  %vm13948_vm9 = vcmask 1041408  }
  0x4f   :  { %9812 = vmatpush3.bf16.msra.mxu1 %v10628_v3  ;;  %v10636_v11 = vld [vmem:[#allocation6 + $0x90] sm:$0xff]   ;;  %v10637_v12 = vld [vmem:[#allocation6 + $0x58] sm:$0xff]   ;;  %v10641_v16 = vld [vmem:[#allocation6 + $0x60] sm:$0xff]   ;;  %vm227_vm8 = vsmask.f32 7950  ;;  %vm210_vm13 = vcmask 1045508  }
  0x50   :  { %9813 = vmatprep.subr.bf16.mxu1 %v10631_v6  ;;  %v10638_v13 = vld [vmem:[#allocation6 + $0x18] sm:$0xff]   ;;  %v10642_v17 = vld [vmem:[#allocation6 + $0x20] sm:$0xff]   ;;  %v10645_v20 = vld [vmem:[#allocation6 + $0x68] sm:$0xff]   ;;  %vm307_vm14 = vsmask.f32 1280 }
  0x51   :  { %9756 = vmatpush3.bf16.msra.mxu0 %v10630_v5  ;;  %v10639_v14 = vld [vmem:[#allocation6 + $0xd8] sm:$0xff]   ;;  %v10643_v18 = vld [vmem:[#allocation6 + $0xe0] sm:$0xff]   ;;  %v10646_v21 = vld [vmem:[#allocation6 + $0x28] sm:$0xff]   ;;  %vm308_vm15 = vsmask.f32 5392 }
  0x52   :  { %9757 = vmatprep.subr.bf16.mxu0 %v10633_v8  ;;  %v10640_v15 = vld [vmem:[#allocation6 + $0x98] sm:$0xff]   ;;  %v10644_v19 = vld [vmem:[#allocation6 + $0xa0] sm:$0xff]   ;;  %vm11314_vm2 = vmand %vm13946_vm1, %vm13947_vm0  ;;  %vm379_vm1 = vcmask 1044484   ;;  %vm568_vm0 = vsmask.f32 7946 }
  0x53   :  { %9814 = vmatpush3.bf16.msra.mxu1 %v10632_v7  ;;  %v10647_v23 = vld [vmem:[#allocation6 + $0xe8] sm:$0xff]   ;;  %v10649_v25 = vld [vmem:[#allocation6 + $0x70] sm:$0xff]   ;;  %v10653_v29 = vld [vmem:[#allocation6 + $0x78] sm:$0xff]  }
  0x54   :  { %9815 = vmatprep.subr.bf16.mxu1 %v10635_v10  ;;  %v10648_v24 = vld [vmem:[#allocation6 + $0xa8] sm:$0xff]   ;;  %v10650_v26 = vld [vmem:[#allocation6 + $0x30] sm:$0xff]   ;;  %v10654_v30 = vld [vmem:[#allocation6 + $0x38] sm:$0xff]  }
  0x55   :  { %9758 = vmatpush3.bf16.msra.mxu0 %v10634_v9  ;;  %v10651_v27 = vld [vmem:[#allocation6 + $0xf0] sm:$0xff]   ;;  %v10655_v31 = vld [vmem:[#allocation6 + $0xf8] sm:$0xff]   ;;  %v220_v38 = vld [vmem:[%s13938_s0 + $0x4] sm:$0xf] }
  0x56   :  { %9759 = vmatprep.subr.bf16.mxu0 %v10637_v12  ;;  %v10652_v28 = vld [vmem:[#allocation6 + $0xb0] sm:$0xff]   ;;  %v80_v32 = vld [vmem:[%s13938_s0] sm:$0xf]  ;;  %v222_v39 = vrot.slane %v220_v38, 5  ;;  %v233_v40 = vld [vmem:[%s13938_s0 + $0x4] sm:$0xe] }
  0x57   :  { %9816 = vmatpush3.bf16.msra.mxu1 %v10636_v11  ;;  %v84_v33 = vld [vmem:[#allocation2] sm:$0xf]  ;;  %v234_v41 = vld [vmem:[%s13938_s0 + $0x8] sm:$0x1]  ;;  %v236_v45 = vshll.u32 %v233_v40, 16  ;;  %v239_v46 = vshrl.u32 %v233_v40, 16  ;;  %vm11348_vm10 = vmor %vm144_vm3, %vm145_vm4 }
  0x58   :  { %9817 = vmatprep.subr.bf16.mxu1 %v10639_v14  ;;  %v87_v34 = vld [vmem:[%s13938_s0] sm:$0xf]  ;;  %v85_v35 = vsel %vm11314_vm2, %v80_v32, %v84_v33  ;;  %v11338_v47 = vld [vmem:[%s13938_s0 + $0x8] sm:$0xe]  ;;  %v98_v48 = vld [vmem:[#allocation2 + $0x4] sm:$0xf] }
  0x59   :  { %9760 = vmatpush3.bf16.msra.mxu0 %v10638_v13  ;;  %v89_v36 = vshrl.u32 %v87_v34, 16  ;;  %v92_v37 = vshll.u32 %v87_v34, 16  ;;  %86 = vst [vmem:[#allocation2] sm:$0xf] %v85_v35  ;;  %v10658_v42 = vld [vmem:[#allocation6 + $0xb8] sm:$0xff]   ;;  %v223_v49 = vrot.slane %v222_v39, 4  ;;  %vm11356_vm11 = vmand %vm226_vm6, %vm227_vm8 }
  0x5a   :  { %9761 = vmatprep.subr.bf16.mxu0 %v10641_v16  ;;  %v245_v50 = vshll.u32 %v234_v41, 16  ;;  %v395_v51 = vrot.slane %v11338_v47, 6  ;;  %v406_v52 = vld [vmem:[%s13938_s0 + $0x8] sm:$0xe]  ;;  %v11344_v55 = vrot.slane %v236_v45, 6  ;;  %v241_v56 = vrot.slane %v239_v46, 5  ;;  %vm11369_vm12 = vmor %vm13949_vm5, %vm106_vm7 }
  0x5b   :  { %9818 = vmatpush3.bf16.msra.mxu1 %v10640_v15  ;;  %v91_v43 = vrot.slane %v89_v36, 4  ;;  %v94_v44 = vrot.slane %v92_v37, 5  ;;  %v10660_v53 = vld [vmem:[#allocation6 + $0x140] sm:$0xff]   ;;  %v409_v57 = vshrl.u32 %v406_v52, 16  ;;  %232 = vst [vmem:[#allocation2 + $0x24] sm:$0x7] %v223_v49  ;;  %vm11413_vm8 = vmor %vm13948_vm9, %vm210_vm13 }
  0x5c   :  { %9819 = vmatprep.subr.bf16.mxu1 %v10643_v18  ;;  %v247_v59 = vrot.slane %v245_v50, 6  ;;  %401 = vst [vmem:[#allocation2 + $0x24] sm:$0x8] %v395_v51  ;;  %v412_v60 = vshll.u32 %v406_v52, 16  ;;  %v242_v63 = vor.u32 %v241_v56, %v11344_v55  ;;  %v101_v1 = vld [vmem:[%s13938_s0] sm:$0xe]  ;;  %vm11434_vm9 = vmand %vm13949_vm5, %vm144_vm3 }
  0x5d   :  { %9762 = vmatpush3.bf16.msra.mxu0 %v10642_v17  ;;  %v95_v54 = vor.u32 %v94_v44, %v91_v43  ;;  %v411_v0 = vrot.slane %v409_v57, 6  ;;  %v102_v3 = vld [vmem:[%s13938_s0 + $0x4] sm:$0x1]  ;;  %v9064_v5 = vrot.slane %v101_v1, 9  ;;  %v113_v6 = vld [vmem:[#allocation2 + $0x8] sm:$0xf]  ;;  %vm11475_vm5 = vmor %vm307_vm14, %vm308_vm15 }
  0x5e   :  { %9763 = vmatprep.subr.bf16.mxu0 %v10645_v20  ;;  %v414_v2 = vrot.slane %v412_v60, 7  ;;  %v243_v9 = vrot.slane %v242_v63, 4  ;;  %v110_v10 = vrot.slane %v102_v3, 5  ;;  %v116_v11 = vld [vmem:[%s13938_s0 + $0x4] sm:$0xf]  ;;  %vm13951_vm4 = vcmask 1040384  }
  0x5f   :  { %9820 = vmatpush3.bf16.msra.mxu1 %v10644_v19  ;;  %v96_v61 = vrot.slane %v95_v54, 4  ;;  %v118_v14 = vshrl.u32 %v116_v11, 16  ;;  %v121_v15 = vshll.u32 %v116_v11, 16  ;;  %v11385_v16 = vld [vmem:[%s13938_s0 + $0x4] sm:$0xe]  ;;  %v396_v41 = vrot.slane %v395_v51, 4  ;;  %vm11484_vm3 = vmor %vm13951_vm4, %vm379_vm1 }
  0x60   :  { %9821 = vmatprep.subr.bf16.mxu1 %v10647_v23  ;;  %v229_v8 = vld [vmem:[#allocation2] sm:$0x8]  ;;  %v11380_v13 = vor.u32 %v414_v2, %v411_v0  ;;  %v248_v17 = vsel %vm11348_vm10, %v243_v9, %v247_v59  ;;  %v111_v18 = vsel %vm11369_vm12, %v9064_v5, %v110_v10  ;;  %v256_v19 = vld [vmem:[%s13938_s0 + $0x8] sm:$0x1]  ;;  %v259_v20 = vrot.slane %v11385_v16, 6  ;;  %v10950_v62 = vld [vmem:[#allocation6 + $0x608] sm:$0xff]  }
  0x61   :  { %9764 = vmatpush3.bf16.msra.mxu0 %v10646_v21  ;;  %v99_v7 = vsel %vm11314_vm2, %v96_v61, %v98_v48  ;;  %v230_v12 = vsel %vm11356_vm11, %v222_v39, %v229_v8  ;;  %v269_v21 = vld [vmem:[%s13938_s0 + $0x8] sm:$0xe]  ;;  %254 = vst [vmem:[#allocation2 + $0x28] sm:$0x7] %v248_v17  ;;  %v114_v23 = vsel %vm11314_vm2, %v111_v18, %v113_v6  ;;  %vm13952_vm6 = vsmask.f32 256 }
  0x62   :  { %9765 = vmatprep.subr.bf16.mxu0 %v10649_v25  ;;  %100 = vst [vmem:[#allocation2 + $0x4] sm:$0xf] %v99_v7  ;;  %231 = vst [vmem:[#allocation2] sm:$0x8] %v230_v12  ;;  %v123_v25 = vrot.slane %v121_v15, 5  ;;  %vm13950_vm13 = vcmask 1043458  }
  0x63   :  { %9822 = vmatpush3.bf16.msra.mxu1 %v10648_v24  ;;  %428 = vst [vmem:[#allocation2 + $0x28] sm:$0x8] %v11380_v13  ;;  %v120_v24 = vrot.slane %v118_v14, 4  ;;  %115 = vst [vmem:[#allocation2 + $0x8] sm:$0xf] %v114_v23  ;;  %v416_v3 = vrot.slane %v11380_v13, 4 }
  0x64   :  { %9823 = vmatprep.subr.bf16.mxu1 %v10651_v27  ;;  %v270_v27 = vld [vmem:[%s13938_s0 + $0xc] sm:$0x1]  ;;  %v11409_v33 = vld [vmem:[%s13938_s0 + $0x8] sm:$0xc]  ;;  %vm489_vm7 = vsmask.f32 4368  ;;  %vm11508_vm15 = vmand %vm13950_vm13, %vm568_vm0 }
  0x65   :  { %9766 = vmatpush3.bf16.msra.mxu0 %v10650_v26  ;;  %v261_v26 = vrot.slane %v256_v19, 6  ;;  %v281_v32 = vshll.u32 %v270_v27, 16  ;;  %v124_v34 = vor.u32 %v123_v25, %v120_v24  ;;  %v436_v36 = vrot.slane %v11409_v33, 7  ;;  %v446_v37 = vld [vmem:[%s13938_s0 + $0xc] sm:$0xe]  ;;  %v10663_v27 = vld [vmem:[#allocation6 + $0x100] sm:$0xff]   ;;  %vm11498_vm1 = vmor %vm13952_vm6, %vm489_vm7 }
  0x66   :  { %9767 = vmatprep.subr.bf16.mxu0 %v10653_v29  ;;  %v260_v29 = vrot.slane %v259_v20, 4  ;;  %v449_v43 = vshrl.u32 %v446_v37, 16  ;;  %v452_v44 = vshll.u32 %v446_v37, 16  ;;  %v392_v45 = vld [vmem:[%s13938_s0 + $0xc] sm:$0x1]  ;;  %vm13954_vm4 = vcmask 1043457  }
  0x67   :  { %9824 = vmatpush3.bf16.msra.mxu1 %v10652_v28  ;;  %v127_v28 = vld [vmem:[#allocation2 + $0xc] sm:$0xf]  ;;  %442 = vst [vmem:[#allocation2 + $0x2c] sm:$0x8] %v436_v36  ;;  %v283_v49 = vrot.slane %v281_v32, 6  ;;  %v397_v50 = vrot.slane %v392_v45, 6 }
  0x68   :  { %9825 = vmatprep.subr.bf16.mxu1 %v10655_v31  ;;  %v275_v31 = vshrl.u32 %v269_v21, 16  ;;  %v262_v38 = vsel %vm11413_vm8, %v260_v29, %v261_v26  ;;  %v403_v51 = vld [vmem:[#allocation2 + $0x48] sm:$0x7]  ;;  %v451_v54 = vrot.slane %v449_v43, 6  ;;  %v454_v56 = vrot.slane %v452_v44, 7  ;;  %v10871_v37 = vld [vmem:[#allocation6 + $0x3c8] sm:$0xff]  }
  0x69   :  { %9768 = vmatpush3.bf16.msra.mxu0 %v10654_v30  ;;  %v272_v30 = vshll.u32 %v269_v21, 16  ;;  %268 = vst [vmem:[#allocation2 + $0x2c] sm:$0x7] %v262_v38  ;;  %v251_v46 = vld [vmem:[#allocation2 + $0x4] sm:$0x8]  ;;  %v398_v60 = vsel %vm11413_vm8, %v396_v41, %v397_v50  ;;  %v10667_v50 = vld [vmem:[#allocation6 + $0x148] sm:$0xff]  }
  0x6a   :  { %9869 = vmatprep.subr.bf16.mxu0 %v10660_v53  ;;  %v277_v40 = vrot.slane %v275_v31, 5  ;;  %v252_v52 = vsel %vm11356_vm11, %v11344_v55, %v251_v46  ;;  %v407_v57 = vld [vmem:[%s13938_s0 + $0xc] sm:$0x1]  ;;  %v557_v55 = vld [vmem:[%s13938_s0 + $0xc] sm:$0xe]  ;;  %v11452_v1 = vor.u32 %v454_v56, %v451_v54  ;;  %v404_v2 = vsel %vm11434_vm9, %v398_v60, %v403_v51 }
  0x6b   :  { %9826 = vmatpush3.bf16.msra.mxu1 %v10658_v42  ;;  %v11423_v39 = vrot.slane %v272_v30, 6  ;;  %v125_v42 = vrot.slane %v124_v34, 4  ;;  %253 = vst [vmem:[#allocation2 + $0x4] sm:$0x8] %v252_v52  ;;  %v418_v61 = vshrl.u32 %v407_v57, 16  ;;  %v421_v63 = vshll.u32 %v407_v57, 16 }
  0x6c   :  { %v265_v0 = vld [vmem:[#allocation2 + $0x8] sm:$0x8]  ;;  %v558_v5 = vld [vmem:[%s13938_s0 + $0x10] sm:$0x1]  ;;  %v561_v6 = vrot.slane %v557_v55, 7  ;;  %v437_v51 = vrot.slane %v436_v36, 4 }
  0x6d   :  { %v278_v47 = vor.u32 %v277_v40, %v11423_v39  ;;  %v128_v53 = vsel %vm11314_vm2, %v125_v42, %v127_v28  ;;  %v266_v7 = vsel %vm11356_vm11, %v259_v20, %v265_v0  ;;  %405 = vst [vmem:[#allocation2 + $0x48] sm:$0x7] %v404_v2  ;;  %v420_v9 = vrot.slane %v418_v61, 6  ;;  %v429_v11 = vld [vmem:[#allocation2 + $0x4c] sm:$0x7] }
  0x6e   :  { %129 = vst [vmem:[#allocation2 + $0xc] sm:$0xf] %v128_v53  ;;  %v423_v10 = vrot.slane %v421_v63, 7  ;;  %v574_v12 = vld [vmem:[%s13938_s0 + $0xc] sm:$0xc]  ;;  %v562_v15 = vrot.slane %v561_v6, 4 }
  0x6f   :  { %v279_v59 = vrot.slane %v278_v47, 4  ;;  %v575_v13 = vld [vmem:[%s13938_s0 + $0x10] sm:$0x3]  ;;  %267 = vst [vmem:[#allocation2 + $0x8] sm:$0x8] %v266_v7  ;;  %v563_v16 = vrot.slane %v558_v5, 7 }
  0x70   :  { %468 = vst [vmem:[#allocation2 + $0x30] sm:$0x8] %v11452_v1  ;;  %v577_v17 = vshrl.u32 %v574_v12, 16  ;;  %v580_v18 = vshll.u32 %v574_v12, 16  ;;  %v711_v19 = vld [vmem:[%s13938_s0 + $0x10] sm:$0xc]  ;;  %v424_v21 = vor.u32 %v423_v10, %v420_v9 }
  0x71   :  { %v284_v8 = vsel %vm11348_vm10, %v279_v59, %v283_v49  ;;  %v585_v23 = vshrl.u32 %v575_v13, 16  ;;  %v588_v24 = vshll.u32 %v575_v13, 16  ;;  %713 = vst [vmem:[#allocation2 + $0x6c] sm:$0xc] %v711_v19  ;;  %v718_v25 = vld [vmem:[%s13938_s0 + $0x10] sm:$0xc]  ;;  %v564_v29 = vsel %vm11484_vm3, %v562_v15, %v563_v16 }
  0x72   :  { %290 = vst [vmem:[#allocation2 + $0x30] sm:$0x7] %v284_v8  ;;  %v11494_v26 = vld [vmem:[%s13938_s0 + $0x14] sm:$0x3]  ;;  %v13982_v28 = vmov 0  ;;  %v579_v30 = vrot.slane %v577_v17, 7  ;;  %v425_v34 = vsel %vm11475_vm5, %v416_v3, %v424_v21 }
  0x73   :  { %v13983_v28 = vsel %vm11498_vm1, 4294967295, %v13982_v28  ;;  %v721_v31 = vshrl.u32 %v718_v25, 16  ;;  %v724_v32 = vshll.u32 %v718_v25, 16  ;;  %573 = vst [vmem:[#allocation2 + $0x6c] sm:$0x3] %v564_v29  ;;  %v587_v38 = vrot.slane %v585_v23, 7 }
  0x74   :  { %v730_v40 = vshll.u32 %v11494_v26, 16  ;;  %v10656_v41 = vld [vmem:[#allocation2 + $0x4] ss:$36 sps:$4 sm:$0xff]   ;;  %v430_v43 = vsel %vm11434_vm9, %v425_v34, %v429_v11  ;;  %v583_v44 = vrot.slane %v579_v30, 4  ;;  %v433_v54 = vld [vmem:[%s13938_s0 + $0xc] sm:$0x3]  ;;  %v582_v60 = vor.u32 %v580_v18, %v579_v30 }
  0x75   :  { %v10659_v42 = vld [vmem:[#allocation2] ss:$36 sps:$4 sm:$0xff]   ;;  %v287_v45 = vld [vmem:[#allocation2 + $0xc] sm:$0x8]  ;;  %431 = vst [vmem:[#allocation2 + $0x4c] sm:$0x7] %v430_v43  ;;  %v590_v46 = vor.u32 %v588_v24, %v587_v38  ;;  %3149 = vmatprep.mubr.bf16.mxu0 %v10656_v41 }
  0x76   :  { %v723_v47 = vrot.slane %v721_v31, 4  ;;  %v726_v49 = vrot.slane %v724_v32, 5  ;;  %v288_v52 = vsel %vm11356_vm11, %v11423_v39, %v287_v45  ;;  %v570_v53 = vld [vmem:[#allocation2 + $0x48] sm:$0xc]  ;;  %3150 = vmatmul.mubr.bf16.vlgmr.msra.gmra.mrb[0].mxu0 %v10659_v42  ;;  %v438_v36 = vrot.slane %v433_v54, 7  ;;  %v10669_v55 = vld [vmem:[#allocation6 + $0x108] sm:$0xff]  }
  0x77   :  { %289 = vst [vmem:[#allocation2 + $0xc] sm:$0x8] %v288_v52  ;;  %v571_v56 = vsel %vm11508_vm15, %v561_v6, %v570_v53  ;;  %v591_v57 = vsel %vm11498_vm1, %v583_v44, %v590_v46  ;;  %v443_v59 = vld [vmem:[#allocation2 + $0x50] sm:$0x7]  ;;  %9870 = vmatpush3.bf16.msra.mxu0 %v10663_v27  ;;  %vm13986_vm0 = vsmask.f32 7440 }
  0x78   :  { %v727_v33 = vor.u32 %v726_v49, %v723_v47  ;;  %v447_v39 = vld [vmem:[%s13938_s0 + $0x10] sm:$0x1]  ;;  %572 = vst [vmem:[#allocation2 + $0x48] sm:$0xc] %v571_v56  ;;  %597 = vst [vmem:[#allocation2 + $0x70] sm:$0x3] %v591_v57  ;;  %9871 = vmatprep.subr.bf16.mxu0 %v10667_v50  ;;  %v439_v6 = vsel %vm11484_vm3, %v437_v51, %v438_v36 }
  0x79   :  { %vm13987_vm7 = vsmask.f32 3328  ;;  %v11536_v63 = vrot.slane %v730_v40, 5  ;;  %v458_v0 = vshrl.u32 %v447_v39, 16  ;;  %v461_v2 = vshll.u32 %v447_v39, 16  ;;  %v10673_v3 = vld [vmem:[#allocation6 + $0x150] sm:$0xff]  }
  0x7a   :  { %vm11532_vm13 = vmor %vm13987_vm7, %vm13986_vm0  ;;  %v728_v5 = vrot.slane %v727_v33, 4  ;;  %v456_v7 = vrot.slane %v11452_v1, 4  ;;  %v599_v8 = vld [vmem:[%s13938_s0 + $0x10] sm:$0x3]  ;;  %v734_v9 = vshrl.u32 %v11494_v26, 16  ;;  %v10689_v10 = vld [vmem:[#allocation6 + $0x1c0] sm:$0xff]   ;;  %v444_v11 = vsel %vm11434_vm9, %v439_v6, %v443_v59 }
  0x7b   :  { %v460_v12 = vrot.slane %v458_v0, 6  ;;  %v463_v13 = vrot.slane %v461_v2, 7  ;;  %v469_v15 = vld [vmem:[#allocation2 + $0x54] sm:$0x7]  ;;  %603 = vst [vmem:[#allocation2 + $0x74] sm:$0x3] %v599_v8  ;;  %9927 = vmatprep.subr.bf16.mxu1 %v10689_v10  ;;  %9872 = vmatpush3.bf16.msra.mxu0 %v10669_v55 }
  0x7c   :  { %v11550_v16 = vld [vmem:[%s13938_s0 + $0x10] sm:$0xc]  ;;  %v605_v1 = vld [vmem:[%s13938_s0 + $0x14] sm:$0x3]  ;;  %v733_v18 = vsel %vm11532_vm13, %v728_v5, %v11536_v63  ;;  %445 = vst [vmem:[#allocation2 + $0x50] sm:$0x7] %v444_v11  ;;  %9873 = vmatprep.subr.bf16.mxu0 %v10673_v3 }
  0x7d   :  { %v10676_v17 = vld [vmem:[#allocation6 + $0x110] sm:$0xff]   ;;  %v607_v19 = vshrl.u32 %v11550_v16, 16  ;;  %v610_v21 = vshll.u32 %v11550_v16, 16  ;;  %v615_v23 = vshrl.u32 %v605_v1, 16  ;;  %v745_v24 = vld [vmem:[%s13938_s0 + $0x10] sm:$0x8]  ;;  %v464_v27 = vor.u32 %v463_v13, %v460_v12 }
  0x7e   :  { %v10681_v25 = vld [vmem:[#allocation6 + $0x158] sm:$0xff]   ;;  %v594_v26 = vld [vmem:[#allocation2 + $0x4c] sm:$0xc]  ;;  %741 = vst [vmem:[#allocation2 + $0x70] sm:$0xc] %v733_v18  ;;  %v618_v29 = vshll.u32 %v605_v1, 16 }
  0x7f   :  { %v746_v30 = vld [vmem:[%s13938_s0 + $0x14] sm:$0x7]  ;;  %v9069_v31 = vrot.slane %v745_v24, 9  ;;  %v595_v32 = vsel %vm11508_vm15, %v582_v60, %v594_v26  ;;  %vm13990_vm0 = vcmask 1041408   ;;  %v13991_v34 = vmov 0  ;;  %v10690_v43 = vld [vmem:[#allocation6 + $0x180] sm:$0xff]   ;;  %9874 = vmatpush3.bf16.msra.mxu0 %v10676_v17 }
  0x80   :  { %vm11570_vm7 = vmand %vm13990_vm0, %vm307_vm14  ;;  %v609_v38 = vrot.slane %v607_v19, 7  ;;  %v617_v40 = vrot.slane %v615_v23, 7  ;;  %v751_v41 = vrot.slane %v746_v30, 5  ;;  %v760_v42 = vld [vmem:[%s13938_s0 + $0x14] sm:$0xc]  ;;  %v465_v46 = vsel %vm11475_vm5, %v456_v7, %v464_v27  ;;  %v10682_v50 = vld [vmem:[#allocation6 + $0x118] sm:$0xff]   ;;  %9875 = vmatprep.subr.bf16.mxu0 %v10681_v25 }
  0x81   :  { %v13992_v34 = vsel %vm11570_vm7, 4294967295, %v13991_v34  ;;  %vm13953_vm6 = vsmask.f32 7942  ;;  %v10661_v44 = vld [vmem:[#allocation2 + $0xc] ss:$36 sps:$4 sm:$0xff]   ;;  %v763_v49 = vshrl.u32 %v760_v42, 16  ;;  %v470_v51 = vsel %vm11434_vm9, %v465_v46, %v469_v15 }
  0x82   :  { %13993 = vst [vmem:[#allocation16_spill] sm:$0xff] %v13992_v34  ;;  %v10664_v45 = vld [vmem:[#allocation2 + $0x8] ss:$36 sps:$4 sm:$0xff]   ;;  %596 = vst [vmem:[#allocation2 + $0x4c] sm:$0xc] %v595_v32  ;;  %v613_v52 = vrot.slane %v609_v38, 4  ;;  %v620_v53 = vor.u32 %v618_v29, %v617_v40  ;;  %3237 = vmatprep.mubr.bf16.mxu1 %v10661_v44  ;;  %v752_v57 = vsel %vm11369_vm12, %v9069_v31, %v751_v41 }
  0x83   :  { %v598_v47 = vld [vmem:[%s13938_s0 + $0xc] sm:$0xc]  ;;  %v11587_v54 = vld [vmem:[%s13938_s0 + $0x18] sm:$0x3]  ;;  %v10691_v56 = vld [vmem:[#allocation6 + $0x160] sm:$0xff]   ;;  %v765_v33 = vrot.slane %v763_v49, 4  ;;  %3238 = vmatmul.mubr.bf16.vlgmr.msra.gmra.mrb[0].mxu1 %v10664_v45  ;;  %v612_v17 = vor.u32 %v610_v21, %v609_v38  ;;  %9876 = vmatpush3.bf16.msra.mxu0 %v10682_v50 }
  0x84   :  { %471 = vst [vmem:[#allocation2 + $0x54] sm:$0x7] %v470_v51  ;;  %v766_v36 = vshll.u32 %v760_v42, 16  ;;  %v772_v59 = vshll.u32 %v11587_v54, 16  ;;  %v10693_v39 = vld [vmem:[#allocation6 + $0x1c8] sm:$0xff]   ;;  %v621_v60 = vsel %vm11498_vm1, %v613_v52, %v620_v53  ;;  %v736_v2 = vrot.slane %v734_v9, 4  ;;  %9928 = vmatpush3.bf16.msra.mxu1 %v10690_v43  ;;  %9877 = vmatprep.subr.bf16.mxu0 %v10691_v56  ;;  %vm11635_vm14 = vmand %vm13954_vm4, %vm13953_vm6 }
  0x85   :  { %756 = vst [vmem:[#allocation2 + $0x74] sm:$0xc] %v752_v57  ;;  %v712_v55 = vld [vmem:[%s13938_s0 + $0x14] sm:$0x3]  ;;  %v715_v0 = vld [vmem:[#allocation2 + $0x90] sm:$0x3]  ;;  %9929 = vmatprep.subr.bf16.mxu1 %v10693_v39 }
  0x86   :  { %v11597_v3 = vrot.slane %v751_v41, 4  ;;  %v600_v5 = vld [vmem:[#allocation2 + $0x50] sm:$0xc]  ;;  %627 = vst [vmem:[#allocation2 + $0x78] sm:$0x3] %v621_v60  ;;  %v768_v6 = vrot.slane %v766_v36, 5  ;;  %v716_v8 = vsel %vm11570_vm7, %v712_v55, %v715_v0  ;;  %v737_v12 = vor.u32 %v736_v2, %v11536_v63 }
  0x87   :  { %v11599_v7 = vrot.slane %v772_v59, 5  ;;  %v742_v10 = vld [vmem:[#allocation2 + $0x94] sm:$0x3]  ;;  %v601_v11 = vsel %vm11508_vm15, %v598_v47, %v600_v5  ;;  %717 = vst [vmem:[#allocation2 + $0x90] sm:$0x3] %v716_v8  ;;  %v776_v15 = vshrl.u32 %v11587_v54, 16 }
  0x88   :  { %v873_v9 = vld [vmem:[%s13938_s0 + $0x14] sm:$0xc]  ;;  %v874_v13 = vld [vmem:[%s13938_s0 + $0x18] sm:$0x3]  ;;  %v10692_v1 = vld [vmem:[#allocation6 + $0x120] sm:$0xff]   ;;  %v769_v18 = vor.u32 %v768_v6, %v765_v33  ;;  %v738_v27 = vrot.slane %v737_v12, 4 }
  0x89   :  { %602 = vst [vmem:[#allocation2 + $0x50] sm:$0xc] %v601_v11  ;;  %v9074_v19 = vrot.slane %v873_v9, 9  ;;  %v879_v23 = vrot.slane %v874_v13, 5  ;;  %v891_v63 = vld [vmem:[%s13938_s0 + $0x14] sm:$0x8]  ;;  %9878 = vmatpush3.bf16.msra.mxu0 %v10692_v1 }
  0x8a   :  { %v892_v24 = vld [vmem:[%s13938_s0 + $0x18] sm:$0x7]  ;;  %v10665_v25 = vld [vmem:[#allocation2 + $0x4c] ss:$36 sps:$4 sm:$0xff]   ;;  %v770_v29 = vrot.slane %v769_v18, 4  ;;  %v894_v30 = vshrl.u32 %v891_v63, 16  ;;  %v743_v40 = vsel %vm11570_vm7, %v738_v27, %v742_v10 }
  0x8b   :  { %v10668_v26 = vld [vmem:[#allocation2 + $0x48] ss:$36 sps:$4 sm:$0xff]   ;;  %v880_v16 = vsel %vm11369_vm12, %v9074_v19, %v879_v23  ;;  %v881_v21 = vrot.slane %v879_v23, 4  ;;  %v1032_v31 = vld [vmem:[%s13938_s0 + $0x18] sm:$0x8]  ;;  %3157 = vmatprep.mubr.bf16.mxu0 %v10665_v25  ;;  %v897_v41 = vshll.u32 %v891_v63, 16 }
  0x8c   :  { %v10696_v32 = vld [vmem:[#allocation6 + $0x188] sm:$0xff]   ;;  %v624_v38 = vld [vmem:[#allocation2 + $0x54] sm:$0xc]  ;;  %v903_v42 = vshrl.u32 %v892_v24, 16  ;;  %v906_v43 = vshll.u32 %v892_v24, 16  ;;  %3158 = vmatmul.mubr.bf16.gmra.mrb[4].mxu0 %v10668_v26  ;;  %v775_v46 = vsel %vm11532_vm13, %v770_v29, %v11599_v7  ;;  %v13994_v47 = vmov 0 }
  0x8d   :  { %v10701_v44 = vld [vmem:[#allocation6 + $0x1d0] sm:$0xff]   ;;  %v625_v45 = vsel %vm11508_vm15, %v612_v17, %v624_v38  ;;  %744 = vst [vmem:[#allocation2 + $0x94] sm:$0x3] %v743_v40  ;;  %v13995_v47 = vsel %vm11635_vm14, 4294967295, %v13994_v47  ;;  %890 = vst [vmem:[#allocation2 + $0xb4] sm:$0x1] %v881_v21  ;;  %9930 = vmatpush3.bf16.msra.mxu1 %v10696_v32 }
  0x8e   :  { %13996 = vst [vmem:[#allocation17_spill] sm:$0xff] %v13995_v47  ;;  %v896_v49 = vrot.slane %v894_v30, 5  ;;  %v1033_v50 = vld [vmem:[%s13938_s0 + $0x1c] sm:$0x7]  ;;  %v9078_v51 = vrot.slane %v1032_v31, 10  ;;  %v899_v52 = vrot.slane %v897_v41, 6  ;;  %9931 = vmatprep.subr.bf16.mxu1 %v10701_v44 }
  0x8f   :  { %626 = vst [vmem:[#allocation2 + $0x54] sm:$0xc] %v625_v45  ;;  %783 = vst [vmem:[#allocation2 + $0x78] sm:$0xc] %v775_v46  ;;  %v905_v53 = vrot.slane %v903_v42, 5  ;;  %v908_v54 = vrot.slane %v906_v43, 6 }
  0x90   :  { %v1038_v56 = vrot.slane %v1033_v50, 6  ;;  %v1048_v57 = vld [vmem:[%s13938_s0 + $0x18] sm:$0x8]  ;;  %vm13997_vm0 = vsmask.f32 256  ;;  %vm13998_vm6 = vcmask 1040384   ;;  %v900_v0 = vor.u32 %v899_v52, %v896_v49 }
  0x91   :  { %vm11647_vm4 = vmand %vm13998_vm6, %vm13997_vm0  ;;  %v887_v36 = vld [vmem:[#allocation2 + $0x90] sm:$0xe]  ;;  %v1049_v59 = vld [vmem:[%s13938_s0 + $0x1c] sm:$0x7]  ;;  %v1051_v39 = vshrl.u32 %v1048_v57, 16  ;;  %v778_v60 = vrot.slane %v776_v15, 4  ;;  %v909_v2 = vor.u32 %v908_v54, %v905_v53 }
  0x92   :  { %v888_v55 = vsel %vm11635_vm14, %v880_v16, %v887_v36  ;;  %v1039_v5 = vsel %vm11413_vm8, %v9078_v51, %v1038_v56  ;;  %v1045_v6 = vld [vmem:[#allocation2 + $0xd8] sm:$0x1]  ;;  %v1040_v8 = vrot.slane %v1038_v56, 4  ;;  %v1056_v11 = vshrl.u32 %v1049_v59, 16  ;;  %v1068_v15 = vld [vmem:[#allocation2 + $0xdc] sm:$0x1] }
  0x93   :  { %889 = vst [vmem:[#allocation2 + $0x90] sm:$0xe] %v888_v55  ;;  %1043 = vst [vmem:[#allocation2 + $0xb4] sm:$0xe] %v1039_v5  ;;  %v9079_v10 = vrot.slane %v1051_v39, 10  ;;  %v1059_v12 = vshll.u32 %v1049_v59, 16  ;;  %v779_v18 = vor.u32 %v778_v60, %v11599_v7 }
  0x94   :  { %v757_v9 = vld [vmem:[#allocation2 + $0x98] sm:$0x3]  ;;  %vm13959_vm6 = vsmask.f32 7938  ;;  %v901_v13 = vrot.slane %v900_v0, 4  ;;  %v911_v1 = vrot.slane %v909_v2, 4  ;;  %v1046_v63 = vsel %vm11647_vm4, %v1040_v8, %v1045_v6 }
  0x95   :  { %v758_v17 = vsel %vm11570_vm7, %v11597_v3, %v757_v9  ;;  %v784_v19 = vld [vmem:[#allocation2 + $0x9c] sm:$0x3]  ;;  %v918_v23 = vld [vmem:[%s13938_s0 + $0x14] sm:$0x8]  ;;  %v1058_v24 = vrot.slane %v1056_v11, 6  ;;  %v1061_v25 = vrot.slane %v1059_v12, 7 }
  0x96   :  { %759 = vst [vmem:[#allocation2 + $0x98] sm:$0x3] %v758_v17  ;;  %v919_v26 = vld [vmem:[%s13938_s0 + $0x18] sm:$0x7]  ;;  %v9075_v27 = vrot.slane %v918_v23, 10  ;;  %v10702_v29 = vld [vmem:[#allocation6 + $0x168] sm:$0xff]   ;;  %v910_v3 = vsel %vm11348_vm10, %v901_v13, %v909_v2 }
  0x97   :  { %v914_v7 = vld [vmem:[#allocation2 + $0x94] sm:$0xe]  ;;  %917 = vst [vmem:[#allocation2 + $0xb8] sm:$0x1] %v911_v1  ;;  %1047 = vst [vmem:[#allocation2 + $0xd8] sm:$0x1] %v1046_v63  ;;  %v1062_v38 = vor.u32 %v1061_v25, %v1058_v24  ;;  %9879 = vmatprep.subr.bf16.mxu0 %v10702_v29 }
  0x98   :  { %v780_v16 = vrot.slane %v779_v18, 4  ;;  %v924_v21 = vrot.slane %v919_v26, 6  ;;  %v933_v30 = vld [vmem:[%s13938_s0 + $0x18] sm:$0x8]  ;;  %v915_v32 = vsel %vm11635_vm14, %v910_v3, %v914_v7  ;;  %v1064_v40 = vrot.slane %v1058_v24, 4  ;;  %v10704_v2 = vld [vmem:[#allocation6 + $0x128] sm:$0xff]  }
  0x99   :  { %v10670_v31 = vld [vmem:[#allocation2 + $0x54] ss:$36 sps:$4 sm:$0xff]   ;;  %v936_v41 = vshrl.u32 %v933_v30, 16  ;;  %916 = vst [vmem:[#allocation2 + $0x94] sm:$0xe] %v915_v32  ;;  %v939_v46 = vshll.u32 %v933_v30, 16  ;;  %v1063_v49 = vsel %vm11475_vm5, %v9079_v10, %v1062_v38  ;;  %9880 = vmatpush3.bf16.msra.mxu0 %v10704_v2 }
  0x9a   :  { %v10672_v42 = vld [vmem:[#allocation2 + $0x50] ss:$36 sps:$4 sm:$0xff]   ;;  %v785_v43 = vsel %vm11570_vm7, %v780_v16, %v784_v19  ;;  %v926_v44 = vrot.slane %v924_v21, 4  ;;  %v934_v45 = vld [vmem:[%s13938_s0 + $0x1c] sm:$0x7]  ;;  %3245 = vmatprep.mubr.bf16.mxu1 %v10670_v31  ;;  %v1069_v50 = vsel %vm11647_vm4, %v1064_v40, %v1068_v15  ;;  %v925_v54 = vsel %vm11413_vm8, %v9075_v27, %v924_v21 }
  0x9b   :  { %786 = vst [vmem:[#allocation2 + $0x9c] sm:$0x3] %v785_v43  ;;  %v938_v51 = vrot.slane %v936_v41, 5  ;;  %v945_v52 = vshrl.u32 %v934_v45, 16  ;;  %v1071_v53 = vld [vmem:[%s13938_s0 + $0x1c] sm:$0xf]  ;;  %3246 = vmatmul.mubr.bf16.gmra.mrb[4].mxu1 %v10672_v42 }
  0x9c   :  { %1067 = vst [vmem:[#allocation2 + $0xb8] sm:$0xe] %v1063_v49  ;;  %1070 = vst [vmem:[#allocation2 + $0xdc] sm:$0x1] %v1069_v50  ;;  %v941_v56 = vrot.slane %v939_v46, 6  ;;  %v948_v57 = vshll.u32 %v934_v45, 16 }
  0x9d   :  { %932 = vst [vmem:[#allocation2 + $0xbc] sm:$0x1] %v926_v44  ;;  %v1073_v36 = vrot.slane %v1071_v53, 7  ;;  %v1078_v59 = vld [vmem:[#allocation2 + $0xe0] sm:$0x1]  ;;  %v10703_v39 = vld [vmem:[#allocation6 + $0x190] sm:$0xff]  }
  0x9e   :  { %v947_v60 = vrot.slane %v945_v52, 5  ;;  %v1081_v55 = vld [vmem:[%s13938_s0 + $0x1c] sm:$0x8]  ;;  %v1082_v0 = vld [vmem:[%s13938_s0 + $0x20] sm:$0x7]  ;;  %v942_v6 = vor.u32 %v941_v56, %v938_v51  ;;  %v950_v8 = vrot.slane %v948_v57, 6  ;;  %9932 = vmatpush3.bf16.msra.mxu1 %v10703_v39 }
  0x9f   :  { %v929_v5 = vld [vmem:[#allocation2 + $0x98] sm:$0xe]  ;;  %v1074_v10 = vrot.slane %v1073_v36, 4  ;;  %1077 = vst [vmem:[#allocation2 + $0xbc] sm:$0xe] %v1073_v36  ;;  %v1084_v11 = vshrl.u32 %v1081_v55, 16 }
  0xa0   :  { %v10705_v12 = vld [vmem:[#allocation6 + $0x1d8] sm:$0xff]   ;;  %v930_v9 = vsel %vm11635_vm14, %v925_v54, %v929_v5  ;;  %v1089_v13 = vshrl.u32 %v1082_v0, 16  ;;  %v1092_v1 = vshll.u32 %v1082_v0, 16  ;;  %v943_v15 = vrot.slane %v942_v6, 4  ;;  %v1160_v25 = vld [vmem:[%s13938_s0 + $0x28] sm:$0xf] }
  0xa1   :  { %931 = vst [vmem:[#allocation2 + $0x98] sm:$0xe] %v930_v9  ;;  %v951_v17 = vor.u32 %v950_v8, %v947_v60  ;;  %v1079_v18 = vsel %vm11647_vm4, %v1074_v10, %v1078_v59  ;;  %v9080_v19 = vrot.slane %v1084_v11, 10  ;;  %vm14001_vm0 = vcmask 1043456   ;;  %9933 = vmatprep.subr.bf16.mxu1 %v10705_v12  ;;  %v10708_v26 = vld [vmem:[#allocation6 + $0x198] sm:$0xff]   ;;  %v10713_v16 = vld [vmem:[#allocation6 + $0x170] sm:$0xff]  }
  0xa2   :  { %vm11703_vm7 = vmand %vm14001_vm0, %vm13959_vm6  ;;  %1080 = vst [vmem:[#allocation2 + $0xe0] sm:$0x1] %v1079_v18  ;;  %v11707_v63 = vrot.slane %v1089_v13, 6  ;;  %v1094_v24 = vrot.slane %v1092_v1, 7  ;;  %v956_v3 = vld [vmem:[#allocation2 + $0x9c] sm:$0xe]  ;;  %9934 = vmatpush3.bf16.msra.mxu1 %v10708_v26  ;;  %9881 = vmatprep.subr.bf16.mxu0 %v10713_v16  ;;  %vm14004_vm0 = vnez %v13992_v34 }
  0xa3   :  { %v952_v27 = vsel %vm11348_vm10, %v943_v15, %v951_v17  ;;  %v953_v29 = vrot.slane %v951_v17, 4  ;;  %v1163_v7 = vld [vmem:[#allocation2 + $0xd8] sm:$0xf]  ;;  %v10677_v38 = vld [vmem:[#allocation2 + $0x90] ss:$36 sps:$4 sm:$0xff]   ;;  %v10714_v46 = vld [vmem:[#allocation6 + $0x1e0] sm:$0xff]  }
  0xa4   :  { %v10674_v21 = vld [vmem:[#allocation2 + $0x94] ss:$36 sps:$4 sm:$0xff]   ;;  %v957_v30 = vsel %vm11635_vm14, %v952_v27, %v956_v3  ;;  %v1095_v31 = vor.u32 %v1094_v24, %v11707_v63  ;;  %v1164_v32 = vsel %vm11703_vm7, %v1160_v25, %v1163_v7  ;;  %v1166_v40 = vld [vmem:[%s13938_s0 + $0x28] sm:$0xe]  ;;  %v1167_v41 = vld [vmem:[%s13938_s0 + $0x2c] sm:$0x1]  ;;  %9935 = vmatprep.subr.bf16.mxu1 %v10714_v46 }
  0xa5   :  { %958 = vst [vmem:[#allocation2 + $0x9c] sm:$0xe] %v957_v30  ;;  %959 = vst [vmem:[#allocation2 + $0xc0] sm:$0x1] %v953_v29  ;;  %3165 = vmatprep.mubr.bf16.mxu0 %v10674_v21  ;;  %v1169_v43 = vshrl.u32 %v1166_v40, 16  ;;  %v1172_v44 = vshll.u32 %v1166_v40, 16 }
  0xa6   :  { %1165 = vst [vmem:[#allocation2 + $0xd8] sm:$0xf] %v1164_v32  ;;  %v1096_v42 = vsel %vm11475_vm5, %v9080_v19, %v1095_v31  ;;  %v1178_v45 = vshll.u32 %v1167_v41, 16  ;;  %3166 = vmatmul.mubr.bf16.gmra.mrb[8].mxu0 %v10677_v38  ;;  %v1302_v49 = vld [vmem:[%s13938_s0 + $0x2c] sm:$0xe]  ;;  %v1097_v51 = vrot.slane %v11707_v63, 4 }
  0xa7   :  { %1100 = vst [vmem:[#allocation2 + $0xc0] sm:$0xe] %v1096_v42  ;;  %v1303_v50 = vld [vmem:[%s13938_s0 + $0x30] sm:$0x1]  ;;  %v1171_v52 = vrot.slane %v1169_v43, 4  ;;  %v1174_v53 = vrot.slane %v1172_v44, 5 }
  0xa8   :  { %v1180_v54 = vrot.slane %v1178_v45, 5  ;;  %v9085_v56 = vrot.slane %v1302_v49, 9  ;;  %v1311_v57 = vld [vmem:[#allocation2 + $0xfc] sm:$0xf]  ;;  %v1308_v36 = vrot.slane %v1303_v50, 5  ;;  %v10715_v60 = vld [vmem:[#allocation6 + $0x130] sm:$0xff]  }
  0xa9   :  { %v1314_v59 = vld [vmem:[%s13938_s0 + $0x2c] sm:$0xe]  ;;  %v1315_v39 = vld [vmem:[%s13938_s0 + $0x30] sm:$0x1]  ;;  %v1175_v55 = vor.u32 %v1174_v53, %v1171_v52  ;;  %v10716_v6 = vld [vmem:[#allocation6 + $0x1a0] sm:$0xff]   ;;  %9882 = vmatpush3.bf16.msra.mxu0 %v10715_v60 }
  0xaa   :  { %v1317_v0 = vshrl.u32 %v1314_v59, 16  ;;  %v1320_v2 = vshll.u32 %v1314_v59, 16  ;;  %v1326_v5 = vshrl.u32 %v1315_v39, 16  ;;  %v1183_v8 = vld [vmem:[#allocation2 + $0xdc] sm:$0xf]  ;;  %v1309_v10 = vsel %vm11369_vm12, %v9085_v56, %v1308_v36  ;;  %v10717_v9 = vld [vmem:[#allocation6 + $0x1e8] sm:$0xff]   ;;  %9936 = vmatpush3.bf16.msra.mxu1 %v10716_v6 }
  0xab   :  { %v1329_v11 = vshll.u32 %v1315_v39, 16  ;;  %v11745_v12 = vld [vmem:[%s13938_s0 + $0x30] sm:$0xe]  ;;  %v1176_v13 = vrot.slane %v1175_v55, 4  ;;  %v1312_v1 = vsel %vm11314_vm2, %v1309_v10, %v1311_v57  ;;  %v1101_v24 = vld [vmem:[#allocation2 + $0xe4] sm:$0x1]  ;;  %9937 = vmatprep.subr.bf16.mxu1 %v10717_v9 }
  0xac   :  { %v1319_v15 = vrot.slane %v1317_v0, 5  ;;  %v1322_v17 = vrot.slane %v1320_v2, 6  ;;  %v11752_v18 = vld [vmem:[%s13938_s0 + $0x30] sm:$0xc]  ;;  %1313 = vst [vmem:[#allocation2 + $0xfc] sm:$0xf] %v1312_v1  ;;  %v1102_v7 = vsel %vm11647_vm4, %v1097_v51, %v1101_v24 }
  0xad   :  { %v1328_v19 = vrot.slane %v1326_v5, 5  ;;  %v1331_v63 = vrot.slane %v1329_v11, 6  ;;  %v10680_v26 = vld [vmem:[#allocation2 + $0x98] ss:$36 sps:$4 sm:$0xff]   ;;  %v1181_v27 = vsel %vm11532_vm13, %v1176_v13, %v1180_v54  ;;  %v1335_v3 = vld [vmem:[#allocation2 + $0x100] sm:$0xf] }
  0xae   :  { %v10678_v25 = vld [vmem:[#allocation2 + $0x9c] ss:$36 sps:$4 sm:$0xff]   ;;  %v1323_v29 = vor.u32 %v1322_v17, %v1319_v15  ;;  %v1184_v16 = vsel %vm11703_vm7, %v1181_v27, %v1183_v8  ;;  %v1462_v30 = vrot.slane %v11745_v12, 6  ;;  %v1475_v31 = vshll.u32 %v11752_v18, 16  ;;  %1103 = vst [vmem:[#allocation2 + $0xe4] sm:$0x1] %v1102_v7 }
  0xaf   :  { %v1332_v21 = vor.u32 %v1331_v63, %v1328_v19  ;;  %v1186_v32 = vld [vmem:[%s13938_s0 + $0x28] sm:$0xe]  ;;  %v1187_v38 = vld [vmem:[%s13938_s0 + $0x2c] sm:$0x1]  ;;  %3253 = vmatprep.mubr.bf16.mxu1 %v10678_v25  ;;  %1185 = vst [vmem:[#allocation2 + $0xdc] sm:$0xf] %v1184_v16 }
  0xb0   :  { %v1324_v40 = vrot.slane %v1323_v29, 4  ;;  %v9081_v41 = vrot.slane %v1186_v32, 9  ;;  %v1192_v42 = vrot.slane %v1187_v38, 5  ;;  %v1195_v43 = vld [vmem:[#allocation2 + $0xe0] sm:$0xf]  ;;  %v1478_v44 = vshrl.u32 %v11752_v18, 16  ;;  %3254 = vmatmul.mubr.bf16.gmra.mrb[8].mxu1 %v10680_v26 }
  0xb1   :  { %v1198_v45 = vld [vmem:[%s13938_s0 + $0x2c] sm:$0xe]  ;;  %v1199_v46 = vld [vmem:[%s13938_s0 + $0x30] sm:$0x1]  ;;  %v1347_v56 = vld [vmem:[#allocation2 + $0x104] sm:$0xf] }
  0xb2   :  { %v1338_v49 = vld [vmem:[%s13938_s0 + $0x2c] sm:$0xc]  ;;  %v1333_v50 = vsel %vm11348_vm10, %v1324_v40, %v1332_v21  ;;  %v1193_v51 = vsel %vm11369_vm12, %v9081_v41, %v1192_v42  ;;  %v1201_v52 = vshrl.u32 %v1198_v45, 16  ;;  %v1204_v53 = vshll.u32 %v1198_v45, 16  ;;  %v1339_v54 = vld [vmem:[%s13938_s0 + $0x30] sm:$0x3] }
  0xb3   :  { %v1336_v57 = vsel %vm11314_vm2, %v1333_v50, %v1335_v3  ;;  %v1196_v36 = vsel %vm11703_vm7, %v1193_v51, %v1195_v43  ;;  %v1210_v59 = vshll.u32 %v1199_v46, 16  ;;  %v9086_v39 = vrot.slane %v1338_v49, 10  ;;  %v1350_v60 = vld [vmem:[%s13938_s0 + $0x30] sm:$0xe]  ;;  %v1351_v55 = vld [vmem:[%s13938_s0 + $0x34] sm:$0x1] }
  0xb4   :  { %1337 = vst [vmem:[#allocation2 + $0x100] sm:$0xf] %v1336_v57  ;;  %v1468_v0 = vld [vmem:[#allocation2 + $0xfc] sm:$0x8]  ;;  %1197 = vst [vmem:[#allocation2 + $0xe0] sm:$0xf] %v1196_v36 }
  0xb5   :  { %v1203_v2 = vrot.slane %v1201_v52, 4  ;;  %v1206_v5 = vrot.slane %v1204_v53, 5  ;;  %v1344_v6 = vrot.slane %v1339_v54, 6  ;;  %v1353_v8 = vshrl.u32 %v1350_v60, 16  ;;  %v10719_v13 = vld [vmem:[#allocation6 + $0x1a8] sm:$0xff]   ;;  %v10722_v21 = vld [vmem:[#allocation6 + $0x178] sm:$0xff]  }
  0xb6   :  { %v1469_v10 = vsel %vm11356_vm11, %v1462_v30, %v1468_v0  ;;  %v1212_v11 = vrot.slane %v1210_v59, 5  ;;  %v1356_v12 = vshll.u32 %v1350_v60, 16  ;;  %v1362_v9 = vshrl.u32 %v1351_v55, 16  ;;  %v1215_v15 = vld [vmem:[#allocation2 + $0xe4] sm:$0xf]  ;;  %9938 = vmatpush3.bf16.msra.mxu1 %v10719_v13  ;;  %9883 = vmatprep.subr.bf16.mxu0 %v10722_v21 }
  0xb7   :  { %1470 = vst [vmem:[#allocation2 + $0xfc] sm:$0x8] %v1469_v10  ;;  %v1207_v1 = vor.u32 %v1206_v5, %v1203_v2  ;;  %v1345_v17 = vsel %vm11413_vm8, %v9086_v39, %v1344_v6  ;;  %v1355_v18 = vrot.slane %v1353_v8, 5  ;;  %v1365_v19 = vshll.u32 %v1351_v55, 16  ;;  %v1498_v63 = vld [vmem:[%s13938_s0 + $0x30] sm:$0xc] }
  0xb8   :  { %v1348_v24 = vsel %vm11314_vm2, %v1345_v17, %v1347_v56  ;;  %v1358_v25 = vrot.slane %v1356_v12, 6  ;;  %v1364_v26 = vrot.slane %v1362_v9, 5  ;;  %v11807_v27 = vld [vmem:[%s13938_s0 + $0x34] sm:$0xc]  ;;  %v1480_v29 = vrot.slane %v1478_v44, 6  ;;  %v10724_v39 = vld [vmem:[#allocation6 + $0x138] sm:$0xff]  }
  0xb9   :  { %v1477_v3 = vrot.slane %v1475_v31, 7  ;;  %v1208_v7 = vrot.slane %v1207_v1, 4  ;;  %1349 = vst [vmem:[#allocation2 + $0x104] sm:$0xf] %v1348_v24  ;;  %v1367_v16 = vrot.slane %v1365_v19, 6  ;;  %v1502_v42 = vrot.slane %v1498_v63, 7  ;;  %9884 = vmatpush3.bf16.msra.mxu0 %v10724_v39 }
  0xba   :  { %v1359_v32 = vor.u32 %v1358_v25, %v1355_v18  ;;  %v1371_v38 = vld [vmem:[#allocation2 + $0x108] sm:$0xf]  ;;  %v1463_v43 = vrot.slane %v1462_v30, 4  ;;  %v1515_v31 = vshll.u32 %v11807_v27, 16  ;;  %v1459_v30 = vld [vmem:[%s13938_s0 + $0x34] sm:$0x1] }
  0xbb   :  { %v1213_v40 = vsel %vm11532_vm13, %v1208_v7, %v1212_v11  ;;  %v1368_v41 = vor.u32 %v1367_v16, %v1364_v26  ;;  %v1494_v45 = vld [vmem:[#allocation2 + $0x100] sm:$0x8]  ;;  %v1481_v49 = vor.u32 %v1480_v29, %v1477_v3  ;;  %v1473_v52 = vld [vmem:[%s13938_s0 + $0x34] sm:$0x3]  ;;  %v1618_v53 = vld [vmem:[%s13938_s0 + $0x34] sm:$0xc] }
  0xbc   :  { %v1216_v46 = vsel %vm11703_vm7, %v1213_v40, %v1215_v15  ;;  %v1360_v44 = vrot.slane %v1359_v32, 4  ;;  %v1495_v50 = vsel %vm11356_vm11, %v1477_v3, %v1494_v45  ;;  %v1464_v56 = vrot.slane %v1459_v30, 6  ;;  %v1619_v59 = vld [vmem:[%s13938_s0 + $0x38] sm:$0x3]  ;;  %v1632_v12 = vld [vmem:[%s13938_s0 + $0x34] sm:$0xc] }
  0xbd   :  { %1217 = vst [vmem:[#allocation2 + $0xe4] sm:$0xf] %v1216_v46  ;;  %1496 = vst [vmem:[#allocation2 + $0x100] sm:$0x8] %v1495_v50  ;;  %v1484_v57 = vshrl.u32 %v1473_v52, 16  ;;  %v1487_v36 = vshll.u32 %v1473_v52, 16 }
  0xbe   :  { %v1369_v51 = vsel %vm11348_vm10, %v1360_v44, %v1368_v41  ;;  %v11832_v55 = vrot.slane %v1515_v31, 7  ;;  %v1482_v0 = vrot.slane %v1481_v49, 4  ;;  %v1622_v2 = vrot.slane %v1618_v53, 7  ;;  %v1633_v9 = vld [vmem:[%s13938_s0 + $0x38] sm:$0x3] }
  0xbf   :  { %v1372_v54 = vsel %vm11314_vm2, %v1369_v51, %v1371_v38  ;;  %v1624_v5 = vrot.slane %v1619_v59, 7  ;;  %v1465_v8 = vsel %vm11413_vm8, %v1463_v43, %v1464_v56  ;;  %v1486_v10 = vrot.slane %v1484_v57, 6  ;;  %v1629_v1 = vld [vmem:[#allocation2 + $0x144] sm:$0x7]  ;;  %v1760_v24 = vld [vmem:[%s13938_s0 + $0x38] sm:$0x8] }
  0xc0   :  { %1373 = vst [vmem:[#allocation2 + $0x108] sm:$0xf] %v1372_v54  ;;  %v1508_v60 = vld [vmem:[#allocation2 + $0x104] sm:$0x8]  ;;  %v1489_v11 = vrot.slane %v1487_v36, 7  ;;  %v1623_v13 = vrot.slane %v1622_v2, 4 }
  0xc1   :  { %v1509_v6 = vsel %vm11356_vm11, %v1502_v42, %v1508_v60  ;;  %1471 = vst [vmem:[#allocation2 + $0x120] sm:$0x7] %v1465_v8  ;;  %1628 = vst [vmem:[#allocation2 + $0x120] sm:$0x8] %v1622_v2  ;;  %v1635_v15 = vshrl.u32 %v1632_v12, 16  ;;  %v1638_v17 = vshll.u32 %v1632_v12, 16 }
  0xc2   :  { %1510 = vst [vmem:[#allocation2 + $0x104] sm:$0x8] %v1509_v6  ;;  %v1643_v18 = vshrl.u32 %v1633_v9, 16  ;;  %v1490_v19 = vor.u32 %v1489_v11, %v1486_v10  ;;  %v1646_v63 = vshll.u32 %v1633_v9, 16  ;;  %v1503_v25 = vrot.slane %v1502_v42, 4  ;;  %v10725_v9 = vld [vmem:[#allocation6 + $0x1f0] sm:$0xff]  }
  0xc3   :  { %v1518_v26 = vshrl.u32 %v11807_v27, 16  ;;  %v1625_v29 = vsel %vm11484_vm3, %v1623_v13, %v1624_v5  ;;  %v1637_v3 = vrot.slane %v1635_v15, 7  ;;  %v1653_v16 = vld [vmem:[#allocation2 + $0x148] sm:$0x7]  ;;  %v11853_v21 = vld [vmem:[%s13938_s0 + $0x3c] sm:$0x7]  ;;  %9939 = vmatprep.subr.bf16.mxu1 %v10725_v9 }
  0xc4   :  { %v1645_v7 = vrot.slane %v1643_v18, 7  ;;  %v1763_v32 = vshrl.u32 %v1760_v24, 16  ;;  %v10683_v38 = vld [vmem:[#allocation2 + $0xdc] ss:$36 sps:$4 sm:$0xff]   ;;  %v1491_v41 = vsel %vm11475_vm5, %v1482_v0, %v1490_v19  ;;  %v1630_v27 = vsel %vm11434_vm9, %v1625_v29, %v1629_v1  ;;  %v1499_v51 = vld [vmem:[%s13938_s0 + $0x34] sm:$0x3] }
  0xc5   :  { %v10685_v40 = vld [vmem:[#allocation2 + $0xd8] ss:$36 sps:$4 sm:$0xff]   ;;  %v1766_v42 = vshll.u32 %v1760_v24, 16  ;;  %1497 = vst [vmem:[#allocation2 + $0x124] sm:$0x7] %v1491_v41  ;;  %v1640_v43 = vor.u32 %v1638_v17, %v1637_v3  ;;  %v1641_v45 = vrot.slane %v1637_v3, 4  ;;  %3173 = vmatprep.mubr.bf16.mxu0 %v10683_v38 }
  0xc6   :  { %1631 = vst [vmem:[#allocation2 + $0x144] sm:$0x7] %v1630_v27  ;;  %v1648_v46 = vor.u32 %v1646_v63, %v1645_v7  ;;  %v1765_v44 = vrot.slane %v1763_v32, 4  ;;  %v1772_v50 = vshll.u32 %v11853_v21, 16  ;;  %3174 = vmatmul.mubr.bf16.gmra.mrb[12].mxu0 %v10685_v40  ;;  %v1504_v53 = vrot.slane %v1499_v51, 7 }
  0xc7   :  { %v1534_v31 = vld [vmem:[#allocation2 + $0x108] sm:$0x8]  ;;  %v1768_v49 = vrot.slane %v1766_v42, 5  ;;  %1652 = vst [vmem:[#allocation2 + $0x124] sm:$0x8] %v1640_v43  ;;  %v1520_v56 = vrot.slane %v1518_v26, 6 }
  0xc8   :  { %v1535_v30 = vsel %vm11356_vm11, %v11832_v55, %v1534_v31  ;;  %v1649_v52 = vsel %vm11498_vm1, %v1641_v45, %v1648_v46  ;;  %v1513_v54 = vld [vmem:[%s13938_s0 + $0x38] sm:$0x3]  ;;  %v1656_v57 = vld [vmem:[%s13938_s0 + $0x34] sm:$0x8]  ;;  %v11876_v39 = vrot.slane %v1772_v50, 5  ;;  %v1505_v5 = vsel %vm11484_vm3, %v1503_v25, %v1504_v53 }
  0xc9   :  { %1536 = vst [vmem:[#allocation2 + $0x108] sm:$0x8] %v1535_v30  ;;  %v1654_v36 = vsel %vm11434_vm9, %v1649_v52, %v1653_v16  ;;  %v1769_v59 = vor.u32 %v1768_v49, %v1765_v44  ;;  %v1524_v60 = vshrl.u32 %v1513_v54, 16  ;;  %v1657_v0 = vld [vmem:[%s13938_s0 + $0x38] sm:$0x7]  ;;  %v1521_v6 = vor.u32 %v1520_v56, %v11832_v55 }
  0xca   :  { %1658 = vst [vmem:[#allocation2 + $0x128] sm:$0x8] %v1656_v57  ;;  %v1659_v2 = vld [vmem:[#allocation2 + $0x14c] sm:$0x7]  ;;  %1655 = vst [vmem:[#allocation2 + $0x148] sm:$0x7] %v1654_v36 }
  0xcb   :  { %v1527_v8 = vshll.u32 %v1513_v54, 16  ;;  %v1660_v10 = vsel %vm11434_vm9, %v1657_v0, %v1659_v2  ;;  %v1662_v11 = vld [vmem:[%s13938_s0 + $0x38] sm:$0xc]  ;;  %v1663_v12 = vld [vmem:[%s13938_s0 + $0x3c] sm:$0x3]  ;;  %v1770_v1 = vrot.slane %v1769_v59, 4 }
  0xcc   :  { %v1754_v13 = vld [vmem:[%s13938_s0 + $0x38] sm:$0xc]  ;;  %1511 = vst [vmem:[#allocation2 + $0x128] sm:$0x7] %v1505_v5  ;;  %v1526_v55 = vrot.slane %v1524_v60, 6  ;;  %v1665_v15 = vshrl.u32 %v1662_v11, 16 }
  0xcd   :  { %1661 = vst [vmem:[#allocation2 + $0x14c] sm:$0x7] %v1660_v10  ;;  %v1668_v17 = vshll.u32 %v1662_v11, 16  ;;  %v1522_v18 = vrot.slane %v1521_v6, 4  ;;  %v1529_v19 = vrot.slane %v1527_v8, 7  ;;  %v1673_v63 = vshrl.u32 %v1663_v12, 16 }
  0xce   :  { %v1676_v24 = vshll.u32 %v1663_v12, 16  ;;  %v1787_v25 = vld [vmem:[%s13938_s0 + $0x38] sm:$0x8]  ;;  %v1756_v26 = vld [vmem:[#allocation2 + $0x144] sm:$0xc]  ;;  %v1775_v29 = vsel %vm11532_vm13, %v1770_v1, %v11876_v39  ;;  %v1667_v3 = vrot.slane %v1665_v15, 7 }
  0xcf   :  { %v11904_v7 = vld [vmem:[%s13938_s0 + $0x3c] sm:$0x7]  ;;  %v9094_v16 = vrot.slane %v1787_v25, 9  ;;  %v1757_v32 = vsel %vm11508_vm15, %v1754_v13, %v1756_v26  ;;  %v1530_v38 = vor.u32 %v1529_v19, %v1526_v55  ;;  %v1675_v40 = vrot.slane %v1673_v63, 7  ;;  %v1683_v41 = vld [vmem:[#allocation2 + $0x150] sm:$0x7] }
  0xd0   :  { %v1793_v27 = vrot.slane %v11904_v7, 5  ;;  %v1802_v42 = vld [vmem:[%s13938_s0 + $0x3c] sm:$0x8]  ;;  %v11915_v43 = vld [vmem:[%s13938_s0 + $0x40] sm:$0x7]  ;;  %v1670_v45 = vor.u32 %v1668_v17, %v1667_v3  ;;  %v1671_v46 = vrot.slane %v1667_v3, 4 }
  0xd1   :  { %1758 = vst [vmem:[#allocation2 + $0x144] sm:$0xc] %v1757_v32  ;;  %v1805_v44 = vshrl.u32 %v1802_v42, 16  ;;  %v1808_v31 = vshll.u32 %v1802_v42, 16  ;;  %v10686_v49 = vld [vmem:[#allocation2 + $0xe4] ss:$36 sps:$4 sm:$0xff]   ;;  %v1531_v51 = vsel %vm11475_vm5, %v1522_v18, %v1530_v38  ;;  %v1678_v30 = vor.u32 %v1676_v24, %v1675_v40 }
  0xd2   :  { %v10688_v50 = vld [vmem:[#allocation2 + $0xe0] ss:$36 sps:$4 sm:$0xff]   ;;  %v1794_v52 = vsel %vm11369_vm12, %v9094_v16, %v1793_v27  ;;  %v1814_v53 = vshll.u32 %v11915_v43, 16  ;;  %v1783_v54 = vld [vmem:[#allocation2 + $0x148] sm:$0xc]  ;;  %3261 = vmatprep.mubr.bf16.mxu1 %v10686_v49  ;;  %v1776_v2 = vshrl.u32 %v11853_v21, 16 }
  0xd3   :  { %1537 = vst [vmem:[#allocation2 + $0x12c] sm:$0x7] %v1531_v51  ;;  %1682 = vst [vmem:[#allocation2 + $0x12c] sm:$0x8] %v1670_v45  ;;  %v1807_v56 = vrot.slane %v1805_v44, 4  ;;  %v1810_v57 = vrot.slane %v1808_v31, 5  ;;  %v1784_v36 = vsel %vm11508_vm15, %v1775_v29, %v1783_v54  ;;  %v1679_v59 = vsel %vm11498_vm1, %v1671_v46, %v1678_v30  ;;  %3262 = vmatmul.mubr.bf16.gmra.mrb[12].mxu1 %v10688_v50 }
  0xd4   :  { %v1798_v60 = vld [vmem:[#allocation2 + $0x14c] sm:$0xc]  ;;  %v11928_v0 = vrot.slane %v1814_v53, 5  ;;  %1785 = vst [vmem:[#allocation2 + $0x148] sm:$0xc] %v1784_v36  ;;  %v1684_v5 = vsel %vm11434_vm9, %v1679_v59, %v1683_v41  ;;  %v1778_v12 = vrot.slane %v1776_v2, 4 }
  0xd5   :  { %v1799_v6 = vsel %vm11508_vm15, %v1794_v52, %v1798_v60  ;;  %v1811_v8 = vor.u32 %v1810_v57, %v1807_v56  ;;  %1685 = vst [vmem:[#allocation2 + $0x150] sm:$0x7] %v1684_v5  ;;  %v1755_v11 = vld [vmem:[%s13938_s0 + $0x3c] sm:$0x3]  ;;  %v1901_v21 = vld [vmem:[%s13938_s0 + $0x3c] sm:$0x8] }
  0xd6   :  { %1800 = vst [vmem:[#allocation2 + $0x14c] sm:$0xc] %v1799_v6  ;;  %1759 = vst [vmem:[#allocation2 + $0x168] sm:$0x3] %v1755_v11  ;;  %v1902_v9 = vld [vmem:[%s13938_s0 + $0x40] sm:$0x7]  ;;  %v1779_v13 = vor.u32 %v1778_v12, %v11876_v39 }
  0xd7   :  { %v1812_v10 = vrot.slane %v1811_v8, 4  ;;  %v9097_v1 = vrot.slane %v1901_v21, 9  ;;  %v1907_v55 = vrot.slane %v1902_v9, 5  ;;  %v1916_v15 = vld [vmem:[%s13938_s0 + $0x3c] sm:$0x8]  ;;  %v10726_v31 = vld [vmem:[#allocation6 + $0x1b0] sm:$0xff]  }
  0xd8   :  { %v1917_v17 = vld [vmem:[%s13938_s0 + $0x40] sm:$0x7]  ;;  %v1913_v18 = vld [vmem:[#allocation2 + $0x18c] sm:$0x3]  ;;  %v1919_v19 = vshrl.u32 %v1916_v15, 16  ;;  %v1780_v26 = vrot.slane %v1779_v13, 4  ;;  %9940 = vmatpush3.bf16.msra.mxu1 %v10726_v31 }
  0xd9   :  { %v1924_v63 = vshrl.u32 %v1917_v17, 16  ;;  %v1927_v24 = vshll.u32 %v1917_v17, 16  ;;  %v1817_v25 = vsel %vm11532_vm13, %v1812_v10, %v11928_v0  ;;  %v1908_v39 = vsel %vm11369_vm12, %v9097_v1, %v1907_v55  ;;  %v2038_v3 = vld [vmem:[%s13938_s0 + $0x40] sm:$0x8]  ;;  %v2039_v16 = vld [vmem:[%s13938_s0 + $0x44] sm:$0x7] }
  0xda   :  { %v1909_v29 = vrot.slane %v1907_v55, 4  ;;  %v10697_v38 = vld [vmem:[#allocation2 + $0x120] ss:$36 sps:$4 sm:$0xff]   ;;  %1912 = vst [vmem:[#allocation2 + $0x168] sm:$0xc] %v1908_v39  ;;  %v9098_v40 = vrot.slane %v1919_v19, 9 }
  0xdb   :  { %v10694_v32 = vld [vmem:[#allocation2 + $0x124] ss:$36 sps:$4 sm:$0xff]   ;;  %1786 = vst [vmem:[#allocation2 + $0x16c] sm:$0x3] %v1780_v26  ;;  %v1926_v45 = vrot.slane %v1924_v63, 5  ;;  %v1929_v46 = vrot.slane %v1927_v24, 6 }
  0xdc   :  { %v1825_v41 = vld [vmem:[#allocation2 + $0x150] sm:$0xc]  ;;  %v1914_v42 = vsel %vm14004_vm0, %v1909_v29, %v1913_v18  ;;  %v9100_v44 = vrot.slane %v2038_v3, 10  ;;  %3181 = vmatprep.mubr.bf16.mxu0 %v10694_v32  ;;  %v2044_v50 = vrot.slane %v2039_v16, 6  ;;  %v2053_v51 = vld [vmem:[%s13938_s0 + $0x44] sm:$0xf] }
  0xdd   :  { %v1826_v49 = vsel %vm11508_vm15, %v1817_v25, %v1825_v41  ;;  %1915 = vst [vmem:[#allocation2 + $0x18c] sm:$0x3] %v1914_v42  ;;  %v1795_v30 = vrot.slane %v1793_v27, 4  ;;  %3182 = vmatmul.mubr.bf16.gmra.mrb[16].mxu0 %v10697_v38  ;;  %v1930_v52 = vor.u32 %v1929_v46, %v1926_v45  ;;  %v2055_v53 = vshrl.u32 %v2053_v51, 16  ;;  %v10727_v57 = vld [vmem:[#allocation6 + $0x1f8] sm:$0xff]  }
  0xde   :  { %1827 = vst [vmem:[#allocation2 + $0x150] sm:$0xc] %v1826_v49  ;;  %v2058_v54 = vshll.u32 %v2053_v51, 16  ;;  %v1818_v56 = vshrl.u32 %v11915_v43, 16  ;;  %v1936_v36 = vld [vmem:[#allocation2 + $0x190] sm:$0x3]  ;;  %9941 = vmatprep.subr.bf16.mxu1 %v10727_v57  ;;  %v2045_v13 = vsel %vm11413_vm8, %v9100_v44, %v2044_v50 }
  0xdf   :  { %1801 = vst [vmem:[#allocation2 + $0x170] sm:$0x3] %v1795_v30  ;;  %v1939_v59 = vld [vmem:[%s13938_s0 + $0x40] sm:$0xf]  ;;  %v1931_v27 = vsel %vm11348_vm10, %v9098_v40, %v1930_v52  ;;  %v1932_v60 = vrot.slane %v1930_v52, 4  ;;  %v2057_v2 = vrot.slane %v2055_v53, 6 }
  0xe0   :  { %v1949_v7 = vld [vmem:[%s13938_s0 + $0x40] sm:$0x8]  ;;  %v2060_v5 = vrot.slane %v2058_v54, 7  ;;  %v1950_v43 = vld [vmem:[%s13938_s0 + $0x44] sm:$0x7]  ;;  %v1820_v8 = vrot.slane %v1818_v56, 4 }
  0xe1   :  { %v10730_v6 = vld [vmem:[#allocation6 + $0x1b8] sm:$0xff]   ;;  %1935 = vst [vmem:[#allocation2 + $0x16c] sm:$0xc] %v1931_v27  ;;  %v1941_v10 = vrot.slane %v1939_v59, 6  ;;  %v1946_v11 = vld [vmem:[#allocation2 + $0x194] sm:$0x3]  ;;  %v1937_v9 = vsel %vm14004_vm0, %v1932_v60, %v1936_v36 }
  0xe2   :  { %v1952_v12 = vshrl.u32 %v1949_v7, 16  ;;  %v1957_v21 = vshrl.u32 %v1950_v43, 16  ;;  %v1960_v1 = vshll.u32 %v1950_v43, 16  ;;  %v2069_v55 = vld [vmem:[%s13938_s0 + $0x44] sm:$0xf]  ;;  %v2046_v17 = vrot.slane %v2044_v50, 4  ;;  %9942 = vmatpush3.bf16.msra.mxu1 %v10730_v6 }
  0xe3   :  { %v2079_v15 = vld [vmem:[%s13938_s0 + $0x48] sm:$0xf]  ;;  %1938 = vst [vmem:[#allocation2 + $0x190] sm:$0x3] %v1937_v9  ;;  %v1821_v18 = vor.u32 %v1820_v8, %v11928_v0  ;;  %v1942_v19 = vrot.slane %v1941_v10, 4  ;;  %v2071_v39 = vrot.slane %v2069_v55, 7  ;;  %v2061_v44 = vor.u32 %v2060_v5, %v2057_v2 }
  0xe4   :  { %1945 = vst [vmem:[#allocation2 + $0x170] sm:$0xc] %v1941_v10  ;;  %v9099_v63 = vrot.slane %v1952_v12, 9  ;;  %v1959_v24 = vrot.slane %v1957_v21, 5  ;;  %v2049_v25 = vld [vmem:[#allocation2 + $0x18c] sm:$0xe] }
  0xe5   :  { %v1962_v26 = vrot.slane %v1960_v1, 6  ;;  %v2081_v29 = vshrl.u32 %v2079_v15, 16  ;;  %v2084_v3 = vshll.u32 %v2079_v15, 16  ;;  %2052 = vst [vmem:[#allocation2 + $0x1b0] sm:$0x1] %v2046_v17  ;;  %v2050_v38 = vsel %vm11635_vm14, %v2045_v13, %v2049_v25 }
  0xe6   :  { %v10698_v16 = vld [vmem:[#allocation2 + $0x12c] ss:$36 sps:$4 sm:$0xff]   ;;  %v1822_v40 = vrot.slane %v1821_v18, 4  ;;  %v1947_v41 = vsel %vm14004_vm0, %v1942_v19, %v1946_v11  ;;  %v1969_v0 = vld [vmem:[#allocation2 + $0x198] sm:$0x3]  ;;  %v2062_v51 = vrot.slane %v2061_v44, 4 }
  0xe7   :  { %v10700_v32 = vld [vmem:[#allocation2 + $0x128] ss:$36 sps:$4 sm:$0xff]   ;;  %2051 = vst [vmem:[#allocation2 + $0x18c] sm:$0xe] %v2050_v38  ;;  %1948 = vst [vmem:[#allocation2 + $0x194] sm:$0x3] %v1947_v41  ;;  %v1963_v42 = vor.u32 %v1962_v26, %v1959_v24  ;;  %3269 = vmatprep.mubr.bf16.mxu1 %v10698_v16 }
  0xe8   :  { %v2083_v45 = vrot.slane %v2081_v29, 6  ;;  %v2086_v46 = vrot.slane %v2084_v3, 7  ;;  %1828 = vst [vmem:[#allocation2 + $0x174] sm:$0x3] %v1822_v40  ;;  %3270 = vmatmul.mubr.bf16.gmra.mrb[16].mxu1 %v10700_v32  ;;  %v2072_v30 = vrot.slane %v2071_v39, 4  ;;  %v11216_v57 = vmov 0.0  }
  0xe9   :  { %v1964_v31 = vsel %vm11348_vm10, %v9099_v63, %v1963_v42  ;;  %v1965_v49 = vrot.slane %v1963_v42, 4  ;;  %2068 = vst [vmem:[#allocation2 + $0x1b4] sm:$0x1] %v2062_v51  ;;  %10427 = vmatprep.subr.bf16.mxu0 %v11216_v57  ;;  %8598 = vst [vmem:[#allocation5] sm:$0xff] %v11216_v57  ;;  %v130_v7 = vld [vmem:[%s13938_s0 + $0x4] sm:$0xe] }
  0xea   :  { %1968 = vst [vmem:[#allocation2 + $0x174] sm:$0xc] %v1964_v31  ;;  %v2087_v50 = vor.u32 %v2086_v46, %v2083_v45  ;;  %v2065_v52 = vld [vmem:[#allocation2 + $0x190] sm:$0xe]  ;;  %2078 = vst [vmem:[#allocation2 + $0x1b8] sm:$0x1] %v2072_v30 }
  0xeb   :  { %v1970_v53 = vsel %vm14004_vm0, %v1965_v49, %v1969_v0  ;;  %v2066_v54 = vsel %vm11635_vm14, %v2061_v44, %v2065_v52  ;;  %v131_v27 = vld [vmem:[%s13938_s0 + $0x8] sm:$0x1]  ;;  %v139_v60 = vld [vmem:[#allocation2 + $0x10] sm:$0xf]  ;;  %v9065_v2 = vrot.slane %v130_v7, 9 }
  0xec   :  { %1971 = vst [vmem:[#allocation2 + $0x198] sm:$0x3] %v1970_v53  ;;  %v2088_v56 = vrot.slane %v2087_v50, 4  ;;  %2067 = vst [vmem:[#allocation2 + $0x190] sm:$0xe] %v2066_v54  ;;  %v136_v5 = vrot.slane %v131_v27, 5 }
  0xed   :  { %v142_v43 = vld [vmem:[%s13938_s0 + $0x4] sm:$0xe]  ;;  %v143_v6 = vld [vmem:[%s13938_s0 + $0x8] sm:$0x1]  ;;  %v291_v3 = vld [vmem:[%s13938_s0 + $0x8] sm:$0xe] }
  0xee   :  { %v2075_v36 = vld [vmem:[#allocation2 + $0x194] sm:$0xe]  ;;  %2094 = vst [vmem:[#allocation2 + $0x1bc] sm:$0x1] %v2088_v56  ;;  %v148_v8 = vshrl.u32 %v142_v43, 16  ;;  %v151_v10 = vshll.u32 %v142_v43, 16  ;;  %v137_v21 = vsel %vm11369_vm12, %v9065_v2, %v136_v5 }
  0xef   :  { %v2076_v59 = vsel %vm11635_vm14, %v2071_v39, %v2075_v36  ;;  %v157_v9 = vshrl.u32 %v143_v6, 16  ;;  %v160_v13 = vshll.u32 %v143_v6, 16  ;;  %v10709_v55 = vld [vmem:[#allocation2 + $0x168] ss:$36 sps:$4 sm:$0xff]   ;;  %v140_v18 = vsel %vm11314_vm2, %v137_v21, %v139_v60  ;;  %v166_v41 = vld [vmem:[#allocation2 + $0x14] sm:$0xf] }
  0xf0   :  { %2077 = vst [vmem:[#allocation2 + $0x194] sm:$0xe] %v2076_v59  ;;  %v12020_v12 = vld [vmem:[#allocation2 + $0x1b0] sm:$0x11]  ;;  %141 = vst [vmem:[#allocation2 + $0x10] sm:$0xf] %v140_v18 }
  0xf1   :  { %v9157_v17 = vcombine.high %v12020_v12, %v12020_v12  ;;  %v150_v63 = vrot.slane %v148_v8, 5  ;;  %v153_v24 = vrot.slane %v151_v10, 6  ;;  %v159_v25 = vrot.slane %v157_v9, 5  ;;  %v292_v16 = vld [vmem:[%s13938_s0 + $0xc] sm:$0x1] }
  0xf2   :  { %v162_v26 = vrot.slane %v160_v13, 6  ;;  %v9156_v39 = vcombine.low %v12020_v12, %v12020_v12  ;;  %v305_v32 = vld [vmem:[%s13938_s0 + $0x8] sm:$0xc]  ;;  %v295_v0 = vrot.slane %v291_v3, 6  ;;  %v297_v42 = vrot.slane %v292_v16, 6 }
  0xf3   :  { %v2091_v11 = vld [vmem:[#allocation2 + $0x198] sm:$0xe]  ;;  %v10706_v1 = vld [vmem:[#allocation2 + $0x16c] ss:$36 sps:$4 sm:$0xff]   ;;  %v154_v38 = vor.u32 %v153_v24, %v150_v63  ;;  %v311_v44 = vshll.u32 %v305_v32, 16  ;;  %v314_v31 = vshrl.u32 %v305_v32, 16 }
  0xf4   :  { %v2092_v15 = vsel %vm11635_vm14, %v2087_v50, %v2091_v11  ;;  %3189 = vmatprep.mubr.bf16.mxu0 %v10706_v1  ;;  %v163_v40 = vor.u32 %v162_v26, %v159_v25  ;;  %v306_v45 = vld [vmem:[%s13938_s0 + $0xc] sm:$0x3]  ;;  %v12051_v46 = vld [vmem:[%s13938_s0 + $0xc] sm:$0xc]  ;;  %v296_v52 = vrot.slane %v295_v0, 4 }
  0xf5   :  { %2093 = vst [vmem:[#allocation2 + $0x198] sm:$0xe] %v2092_v15  ;;  %v12030_v19 = vld [vmem:[#allocation2 + $0x1b8] sm:$0x11]  ;;  %3190 = vmatmul.mubr.bf16.gmra.mrb[20].mxu0 %v10709_v55  ;;  %v320_v49 = vshrl.u32 %v306_v45, 16  ;;  %v323_v50 = vshll.u32 %v306_v45, 16 }
  0xf6   :  { %v9159_v29 = vcombine.high %v12030_v19, %v12030_v19  ;;  %3197 = vmatprep.mubr.bf16.mxu0 %v9157_v17  ;;  %v486_v51 = vld [vmem:[%s13938_s0 + $0xc] sm:$0xc]  ;;  %v155_v30 = vrot.slane %v154_v38, 4  ;;  %v476_v53 = vrot.slane %v12051_v46, 7  ;;  %v12057_v56 = vrot.slane %v311_v44, 7 }
  0xf7   :  { %v492_v54 = vshrl.u32 %v486_v51, 16  ;;  %v316_v36 = vrot.slane %v314_v31, 6  ;;  %v322_v59 = vrot.slane %v320_v49, 6  ;;  %v325_v7 = vrot.slane %v323_v50, 7  ;;  %v169_v43 = vld [vmem:[%s13938_s0 + $0x8] sm:$0xe] }
  0xf8   :  { %v164_v27 = vsel %vm11348_vm10, %v155_v30, %v163_v40  ;;  %v298_v60 = vsel %vm11413_vm8, %v296_v52, %v297_v42  ;;  %482 = vst [vmem:[#allocation2 + $0x34] sm:$0x8] %v476_v53  ;;  %v495_v5 = vshll.u32 %v486_v51, 16  ;;  %v170_v6 = vld [vmem:[%s13938_s0 + $0xc] sm:$0x1]  ;;  %v9066_v9 = vrot.slane %v169_v43, 9 }
  0xf9   :  { %v12065_v2 = vrot.slane %v492_v54, 7  ;;  %v10712_v10 = vld [vmem:[#allocation2 + $0x170] ss:$36 sps:$4 sm:$0xff]   ;;  %v167_v11 = vsel %vm11314_vm2, %v164_v27, %v166_v41  ;;  %304 = vst [vmem:[#allocation2 + $0x34] sm:$0x7] %v298_v60  ;;  %v317_v12 = vor.u32 %v316_v36, %v12057_v56  ;;  %v326_v21 = vor.u32 %v325_v7, %v322_v59 }
  0xfa   :  { %168 = vst [vmem:[#allocation2 + $0x14] sm:$0xf] %v167_v11  ;;  %v301_v13 = vld [vmem:[#allocation2 + $0x10] sm:$0x8]  ;;  %v175_v55 = vrot.slane %v170_v6, 5  ;;  %v9158_v32 = vcombine.low %v12030_v19, %v12030_v19 }
  0xfb   :  { %v497_v1 = vor.u32 %v495_v5, %v12065_v2  ;;  %v178_v15 = vld [vmem:[#allocation2 + $0x18] sm:$0xf]  ;;  %v302_v17 = vsel %vm11356_vm11, %v295_v0, %v301_v13  ;;  %v318_v18 = vrot.slane %v317_v12, 4  ;;  %v181_v63 = vld [vmem:[%s13938_s0 + $0x8] sm:$0xe] }
  0xfc   :  { %v10710_v8 = vld [vmem:[#allocation2 + $0x174] ss:$36 sps:$4 sm:$0xff]   ;;  %v182_v24 = vld [vmem:[%s13938_s0 + $0xc] sm:$0x1]  ;;  %303 = vst [vmem:[#allocation2 + $0x10] sm:$0x8] %v302_v17  ;;  %v176_v25 = vsel %vm11369_vm12, %v9066_v9, %v175_v55 }
  0xfd   :  { %3277 = vmatprep.mubr.bf16.mxu1 %v10710_v8  ;;  %3198 = vmatmul.mubr.bf16.gmra.mrb[24].mxu0 %v9156_v39  ;;  %509 = vst [vmem:[#allocation2 + $0x38] sm:$0x8] %v497_v1  ;;  %v184_v26 = vshrl.u32 %v181_v63, 16  ;;  %v187_v3 = vshll.u32 %v181_v63, 16  ;;  %v193_v16 = vshrl.u32 %v182_v24, 16  ;;  %v327_v38 = vsel %vm11475_vm5, %v318_v18, %v326_v21 }
  0xfe   :  { %3278 = vmatmul.mubr.bf16.gmra.mrb[20].mxu1 %v10712_v10  ;;  %v179_v40 = vsel %vm11314_vm2, %v176_v25, %v178_v15  ;;  %v196_v41 = vshll.u32 %v182_v24, 16  ;;  %v334_v39 = vld [vmem:[%s13938_s0 + $0xc] sm:$0xe]  ;;  %v335_v0 = vld [vmem:[%s13938_s0 + $0x10] sm:$0x1]  ;;  %v477_v18 = vrot.slane %v476_v53, 4 }
  0xff   :  { %3285 = vmatprep.mubr.bf16.mxu1 %v9159_v29  ;;  %333 = vst [vmem:[#allocation2 + $0x38] sm:$0x7] %v327_v38  ;;  %180 = vst [vmem:[#allocation2 + $0x18] sm:$0xf] %v179_v40  ;;  %v186_v29 = vrot.slane %v184_v26, 5  ;;  %v189_v42 = vrot.slane %v187_v3, 6 }
 0x100   :  { %v195_v19 = vrot.slane %v193_v16, 5  ;;  %v338_v45 = vrot.slane %v334_v39, 6  ;;  %v348_v44 = vld [vmem:[%s13938_s0 + $0xc] sm:$0xc]  ;;  %v198_v31 = vrot.slane %v196_v41, 6  ;;  %v340_v49 = vrot.slane %v335_v0, 6 }
 0x101   :  { %v349_v50 = vld [vmem:[%s13938_s0 + $0x10] sm:$0x3]  ;;  %v351_v51 = vshll.u32 %v348_v44, 16  ;;  %v354_v30 = vshrl.u32 %v348_v44, 16  ;;  %v190_v52 = vor.u32 %v189_v42, %v186_v29  ;;  %v202_v54 = vld [vmem:[#allocation2 + $0x1c] sm:$0xf] }
 0x102   :  { %v339_v36 = vrot.slane %v338_v45, 4  ;;  %v360_v59 = vshrl.u32 %v349_v50, 16  ;;  %v363_v7 = vshll.u32 %v349_v50, 16  ;;  %v12108_v27 = vld [vmem:[%s13938_s0 + $0x10] sm:$0xc]  ;;  %v199_v5 = vor.u32 %v198_v31, %v195_v19  ;;  %v10734_v19 = vld [vmem:[#allocation6 + $0x200] sm:$0xff]  }
 0x103   :  { %v330_v60 = vld [vmem:[#allocation2 + $0x14] sm:$0x8]  ;;  %v12110_v43 = vrot.slane %v351_v51, 7  ;;  %v356_v6 = vrot.slane %v354_v30, 6  ;;  %v517_v8 = vrot.slane %v12108_v27, 7  ;;  %v191_v11 = vrot.slane %v190_v52, 4 }
 0x104   :  { %v331_v10 = vsel %vm11356_vm11, %v12057_v56, %v330_v60  ;;  %v341_v12 = vsel %vm11413_vm8, %v339_v36, %v340_v49  ;;  %v362_v21 = vrot.slane %v360_v59, 6  ;;  %v527_v9 = vld [vmem:[%s13938_s0 + $0x10] sm:$0xc]  ;;  %v365_v1 = vrot.slane %v363_v7, 7  ;;  %v473_v17 = vld [vmem:[%s13938_s0 + $0x10] sm:$0x3] }
 0x105   :  { %332 = vst [vmem:[#allocation2 + $0x14] sm:$0x8] %v331_v10  ;;  %347 = vst [vmem:[#allocation2 + $0x3c] sm:$0x7] %v341_v12  ;;  %v357_v13 = vor.u32 %v356_v6, %v12110_v43  ;;  %v530_v55 = vshrl.u32 %v527_v9, 16  ;;  %v533_v15 = vshll.u32 %v527_v9, 16  ;;  %v200_v56 = vsel %vm11348_vm10, %v191_v11, %v199_v5 }
 0x106   :  { %523 = vst [vmem:[#allocation2 + $0x3c] sm:$0x8] %v517_v8  ;;  %3286 = vmatmul.mubr.bf16.gmra.mrb[24].mxu1 %v9158_v32  ;;  %v487_v63 = vld [vmem:[%s13938_s0 + $0x10] sm:$0x3]  ;;  %v203_v24 = vsel %vm11314_vm2, %v200_v56, %v202_v54  ;;  %v344_v25 = vld [vmem:[#allocation2 + $0x18] sm:$0x8]  ;;  %v366_v3 = vor.u32 %v365_v1, %v362_v21 }
 0x107   :  { %v358_v26 = vrot.slane %v357_v13, 4  ;;  %v12136_v16 = vrot.slane %v530_v55, 7  ;;  %204 = vst [vmem:[#allocation2 + $0x1c] sm:$0xf] %v203_v24  ;;  %v345_v32 = vsel %vm11356_vm11, %v338_v45, %v344_v25  ;;  %v478_v38 = vrot.slane %v473_v17, 7 }
 0x108   :  { %v483_v40 = vld [vmem:[#allocation2 + $0x58] sm:$0x7]  ;;  %v500_v46 = vshrl.u32 %v487_v63, 16  ;;  %v503_v53 = vshll.u32 %v487_v63, 16  ;;  %346 = vst [vmem:[#allocation2 + $0x18] sm:$0x8] %v345_v32 }
 0x109   :  { %v367_v41 = vsel %vm11475_vm5, %v358_v26, %v366_v3  ;;  %v535_v39 = vor.u32 %v533_v15, %v12136_v16  ;;  %v498_v0 = vrot.slane %v12065_v2, 4  ;;  %v629_v29 = vld [vmem:[%s13938_s0 + $0x14] sm:$0x3]  ;;  %v634_v42 = vld [vmem:[%s13938_s0 + $0x10] sm:$0x8]  ;;  %v479_v45 = vsel %vm11484_vm3, %v477_v18, %v478_v38 }
 0x10a   :  { %373 = vst [vmem:[#allocation2 + $0x40] sm:$0x7] %v367_v41  ;;  %v502_v44 = vrot.slane %v500_v46, 7  ;;  %v510_v31 = vld [vmem:[#allocation2 + $0x5c] sm:$0x7]  ;;  %v639_v49 = vshrl.u32 %v634_v42, 16  ;;  %v484_v51 = vsel %vm11434_vm9, %v479_v45, %v483_v40 }
 0x10b   :  { %633 = vst [vmem:[#allocation2 + $0x7c] sm:$0x3] %v629_v29  ;;  %v635_v2 = vld [vmem:[%s13938_s0 + $0x14] sm:$0x7]  ;;  %v642_v50 = vshll.u32 %v634_v42, 16  ;;  %v10739_v3 = vld [vmem:[#allocation6 + $0x208] sm:$0xff]  }
 0x10c   :  { %547 = vst [vmem:[#allocation2 + $0x40] sm:$0x8] %v535_v39  ;;  %v648_v30 = vshll.u32 %v635_v2, 16  ;;  %v652_v52 = vshrl.u32 %v635_v2, 16  ;;  %v787_v54 = vld [vmem:[%s13938_s0 + $0x14] sm:$0x8]  ;;  %v505_v60 = vor.u32 %v503_v53, %v502_v44 }
 0x10d   :  { %v788_v36 = vld [vmem:[%s13938_s0 + $0x18] sm:$0x7]  ;;  %v10731_v7 = vld [vmem:[#allocation2 + $0x10] ss:$36 sps:$4 sm:$0xff]   ;;  %485 = vst [vmem:[#allocation2 + $0x58] sm:$0x7] %v484_v51 }
 0x10e   :  { %v10728_v59 = vld [vmem:[#allocation2 + $0x14] ss:$36 sps:$4 sm:$0xff]   ;;  %v641_v5 = vrot.slane %v639_v49, 4  ;;  %v644_v6 = vrot.slane %v642_v50, 5  ;;  %v12163_v10 = vrot.slane %v648_v30, 5  ;;  %v654_v11 = vrot.slane %v652_v52, 4 }
 0x10f   :  { %v9070_v12 = vrot.slane %v787_v54, 9  ;;  %v802_v21 = vld [vmem:[%s13938_s0 + $0x14] sm:$0x8]  ;;  %3325 = vmatprep.mubr.bf16.mxu0 %v10728_v59  ;;  %v506_v9 = vsel %vm11498_vm1, %v498_v0, %v505_v60  ;;  %v793_v13 = vrot.slane %v788_v36, 5  ;;  %v803_v1 = vld [vmem:[%s13938_s0 + $0x18] sm:$0x7] }
 0x110   :  { %v805_v55 = vshrl.u32 %v802_v21, 16  ;;  %3326 = vmatmul.mubr.bf16.vlgmr.msra.gmra.mrb[28].mxu0 %v10731_v7  ;;  %v370_v15 = vld [vmem:[#allocation2 + $0x1c] sm:$0x8]  ;;  %v511_v56 = vsel %vm11434_vm9, %v506_v9, %v510_v31  ;;  %v645_v17 = vor.u32 %v644_v6, %v641_v5  ;;  %v655_v18 = vor.u32 %v654_v11, %v12163_v10  ;;  %v628_v25 = vld [vmem:[%s13938_s0 + $0x10] sm:$0xc]  ;;  %v10745_v42 = vld [vmem:[#allocation6 + $0x210] sm:$0xff]  }
 0x111   :  { %v810_v63 = vshrl.u32 %v803_v1, 16  ;;  %v371_v24 = vsel %vm11356_vm11, %v12110_v43, %v370_v15  ;;  %10428 = vmatpush3.bf16.msra.mxu0 %v10734_v19  ;;  %512 = vst [vmem:[#allocation2 + $0x5c] sm:$0x7] %v511_v56  ;;  %v794_v26 = vsel %vm11369_vm12, %v9070_v12, %v793_v13  ;;  %v514_v32 = vld [vmem:[%s13938_s0 + $0x14] sm:$0x3]  ;;  %v813_v43 = vshll.u32 %v803_v1, 16 }
 0x112   :  { %372 = vst [vmem:[#allocation2 + $0x1c] sm:$0x8] %v371_v24  ;;  %v646_v38 = vrot.slane %v645_v17, 4  ;;  %v656_v40 = vrot.slane %v655_v18, 4  ;;  %798 = vst [vmem:[#allocation2 + $0x7c] sm:$0xc] %v794_v26  ;;  %10429 = vmatprep.subr.bf16.mxu0 %v11216_v57 }
 0x113   :  { %v812_v46 = vrot.slane %v810_v63, 5  ;;  %v528_v53 = vld [vmem:[%s13938_s0 + $0x14] sm:$0x3]  ;;  %v518_v41 = vrot.slane %v517_v8, 4  ;;  %v519_v39 = vrot.slane %v514_v32, 7  ;;  %v12193_v45 = vrot.slane %v793_v13, 4 }
 0x114   :  { %v524_v0 = vld [vmem:[#allocation2 + $0x60] sm:$0x7]  ;;  %v538_v29 = vshrl.u32 %v528_v53, 16  ;;  %v630_v19 = vld [vmem:[#allocation2 + $0x58] sm:$0xc]  ;;  %v9071_v44 = vrot.slane %v805_v55, 9  ;;  %v651_v52 = vsel %vm11532_vm13, %v646_v38, %v12163_v10 }
 0x115   :  { %662 = vst [vmem:[#allocation2 + $0x80] sm:$0x3] %v656_v40  ;;  %v815_v31 = vrot.slane %v813_v43, 6  ;;  %v541_v2 = vshll.u32 %v528_v53, 16  ;;  %v631_v49 = vsel %vm11508_vm15, %v628_v25, %v630_v19  ;;  %10430 = vmatpush3.bf16.msra.mxu0 %v10739_v3  ;;  %v520_v50 = vsel %vm11484_vm3, %v518_v41, %v519_v39  ;;  %v548_v51 = vld [vmem:[#allocation2 + $0x64] sm:$0x7] }
 0x116   :  { %v536_v27 = vrot.slane %v12136_v16, 4  ;;  %v540_v8 = vrot.slane %v538_v29, 7  ;;  %v664_v30 = vld [vmem:[%s13938_s0 + $0x18] sm:$0x3]  ;;  %632 = vst [vmem:[#allocation2 + $0x58] sm:$0xc] %v631_v49  ;;  %v525_v36 = vsel %vm11434_vm9, %v520_v50, %v524_v0  ;;  %10431 = vmatprep.subr.bf16.mxu0 %v11216_v57 }
 0x117   :  { %v12206_v54 = vor.u32 %v815_v31, %v812_v46  ;;  %668 = vst [vmem:[#allocation2 + $0x84] sm:$0x3] %v664_v30  ;;  %v669_v16 = vld [vmem:[%s13938_s0 + $0x14] sm:$0x8]  ;;  %v670_v59 = vld [vmem:[%s13938_s0 + $0x18] sm:$0x7] }
 0x118   :  { %v825_v7 = vld [vmem:[%s13938_s0 + $0x18] sm:$0x8]  ;;  %526 = vst [vmem:[#allocation2 + $0x60] sm:$0x7] %v525_v36  ;;  %v543_v60 = vor.u32 %v541_v2, %v540_v8  ;;  %v672_v5 = vshrl.u32 %v669_v16, 16  ;;  %v675_v6 = vshll.u32 %v669_v16, 16 }
 0x119   :  { %v681_v10 = vshll.u32 %v670_v59, 16  ;;  %v826_v11 = vld [vmem:[%s13938_s0 + $0x1c] sm:$0x7]  ;;  %v817_v21 = vsel %vm11348_vm10, %v9071_v44, %v12206_v54  ;;  %v818_v9 = vrot.slane %v12206_v54, 4  ;;  %v685_v13 = vshrl.u32 %v670_v59, 16  ;;  %10432 = vmatpush3.bf16.msra.mxu0 %v10745_v42  ;;  %v10757_v41 = vld [vmem:[#allocation6 + $0x220] sm:$0xff]  }
 0x11a   :  { %v659_v12 = vld [vmem:[#allocation2 + $0x5c] sm:$0xc]  ;;  %v9072_v1 = vrot.slane %v825_v7, 9  ;;  %821 = vst [vmem:[#allocation2 + $0x80] sm:$0xc] %v817_v21  ;;  %v544_v18 = vsel %vm11498_vm1, %v536_v27, %v543_v60  ;;  %v674_v63 = vrot.slane %v672_v5, 4  ;;  %10433 = vmatprep.subr.bf16.mxu0 %v11216_v57 }
 0x11b   :  { %v10750_v55 = vld [vmem:[#allocation6 + $0x218] sm:$0xff]   ;;  %v660_v17 = vsel %vm11508_vm15, %v651_v52, %v659_v12  ;;  %v549_v24 = vsel %vm11434_vm9, %v544_v18, %v548_v51  ;;  %v663_v25 = vld [vmem:[%s13938_s0 + $0x14] sm:$0xc]  ;;  %v677_v26 = vrot.slane %v675_v6, 5  ;;  %v683_v3 = vrot.slane %v681_v10, 5  ;;  %v10764_v21 = vld [vmem:[#allocation6 + $0x228] sm:$0xff]  }
 0x11c   :  { %v10732_v15 = vld [vmem:[#allocation2 + $0x1c] ss:$36 sps:$4 sm:$0xff]   ;;  %661 = vst [vmem:[#allocation2 + $0x5c] sm:$0xc] %v660_v17  ;;  %v687_v32 = vrot.slane %v685_v13, 4  ;;  %v831_v40 = vrot.slane %v826_v11, 5 }
 0x11d   :  { %v10735_v56 = vld [vmem:[#allocation2 + $0x18] ss:$36 sps:$4 sm:$0xff]   ;;  %3413 = vmatprep.mubr.bf16.mxu1 %v10732_v15  ;;  %550 = vst [vmem:[#allocation2 + $0x64] sm:$0x7] %v549_v24  ;;  %v799_v53 = vld [vmem:[#allocation2 + $0xa0] sm:$0x3]  ;;  %v678_v39 = vor.u32 %v677_v26, %v674_v63  ;;  %10434 = vmatpush3.bf16.msra.mxu0 %v10750_v55 }
 0x11e   :  { %v840_v38 = vld [vmem:[%s13938_s0 + $0x18] sm:$0x8]  ;;  %v841_v46 = vld [vmem:[%s13938_s0 + $0x1c] sm:$0x7]  ;;  %3414 = vmatmul.mubr.bf16.vlgmr.msra.gmra.mrb[28].mxu1 %v10735_v56  ;;  %v688_v0 = vor.u32 %v687_v32, %v683_v3  ;;  %v822_v19 = vld [vmem:[#allocation2 + $0xa4] sm:$0x3]  ;;  %v832_v31 = vsel %vm11369_vm12, %v9072_v1, %v831_v40  ;;  %v800_v50 = vsel %vm14004_vm0, %v12193_v45, %v799_v53  ;;  %10435 = vmatprep.subr.bf16.mxu0 %v11216_v57 }
 0x11f   :  { %v843_v43 = vshrl.u32 %v840_v38, 16  ;;  %v848_v29 = vshrl.u32 %v841_v46, 16  ;;  %v851_v42 = vshll.u32 %v841_v46, 16  ;;  %v960_v44 = vld [vmem:[%s13938_s0 + $0x18] sm:$0x8]  ;;  %v12248_v2 = vrot.slane %v831_v40, 4 }
 0x120   :  { %v961_v27 = vld [vmem:[%s13938_s0 + $0x1c] sm:$0x7]  ;;  %v665_v51 = vld [vmem:[#allocation2 + $0x60] sm:$0xc]  ;;  %v679_v30 = vrot.slane %v678_v39, 4  ;;  %v689_v52 = vrot.slane %v688_v0, 4  ;;  %v823_v16 = vsel %vm14004_vm0, %v818_v9, %v822_v19 }
 0x121   :  { %v9073_v49 = vrot.slane %v843_v43, 9  ;;  %v975_v8 = vld [vmem:[%s13938_s0 + $0x1c] sm:$0xf]  ;;  %836 = vst [vmem:[#allocation2 + $0x84] sm:$0xc] %v832_v31  ;;  %v850_v54 = vrot.slane %v848_v29, 5  ;;  %v666_v45 = vsel %vm11508_vm15, %v663_v25, %v665_v51  ;;  %10436 = vmatpush3.bf16.msra.mxu0 %v10757_v41 }
 0x122   :  { %v853_v36 = vrot.slane %v851_v42, 6  ;;  %801 = vst [vmem:[#allocation2 + $0xa0] sm:$0x3] %v800_v50  ;;  %v9076_v59 = vrot.slane %v960_v44, 10  ;;  %v966_v7 = vrot.slane %v961_v27, 6  ;;  %v684_v6 = vsel %vm11532_vm13, %v679_v30, %v683_v3  ;;  %10437 = vmatprep.subr.bf16.mxu0 %v11216_v57  ;;  %v10771_v29 = vld [vmem:[#allocation6 + $0x230] sm:$0xff]  }
 0x123   :  { %v1104_v60 = vld [vmem:[%s13938_s0 + $0x20] sm:$0xf]  ;;  %667 = vst [vmem:[#allocation2 + $0x60] sm:$0xc] %v666_v45  ;;  %695 = vst [vmem:[#allocation2 + $0x88] sm:$0x3] %v689_v52 }
 0x124   :  { %v1114_v5 = vld [vmem:[%s13938_s0 + $0x20] sm:$0xf]  ;;  %v854_v10 = vor.u32 %v853_v36, %v850_v54  ;;  %824 = vst [vmem:[#allocation2 + $0xa4] sm:$0x3] %v823_v16  ;;  %v977_v11 = vshrl.u32 %v975_v8, 16  ;;  %v980_v12 = vshll.u32 %v975_v8, 16  ;;  %v967_v1 = vsel %vm11413_vm8, %v9076_v59, %v966_v7 }
 0x125   :  { %v10736_v9 = vld [vmem:[#allocation2 + $0x5c] ss:$36 sps:$4 sm:$0xff]   ;;  %v968_v55 = vrot.slane %v966_v7, 4  ;;  %v692_v15 = vld [vmem:[#allocation2 + $0x64] sm:$0xc]  ;;  %v1106_v25 = vrot.slane %v1104_v60, 7  ;;  %10438 = vmatpush3.bf16.msra.mxu0 %v10764_v21 }
 0x126   :  { %v10738_v13 = vld [vmem:[#allocation2 + $0x58] ss:$36 sps:$4 sm:$0xff]   ;;  %v855_v56 = vsel %vm11348_vm10, %v9073_v49, %v854_v10  ;;  %v856_v17 = vrot.slane %v854_v10, 4  ;;  %v979_v18 = vrot.slane %v977_v11, 6  ;;  %v982_v63 = vrot.slane %v980_v12, 7  ;;  %3333 = vmatprep.mubr.bf16.mxu0 %v10736_v9  ;;  %10439 = vmatprep.subr.bf16.mxu0 %v11216_v57 }
 0x127   :  { %v693_v24 = vsel %vm11508_vm15, %v684_v6, %v692_v15  ;;  %859 = vst [vmem:[#allocation2 + $0x88] sm:$0xc] %v855_v56  ;;  %974 = vst [vmem:[#allocation2 + $0xc4] sm:$0x1] %v968_v55  ;;  %v1116_v26 = vshrl.u32 %v1114_v5, 16  ;;  %v1119_v3 = vshll.u32 %v1114_v5, 16  ;;  %3334 = vmatmul.mubr.bf16.gmra.mrb[32].mxu0 %v10738_v13 }
 0x128   :  { %694 = vst [vmem:[#allocation2 + $0x64] sm:$0xc] %v693_v24  ;;  %v983_v32 = vor.u32 %v982_v63, %v979_v18  ;;  %v837_v38 = vld [vmem:[#allocation2 + $0xa8] sm:$0x3]  ;;  %v860_v40 = vld [vmem:[#allocation2 + $0xac] sm:$0x3] }
 0x129   :  { %v991_v46 = vld [vmem:[%s13938_s0 + $0x1c] sm:$0x8]  ;;  %v971_v43 = vld [vmem:[#allocation2 + $0xa0] sm:$0xe]  ;;  %1110 = vst [vmem:[#allocation2 + $0xc4] sm:$0xe] %v1106_v25  ;;  %v838_v41 = vsel %vm14004_vm0, %v12248_v2, %v837_v38  ;;  %v861_v39 = vsel %vm14004_vm0, %v856_v17, %v860_v40  ;;  %10440 = vmatpush3.bf16.msra.mxu0 %v10771_v29 }
 0x12a   :  { %v1118_v53 = vrot.slane %v1116_v26, 7  ;;  %v992_v0 = vld [vmem:[%s13938_s0 + $0x20] sm:$0x7]  ;;  %v972_v42 = vsel %vm11635_vm14, %v967_v1, %v971_v43  ;;  %v984_v19 = vrot.slane %v983_v32, 4  ;;  %v1107_v44 = vrot.slane %v1106_v25, 4  ;;  %10441 = vmatprep.subr.bf16.mxu0 %v11216_v57 }
 0x12b   :  { %839 = vst [vmem:[#allocation2 + $0xa8] sm:$0x3] %v838_v41  ;;  %862 = vst [vmem:[#allocation2 + $0xac] sm:$0x3] %v861_v39  ;;  %v997_v31 = vrot.slane %v992_v0, 6  ;;  %v9077_v27 = vrot.slane %v991_v46, 10 }
 0x12c   :  { %v1006_v2 = vld [vmem:[%s13938_s0 + $0x20] sm:$0xf]  ;;  %973 = vst [vmem:[#allocation2 + $0xa0] sm:$0xe] %v972_v42  ;;  %v987_v49 = vld [vmem:[#allocation2 + $0xa4] sm:$0xe]  ;;  %v1121_v50 = vor.u32 %v1119_v3, %v1118_v53 }
 0x12d   :  { %v1008_v8 = vshrl.u32 %v1006_v2, 16  ;;  %v1011_v51 = vshll.u32 %v1006_v2, 16  ;;  %v10776_v30 = vld [vmem:[#allocation6 + $0x238] sm:$0xff]   ;;  %v988_v52 = vsel %vm11635_vm14, %v983_v32, %v987_v49  ;;  %990 = vst [vmem:[#allocation2 + $0xc8] sm:$0x1] %v984_v19  ;;  %v1122_v54 = vrot.slane %v1118_v53, 4 }
 0x12e   :  { %v999_v36 = vrot.slane %v997_v31, 4  ;;  %v12301_v45 = vld [vmem:[%s13938_s0 + $0x24] sm:$0xf]  ;;  %989 = vst [vmem:[#allocation2 + $0xa4] sm:$0xe] %v988_v52  ;;  %v998_v21 = vsel %vm11413_vm8, %v9077_v27, %v997_v31  ;;  %10442 = vmatpush3.bf16.msra.mxu0 %v10776_v30 }
 0x12f   :  { %v1139_v16 = vld [vmem:[%s13938_s0 + $0x24] sm:$0xf]  ;;  %1125 = vst [vmem:[#allocation2 + $0xc8] sm:$0xe] %v1121_v50  ;;  %v1010_v59 = vrot.slane %v1008_v8, 6  ;;  %v1013_v7 = vrot.slane %v1011_v51, 7 }
 0x130   :  { %v1131_v60 = vrot.slane %v12301_v45, 7  ;;  %v1141_v5 = vshrl.u32 %v1139_v16, 16  ;;  %1005 = vst [vmem:[#allocation2 + $0xcc] sm:$0x1] %v999_v36  ;;  %v1144_v6 = vshll.u32 %v1139_v16, 16 }
 0x131   :  { %v1111_v10 = vld [vmem:[#allocation2 + $0xe8] sm:$0x1]  ;;  %v10742_v12 = vld [vmem:[#allocation2 + $0x60] ss:$36 sps:$4 sm:$0xff]   ;;  %v1014_v9 = vor.u32 %v1013_v7, %v1010_v59  ;;  %v1126_v55 = vld [vmem:[#allocation2 + $0xec] sm:$0x1] }
 0x132   :  { %v10740_v11 = vld [vmem:[#allocation2 + $0x64] ss:$36 sps:$4 sm:$0xff]   ;;  %1135 = vst [vmem:[#allocation2 + $0xcc] sm:$0xe] %v1131_v60  ;;  %v1112_v13 = vsel %vm11647_vm4, %v1107_v44, %v1111_v10  ;;  %v12314_v1 = vrot.slane %v1141_v5, 7  ;;  %v1127_v18 = vsel %vm11647_vm4, %v1122_v54, %v1126_v55 }
 0x133   :  { %1113 = vst [vmem:[#allocation2 + $0xe8] sm:$0x1] %v1112_v13  ;;  %v1218_v57 = vld [vmem:[%s13938_s0 + $0x2c] sm:$0xe]  ;;  %3421 = vmatprep.mubr.bf16.mxu1 %v10740_v11  ;;  %v1002_v15 = vld [vmem:[#allocation2 + $0xa8] sm:$0xe] }
 0x134   :  { %v1015_v56 = vrot.slane %v1014_v9, 4  ;;  %v1018_v17 = vld [vmem:[#allocation2 + $0xac] sm:$0xe]  ;;  %v9082_v63 = vrot.slane %v1218_v57, 9  ;;  %3422 = vmatmul.mubr.bf16.gmra.mrb[32].mxu1 %v10742_v12  ;;  %v1003_v24 = vsel %vm11635_vm14, %v998_v21, %v1002_v15  ;;  %v1146_v26 = vor.u32 %v1144_v6, %v12314_v1  ;;  %1128 = vst [vmem:[#allocation2 + $0xec] sm:$0x1] %v1127_v18 }
 0x135   :  { %v1019_v25 = vsel %vm11635_vm14, %v1014_v9, %v1018_v17  ;;  %v1219_v3 = vld [vmem:[%s13938_s0 + $0x30] sm:$0x1]  ;;  %1004 = vst [vmem:[#allocation2 + $0xa8] sm:$0xe] %v1003_v24  ;;  %v1230_v38 = vld [vmem:[%s13938_s0 + $0x2c] sm:$0xc] }
 0x136   :  { %1020 = vst [vmem:[#allocation2 + $0xac] sm:$0xe] %v1019_v25  ;;  %1021 = vst [vmem:[#allocation2 + $0xd0] sm:$0x1] %v1015_v56  ;;  %v1224_v32 = vrot.slane %v1219_v3, 5  ;;  %v1233_v43 = vshrl.u32 %v1230_v38, 16 }
 0x137   :  { %v1231_v40 = vld [vmem:[%s13938_s0 + $0x30] sm:$0x3]  ;;  %v10743_v46 = vld [vmem:[#allocation2 + $0xa4] ss:$36 sps:$4 sm:$0xff]   ;;  %1150 = vst [vmem:[#allocation2 + $0xd0] sm:$0xe] %v1146_v26 }
 0x138   :  { %v1236_v53 = vshll.u32 %v1230_v38, 16  ;;  %v10746_v41 = vld [vmem:[#allocation2 + $0xa0] ss:$36 sps:$4 sm:$0xff]   ;;  %v1225_v39 = vsel %vm11369_vm12, %v9082_v63, %v1224_v32  ;;  %v1242_v0 = vshrl.u32 %v1231_v40, 16  ;;  %v1245_v29 = vshll.u32 %v1231_v40, 16  ;;  %3341 = vmatprep.mubr.bf16.mxu0 %v10743_v46 }
 0x139   :  { %v1235_v42 = vrot.slane %v1233_v43, 5  ;;  %v1374_v44 = vld [vmem:[%s13938_s0 + $0x30] sm:$0xc]  ;;  %v1375_v31 = vld [vmem:[%s13938_s0 + $0x34] sm:$0x3]  ;;  %3342 = vmatmul.mubr.bf16.gmra.mrb[36].mxu0 %v10746_v41  ;;  %v1132_v6 = vrot.slane %v1131_v60, 4 }
 0x13a   :  { %v1238_v19 = vrot.slane %v1236_v53, 6  ;;  %v1227_v2 = vld [vmem:[#allocation2 + $0xe8] sm:$0xf]  ;;  %v1244_v49 = vrot.slane %v1242_v0, 5  ;;  %v1247_v50 = vrot.slane %v1245_v29, 6  ;;  %v9087_v27 = vrot.slane %v1374_v44, 10 }
 0x13b   :  { %v1380_v8 = vrot.slane %v1375_v31, 6  ;;  %v1228_v51 = vsel %vm11703_vm7, %v1225_v39, %v1227_v2  ;;  %v1383_v52 = vld [vmem:[#allocation2 + $0x10c] sm:$0xf]  ;;  %v1386_v54 = vld [vmem:[%s13938_s0 + $0x30] sm:$0xc]  ;;  %v1147_v10 = vrot.slane %v12314_v1, 4 }
 0x13c   :  { %v1239_v30 = vor.u32 %v1238_v19, %v1235_v42  ;;  %1229 = vst [vmem:[#allocation2 + $0xe8] sm:$0xf] %v1228_v51  ;;  %v1248_v36 = vor.u32 %v1247_v50, %v1244_v49  ;;  %v1387_v59 = vld [vmem:[%s13938_s0 + $0x34] sm:$0x3]  ;;  %v1389_v7 = vshrl.u32 %v1386_v54, 16  ;;  %v1392_v5 = vshll.u32 %v1386_v54, 16 }
 0x13d   :  { %v1381_v16 = vsel %vm11413_vm8, %v9087_v27, %v1380_v8  ;;  %v1251_v12 = vld [vmem:[#allocation2 + $0xec] sm:$0xf]  ;;  %v1398_v56 = vshrl.u32 %v1387_v59, 16  ;;  %v1401_v17 = vshll.u32 %v1387_v59, 16  ;;  %v1538_v45 = vld [vmem:[%s13938_s0 + $0x34] sm:$0xc] }
 0x13e   :  { %v1240_v11 = vrot.slane %v1239_v30, 4  ;;  %v1384_v21 = vsel %vm11314_vm2, %v1381_v16, %v1383_v52  ;;  %v10747_v9 = vld [vmem:[#allocation2 + $0xac] ss:$36 sps:$4 sm:$0xff]   ;;  %v1391_v55 = vrot.slane %v1389_v7, 6  ;;  %v1394_v15 = vrot.slane %v1392_v5, 7 }
 0x13f   :  { %v10749_v13 = vld [vmem:[#allocation2 + $0xa8] ss:$36 sps:$4 sm:$0xff]   ;;  %1385 = vst [vmem:[#allocation2 + $0x10c] sm:$0xf] %v1384_v21  ;;  %3429 = vmatprep.mubr.bf16.mxu1 %v10747_v9  ;;  %v1542_v1 = vrot.slane %v1538_v45, 7  ;;  %v1400_v25 = vrot.slane %v1398_v56, 6 }
 0x140   :  { %v1249_v57 = vsel %vm11348_vm10, %v1240_v11, %v1248_v36  ;;  %v12368_v18 = vld [vmem:[%s13938_s0 + $0x34] sm:$0x8]  ;;  %v1136_v63 = vld [vmem:[#allocation2 + $0xf0] sm:$0x1]  ;;  %3430 = vmatmul.mubr.bf16.gmra.mrb[36].mxu1 %v10749_v13  ;;  %v1395_v24 = vor.u32 %v1394_v15, %v1391_v55  ;;  %v1403_v26 = vrot.slane %v1401_v17, 7 }
 0x141   :  { %v1252_v60 = vsel %vm11703_vm7, %v1249_v57, %v1251_v12  ;;  %v1407_v3 = vld [vmem:[#allocation2 + $0x110] sm:$0xf]  ;;  %v1555_v32 = vshll.u32 %v12368_v18, 16  ;;  %v1151_v38 = vld [vmem:[#allocation2 + $0xf4] sm:$0x1]  ;;  %v1137_v40 = vsel %vm11647_vm4, %v1132_v6, %v1136_v63  ;;  %v1543_v54 = vrot.slane %v1542_v1, 4 }
 0x142   :  { %1253 = vst [vmem:[#allocation2 + $0xec] sm:$0xf] %v1252_v60  ;;  %v1152_v46 = vsel %vm11647_vm4, %v1147_v10, %v1151_v38  ;;  %v1254_v43 = vld [vmem:[%s13938_s0 + $0x30] sm:$0xe]  ;;  %v1255_v53 = vld [vmem:[%s13938_s0 + $0x34] sm:$0x1]  ;;  %v1404_v0 = vor.u32 %v1403_v26, %v1400_v25 }
 0x143   :  { %v1266_v41 = vld [vmem:[%s13938_s0 + $0x30] sm:$0xc]  ;;  %v1396_v39 = vrot.slane %v1395_v24, 4  ;;  %1138 = vst [vmem:[#allocation2 + $0xf0] sm:$0x1] %v1137_v40  ;;  %v9083_v29 = vrot.slane %v1254_v43, 9 }
 0x144   :  { %1153 = vst [vmem:[#allocation2 + $0xf4] sm:$0x1] %v1152_v46  ;;  %v1260_v42 = vrot.slane %v1255_v53, 5  ;;  %v1267_v19 = vld [vmem:[%s13938_s0 + $0x34] sm:$0x3]  ;;  %v1269_v44 = vshrl.u32 %v1266_v41, 16 }
 0x145   :  { %v1272_v31 = vshll.u32 %v1266_v41, 16  ;;  %v1278_v2 = vshrl.u32 %v1267_v19, 16  ;;  %v1281_v49 = vshll.u32 %v1267_v19, 16  ;;  %v1410_v50 = vld [vmem:[%s13938_s0 + $0x34] sm:$0xc]  ;;  %v1405_v27 = vsel %vm11475_vm5, %v1396_v39, %v1404_v0 }
 0x146   :  { %v1548_v8 = vld [vmem:[#allocation2 + $0x10c] sm:$0x8]  ;;  %v1261_v51 = vsel %vm11369_vm12, %v9083_v29, %v1260_v42  ;;  %v1411_v30 = vld [vmem:[%s13938_s0 + $0x38] sm:$0x3]  ;;  %v9088_v52 = vrot.slane %v1410_v50, 10  ;;  %v1408_v36 = vsel %vm11314_vm2, %v1405_v27, %v1407_v3  ;;  %v1271_v59 = vrot.slane %v1269_v44, 5 }
 0x147   :  { %v1549_v16 = vsel %vm11356_vm11, %v1542_v1, %v1548_v8  ;;  %v1274_v7 = vrot.slane %v1272_v31, 6  ;;  %v1419_v5 = vld [vmem:[#allocation2 + $0x114] sm:$0xf]  ;;  %1409 = vst [vmem:[#allocation2 + $0x110] sm:$0xf] %v1408_v36  ;;  %v1280_v10 = vrot.slane %v1278_v2, 5 }
 0x148   :  { %v1422_v6 = vld [vmem:[%s13938_s0 + $0x34] sm:$0xc]  ;;  %1550 = vst [vmem:[#allocation2 + $0x10c] sm:$0x8] %v1549_v16  ;;  %v1283_v11 = vrot.slane %v1281_v49, 6  ;;  %v1416_v12 = vrot.slane %v1411_v30, 6 }
 0x149   :  { %v1423_v21 = vld [vmem:[%s13938_s0 + $0x38] sm:$0x3]  ;;  %v1425_v9 = vshrl.u32 %v1422_v6, 16  ;;  %v1275_v13 = vor.u32 %v1274_v7, %v1271_v59  ;;  %v1428_v55 = vshll.u32 %v1422_v6, 16  ;;  %v1575_v60 = vld [vmem:[%s13938_s0 + $0x38] sm:$0xc] }
 0x14a   :  { %v1434_v57 = vshrl.u32 %v1423_v21, 16  ;;  %v1437_v15 = vshll.u32 %v1423_v21, 16  ;;  %v1284_v56 = vor.u32 %v1283_v11, %v1280_v10  ;;  %v1417_v17 = vsel %vm11413_vm8, %v9088_v52, %v1416_v12  ;;  %v12415_v1 = vld [vmem:[%s13938_s0 + $0x38] sm:$0x8]  ;;  %v1263_v24 = vld [vmem:[#allocation2 + $0xf0] sm:$0xf] }
 0x14b   :  { %v1427_v45 = vrot.slane %v1425_v9, 6  ;;  %v1557_v63 = vshrl.u32 %v12368_v18, 16  ;;  %v1276_v25 = vrot.slane %v1275_v13, 4  ;;  %v1287_v26 = vld [vmem:[#allocation2 + $0xf4] sm:$0xf]  ;;  %v1420_v3 = vsel %vm11314_vm2, %v1417_v17, %v1419_v5 }
 0x14c   :  { %v1430_v38 = vrot.slane %v1428_v55, 7  ;;  %v1264_v40 = vsel %vm11703_vm7, %v1261_v51, %v1263_v24  ;;  %1421 = vst [vmem:[#allocation2 + $0x114] sm:$0xf] %v1420_v3  ;;  %v1436_v46 = vrot.slane %v1434_v57, 6  ;;  %v1439_v43 = vrot.slane %v1437_v15, 7 }
 0x14d   :  { %v1579_v53 = vrot.slane %v1575_v60, 7  ;;  %1265 = vst [vmem:[#allocation2 + $0xf0] sm:$0xf] %v1264_v40  ;;  %v1285_v41 = vsel %vm11348_vm10, %v1276_v25, %v1284_v56  ;;  %v1443_v0 = vld [vmem:[#allocation2 + $0x118] sm:$0xf]  ;;  %v1592_v29 = vshll.u32 %v12415_v1, 16 }
 0x14e   :  { %v1431_v39 = vor.u32 %v1430_v38, %v1427_v45  ;;  %v1539_v42 = vld [vmem:[%s13938_s0 + $0x38] sm:$0x3]  ;;  %v9090_v19 = vrot.slane %v1557_v63, 11  ;;  %v1288_v44 = vsel %vm11703_vm7, %v1285_v41, %v1287_v26  ;;  %v1440_v31 = vor.u32 %v1439_v43, %v1436_v46  ;;  %v1686_v50 = vld [vmem:[%s13938_s0 + $0x38] sm:$0x8] }
 0x14f   :  { %v1544_v2 = vrot.slane %v1539_v42, 7  ;;  %v1553_v49 = vld [vmem:[%s13938_s0 + $0x38] sm:$0x7]  ;;  %v1580_v27 = vrot.slane %v1579_v53, 4  ;;  %v1571_v8 = vld [vmem:[#allocation2 + $0x110] sm:$0x8] }
 0x150   :  { %1289 = vst [vmem:[#allocation2 + $0xf4] sm:$0xf] %v1288_v44  ;;  %v1432_v51 = vrot.slane %v1431_v39, 4  ;;  %v1562_v30 = vshrl.u32 %v1553_v49, 16  ;;  %v1565_v52 = vshll.u32 %v1553_v49, 16  ;;  %v1594_v36 = vshrl.u32 %v12415_v1, 16 }
 0x151   :  { %1688 = vst [vmem:[#allocation2 + $0x130] sm:$0x8] %v1686_v50  ;;  %v1572_v16 = vsel %vm11356_vm11, %v1555_v32, %v1571_v8  ;;  %v1545_v59 = vsel %vm11484_vm3, %v1543_v54, %v1544_v2  ;;  %v1687_v7 = vld [vmem:[%s13938_s0 + $0x3c] sm:$0x7]  ;;  %v1689_v5 = vld [vmem:[#allocation2 + $0x154] sm:$0x7] }
 0x152   :  { %v1692_v6 = vld [vmem:[%s13938_s0 + $0x38] sm:$0x8]  ;;  %1573 = vst [vmem:[#allocation2 + $0x110] sm:$0x8] %v1572_v16  ;;  %v1441_v10 = vsel %vm11475_vm5, %v1432_v51, %v1440_v31  ;;  %1551 = vst [vmem:[#allocation2 + $0x130] sm:$0x7] %v1545_v59  ;;  %v1690_v32 = vsel %vm11434_vm9, %v1687_v7, %v1689_v5 }
 0x153   :  { %v1564_v18 = vrot.slane %v1562_v30, 7  ;;  %v1693_v54 = vld [vmem:[%s13938_s0 + $0x3c] sm:$0x7]  ;;  %v1695_v11 = vshrl.u32 %v1692_v6, 16  ;;  %v1444_v12 = vsel %vm11314_vm2, %v1441_v10, %v1443_v0  ;;  %1691 = vst [vmem:[#allocation2 + $0x154] sm:$0x7] %v1690_v32 }
 0x154   :  { %v1700_v21 = vshll.u32 %v1693_v54, 16  ;;  %v1704_v9 = vshrl.u32 %v1693_v54, 16  ;;  %v1829_v13 = vld [vmem:[%s13938_s0 + $0x3c] sm:$0x8]  ;;  %v1830_v55 = vld [vmem:[%s13938_s0 + $0x40] sm:$0x7] }
 0x155   :  { %1445 = vst [vmem:[#allocation2 + $0x118] sm:$0xf] %v1444_v12  ;;  %v1585_v57 = vld [vmem:[#allocation2 + $0x114] sm:$0x8]  ;;  %v1567_v15 = vor.u32 %v1565_v52, %v1564_v18  ;;  %v9095_v56 = vrot.slane %v1829_v13, 9  ;;  %v1835_v17 = vrot.slane %v1830_v55, 5 }
 0x156   :  { %v1844_v45 = vld [vmem:[%s13938_s0 + $0x40] sm:$0xf]  ;;  %v1586_v60 = vsel %vm11356_vm11, %v1579_v53, %v1585_v57  ;;  %v1702_v63 = vrot.slane %v1700_v21, 5  ;;  %v1706_v24 = vrot.slane %v1704_v9, 4  ;;  %v1576_v26 = vld [vmem:[%s13938_s0 + $0x3c] sm:$0x3] }
 0x157   :  { %v1846_v25 = vshrl.u32 %v1844_v45, 16  ;;  %1587 = vst [vmem:[#allocation2 + $0x114] sm:$0x8] %v1586_v60  ;;  %v1568_v3 = vsel %vm11498_vm1, %v9090_v19, %v1567_v15  ;;  %v1712_v38 = vld [vmem:[#allocation2 + $0x158] sm:$0x7]  ;;  %v1836_v40 = vsel %vm11369_vm12, %v9095_v56, %v1835_v17  ;;  %v1849_v46 = vshll.u32 %v1844_v45, 16 }
 0x158   :  { %v1581_v43 = vrot.slane %v1576_v26, 7  ;;  %v1590_v53 = vld [vmem:[%s13938_s0 + $0x3c] sm:$0x7]  ;;  %v1715_v41 = vld [vmem:[%s13938_s0 + $0x3c] sm:$0x8]  ;;  %v1703_v39 = vsel %vm11532_vm13, %v1695_v11, %v1702_v63  ;;  %v1707_v0 = vor.u32 %v1706_v24, %v1702_v63  ;;  %v9091_v19 = vrot.slane %v1594_v36, 11 }
 0x159   :  { %1574 = vst [vmem:[#allocation2 + $0x134] sm:$0x7] %v1568_v3  ;;  %v1848_v42 = vrot.slane %v1846_v25, 5  ;;  %v1716_v44 = vld [vmem:[%s13938_s0 + $0x40] sm:$0x7]  ;;  %v1851_v31 = vrot.slane %v1849_v46, 6 }
 0x15a   :  { %1717 = vst [vmem:[#allocation2 + $0x138] sm:$0x8] %v1715_v41  ;;  %1711 = vst [vmem:[#allocation2 + $0x134] sm:$0x8] %v1703_v39  ;;  %v1582_v2 = vsel %vm11484_vm3, %v1580_v27, %v1581_v43  ;;  %v1599_v49 = vshrl.u32 %v1590_v53, 16  ;;  %v1602_v50 = vshll.u32 %v1590_v53, 16 }
 0x15b   :  { %v1718_v8 = vld [vmem:[#allocation2 + $0x15c] sm:$0x7]  ;;  %v10751_v51 = vld [vmem:[#allocation2 + $0xec] ss:$36 sps:$4 sm:$0xff]   ;;  %v1708_v52 = vrot.slane %v1707_v0, 4  ;;  %v1837_v5 = vrot.slane %v1835_v17, 4  ;;  %v1852_v18 = vor.u32 %v1851_v31, %v1848_v42 }
 0x15c   :  { %v10753_v30 = vld [vmem:[#allocation2 + $0xe8] ss:$36 sps:$4 sm:$0xff]   ;;  %1588 = vst [vmem:[#allocation2 + $0x138] sm:$0x7] %v1582_v2  ;;  %v1719_v36 = vsel %vm11434_vm9, %v1716_v44, %v1718_v8  ;;  %v1840_v16 = vld [vmem:[#allocation2 + $0x154] sm:$0xc]  ;;  %3349 = vmatprep.mubr.bf16.mxu0 %v10751_v51 }
 0x15d   :  { %v1601_v59 = vrot.slane %v1599_v49, 7  ;;  %1720 = vst [vmem:[#allocation2 + $0x15c] sm:$0x7] %v1719_v36  ;;  %v1721_v7 = vld [vmem:[%s13938_s0 + $0x3c] sm:$0x8]  ;;  %v1713_v6 = vsel %vm11434_vm9, %v1708_v52, %v1712_v38  ;;  %v1841_v10 = vsel %vm11508_vm15, %v1836_v40, %v1840_v16  ;;  %3350 = vmatmul.mubr.bf16.gmra.mrb[40].mxu0 %v10753_v30  ;;  %v9769_v30 = vpop.f32.mrb[0].mxu0 }
 0x15e   :  { %v1608_v27 = vld [vmem:[#allocation2 + $0x118] sm:$0x8]  ;;  %v1722_v32 = vld [vmem:[%s13938_s0 + $0x40] sm:$0x7]  ;;  %v1724_v54 = vshrl.u32 %v1721_v7, 16 }
 0x15f   :  { %v1609_v11 = vsel %vm11356_vm11, %v1592_v29, %v1608_v27  ;;  %1714 = vst [vmem:[#allocation2 + $0x158] sm:$0x7] %v1713_v6  ;;  %1842 = vst [vmem:[#allocation2 + $0x154] sm:$0xc] %v1841_v10  ;;  %v1604_v12 = vor.u32 %v1602_v50, %v1601_v59  ;;  %v1729_v21 = vshll.u32 %v1722_v32, 16  ;;  %v1733_v9 = vshrl.u32 %v1722_v32, 16 }
 0x160   :  { %v1860_v13 = vld [vmem:[%s13938_s0 + $0x40] sm:$0x8]  ;;  %1843 = vst [vmem:[#allocation2 + $0x178] sm:$0x3] %v1837_v5  ;;  %1610 = vst [vmem:[#allocation2 + $0x118] sm:$0x8] %v1609_v11 }
 0x161   :  { %v1861_v55 = vld [vmem:[%s13938_s0 + $0x44] sm:$0x7]  ;;  %v9096_v57 = vrot.slane %v1860_v13, 9  ;;  %v1853_v29 = vrot.slane %v1852_v18, 4  ;;  %v1605_v15 = vsel %vm11498_vm1, %v9091_v19, %v1604_v12  ;;  %v1731_v56 = vrot.slane %v1729_v21, 5 }
 0x162   :  { %v1875_v1 = vld [vmem:[%s13938_s0 + $0x44] sm:$0xf]  ;;  %v1735_v17 = vrot.slane %v1733_v9, 4  ;;  %v1866_v45 = vrot.slane %v1861_v55, 5  ;;  %1611 = vst [vmem:[#allocation2 + $0x13c] sm:$0x7] %v1605_v15 }
 0x163   :  { %v1877_v60 = vshrl.u32 %v1875_v1, 16  ;;  %v1880_v63 = vshll.u32 %v1875_v1, 16  ;;  %1859 = vst [vmem:[#allocation2 + $0x17c] sm:$0x3] %v1853_v29  ;;  %v1732_v24 = vsel %vm11532_vm13, %v1724_v54, %v1731_v56  ;;  %v1741_v26 = vld [vmem:[#allocation2 + $0x160] sm:$0x7] }
 0x164   :  { %v1736_v25 = vor.u32 %v1735_v17, %v1731_v56  ;;  %v1867_v3 = vsel %vm11369_vm12, %v9096_v57, %v1866_v45  ;;  %v1972_v38 = vld [vmem:[%s13938_s0 + $0x44] sm:$0xf]  ;;  %1740 = vst [vmem:[#allocation2 + $0x13c] sm:$0x8] %v1732_v24  ;;  %v1871_v46 = vld [vmem:[#allocation2 + $0x15c] sm:$0xc] }
 0x165   :  { %v1982_v40 = vld [vmem:[%s13938_s0 + $0x44] sm:$0xf]  ;;  %v1879_v43 = vrot.slane %v1877_v60, 5  ;;  %v1882_v53 = vrot.slane %v1880_v63, 6  ;;  %v1974_v41 = vrot.slane %v1972_v38, 6  ;;  %v1872_v42 = vsel %vm11508_vm15, %v1867_v3, %v1871_v46  ;;  %v9770_v9 = vpop.f32.mrb[1].mxu0 }
 0x166   :  { %v1984_v39 = vshrl.u32 %v1982_v40, 16  ;;  %v1737_v0 = vrot.slane %v1736_v25, 4  ;;  %v1979_v19 = vld [vmem:[#allocation2 + $0x19c] sm:$0x3]  ;;  %v1987_v44 = vshll.u32 %v1982_v40, 16  ;;  %v1868_v6 = vrot.slane %v1866_v45, 4 }
 0x167   :  { %v12531_v31 = vld [vmem:[%s13938_s0 + $0x48] sm:$0xf]  ;;  %v1856_v2 = vld [vmem:[#allocation2 + $0x158] sm:$0xc]  ;;  %1873 = vst [vmem:[#allocation2 + $0x15c] sm:$0xc] %v1872_v42  ;;  %v12533_v49 = vor.u32 %v1882_v53, %v1879_v43  ;;  %v12557_v1 = vadd.f32 %v9770_v9, %v9769_v30 }
 0x168   :  { %v1975_v50 = vrot.slane %v1974_v41, 4  ;;  %1978 = vst [vmem:[#allocation2 + $0x178] sm:$0xc] %v1974_v41  ;;  %v1986_v8 = vrot.slane %v1984_v39, 6  ;;  %v2097_v51 = vrot.slane %v12531_v31, 7  ;;  %v1857_v16 = vsel %vm11508_vm15, %v1852_v18, %v1856_v2  ;;  %v9772_v45 = vpop.f32.mrb[2].mxu0 }
 0x169   :  { %v10754_v52 = vld [vmem:[#allocation2 + $0xf4] ss:$36 sps:$4 sm:$0xff]   ;;  %v1742_v59 = vsel %vm11434_vm9, %v1737_v0, %v1741_v26  ;;  %v1989_v7 = vrot.slane %v1987_v44, 7  ;;  %1858 = vst [vmem:[#allocation2 + $0x158] sm:$0xc] %v1857_v16  ;;  %v1884_v10 = vrot.slane %v12533_v49, 4 }
 0x16a   :  { %v10756_v36 = vld [vmem:[#allocation2 + $0xf0] ss:$36 sps:$4 sm:$0xff]   ;;  %1743 = vst [vmem:[#allocation2 + $0x160] sm:$0x7] %v1742_v59  ;;  %v1980_v5 = vsel %vm14004_vm0, %v1975_v50, %v1979_v19  ;;  %v2105_v27 = vld [vmem:[%s13938_s0 + $0x48] sm:$0xe]  ;;  %3437 = vmatprep.mubr.bf16.mxu1 %v10754_v52 }
 0x16b   :  { %v1998_v18 = vld [vmem:[%s13938_s0 + $0x48] sm:$0xf]  ;;  %1981 = vst [vmem:[#allocation2 + $0x19c] sm:$0x3] %v1980_v5  ;;  %v1990_v32 = vor.u32 %v1989_v7, %v1986_v8  ;;  %v1995_v54 = vld [vmem:[#allocation2 + $0x1a0] sm:$0x3]  ;;  %3438 = vmatmul.mubr.bf16.gmra.mrb[40].mxu1 %v10756_v36 }
 0x16c   :  { %v2108_v11 = vshrl.u32 %v2105_v27, 16  ;;  %v2111_v12 = vshll.u32 %v2105_v27, 16  ;;  %v2000_v21 = vrot.slane %v1998_v18, 6  ;;  %1874 = vst [vmem:[#allocation2 + $0x180] sm:$0x3] %v1868_v6  ;;  %v9827_v40 = vpop.f32.mrb[0].mxu1 }
 0x16d   :  { %1890 = vst [vmem:[#allocation2 + $0x184] sm:$0x3] %v1884_v10  ;;  %v2005_v13 = vld [vmem:[#allocation2 + $0x1a4] sm:$0x3]  ;;  %v2008_v55 = vld [vmem:[%s13938_s0 + $0x48] sm:$0xf] }
 0x16e   :  { %v12555_v57 = vld [vmem:[%s13938_s0 + $0x4c] sm:$0xf]  ;;  %v1991_v29 = vrot.slane %v1990_v32, 4  ;;  %1994 = vst [vmem:[#allocation2 + $0x17c] sm:$0xc] %v1990_v32  ;;  %v2110_v15 = vrot.slane %v2108_v11, 7 }
 0x16f   :  { %v2001_v56 = vrot.slane %v2000_v21, 4  ;;  %2004 = vst [vmem:[#allocation2 + $0x180] sm:$0xc] %v2000_v21  ;;  %v2010_v17 = vshrl.u32 %v2008_v55, 16  ;;  %v2013_v60 = vshll.u32 %v2008_v55, 16  ;;  %v2127_v63 = vrot.slane %v12555_v57, 7 }
 0x170   :  { %v12563_v24 = vld [vmem:[%s13938_s0 + $0x4c] sm:$0xe]  ;;  %v1996_v25 = vsel %vm14004_vm0, %v1991_v29, %v1995_v54  ;;  %v2106_v38 = vld [vmem:[%s13938_s0 + $0x4c] sm:$0x1]  ;;  %v2098_v41 = vrot.slane %v2097_v51, 4  ;;  %v2114_v44 = vrot.slane %v2110_v15, 4  ;;  %v2113_v5 = vor.u32 %v2111_v12, %v2110_v15 }
 0x171   :  { %v2006_v26 = vsel %vm14004_vm0, %v2001_v56, %v2005_v13  ;;  %v2012_v3 = vrot.slane %v2010_v17, 6  ;;  %1997 = vst [vmem:[#allocation2 + $0x1a0] sm:$0x3] %v1996_v25  ;;  %v2015_v46 = vrot.slane %v2013_v60, 7  ;;  %v2138_v43 = vshrl.u32 %v12563_v24, 16  ;;  %v9773_v31 = vpop.f32.mrb[3].mxu0 }
 0x172   :  { %2007 = vst [vmem:[#allocation2 + $0x1a4] sm:$0x3] %v2006_v26  ;;  %v2141_v53 = vshll.u32 %v12563_v24, 16  ;;  %v2136_v39 = vld [vmem:[%s13938_s0 + $0x50] sm:$0x1]  ;;  %v2116_v52 = vshll.u32 %v2106_v38, 16  ;;  %v12594_v54 = vadd.f32 %v9773_v31, %v9772_v45 }
 0x173   :  { %v10758_v0 = vld [vmem:[#allocation2 + $0x134] ss:$36 sps:$4 sm:$0xff]   ;;  %v2021_v19 = vld [vmem:[#allocation2 + $0x1a8] sm:$0x3]  ;;  %v1887_v2 = vld [vmem:[#allocation2 + $0x160] sm:$0xc]  ;;  %v2016_v8 = vor.u32 %v2015_v46, %v2012_v3 }
 0x174   :  { %v10760_v42 = vld [vmem:[#allocation2 + $0x130] ss:$36 sps:$4 sm:$0xff]   ;;  %v2101_v50 = vld [vmem:[#allocation2 + $0x19c] sm:$0xe]  ;;  %v2140_v30 = vrot.slane %v2138_v43, 7  ;;  %3357 = vmatprep.mubr.bf16.mxu0 %v10758_v0  ;;  %v1888_v36 = vsel %vm11508_vm15, %v12533_v49, %v1887_v2  ;;  %v2128_v59 = vrot.slane %v2127_v63, 4  ;;  %v2118_v6 = vsel %vm11498_vm1, %v2114_v44, %v2116_v52 }
 0x175   :  { %2104 = vst [vmem:[#allocation2 + $0x1c0] sm:$0x1] %v2098_v41  ;;  %v2102_v16 = vsel %vm11635_vm14, %v2097_v51, %v2101_v50  ;;  %v2146_v7 = vshll.u32 %v2136_v39, 16  ;;  %3358 = vmatmul.mubr.bf16.gmra.mrb[44].mxu0 %v10760_v42  ;;  %1889 = vst [vmem:[#allocation2 + $0x160] sm:$0xc] %v1888_v36  ;;  %v2017_v27 = vrot.slane %v2016_v8, 4 }
 0x176   :  { %2103 = vst [vmem:[#allocation2 + $0x19c] sm:$0xe] %v2102_v16  ;;  %2020 = vst [vmem:[#allocation2 + $0x184] sm:$0xc] %v2016_v8  ;;  %v2144_v10 = vrot.slane %v2140_v30, 4  ;;  %v9828_v11 = vpop.f32.mrb[1].mxu1  ;;  %v2143_v36 = vor.u32 %v2141_v53, %v2140_v30 }
 0x177   :  { %v205_v49 = vld [vmem:[%s13938_s0 + $0x8] sm:$0xc]  ;;  %2124 = vst [vmem:[#allocation2 + $0x1c4] sm:$0x1] %v2118_v6  ;;  %2134 = vst [vmem:[#allocation2 + $0x1c8] sm:$0x1] %v2128_v59  ;;  %v2022_v12 = vsel %vm14004_vm0, %v2017_v27, %v2021_v19  ;;  %v12608_v57 = vadd.f32 %v9828_v11, %v9827_v40 }
 0x178   :  { %v206_v51 = vld [vmem:[%s13938_s0 + $0xc] sm:$0x3]  ;;  %v9067_v18 = vrot.slane %v205_v49, 10  ;;  %v217_v32 = vld [vmem:[#allocation2 + $0x20] sm:$0xf]  ;;  %v2148_v21 = vsel %vm11498_vm1, %v2144_v10, %v2146_v7  ;;  %v9830_v29 = vpop.f32.mrb[2].mxu1 }
 0x179   :  { %v214_v9 = vrot.slane %v206_v51, 6  ;;  %v12603_v13 = vld [vmem:[%s13938_s0 + $0xc] sm:$0xc]  ;;  %v375_v55 = vld [vmem:[%s13938_s0 + $0x10] sm:$0x3]  ;;  %v9831_v0 = vpop.f32.mrb[3].mxu1 }
 0x17a   :  { %v2121_v15 = vld [vmem:[#allocation2 + $0x1a0] sm:$0xe]  ;;  %2023 = vst [vmem:[#allocation2 + $0x1a8] sm:$0x3] %v2022_v12  ;;  %v2131_v56 = vld [vmem:[#allocation2 + $0x1a4] sm:$0xe]  ;;  %v12638_v50 = vadd.f32 %v9831_v0, %v9830_v29 }
 0x17b   :  { %2154 = vst [vmem:[#allocation2 + $0x1cc] sm:$0x1] %v2148_v21  ;;  %v381_v17 = vrot.slane %v12603_v13, 7  ;;  %v383_v45 = vrot.slane %v375_v55, 7  ;;  %v2122_v60 = vsel %vm11635_vm14, %v2113_v5, %v2121_v15  ;;  %v2132_v25 = vsel %vm11635_vm14, %v2127_v63, %v2131_v56  ;;  %v551_v3 = vld [vmem:[%s13938_s0 + $0x10] sm:$0x8] }
 0x17c   :  { %v215_v26 = vsel %vm11413_vm8, %v9067_v18, %v214_v9  ;;  %v552_v38 = vld [vmem:[%s13938_s0 + $0x14] sm:$0x7]  ;;  %v554_v40 = vld [vmem:[#allocation2 + $0x68] sm:$0x7]  ;;  %2123 = vst [vmem:[#allocation2 + $0x1a0] sm:$0xe] %v2122_v60 }
 0x17d   :  { %2133 = vst [vmem:[#allocation2 + $0x1a4] sm:$0xe] %v2132_v25  ;;  %v218_v46 = vsel %vm11314_vm2, %v215_v26, %v217_v32  ;;  %v382_v63 = vrot.slane %v381_v17, 4  ;;  %553 = vst [vmem:[#allocation2 + $0x44] sm:$0x8] %v551_v3  ;;  %v555_v43 = vsel %vm11434_vm9, %v552_v38, %v554_v40 }
 0x17e   :  { %v696_v41 = vld [vmem:[%s13938_s0 + $0x14] sm:$0x8]  ;;  %v697_v39 = vld [vmem:[%s13938_s0 + $0x18] sm:$0x7]  ;;  %219 = vst [vmem:[#allocation2 + $0x20] sm:$0xf] %v218_v46 }
 0x17f   :  { %556 = vst [vmem:[#allocation2 + $0x68] sm:$0x7] %v555_v43  ;;  %v9068_v42 = vrot.slane %v696_v41, 9  ;;  %v702_v19 = vrot.slane %v697_v39, 5  ;;  %v863_v44 = vld [vmem:[%s13938_s0 + $0x1c] sm:$0xf]  ;;  %v384_v16 = vsel %vm11484_vm3, %v382_v63, %v383_v45 }
 0x180   :  { %v870_v2 = vld [vmem:[#allocation2 + $0xb0] sm:$0x3]  ;;  %v10761_v8 = vld [vmem:[#allocation2 + $0x13c] ss:$36 sps:$4 sm:$0xff]   ;;  %v865_v59 = vrot.slane %v863_v44, 6 }
 0x181   :  { %v10763_v52 = vld [vmem:[#allocation2 + $0x138] ss:$36 sps:$4 sm:$0xff]   ;;  %v12644_v7 = vld [vmem:[#allocation2 + $0x1c0] sm:$0x11]  ;;  %390 = vst [vmem:[#allocation2 + $0x44] sm:$0x7] %v384_v16  ;;  %3445 = vmatprep.mubr.bf16.mxu1 %v10761_v8  ;;  %v703_v51 = vsel %vm11369_vm12, %v9068_v42, %v702_v19 }
 0x182   :  { %v704_v5 = vrot.slane %v702_v19, 4  ;;  %v12649_v27 = vld [vmem:[%s13938_s0 + $0x20] sm:$0xf]  ;;  %v866_v6 = vrot.slane %v865_v59, 4  ;;  %869 = vst [vmem:[#allocation2 + $0x8c] sm:$0xc] %v865_v59  ;;  %3446 = vmatmul.mubr.bf16.gmra.mrb[44].mxu1 %v10763_v52  ;;  %v9161_v55 = vcombine.high %v12644_v7, %v12644_v7 }
 0x183   :  { %v1024_v10 = vrot.slane %v12649_v27, 7  ;;  %v1154_v24 = vld [vmem:[%s13938_s0 + $0x24] sm:$0xe]  ;;  %v1155_v53 = vld [vmem:[%s13938_s0 + $0x28] sm:$0x1]  ;;  %v9775_v19 = vpop.f32.mrb[4].mxu0 }
 0x184   :  { %v2151_v30 = vld [vmem:[#allocation2 + $0x1a8] sm:$0xe]  ;;  %710 = vst [vmem:[#allocation2 + $0x8c] sm:$0x3] %v704_v5  ;;  %1156 = vst [vmem:[#allocation2 + $0xd4] sm:$0xe] %v1154_v24  ;;  %v871_v18 = vsel %vm14004_vm0, %v866_v6, %v870_v2  ;;  %v9160_v6 = vcombine.low %v12644_v7, %v12644_v7 }
 0x185   :  { %v1157_v49 = vld [vmem:[#allocation2 + $0xf8] sm:$0x1]  ;;  %v2152_v31 = vsel %vm11635_vm14, %v2143_v36, %v2151_v30  ;;  %v1290_v32 = vld [vmem:[%s13938_s0 + $0x30] sm:$0xc]  ;;  %v1291_v11 = vld [vmem:[%s13938_s0 + $0x34] sm:$0x3] }
 0x186   :  { %v1446_v12 = vld [vmem:[%s13938_s0 + $0x34] sm:$0x8]  ;;  %v10765_v21 = vld [vmem:[#allocation2 + $0x17c] ss:$36 sps:$4 sm:$0xff]   ;;  %2153 = vst [vmem:[#allocation2 + $0x1a8] sm:$0xe] %v2152_v31  ;;  %v1158_v15 = vsel %vm11647_vm4, %v1155_v53, %v1157_v49 }
 0x187   :  { %v10767_v9 = vld [vmem:[#allocation2 + $0x178] ss:$36 sps:$4 sm:$0xff]   ;;  %872 = vst [vmem:[#allocation2 + $0xb0] sm:$0x3] %v871_v18  ;;  %v1025_v29 = vrot.slane %v1024_v10, 4  ;;  %3365 = vmatprep.mubr.bf16.mxu0 %v10765_v21  ;;  %v9084_v3 = vrot.slane %v1290_v32, 10 }
 0x188   :  { %v387_v56 = vld [vmem:[#allocation2 + $0x20] sm:$0x8]  ;;  %v707_v45 = vld [vmem:[#allocation2 + $0x68] sm:$0xc]  ;;  %1159 = vst [vmem:[#allocation2 + $0xf8] sm:$0x1] %v1158_v15  ;;  %3366 = vmatmul.mubr.bf16.gmra.mrb[48].mxu0 %v10767_v9 }
 0x189   :  { %v12679_v60 = vld [vmem:[#allocation2 + $0x1c8] sm:$0x11]  ;;  %v388_v25 = vsel %vm11356_vm11, %v381_v17, %v387_v56  ;;  %v708_v26 = vsel %vm11508_vm15, %v703_v51, %v707_v45  ;;  %1031 = vst [vmem:[#allocation2 + $0xd4] sm:$0x1] %v1025_v29  ;;  %v1296_v38 = vrot.slane %v1291_v11, 6  ;;  %v9089_v46 = vrot.slane %v1446_v12, 11  ;;  %3373 = vmatprep.mubr.bf16.mxu0 %v9161_v55 }
 0x18a   :  { %v1447_v40 = vld [vmem:[%s13938_s0 + $0x38] sm:$0x7]  ;;  %389 = vst [vmem:[#allocation2 + $0x20] sm:$0x8] %v388_v25  ;;  %709 = vst [vmem:[#allocation2 + $0x68] sm:$0xc] %v708_v26  ;;  %v9163_v22 = vcombine.high %v12679_v60, %v12679_v60 }
 0x18b   :  { %v1452_v63 = vrot.slane %v1447_v40, 7  ;;  %v1455_v43 = vld [vmem:[#allocation2 + $0x11c] sm:$0xf]  ;;  %v1744_v17 = vld [vmem:[%s13938_s0 + $0x40] sm:$0xf]  ;;  %v1297_v44 = vsel %vm11413_vm8, %v9084_v3, %v1296_v38  ;;  %v9776_v16 = vpop.f32.mrb[5].mxu0 }
 0x18c   :  { %v1613_v13 = vld [vmem:[%s13938_s0 + $0x3c] sm:$0x7]  ;;  %v1751_v41 = vld [vmem:[#allocation2 + $0x164] sm:$0x7]  ;;  %v1746_v0 = vrot.slane %v1744_v17, 5  ;;  %v9777_v53 = vadd.f32 %v9776_v16, %v9775_v19  ;;  %v9778_v12 = vpop.f32.mrb[6].mxu0 }
 0x18d   :  { %v1453_v39 = vsel %vm11484_vm3, %v9089_v46, %v1452_v63  ;;  %1617 = vst [vmem:[#allocation2 + $0x140] sm:$0x7] %v1613_v13  ;;  %v12701_v42 = vld [vmem:[%s13938_s0 + $0x44] sm:$0xf]  ;;  %v2024_v52 = vld [vmem:[%s13938_s0 + $0x48] sm:$0xe]  ;;  %v9162_v63 = vcombine.low %v12679_v60, %v12679_v60 }
 0x18e   :  { %v1456_v2 = vsel %vm11314_vm2, %v1453_v39, %v1455_v43  ;;  %v1893_v8 = vrot.slane %v12701_v42, 6  ;;  %v2025_v36 = vld [vmem:[%s13938_s0 + $0x4c] sm:$0x1]  ;;  %v10768_v59 = vld [vmem:[#allocation2 + $0x184] ss:$36 sps:$4 sm:$0xff]   ;;  %v1747_v24 = vrot.slane %v1746_v0, 4 }
 0x18f   :  { %v10770_v5 = vld [vmem:[#allocation2 + $0x180] ss:$36 sps:$4 sm:$0xff]   ;;  %1457 = vst [vmem:[#allocation2 + $0x11c] sm:$0xf] %v1456_v2  ;;  %1750 = vst [vmem:[#allocation2 + $0x140] sm:$0x8] %v1746_v0  ;;  %3453 = vmatprep.mubr.bf16.mxu1 %v10768_v59 }
 0x190   :  { %v1028_v30 = vld [vmem:[#allocation2 + $0xb0] sm:$0xe]  ;;  %v1299_v49 = vld [vmem:[#allocation2 + $0xf8] sm:$0xf]  ;;  %v1894_v31 = vrot.slane %v1893_v8, 4  ;;  %v2028_v51 = vrot.slane %v2024_v52, 7  ;;  %v1752_v32 = vsel %vm11434_vm9, %v1747_v24, %v1751_v41  ;;  %3454 = vmatmul.mubr.bf16.gmra.mrb[48].mxu1 %v10770_v5  ;;  %3374 = vmatmul.mubr.bf16.gmra.mrb[52].mxu0 %v9160_v6 }
 0x191   :  { %v1029_v18 = vsel %vm11635_vm14, %v1024_v10, %v1028_v30  ;;  %v1300_v7 = vsel %vm11703_vm7, %v1297_v44, %v1299_v49  ;;  %v2030_v11 = vrot.slane %v2025_v36, 7  ;;  %1753 = vst [vmem:[#allocation2 + $0x164] sm:$0x7] %v1752_v32  ;;  %3461 = vmatprep.mubr.bf16.mxu1 %v9163_v22  ;;  %v1612_v27 = vld [vmem:[%s13938_s0 + $0x38] sm:$0x8]  ;;  %v9833_v21 = vpop.f32.mrb[4].mxu1 }
 0x192   :  { %1030 = vst [vmem:[#allocation2 + $0xb0] sm:$0xe] %v1029_v18  ;;  %1301 = vst [vmem:[#allocation2 + $0xf8] sm:$0xf] %v1300_v7  ;;  %v2029_v10 = vrot.slane %v2028_v51, 4  ;;  %v12731_v9 = vld [vmem:[#allocation5] sm:$0xff] }
 0x193   :  { %1900 = vst [vmem:[#allocation2 + $0x188] sm:$0x3] %v1894_v31  ;;  %2034 = vst [vmem:[#allocation2 + $0x188] sm:$0xc] %v2028_v51  ;;  %v2035_v23 = vld [vmem:[#allocation2 + $0x1ac] sm:$0x3] }
 0x194   :  { %vm13957_vm2 = vmmov 0   ;;  %v2156_v55 = vld [vmem:[%s13938_s0 + $0x50] sm:$0x1]  ;;  %v12738_v29 = vld [vmem:[#allocation8] ss:$0 sm:$0xff]  ;;  %v9779_v15 = vpop.f32.mrb[7].mxu0  ;;  %v2031_v25 = vsel %vm11484_vm3, %v2029_v10, %v2030_v11 }
 0x195   :  { %10443 = vmatprep.mubr.msk.bf16.mxu0 %vm13957_vm2, %v12731_v9  ;;  %v9834_v56 = vpop.f32.mrb[5].mxu1  ;;  %v10777_v45 = vld [vmem:[#allocation2 + $0x20] ss:$36 sps:$4 sm:$0xff]   ;;  %2160 = vst [vmem:[#allocation2 + $0x1d0] sm:$0x1] %v2156_v55  ;;  %v3152_v26 = vadd.f32 %v12557_v1, %v12738_v29  ;;  %v3155_v3 = vadd.f32 %v12594_v54, %v12738_v29  ;;  %v3160_v38 = vadd.f32 %v9777_v53, %v12738_v29  ;;  %v9781_v46 = vpop.f32.mrb[8].mxu0 }
 0x196   :  { %v9836_v40 = vpop.f32.mrb[6].mxu1  ;;  %v1614_v43 = vld [vmem:[#allocation2 + $0x11c] sm:$0x8]  ;;  %v2036_v13 = vsel %vm14004_vm0, %v2031_v25, %v2035_v23  ;;  %v9780_v17 = vadd.f32 %v9779_v15, %v9778_v12  ;;  %v9835_v41 = vadd.f32 %v9834_v56, %v9833_v21  ;;  %v9782_v0 = vpop.f32.mrb[9].mxu0  ;;  %v10778_v49 = vld [vmem:[#allocation2 + $0x68] ss:$36 sps:$4 sm:$0xff]  }
 0x197   :  { %v9837_v39 = vpop.f32.mrb[7].mxu1  ;;  %v1615_v1 = vsel %vm11356_vm11, %v1612_v27, %v1614_v43  ;;  %2037 = vst [vmem:[#allocation2 + $0x1ac] sm:$0x3] %v2036_v13  ;;  %v12754_v54 = vadd.f32 %v12608_v57, %v3152_v26  ;;  %v12757_v19 = vadd.f32 %v12638_v50, %v3155_v3  ;;  %v9784_v60 = vpop.f32.mrb[10].mxu0  ;;  %v9783_v36 = vadd.f32 %v9782_v0, %v9781_v46  ;;  %v2155_v50 = vld [vmem:[%s13938_s0 + $0x4c] sm:$0xe] }
 0x198   :  { %v9838_v44 = vadd.f32 %v9837_v39, %v9836_v40  ;;  %1616 = vst [vmem:[#allocation2 + $0x11c] sm:$0x8] %v1615_v1  ;;  %v3163_v2 = vadd.f32 %v9780_v17, %v12738_v29  ;;  %v12760_v52 = vadd.f32 %v9835_v41, %v3160_v38  ;;  %v9785_v16 = vpop.f32.mrb[11].mxu0  ;;  %3462 = vmatmul.mubr.bf16.gmra.mrb[52].mxu1 %v9162_v63  ;;  %v1897_v5 = vld [vmem:[#allocation2 + $0x164] sm:$0xc]  ;;  %v9839_v24 = vpop.f32.mrb[8].mxu1 }
 0x199   :  { %v9786_v59 = vadd.f32 %v9785_v16, %v9784_v60  ;;  %10444 = vmatmul.mubr.bf16.vlgmr.msra.gmra.mrb[56].mxu0 %v10777_v45  ;;  %v1898_v57 = vsel %vm11508_vm15, %v1893_v8, %v1897_v5  ;;  %v3168_v22 = vadd.f32 %v9783_v36, %v12738_v29  ;;  %v9840_v30 = vpop.f32.mrb[9].mxu1  ;;  %v10779_v12 = vld [vmem:[#allocation2 + $0xb0] ss:$36 sps:$4 sm:$0xff]   ;;  %v9787_v10 = vpop.f32.mrb[12].mxu0  ;;  %vm14005_vm7 = vsmask.f32 3328 }
 0x19a   :  { %v12762_v6 = vadd.f32 %v9838_v44, %v3163_v2  ;;  %10447 = vmatprep.mubr.msk.bf16.mxu0 %vm13957_vm2, %v12731_v9  ;;  %1899 = vst [vmem:[#allocation2 + $0x164] sm:$0xc] %v1898_v57  ;;  %v9841_v8 = vadd.f32 %v9840_v30, %v9839_v24  ;;  %v9842_v51 = vpop.f32.mrb[10].mxu1  ;;  %v9788_v23 = vpop.f32.mrb[13].mxu0  ;;  %v3727_v47 = vld [vmem:[#allocation2 + $0x1c] sm:$0x7] }
 0x19b   :  { %v3171_v31 = vadd.f32 %v9786_v59, %v12738_v29  ;;  %v9843_v18 = vpop.f32.mrb[11].mxu1  ;;  %v9789_v55 = vadd.f32 %v9788_v23, %v9787_v10  ;;  %v9790_v15 = vpop.f32.mrb[14].mxu0 }
 0x19c   :  { %v12777_v7 = vadd.f32 %v9841_v8, %v3168_v22  ;;  %v9844_v32 = vadd.f32 %v9843_v18, %v9842_v51  ;;  %v9791_v56 = vpop.f32.mrb[15].mxu0  ;;  %v10783_v39 = vld [vmem:[#allocation2 + $0x1d0] ss:$0 sps:$4 sm:$0x11]  }
 0x19d   :  { %v9792_v45 = vadd.f32 %v9791_v56, %v9790_v15  ;;  %v3176_v26 = vadd.f32 %v9789_v55, %v12738_v29 }
 0x19e   :  { %v2157_v53 = vld [vmem:[#allocation2 + $0x1ac] sm:$0xe]  ;;  %v12779_v11 = vadd.f32 %v9844_v32, %v3171_v31 }
 0x19f   :  { %v2158_v42 = vsel %vm11635_vm14, %v2155_v50, %v2157_v53  ;;  %v10780_v27 = vld [vmem:[#allocation2 + $0xf8] ss:$36 sps:$4 sm:$0xff]   ;;  %v3179_v40 = vadd.f32 %v9792_v45, %v12738_v29 }
 0x1a0   :  { %2159 = vst [vmem:[#allocation2 + $0x1ac] sm:$0xe] %v2158_v42 }
 0x1a1   :  { %10448 = vmatmul.mubr.bf16.gmra.mrb[60].mxu0 %v10778_v49  ;;  %v10781_v21 = vld [vmem:[#allocation2 + $0x140] ss:$36 sps:$4 sm:$0xff]  }
 0x1a2   :  { %10451 = vmatprep.mubr.msk.bf16.mxu0 %vm13957_vm2, %v12731_v9 }
 0x1a6   :  { %v9845_v3 = vpop.f32.mrb[12].mxu1 }
 0x1a7   :  { %v10782_v25 = vld [vmem:[#allocation2 + $0x188] ss:$36 sps:$4 sm:$0xff]   ;;  %v9846_v38 = vpop.f32.mrb[13].mxu1 }
 0x1a8   :  { %v9847_v46 = vadd.f32 %v9846_v38, %v9845_v3  ;;  %v9848_v63 = vpop.f32.mrb[14].mxu1 }
 0x1a9   :  { %10452 = vmatmul.mubr.bf16.gmra.mrb[64].mxu0 %v10779_v12  ;;  %v9849_v43 = vpop.f32.mrb[15].mxu1 }
 0x1aa   :  { %10455 = vmatprep.mubr.msk.bf16.mxu0 %vm13957_vm2, %v12731_v9  ;;  %v12791_v13 = vadd.f32 %v9847_v46, %v3176_v26  ;;  %v9850_v17 = vadd.f32 %v9849_v43, %v9848_v63 }
 0x1ac   :  { %v12795_v41 = vadd.f32 %v9850_v17, %v3179_v40 }
 0x1b0   :  { %v9793_v0 = vpop.f32.mrb[16].mxu0 }
 0x1b1   :  { %10456 = vmatmul.mubr.bf16.gmra.mrb[68].mxu0 %v10780_v27  ;;  %v9794_v1 = vpop.f32.mrb[17].mxu0 }
 0x1b2   :  { %10459 = vmatprep.mubr.msk.bf16.mxu0 %vm13957_vm2, %v12731_v9  ;;  %v9795_v44 = vadd.f32 %v9794_v1, %v9793_v0  ;;  %v9796_v60 = vpop.f32.mrb[18].mxu0 }
 0x1b3   :  { %v9797_v2 = vpop.f32.mrb[19].mxu0 }
 0x1b4   :  { %v9798_v36 = vadd.f32 %v9797_v2, %v9796_v60  ;;  %v3184_v16 = vadd.f32 %v9795_v44, %v12738_v29 }
 0x1b6   :  { %v3187_v57 = vadd.f32 %v9798_v36, %v12738_v29 }
 0x1b9   :  { %10460 = vmatmul.mubr.bf16.gmra.mrb[72].mxu0 %v10781_v21 }
 0x1ba   :  { %10463 = vmatprep.mubr.msk.bf16.mxu0 %vm13957_vm2, %v12731_v9 }
 0x1bb   :  { %v9851_v59 = vpop.f32.mrb[16].mxu1 }
 0x1bc   :  { %v9852_v5 = vpop.f32.mrb[17].mxu1 }
 0x1bd   :  { %v9853_v50 = vadd.f32 %v9852_v5, %v9851_v59  ;;  %v9854_v22 = vpop.f32.mrb[18].mxu1 }
 0x1be   :  { %v9855_v24 = vpop.f32.mrb[19].mxu1 }
 0x1bf   :  { %v9856_v53 = vadd.f32 %v9855_v24, %v9854_v22 }
 0x1c1   :  { %10464 = vmatmul.mubr.bf16.gmra.mrb[76].mxu0 %v10782_v25  ;;  %v12801_v30 = vadd.f32 %v9856_v53, %v3187_v57 }
 0x1c2   :  { %10467 = vmatprep.mubr.msk.bf16.mxu0 %vm13957_vm2, %v12731_v9  ;;  %v12799_v9 = vadd.f32 %v9853_v50, %v3184_v16  ;;  %vm14006_vm2 = vcmask 1043457  }
 0x1c3   :  { %vm12955_vm6 = vmand %vm14006_vm2, %vm14005_vm7  ;;  %vm14016_vm2 = vsmask.f32 7938  ;;  %vm14017_vm7 = vcmask 1042432  }
 0x1c8   :  { %v9799_v49 = vpop.f32.mrb[20].mxu0 }
 0x1c9   :  { %10468 = vmatmul.mubr.bf16.gmra.mrb[80].mxu0 %v10783_v39  ;;  %v9800_v42 = vpop.f32.mrb[21].mxu0 }
 0x1ca   :  { %v9801_v31 = vadd.f32 %v9800_v42, %v9799_v49  ;;  %v9802_v8 = vpop.f32.mrb[22].mxu0 }
 0x1cb   :  { %v9803_v51 = vpop.f32.mrb[23].mxu0 }
 0x1cc   :  { %v9804_v18 = vadd.f32 %v9803_v51, %v9802_v8  ;;  %v3192_v32 = vadd.f32 %v9801_v31, %v12738_v29  ;;  %v10784_v51 = vld [vmem:[#allocation6 + $0x280] sm:$0xff]  }
 0x1cd   :  { %10000 = vmatprep.subr.bf16.mxu1 %v10784_v51 }
 0x1ce   :  { %v3195_v21 = vadd.f32 %v9804_v18, %v12738_v29 }
 0x1d0   :  { %v9805_v27 = vpop.f32.mrb[24].mxu0 }
 0x1d1   :  { %v9857_v12 = vpop.f32.mrb[20].mxu1  ;;  %v9806_v23 = vpop.f32.mrb[25].mxu0 }
 0x1d2   :  { %v9858_v10 = vpop.f32.mrb[21].mxu1  ;;  %v9807_v56 = vadd.f32 %v9806_v23, %v9805_v27  ;;  %v9808_v45 = vpop.f32.mrb[26].mxu0 }
 0x1d3   :  { %v9859_v55 = vadd.f32 %v9858_v10, %v9857_v12  ;;  %v9860_v15 = vpop.f32.mrb[22].mxu1  ;;  %v9809_v26 = vpop.f32.mrb[27].mxu0 }
 0x1d4   :  { %v9861_v25 = vpop.f32.mrb[23].mxu1  ;;  %v3200_v46 = vadd.f32 %v9807_v56, %v12738_v29 }
 0x1d5   :  { %v12805_v3 = vadd.f32 %v9859_v55, %v3192_v32  ;;  %v9862_v38 = vadd.f32 %v9861_v25, %v9860_v15  ;;  %v10785_v32 = vld [vmem:[#allocation6 + $0x240] sm:$0xff]  }
 0x1d6   :  { %10001 = vmatpush3.bf16.msra.mxu1 %v10785_v32 }
 0x1d7   :  { %v12807_v40 = vadd.f32 %v9862_v38, %v3195_v21 }
 0x1d9   :  { %v9863_v63 = vpop.f32.mrb[24].mxu1 }
 0x1da   :  { %v9864_v43 = vpop.f32.mrb[25].mxu1 }
 0x1db   :  { %v9865_v17 = vadd.f32 %v9864_v43, %v9863_v63  ;;  %v9866_v39 = vpop.f32.mrb[26].mxu1  ;;  %v10786_v43 = vld [vmem:[#allocation6 + $0x288] sm:$0xff]  }
 0x1dc   :  { %v9867_v0 = vpop.f32.mrb[27].mxu1  ;;  %10002 = vmatprep.subr.bf16.mxu1 %v10786_v43  ;;  %v10798_v43 = vld [vmem:[#allocation6 + $0x2a0] sm:$0xff]  }
 0x1dd   :  { %v12810_v1 = vadd.f32 %v9865_v17, %v3200_v46  ;;  %v10787_v0 = vld [vmem:[#allocation6 + $0x248] sm:$0xff]  }
 0x1de   :  { %10003 = vmatpush3.bf16.msra.mxu1 %v10787_v0 }
 0x1e3   :  { %v9885_v44 = vpop.f32.mrb[28].mxu0 }
 0x1e4   :  { %v9886_v60 = vpop.f32.mrb[29].mxu0 }
 0x1e5   :  { %v9887_v2 = vadd.f32 %v9886_v60, %v9885_v44  ;;  %v9888_v36 = vpop.f32.mrb[30].mxu0 }
 0x1e6   :  { %v9889_v16 = vpop.f32.mrb[31].mxu0 }
 0x1e7   :  { %v3328_v59 = vadd.f32 %v9887_v2, %v12754_v54  ;;  %v9890_v5 = vadd.f32 %v9889_v16, %v9888_v36 }
 0x1e9   :  { %v3331_v57 = vadd.f32 %v9890_v5, %v12757_v19 }
 0x1f1   :  { %v9943_v50 = vpop.f32.mrb[28].mxu1 }
 0x1f2   :  { %v9944_v22 = vpop.f32.mrb[29].mxu1 }
 0x1f3   :  { %v9945_v29 = vadd.f32 %v9944_v22, %v9943_v50  ;;  %v9946_v24 = vpop.f32.mrb[30].mxu1 }
 0x1f4   :  { %v9947_v53 = vpop.f32.mrb[31].mxu1 }
 0x1f5   :  { %v9948_v49 = vadd.f32 %v9947_v53, %v9946_v24  ;;  %v12814_v42 = vadd.f32 %v9945_v29, %v3328_v59  ;;  %v10790_v29 = vld [vmem:[#allocation6 + $0x380] sm:$0xff]   ;;  %v10792_v53 = vld [vmem:[#allocation6 + $0x388] sm:$0xff]  }
 0x1f6   :  { %v10791_v24 = vld [vmem:[#allocation6 + $0x340] sm:$0xff]   ;;  %10080 = vmatprep.subr.bf16.mxu0 %v10790_v29  ;;  %v10801_v29 = vld [vmem:[#allocation6 + $0x358] sm:$0xff]  }
 0x1f7   :  { %v12816_v31 = vadd.f32 %v9948_v49, %v3331_v57  ;;  %10081 = vmatpush3.bf16.msra.mxu0 %v10791_v24  ;;  %v10788_v49 = vld [vmem:[#allocation6 + $0x290] sm:$0xff]  }
 0x1f8   :  { %10082 = vmatprep.subr.bf16.mxu0 %v10792_v53  ;;  %10004 = vmatprep.subr.bf16.mxu1 %v10788_v49 }
 0x1fa   :  { %v9891_v8 = vpop.f32.mrb[32].mxu0 }
 0x1fb   :  { %v9892_v18 = vpop.f32.mrb[33].mxu0 }
 0x1fc   :  { %v9893_v12 = vadd.f32 %v9892_v18, %v9891_v8  ;;  %v9894_v27 = vpop.f32.mrb[34].mxu0  ;;  %v10789_v8 = vld [vmem:[#allocation6 + $0x250] sm:$0xff]  }
 0x1fd   :  { %v9895_v54 = vpop.f32.mrb[35].mxu0  ;;  %10005 = vmatpush3.bf16.msra.mxu1 %v10789_v8  ;;  %v10797_v18 = vld [vmem:[#allocation6 + $0x350] sm:$0xff]   ;;  %v10802_v8 = vld [vmem:[#allocation6 + $0x3a0] sm:$0xff]  }
 0x1fe   :  { %v3336_v19 = vadd.f32 %v9893_v12, %v12760_v52  ;;  %v9896_v10 = vadd.f32 %v9895_v54, %v9894_v27 }
 0x200   :  { %v3339_v23 = vadd.f32 %v9896_v10, %v12762_v6 }
 0x207   :  { %v9949_v21 = vpop.f32.mrb[32].mxu1 }
 0x208   :  { %v9950_v55 = vpop.f32.mrb[33].mxu1 }
 0x209   :  { %v9951_v15 = vadd.f32 %v9950_v55, %v9949_v21  ;;  %v9952_v56 = vpop.f32.mrb[34].mxu1  ;;  %v10795_v21 = vld [vmem:[#allocation6 + $0x258] sm:$0xff]  }
 0x20a   :  { %v9953_v45 = vpop.f32.mrb[35].mxu1 }
 0x20b   :  { %v9954_v25 = vadd.f32 %v9953_v45, %v9952_v56  ;;  %v12820_v26 = vadd.f32 %v9951_v15, %v3336_v19  ;;  %v10793_v19 = vld [vmem:[#allocation6 + $0x298] sm:$0xff]  }
 0x20c   :  { %v9897_v38 = vpop.f32.mrb[36].mxu0  ;;  %10006 = vmatprep.subr.bf16.mxu1 %v10793_v19  ;;  %v10799_v15 = vld [vmem:[#allocation6 + $0x398] sm:$0xff]   ;;  %v10804_v19 = vld [vmem:[#allocation6 + $0x2a8] sm:$0xff]  }
 0x20d   :  { %v9898_v46 = vpop.f32.mrb[37].mxu0  ;;  %v12822_v63 = vadd.f32 %v9954_v25, %v3339_v23  ;;  %10007 = vmatpush3.bf16.msra.mxu1 %v10795_v21 }
 0x20e   :  { %v9899_v17 = vadd.f32 %v9898_v46, %v9897_v38  ;;  %v9900_v39 = vpop.f32.mrb[38].mxu0  ;;  %10008 = vmatprep.subr.bf16.mxu1 %v10798_v43 }
 0x20f   :  { %v9901_v52 = vpop.f32.mrb[39].mxu0 }
 0x210   :  { %v3344_v6 = vadd.f32 %v9899_v17, %v12777_v7  ;;  %v9902_v44 = vadd.f32 %v9901_v52, %v9900_v39  ;;  %v10794_v7 = vld [vmem:[#allocation6 + $0x348] sm:$0xff]  }
 0x211   :  { %10083 = vmatpush3.bf16.msra.mxu0 %v10794_v7 }
 0x212   :  { %v3347_v60 = vadd.f32 %v9902_v44, %v12779_v11  ;;  %v10796_v11 = vld [vmem:[#allocation6 + $0x390] sm:$0xff]  }
 0x213   :  { %v9955_v2 = vpop.f32.mrb[36].mxu1  ;;  %10084 = vmatprep.subr.bf16.mxu0 %v10796_v11 }
 0x214   :  { %v9956_v36 = vpop.f32.mrb[37].mxu1 }
 0x215   :  { %v9957_v16 = vadd.f32 %v9956_v36, %v9955_v2  ;;  %v9958_v59 = vpop.f32.mrb[38].mxu1  ;;  %10085 = vmatpush3.bf16.msra.mxu0 %v10797_v18  ;;  %v10800_v18 = vld [vmem:[#allocation6 + $0x260] sm:$0xff]  }
 0x216   :  { %v9959_v5 = vpop.f32.mrb[39].mxu1  ;;  %10086 = vmatprep.subr.bf16.mxu0 %v10799_v15  ;;  %10009 = vmatpush3.bf16.msra.mxu1 %v10800_v18  ;;  %v10807_v18 = vld [vmem:[#allocation6 + $0x368] sm:$0xff]  }
 0x217   :  { %v9960_v57 = vadd.f32 %v9959_v5, %v9958_v59  ;;  %v12826_v50 = vadd.f32 %v9957_v16, %v3344_v6  ;;  %10010 = vmatprep.subr.bf16.mxu1 %v10804_v19  ;;  %v10811_v19 = vld [vmem:[#allocation6 + $0x370] sm:$0xff]  }
 0x219   :  { %v12828_v22 = vadd.f32 %v9960_v57, %v3347_v60  ;;  %10087 = vmatpush3.bf16.msra.mxu0 %v10801_v29 }
 0x21a   :  { %10088 = vmatprep.subr.bf16.mxu0 %v10802_v8 }
 0x230   :  { %v9903_v51 = vpop.f32.mrb[40].mxu0 }
 0x231   :  { %v9904_v32 = vpop.f32.mrb[41].mxu0 }
 0x232   :  { %v9905_v12 = vadd.f32 %v9904_v32, %v9903_v51  ;;  %v9906_v27 = vpop.f32.mrb[42].mxu0 }
 0x233   :  { %v9907_v54 = vpop.f32.mrb[43].mxu0 }
 0x234   :  { %v3352_v10 = vadd.f32 %v9905_v12, %v12791_v13  ;;  %v9908_v23 = vadd.f32 %v9907_v54, %v9906_v27 }
 0x236   :  { %v3355_v55 = vadd.f32 %v9908_v23, %v12795_v41  ;;  %v10805_v23 = vld [vmem:[#allocation6 + $0x268] sm:$0xff]  }
 0x237   :  { %10011 = vmatpush3.bf16.msra.mxu1 %v10805_v23 }
 0x23e   :  { %v9961_v56 = vpop.f32.mrb[40].mxu1 }
 0x23f   :  { %v9962_v45 = vpop.f32.mrb[41].mxu1 }
 0x240   :  { %v9963_v25 = vadd.f32 %v9962_v45, %v9961_v56  ;;  %v9964_v38 = vpop.f32.mrb[42].mxu1 }
 0x241   :  { %v9965_v46 = vpop.f32.mrb[43].mxu1 }
 0x242   :  { %v9966_v17 = vadd.f32 %v9965_v46, %v9964_v38  ;;  %v12832_v39 = vadd.f32 %v9963_v25, %v3352_v10  ;;  %v10806_v10 = vld [vmem:[#allocation6 + $0x3a8] sm:$0xff]  }
 0x244   :  { %v12834_v0 = vadd.f32 %v9966_v17, %v3355_v55 }
 0x248   :  { %v9909_v13 = vpop.f32.mrb[44].mxu0 }
 0x249   :  { %v9910_v52 = vpop.f32.mrb[45].mxu0 }
 0x24a   :  { %v9911_v6 = vadd.f32 %v9910_v52, %v9909_v13  ;;  %v9912_v44 = vpop.f32.mrb[46].mxu0 }
 0x24b   :  { %v9913_v41 = vpop.f32.mrb[47].mxu0 }
 0x24c   :  { %v3360_v60 = vadd.f32 %v9911_v6, %v12799_v9  ;;  %v9914_v2 = vadd.f32 %v9913_v41, %v9912_v44  ;;  %v10803_v9 = vld [vmem:[#allocation6 + $0x360] sm:$0xff]  }
 0x24d   :  { %10089 = vmatpush3.bf16.msra.mxu0 %v10803_v9 }
 0x24e   :  { %v3363_v36 = vadd.f32 %v9914_v2, %v12801_v30  ;;  %10090 = vmatprep.subr.bf16.mxu0 %v10806_v10 }
 0x251   :  { %10091 = vmatpush3.bf16.msra.mxu0 %v10807_v18 }
 0x255   :  { %v9967_v16 = vpop.f32.mrb[44].mxu1 }
 0x256   :  { %v9968_v59 = vpop.f32.mrb[45].mxu1 }
 0x257   :  { %v9969_v5 = vadd.f32 %v9968_v59, %v9967_v16  ;;  %v9970_v57 = vpop.f32.mrb[46].mxu1 }
 0x258   :  { %v9971_v24 = vpop.f32.mrb[47].mxu1 }
 0x259   :  { %v9972_v53 = vadd.f32 %v9971_v24, %v9970_v57  ;;  %v12838_v7 = vadd.f32 %v9969_v5, %v3360_v60 }
 0x25b   :  { %v9915_v49 = vpop.f32.mrb[48].mxu0  ;;  %v12840_v51 = vadd.f32 %v9972_v53, %v3363_v36 }
 0x25c   :  { %v9916_v11 = vpop.f32.mrb[49].mxu0 }
 0x25d   :  { %v9917_v32 = vadd.f32 %v9916_v11, %v9915_v49  ;;  %v9918_v12 = vpop.f32.mrb[50].mxu0 }
 0x25e   :  { %v9919_v30 = vpop.f32.mrb[51].mxu0 }
 0x25f   :  { %v3368_v27 = vadd.f32 %v9917_v32, %v12805_v3  ;;  %v9920_v54 = vadd.f32 %v9919_v30, %v9918_v12 }
 0x261   :  { %v3371_v21 = vadd.f32 %v9920_v54, %v12807_v40  ;;  %v10809_v54 = vld [vmem:[#allocation6 + $0x3b0] sm:$0xff]  }
 0x262   :  { %10092 = vmatprep.subr.bf16.mxu0 %v10809_v54 }
 0x263   :  { %v9973_v55 = vpop.f32.mrb[48].mxu1  ;;  %v9921_v56 = vpop.f32.mrb[52].mxu0  ;;  %10093 = vmatpush3.bf16.msra.mxu0 %v10811_v19 }
 0x264   :  { %v9974_v15 = vpop.f32.mrb[49].mxu1  ;;  %v9922_v38 = vpop.f32.mrb[53].mxu0 }
 0x265   :  { %v9975_v45 = vadd.f32 %v9974_v15, %v9973_v55  ;;  %v9976_v25 = vpop.f32.mrb[50].mxu1  ;;  %v9923_v43 = vadd.f32 %v9922_v38, %v9921_v56  ;;  %v9924_v17 = vpop.f32.mrb[54].mxu0  ;;  %v3659_v55 = vld [vmem:[#allocation2 + $0x8] sm:$0x7]  ;;  %v3682_v15 = vld [vmem:[#allocation2 + $0x10] sm:$0x7] }
 0x266   :  { %v9977_v46 = vpop.f32.mrb[51].mxu1  ;;  %v9925_v3 = vpop.f32.mrb[55].mxu0  ;;  %v10812_v56 = vld [vmem:[#allocation6 + $0x2b8] sm:$0xff]  }
 0x267   :  { %v9978_v13 = vadd.f32 %v9977_v46, %v9976_v25  ;;  %v12844_v52 = vadd.f32 %v9975_v45, %v3368_v27  ;;  %v3376_v6 = vadd.f32 %v9923_v43, %v12810_v1  ;;  %v10808_v27 = vld [vmem:[#allocation6 + $0x2b0] sm:$0xff]   ;;  %v10813_v45 = vld [vmem:[#allocation6 + $0x3b8] sm:$0xff]  }
 0x268   :  { %10012 = vmatprep.subr.bf16.mxu1 %v10808_v27  ;;  %10094 = vmatprep.subr.bf16.mxu0 %v10813_v45  ;;  %v10815_v45 = vld [vmem:[#allocation6 + $0x378] sm:$0xff]  }
 0x269   :  { %v12847_v44 = vadd.f32 %v9978_v13, %v3371_v21  ;;  %v3637_v21 = vld [vmem:[#allocation2] sm:$0x7]  ;;  %10095 = vmatpush3.bf16.msra.mxu0 %v10815_v45 }
 0x26b   :  { %v9979_v40 = vpop.f32.mrb[52].mxu1 }
 0x26c   :  { %v9980_v41 = vpop.f32.mrb[53].mxu1  ;;  %v3503_v60 = vpop.f32.mrb[56].mxu0 }
 0x26d   :  { %v9981_v2 = vadd.f32 %v9980_v41, %v9979_v40  ;;  %v3504_v36 = vadd.f32 %v3503_v60, %v12814_v42  ;;  %v10445_v16 = vpop.f32.mrb[57].mxu0  ;;  %v9982_v59 = vpop.f32.mrb[54].mxu1 }
 0x26e   :  { %v3506_v5 = vpop.f32.mrb[58].mxu0  ;;  %v9983_v57 = vpop.f32.mrb[55].mxu1 }
 0x26f   :  { %v3507_v29 = vadd.f32 %v3506_v5, %v12816_v31  ;;  %v10446_v24 = vpop.f32.mrb[59].mxu0  ;;  %v12851_v53 = vadd.f32 %v9981_v2, %v3376_v6  ;;  %v3557_v49 = vmax.f32 %v3504_v36, 0.0  ;;  %v10810_v31 = vld [vmem:[#allocation6 + $0x270] sm:$0xff]  }
 0x270   :  { %10013 = vmatpush3.bf16.msra.mxu1 %v10810_v31 }
 0x271   :  { %v3558_v8 = vmax.f32 %v3507_v29, 0.0  ;;  %10014 = vmatprep.subr.bf16.mxu1 %v10812_v56 }
 0x273   :  { %v9699_v1 = vpack.c.bf16 %v3558_v8, %v3557_v49  ;;  %v3651_v49 = vld [vmem:[#allocation2 + $0x4] sm:$0x7] }
 0x274   :  { %v3511_v11 = vpop.f32.mrb[60].mxu0 }
 0x275   :  { %9700 = vst [vmem:[#allocation3] sm:$0xff] %v9699_v1   ;;  %v3512_v9 = vadd.f32 %v3511_v11, %v12820_v26  ;;  %v10449_v32 = vpop.f32.mrb[61].mxu0 }
 0x276   :  { %v3514_v12 = vpop.f32.mrb[62].mxu0  ;;  %v3678_v32 = vld [vmem:[#allocation2 + $0xc] sm:$0x7] }
 0x277   :  { %v3515_v42 = vadd.f32 %v3514_v12, %v12822_v63  ;;  %v10450_v30 = vpop.f32.mrb[63].mxu0  ;;  %v3559_v10 = vmax.f32 %v3512_v9, 0.0 }
 0x278   :  { %v10814_v30 = vld [vmem:[#allocation6 + $0x278] sm:$0xff]  }
 0x279   :  { %v3560_v23 = vmax.f32 %v3515_v42, 0.0  ;;  %10015 = vmatpush3.bf16.msra.mxu1 %v10814_v30 }
 0x27b   :  { %v9704_v26 = vpack.c.bf16 %v3560_v23, %v3559_v10 }
 0x27c   :  { %v3636_v25 = vld [vmem:[#allocation3] sm:$0x7]  ;;  %v3662_v3 = vld [vmem:[#allocation3] sm:$0x8]  ;;  %v3519_v6 = vpop.f32.mrb[64].mxu0 }
 0x27d   :  { %v3640_v38 = vld [vmem:[#allocation3] sm:$0x7]  ;;  %v3638_v46 = vsel %vm11434_vm9, %v3636_v25, %v3637_v21  ;;  %9746 = vst [vmem:[#allocation3 + $0x8] sm:$0xff] %v9704_v26   ;;  %v3663_v40 = vld [vmem:[#allocation3 + $0x4] sm:$0x3]  ;;  %v3665_v41 = vshrl.u32 %v3662_v3, 16  ;;  %v12858_v2 = vadd.f32 %v3519_v6, %v12826_v50 }
 0x27e   :  { %v3654_v63 = vld [vmem:[#allocation3] sm:$0xe]  ;;  %v3642_v43 = vshrl.u32 %v3640_v38, 16  ;;  %v3645_v17 = vshll.u32 %v3640_v38, 16  ;;  %3639 = vst [vmem:[#allocation2] sm:$0x7] %v3638_v46 }
 0x27f   :  { %v9250_v13 = vrot.slane %v3654_v63, 9  ;;  %v3681_v60 = vld [vmem:[#allocation3 + $0x4] sm:$0x7]  ;;  %v10453_v36 = vpop.f32.mrb[65].mxu0  ;;  %v3670_v57 = vshrl.u32 %v3663_v40, 16  ;;  %v3673_v50 = vshll.u32 %v3663_v40, 16 }
 0x280   :  { %v3644_v16 = vrot.slane %v3642_v43, 4  ;;  %v3647_v59 = vrot.slane %v3645_v17, 5  ;;  %v3685_v29 = vld [vmem:[#allocation3 + $0x4] sm:$0x7]  ;;  %v3522_v24 = vpop.f32.mrb[66].mxu0  ;;  %v3683_v8 = vsel %vm11434_vm9, %v3681_v60, %v3682_v15  ;;  %v9251_v27 = vrot.slane %v3665_v41, 11 }
 0x281   :  { %v3660_v5 = vsel %vm11434_vm9, %v9250_v13, %v3659_v55  ;;  %v3687_v1 = vshrl.u32 %v3685_v29, 16  ;;  %v10454_v11 = vpop.f32.mrb[67].mxu0  ;;  %v3672_v9 = vrot.slane %v3670_v57, 7  ;;  %3684 = vst [vmem:[#allocation2 + $0x10] sm:$0x7] %v3683_v8  ;;  %v3690_v12 = vshll.u32 %v3685_v29, 16 }
 0x282   :  { %3661 = vst [vmem:[#allocation2 + $0x8] sm:$0x7] %v3660_v5  ;;  %v3648_v18 = vor.u32 %v3647_v59, %v3644_v16  ;;  %v12864_v42 = vld [vmem:[#allocation3 + $0x4] sm:$0x8]  ;;  %v3734_v31 = vld [vmem:[#allocation3] sm:$0x8]  ;;  %v12867_v10 = vadd.f32 %v3522_v24, %v12828_v22 }
 0x283   :  { %v3689_v54 = vrot.slane %v3687_v1, 4  ;;  %v3735_v19 = vld [vmem:[#allocation3 + $0x4] sm:$0x3]  ;;  %v3675_v21 = vor.u32 %v3673_v50, %v3672_v9  ;;  %v3692_v55 = vrot.slane %v3690_v12, 5  ;;  %v12869_v15 = vld [vmem:[#allocation3 + $0x4] sm:$0x8] }
 0x284   :  { %v3649_v23 = vrot.slane %v3648_v18, 4  ;;  %v9254_v26 = vrot.slane %v3734_v31, 9  ;;  %v3749_v56 = vld [vmem:[#allocation3 + $0x4] sm:$0x7]  ;;  %v3714_v25 = vshrl.u32 %v12864_v42, 16  ;;  %v3740_v38 = vrot.slane %v3735_v19, 5 }
 0x285   :  { %v3751_v63 = vshrl.u32 %v3749_v56, 16  ;;  %v3754_v46 = vshll.u32 %v3749_v56, 16  ;;  %v3765_v43 = vld [vmem:[#allocation3 + $0x4] sm:$0x7]  ;;  %v3676_v22 = vsel %vm11498_vm1, %v9251_v27, %v3675_v21  ;;  %v3693_v13 = vor.u32 %v3692_v55, %v3689_v54  ;;  %v3745_v3 = vld [vmem:[#allocation2] sm:$0xc] }
 0x286   :  { %v3652_v17 = vsel %vm11434_vm9, %v3649_v23, %v3651_v49  ;;  %v3767_v6 = vrot.slane %v3765_v43, 6  ;;  %v3775_v40 = vld [vmem:[#allocation3 + $0x4] sm:$0x8]  ;;  %v3527_v41 = vpop.f32.mrb[68].mxu0  ;;  %v3679_v60 = vsel %vm11434_vm9, %v3676_v22, %v3678_v32  ;;  %v3696_v36 = vld [vmem:[#allocation2 + $0x14] sm:$0x7]  ;;  %v3741_v16 = vsel %vm11369_vm12, %v9254_v26, %v3740_v38 }
 0x287   :  { %3653 = vst [vmem:[#allocation2 + $0x4] sm:$0x7] %v3652_v17  ;;  %v3742_v59 = vrot.slane %v3740_v38, 4  ;;  %v3753_v5 = vrot.slane %v3751_v63, 5  ;;  %v3731_v57 = vld [vmem:[#allocation2 + $0x20] sm:$0x7]  ;;  %v3746_v24 = vsel %vm11508_vm15, %v3741_v16, %v3745_v3 }
 0x288   :  { %3680 = vst [vmem:[#allocation2 + $0xc] sm:$0x7] %v3679_v60  ;;  %v3694_v29 = vrot.slane %v3693_v13, 4  ;;  %v3756_v49 = vrot.slane %v3754_v46, 6  ;;  %v3768_v8 = vrot.slane %v3767_v6, 4  ;;  %v10457_v11 = vpop.f32.mrb[69].mxu0  ;;  %v12896_v46 = vadd.f32 %v3527_v41, %v12832_v39 }
 0x289   :  { %v3771_v1 = vld [vmem:[#allocation2 + $0x8] sm:$0xc]  ;;  %v9252_v18 = vrot.slane %v12869_v15, 11  ;;  %3747 = vst [vmem:[#allocation2] sm:$0xc] %v3746_v24  ;;  %v3778_v50 = vshrl.u32 %v3775_v40, 16 }
 0x28a   :  { %3748 = vst [vmem:[#allocation2 + $0x24] sm:$0x1] %v3742_v59  ;;  %v3772_v9 = vsel %vm11508_vm15, %v3767_v6, %v3771_v1  ;;  %v3781_v32 = vshll.u32 %v3775_v40, 16  ;;  %v12885_v12 = vld [vmem:[#allocation3 + $0x4] sm:$0x8]  ;;  %v3530_v42 = vpop.f32.mrb[70].mxu0  ;;  %v3697_v30 = vsel %vm11434_vm9, %v3694_v29, %v3696_v36  ;;  %v3757_v27 = vor.u32 %v3756_v49, %v3753_v5 }
 0x28b   :  { %3773 = vst [vmem:[#allocation2 + $0x8] sm:$0xc] %v3772_v9  ;;  %3774 = vst [vmem:[#allocation2 + $0x2c] sm:$0x1] %v3768_v8  ;;  %v12889_v54 = vld [vmem:[#allocation3 + $0x4] sm:$0x8]  ;;  %v12899_v43 = vadd.f32 %v3530_v42, %v12834_v0 }
 0x28c   :  { %v3894_v31 = vld [vmem:[#allocation3 + $0x4] sm:$0x8]  ;;  %v3700_v19 = vld [vmem:[#allocation3 + $0x8] sm:$0x3]  ;;  %3698 = vst [vmem:[#allocation2 + $0x14] sm:$0x7] %v3697_v30 }
 0x28d   :  { %v3780_v23 = vrot.slane %v3778_v50, 4  ;;  %v3783_v21 = vrot.slane %v3781_v32, 5  ;;  %v3897_v55 = vshrl.u32 %v3894_v31, 16  ;;  %v12891_v15 = vld [vmem:[#allocation3 + $0x8] sm:$0x3]  ;;  %v3705_v26 = vrot.slane %v3700_v19, 7 }
 0x28e   :  { %v3708_v56 = vld [vmem:[#allocation2 + $0x18] sm:$0x7]  ;;  %v12893_v45 = vrot.slane %v3714_v25, 11  ;;  %v3758_v38 = vrot.slane %v3757_v27, 4  ;;  %v3730_v63 = vld [vmem:[#allocation3 + $0x8] sm:$0x7] }
 0x28f   :  { %v3784_v17 = vor.u32 %v3783_v21, %v3780_v23  ;;  %v9255_v22 = vrot.slane %v12885_v12, 9  ;;  %v3776_v3 = vld [vmem:[#allocation3 + $0x8] sm:$0x3]  ;;  %v3732_v6 = vsel %vm11434_vm9, %v3730_v63, %v3731_v57  ;;  %v3761_v40 = vld [vmem:[#allocation2 + $0x4] sm:$0xc]  ;;  %v3719_v60 = vshrl.u32 %v12891_v15, 16 }
 0x290   :  { %3764 = vst [vmem:[#allocation2 + $0x28] sm:$0x1] %v3758_v38  ;;  %v3803_v25 = vld [vmem:[#allocation3 + $0x8] sm:$0x3]  ;;  %v3706_v39 = vsel %vm11484_vm3, %v9252_v18, %v3705_v26  ;;  %3733 = vst [vmem:[#allocation2 + $0x20] sm:$0x7] %v3732_v6  ;;  %v3762_v41 = vsel %vm11508_vm15, %v3757_v27, %v3761_v40 }
 0x291   :  { %v12911_v36 = vrot.slane %v3897_v55, 10  ;;  %v3882_v16 = vld [vmem:[#allocation3 + $0x8] sm:$0x3]  ;;  %v3722_v5 = vshll.u32 %v12891_v15, 16  ;;  %v3709_v57 = vsel %vm11434_vm9, %v3706_v39, %v3708_v56  ;;  %3763 = vst [vmem:[#allocation2 + $0x4] sm:$0xc] %v3762_v41 }
 0x292   :  { %v12913_v59 = vld [vmem:[#allocation3 + $0x8] sm:$0x3]  ;;  %v3785_v29 = vrot.slane %v3784_v17, 4  ;;  %v12918_v24 = vld [vmem:[#allocation3 + $0x8] sm:$0xc]  ;;  %v3787_v8 = vshll.u32 %v3776_v3, 16 }
 0x293   :  { %v12920_v49 = vld [vmem:[#allocation3 + $0xc] sm:$0x1]  ;;  %3710 = vst [vmem:[#allocation2 + $0x18] sm:$0x7] %v3709_v57  ;;  %v12922_v1 = vld [vmem:[#allocation3 + $0x8] sm:$0x8] }
 0x294   :  { %v12924_v11 = vld [vmem:[#allocation3 + $0xc] sm:$0x3]  ;;  %v12926_v18 = vld [vmem:[#allocation3 + $0x8] sm:$0x8]  ;;  %v4173_v30 = vld [vmem:[#allocation3 + $0xc] sm:$0xc] }
 0x295   :  { %v12928_v9 = vld [vmem:[#allocation3 + $0xc] sm:$0x3]  ;;  %v12930_v50 = vld [vmem:[#allocation3 + $0x8] sm:$0xc]  ;;  %v3791_v27 = vshrl.u32 %v3776_v3, 16  ;;  %v3808_v31 = vrot.slane %v3803_v25, 5 }
 0x296   :  { %v12932_v32 = vld [vmem:[#allocation3 + $0xc] sm:$0x1]  ;;  %v12934_v19 = vld [vmem:[#allocation3 + $0x8] sm:$0x8]  ;;  %v3887_v23 = vrot.slane %v3882_v16, 6  ;;  %v3902_v21 = vshrl.u32 %v12913_v59, 16 }
 0x297   :  { %v4063_v42 = vld [vmem:[#allocation3 + $0xc] sm:$0x3]  ;;  %v3905_v55 = vshll.u32 %v12913_v59, 16  ;;  %v3924_v15 = vshrl.u32 %v12918_v24, 16  ;;  %4175 = vst [vmem:[#allocation2 + $0x48] sm:$0xc] %v4173_v30  ;;  %v3809_v57 = vsel %vm11369_vm12, %v9255_v22, %v3808_v31 }
 0x298   :  { %4067 = vst [vmem:[#allocation2 + $0x50] sm:$0x3] %v4063_v42  ;;  %v12939_v26 = vld [vmem:[#allocation3 + $0xc] sm:$0x3]  ;;  %v3927_v56 = vshll.u32 %v12918_v24, 16  ;;  %v3933_v38 = vshrl.u32 %v12920_v49, 16 }
 0x299   :  { %v3936_v63 = vshll.u32 %v12920_v49, 16  ;;  %v9259_v17 = vrot.slane %v12922_v1, 10  ;;  %v3891_v3 = vld [vmem:[#allocation2 + $0x24] sm:$0xe]  ;;  %v3833_v6 = vld [vmem:[#allocation3 + $0x8] sm:$0xc] }
 0x29a   :  { %v3951_v40 = vrot.slane %v12924_v11, 6  ;;  %v3960_v25 = vshrl.u32 %v12926_v18, 16  ;;  %v3965_v39 = vshrl.u32 %v12928_v9, 16  ;;  %v3968_v41 = vshll.u32 %v12928_v9, 16  ;;  %v3835_v49 = vld [vmem:[#allocation2 + $0x18] sm:$0xc] }
 0x29b   :  { %v4044_v24 = vshrl.u32 %v12934_v19, 16  ;;  %v3798_v1 = vld [vmem:[#allocation2 + $0xc] sm:$0xc]  ;;  %v4052_v9 = vshll.u32 %v12939_v26, 16  ;;  %v3721_v42 = vrot.slane %v3719_v60, 7  ;;  %v3789_v30 = vrot.slane %v3787_v8, 5 }
 0x29c   :  { %v3813_v0 = vld [vmem:[#allocation2 + $0x10] sm:$0xc]  ;;  %v3793_v59 = vrot.slane %v3791_v27, 4  ;;  %v3810_v16 = vrot.slane %v3808_v31, 4  ;;  %v3836_v13 = vsel %vm11508_vm15, %v3833_v6, %v3835_v49  ;;  %v14009_v8 = vrot.slane %v12889_v54, 10  ;;  %v10458_v27 = vpop.f32.mrb[71].mxu0 }
 0x29d   :  { %v3724_v34 = vor.u32 %v3722_v5, %v3721_v42  ;;  %v3790_v18 = vsel %vm11532_vm13, %v3785_v29, %v3789_v30  ;;  %v3814_v60 = vsel %vm11508_vm15, %v3809_v57, %v3813_v0  ;;  %3837 = vst [vmem:[#allocation2 + $0x18] sm:$0xc] %v3836_v13  ;;  %v3904_v29 = vrot.slane %v3902_v21, 6  ;;  %v12979_v6 = vpop.f32.mrb[72].mxu0  ;;  %v3911_v0 = vld [vmem:[#allocation2 + $0x28] sm:$0xe] }
 0x29e   :  { %v3888_v12 = vsel %vm11413_vm8, %v14009_v8, %v3887_v23  ;;  %v3794_v22 = vor.u32 %v3793_v59, %v3789_v30  ;;  %v3799_v31 = vsel %vm11508_vm15, %v3790_v18, %v3798_v1  ;;  %3815 = vst [vmem:[#allocation2 + $0x10] sm:$0xc] %v3814_v60  ;;  %3816 = vst [vmem:[#allocation2 + $0x34] sm:$0x1] %v3810_v16  ;;  %v3954_v57 = vld [vmem:[#allocation2 + $0x34] sm:$0xe] }
 0x29f   :  { %v3892_v5 = vsel %vm12955_vm6, %v3888_v12, %v3891_v3  ;;  %v3725_v54 = vsel %vm11498_vm1, %v12893_v45, %v3724_v34  ;;  %3800 = vst [vmem:[#allocation2 + $0xc] sm:$0xc] %v3799_v31  ;;  %v3907_v13 = vrot.slane %v3905_v55, 7  ;;  %v3926_v23 = vrot.slane %v3924_v15, 5  ;;  %v10461_v49 = vpop.f32.mrb[73].mxu0  ;;  %v10825_v42 = vld [vmem:[#allocation6 + $0x300] sm:$0xff]  }
 0x2a0   :  { %3893 = vst [vmem:[#allocation2 + $0x24] sm:$0xe] %v3892_v5  ;;  %v3929_v59 = vrot.slane %v3927_v56, 6  ;;  %v3728_v16 = vsel %vm11434_vm9, %v3725_v54, %v3727_v47  ;;  %v3795_v1 = vrot.slane %v3794_v22, 4  ;;  %v3935_v3 = vrot.slane %v3933_v38, 5  ;;  %v12986_v18 = vpop.f32.mrb[74].mxu0  ;;  %10040 = vmatprep.subr.bf16.mxu1 %v10825_v42 }
 0x2a1   :  { %v3938_v21 = vrot.slane %v3936_v63, 6  ;;  %v3942_v30 = vld [vmem:[#allocation2 + $0x30] sm:$0xe]  ;;  %3729 = vst [vmem:[#allocation2 + $0x1c] sm:$0x7] %v3728_v16  ;;  %v3908_v60 = vor.u32 %v3907_v13, %v3904_v29  ;;  %v3952_v34 = vsel %vm11413_vm8, %v9259_v17, %v3951_v40  ;;  %v9260_v45 = vrot.slane %v3960_v25, 10 }
 0x2a2   :  { %v3930_v8 = vor.u32 %v3929_v59, %v3926_v23  ;;  %v12990_v55 = vld [vmem:[#allocation3 + $0xc] sm:$0xc]  ;;  %v10462_v15 = vpop.f32.mrb[75].mxu0  ;;  %v3974_v56 = vld [vmem:[#allocation2 + $0x38] sm:$0xe]  ;;  %v3955_v47 = vsel %vm12955_vm6, %v3952_v34, %v3954_v57  ;;  %v3967_v38 = vrot.slane %v3965_v39, 6 }
 0x2a3   :  { %v3939_v12 = vor.u32 %v3938_v21, %v3935_v3  ;;  %v3970_v63 = vrot.slane %v3968_v41, 7  ;;  %3801 = vst [vmem:[#allocation2 + $0x30] sm:$0x1] %v3795_v1  ;;  %v3989_v27 = vld [vmem:[#allocation3 + $0xc] sm:$0xc]  ;;  %v12994_v22 = vpop.f32.mrb[76].mxu0  ;;  %v3909_v17 = vsel %vm11475_vm5, %v12911_v36, %v3908_v60 }
 0x2a4   :  { %v10833_v31 = vld [vmem:[#allocation6 + $0x440] sm:$0xff]   ;;  %v3931_v40 = vrot.slane %v3930_v8, 4  ;;  %v14010_v25 = vrot.slane %v12930_v50, 7  ;;  %v9263_v29 = vrot.slane %v4044_v24, 11  ;;  %3956 = vst [vmem:[#allocation2 + $0x34] sm:$0xe] %v3955_v47  ;;  %v3912_v41 = vsel %vm12955_vm6, %v3909_v17, %v3911_v0 }
 0x2a5   :  { %v13001_v54 = vld [vmem:[#allocation3 + $0xc] sm:$0x8]  ;;  %v10465_v39 = vpop.f32.mrb[77].mxu0  ;;  %v3971_v57 = vor.u32 %v3970_v63, %v3967_v38  ;;  %v14011_v13 = vshrl.u32 %v12939_v26, 16  ;;  %v3562_v59 = vmax.f32 %v12867_v10, 0.0  ;;  %10471 = vmatprep.subr.bf16.mxu0 %v10833_v31  ;;  %v14012_v16 = vrot.slane %v12932_v32, 7 }
 0x2a6   :  { %v4030_v5 = vrot.slane %v14010_v25, 4  ;;  %v4068_v49 = vld [vmem:[#allocation3 + $0xc] sm:$0xc]  ;;  %v3546_v36 = vpop.f32.mrb[78].mxu0  ;;  %3913 = vst [vmem:[#allocation2 + $0x28] sm:$0xe] %v3912_v41  ;;  %v3940_v24 = vsel %vm11348_vm10, %v3931_v40, %v3939_v12 }
 0x2a7   :  { %v4051_v23 = vrot.slane %v14011_v13, 7  ;;  %v9261_v0 = vrot.slane %v12990_v55, 9  ;;  %v3992_v3 = vshrl.u32 %v3989_v27, 16  ;;  %v4090_v21 = vld [vmem:[#allocation3 + $0xc] sm:$0xc]  ;;  %v10466_v42 = vpop.f32.mrb[79].mxu0  ;;  %v3943_v10 = vsel %vm12955_vm6, %v3940_v24, %v3942_v30 }
 0x2a8   :  { %v4032_v1 = vsel %vm11484_vm3, %v4030_v5, %v14012_v16  ;;  %v3972_v60 = vsel %vm11475_vm5, %v9260_v45, %v3971_v57  ;;  %v14013_v32 = vmax.f32 %v12858_v2, 0.0  ;;  %v13023_v15 = vld [vmem:[#allocation3 + $0xc] sm:$0x8]  ;;  %v3551_v47 = vpop.f32.mrb[80].mxu0  ;;  %3944 = vst [vmem:[#allocation2 + $0x30] sm:$0xe] %v3943_v10 }
 0x2a9   :  { %4038 = vst [vmem:[#allocation2 + $0x48] sm:$0x3] %v4032_v1  ;;  %v4054_v8 = vor.u32 %v4052_v9, %v4051_v23  ;;  %v4179_v12 = vld [vmem:[#allocation3 + $0xc] sm:$0xc]  ;;  %v3975_v38 = vsel %vm12955_vm6, %v3972_v60, %v3974_v56  ;;  %v3994_v63 = vrot.slane %v3992_v3, 5  ;;  %v3995_v30 = vshll.u32 %v3989_v27, 16 }
 0x2aa   :  { %v9709_v34 = vpack.c.bf16 %v3562_v59, %v14013_v32  ;;  %v9262_v31 = vrot.slane %v13001_v54, 10  ;;  %3976 = vst [vmem:[#allocation2 + $0x38] sm:$0xe] %v3975_v38  ;;  %v4071_v26 = vshll.u32 %v4068_v49, 16  ;;  %v4074_v2 = vshrl.u32 %v4068_v49, 16  ;;  %v10469_v42 = vpop.f32.mrb[81].mxu0 }
 0x2ab   :  { %v4055_v45 = vsel %vm11498_vm1, %v9263_v29, %v4054_v8  ;;  %v4094_v9 = vrot.slane %v4090_v21, 7  ;;  %v3997_v17 = vrot.slane %v3995_v30, 6  ;;  %v4107_v40 = vshll.u32 %v13023_v15, 16  ;;  %v13032_v5 = vld [vmem:[#allocation3 + $0xc] sm:$0x8] }
 0x2ac   :  { %9747 = vst [vmem:[#allocation3 + $0x10] sm:$0xff] %v9709_v34   ;;  %4061 = vst [vmem:[#allocation2 + $0x4c] sm:$0x3] %v4055_v45  ;;  %v4109_v25 = vshrl.u32 %v13023_v15, 16  ;;  %v4182_v56 = vshrl.u32 %v4179_v12, 16  ;;  %v4073_v27 = vrot.slane %v4071_v26, 7  ;;  %v13047_v8 = vadd.f32 %v12979_v6, %v12838_v7 }
 0x2ad   :  { %v4076_v39 = vrot.slane %v4074_v2, 6  ;;  %v13034_v41 = vrot.slane %v4094_v9, 4  ;;  %v4100_v57 = vld [vmem:[#allocation2 + $0x34] sm:$0x8]  ;;  %v4185_v29 = vshll.u32 %v4179_v12, 16  ;;  %v3998_v13 = vor.u32 %v3997_v17, %v3994_v63 }
 0x2ae   :  { %v4101_v23 = vsel %vm11356_vm11, %v4094_v9, %v4100_v57  ;;  %v13038_v59 = vrot.slane %v4109_v25, 11  ;;  %v4184_v49 = vrot.slane %v4182_v56, 4  ;;  %v9266_v1 = vrot.slane %v13032_v5, 9  ;;  %v4035_v21 = vld [vmem:[#allocation2 + $0x24] sm:$0x8] }
 0x2af   :  { %v4077_v24 = vor.u32 %v4076_v39, %v4073_v27  ;;  %v4187_v16 = vrot.slane %v4185_v29, 5  ;;  %4102 = vst [vmem:[#allocation2 + $0x34] sm:$0x8] %v4101_v23  ;;  %v3563_v3 = vmax.f32 %v12896_v46, 0.0  ;;  %v13042_v10 = vrot.slane %v3998_v13, 4 }
 0x2b0   :  { %v3564_v60 = vmax.f32 %v12899_v43, 0.0  ;;  %v13051_v32 = vadd.f32 %v12986_v18, %v12840_v51  ;;  %v3986_v34 = vld [vmem:[#allocation2 + $0x3c] sm:$0xe]  ;;  %v4022_v12 = vld [vmem:[#allocation2 + $0x44] sm:$0xe]  ;;  %v13055_v46 = vadd.f32 %v12994_v22, %v12844_v52  ;;  %v13058_v45 = vadd.f32 %v3546_v36, %v12847_v44 }
 0x2b1   :  { %v4078_v38 = vrot.slane %v4077_v24, 4  ;;  %v4086_v63 = vld [vmem:[#allocation2 + $0x30] sm:$0x8]  ;;  %v4188_v30 = vor.u32 %v4187_v16, %v4184_v49  ;;  %v4058_v43 = vld [vmem:[#allocation2 + $0x28] sm:$0x8]  ;;  %v13063_v2 = vadd.f32 %v3551_v47, %v12851_v53  ;;  %v14014_v9 = vrot.slane %v12930_v50, 7 }
 0x2b2   :  { %v4087_v51 = vsel %vm11356_vm11, %v4073_v27, %v4086_v63  ;;  %v9714_v18 = vpack.c.bf16 %v3564_v60, %v3563_v3  ;;  %v14015_v53 = vshll.u32 %v12934_v19, 16  ;;  %v4010_v23 = vld [vmem:[#allocation2 + $0x40] sm:$0xe]  ;;  %v4123_v24 = vld [vmem:[#allocation2 + $0x38] sm:$0x8] }
 0x2b3   :  { %v3978_v26 = vld [vmem:[#allocation3 + $0x10] sm:$0x1]  ;;  %v4036_v52 = vsel %vm11356_vm11, %v14014_v9, %v4035_v21  ;;  %4088 = vst [vmem:[#allocation2 + $0x30] sm:$0x8] %v4087_v51  ;;  %v13069_v27 = vrot.slane %v4188_v30, 4 }
 0x2b4   :  { %v3990_v7 = vld [vmem:[#allocation3 + $0x10] sm:$0x1]  ;;  %v3983_v22 = vrot.slane %v3978_v26, 5  ;;  %4037 = vst [vmem:[#allocation2 + $0x24] sm:$0x8] %v4036_v52  ;;  %9748 = vst [vmem:[#allocation3 + $0x18] sm:$0xff] %v9714_v18   ;;  %v4059_v50 = vsel %vm11356_vm11, %v14015_v53, %v4058_v43 }
 0x2b5   :  { %v4014_v6 = vld [vmem:[#allocation3 + $0x10] sm:$0x3]  ;;  %v4001_v17 = vshrl.u32 %v3990_v7, 16  ;;  %v4004_v44 = vshll.u32 %v3990_v7, 16  ;;  %4060 = vst [vmem:[#allocation2 + $0x28] sm:$0x8] %v4059_v50 }
 0x2b6   :  { %v4019_v36 = vrot.slane %v4014_v6, 6  ;;  %v4069_v25 = vld [vmem:[#allocation3 + $0x10] sm:$0x1]  ;;  %v3984_v47 = vsel %vm11369_vm12, %v9261_v0, %v3983_v22  ;;  %v13083_v16 = vld [vmem:[#allocation3 + $0x10] sm:$0xe] }
 0x2b7   :  { %v4080_v56 = vshll.u32 %v4069_v25, 16  ;;  %v4091_v39 = vld [vmem:[#allocation3 + $0x10] sm:$0x1]  ;;  %v4003_v29 = vrot.slane %v4001_v17, 5  ;;  %v4006_v13 = vrot.slane %v4004_v44, 6  ;;  %v3987_v19 = vsel %vm12955_vm6, %v3984_v47, %v3986_v34 }
 0x2b8   :  { %v4105_v57 = vld [vmem:[#allocation3 + $0x10] sm:$0x3]  ;;  %v4020_v49 = vsel %vm11413_vm8, %v9262_v31, %v4019_v36  ;;  %v4096_v0 = vrot.slane %v4091_v39, 7  ;;  %v4137_v21 = vld [vmem:[#allocation3 + $0x10] sm:$0xc]  ;;  %v4124_v31 = vsel %vm11356_vm11, %v4107_v40, %v4123_v24  ;;  %v4129_v7 = vrot.slane %v13083_v16, 6 }
 0x2b9   :  { %v4023_v55 = vsel %vm12955_vm6, %v4020_v49, %v4022_v12  ;;  %v4082_v3 = vrot.slane %v4080_v56, 7  ;;  %v4138_v42 = vld [vmem:[#allocation3 + $0x14] sm:$0x1]  ;;  %3988 = vst [vmem:[#allocation2 + $0x3c] sm:$0xe] %v3987_v19  ;;  %v4007_v60 = vor.u32 %v4006_v13, %v4003_v29  ;;  %v4114_v54 = vshrl.u32 %v4105_v57, 16 }
 0x2ba   :  { %4024 = vst [vmem:[#allocation2 + $0x44] sm:$0xe] %v4023_v55  ;;  %v4117_v63 = vshll.u32 %v4105_v57, 16  ;;  %v4159_v30 = vld [vmem:[#allocation3 + $0x10] sm:$0xc]  ;;  %v4097_v26 = vsel %vm11484_vm3, %v13034_v41, %v4096_v0  ;;  %v4140_v6 = vshll.u32 %v4137_v21, 16 }
 0x2bb   :  { %v4160_v43 = vld [vmem:[#allocation3 + $0x14] sm:$0x1]  ;;  %v4176_v34 = vld [vmem:[#allocation2 + $0x6c] sm:$0x1]  ;;  %v4083_v12 = vsel %vm11475_vm5, %v4078_v38, %v4082_v3  ;;  %v4174_v51 = vld [vmem:[#allocation3 + $0x10] sm:$0x1]  ;;  %v4008_v15 = vsel %vm11348_vm10, %v13042_v10, %v4007_v60 }
 0x2bc   :  { %v4180_v18 = vld [vmem:[#allocation3 + $0x10] sm:$0x1]  ;;  %4125 = vst [vmem:[#allocation2 + $0x38] sm:$0x8] %v4124_v31  ;;  %v4116_v40 = vrot.slane %v4114_v54, 7  ;;  %v4143_v9 = vshrl.u32 %v4137_v21, 16  ;;  %v4011_v41 = vsel %vm12955_vm6, %v4008_v15, %v4010_v23  ;;  %v4177_v29 = vsel %vm11647_vm4, %v4174_v51, %v4176_v34 }
 0x2bd   :  { %v4149_v52 = vshll.u32 %v4138_v42, 16  ;;  %v4202_v22 = vld [vmem:[#allocation2 + $0x70] sm:$0x1]  ;;  %v4206_v17 = vld [vmem:[#allocation3 + $0x10] sm:$0x3]  ;;  %v4130_v38 = vrot.slane %v4129_v7, 4 }
 0x2be   :  { %4089 = vst [vmem:[#allocation2 + $0x54] sm:$0x3] %v4083_v12  ;;  %4103 = vst [vmem:[#allocation2 + $0x58] sm:$0x3] %v4097_v26  ;;  %v13104_v44 = vrot.slane %v4140_v6, 7  ;;  %v4163_v36 = vrot.slane %v4159_v30, 7  ;;  %v4119_v56 = vor.u32 %v4117_v63, %v4116_v40 }
 0x2bf   :  { %v4220_v25 = vld [vmem:[#allocation3 + $0x10] sm:$0xe]  ;;  %4012 = vst [vmem:[#allocation2 + $0x40] sm:$0xe] %v4011_v41  ;;  %v4145_v39 = vrot.slane %v4143_v9, 6  ;;  %v4151_v57 = vrot.slane %v4149_v52, 7 }
 0x2c0   :  { %v4165_v10 = vrot.slane %v4160_v43, 7  ;;  %v4235_v53 = vld [vmem:[#allocation3 + $0x10] sm:$0xc]  ;;  %v4238_v50 = vld [vmem:[#allocation2 + $0x7c] sm:$0x1]  ;;  %v4164_v47 = vrot.slane %v4163_v36, 4  ;;  %v4120_v23 = vsel %vm11498_vm1, %v13038_v59, %v4119_v56  ;;  %vm13137_vm1 = vmand %vm14017_vm7, %vm14016_vm2 }
 0x2c1   :  { %v4191_v13 = vshll.u32 %v4180_v18, 16  ;;  %v4195_v49 = vshrl.u32 %v4180_v18, 16  ;;  %v4236_v24 = vld [vmem:[#allocation3 + $0x14] sm:$0x1]  ;;  %4136 = vst [vmem:[#allocation2 + $0x60] sm:$0x3] %v4130_v38  ;;  %v4146_v16 = vor.u32 %v4145_v39, %v13104_v44 }
 0x2c2   :  { %4237 = vst [vmem:[#allocation2 + $0x58] sm:$0xc] %v4235_v53  ;;  %4178 = vst [vmem:[#allocation2 + $0x6c] sm:$0x1] %v4177_v29  ;;  %v4211_v19 = vrot.slane %v4206_v17, 5  ;;  %v4222_v3 = vshrl.u32 %v4220_v25, 16  ;;  %v4166_v60 = vsel %vm11484_vm3, %v4164_v47, %v4165_v10  ;;  %v4239_v9 = vsel %vm11647_vm4, %v4236_v24, %v4238_v50 }
 0x2c3   :  { %v4217_v55 = vld [vmem:[#allocation2 + $0x74] sm:$0x1]  ;;  %v4241_v0 = vld [vmem:[#allocation3 + $0x10] sm:$0xc]  ;;  %v4242_v21 = vld [vmem:[#allocation3 + $0x14] sm:$0x1]  ;;  %v4203_v31 = vsel %vm11647_vm4, %v4195_v49, %v4202_v22 }
 0x2c4   :  { %v4133_v42 = vld [vmem:[#allocation2 + $0x3c] sm:$0x8]  ;;  %v4169_v54 = vld [vmem:[#allocation2 + $0x44] sm:$0x8]  ;;  %v4193_v63 = vrot.slane %v4191_v13, 5  ;;  %v4225_v30 = vshll.u32 %v4220_v25, 16  ;;  %v4212_v12 = vsel %vm11369_vm12, %v9266_v1, %v4211_v19 }
 0x2c5   :  { %4126 = vst [vmem:[#allocation2 + $0x5c] sm:$0x3] %v4120_v23  ;;  %v4134_v59 = vsel %vm11356_vm11, %v4129_v7, %v4133_v42  ;;  %v4147_v43 = vrot.slane %v4146_v16, 4  ;;  %v4170_v34 = vsel %vm11356_vm11, %v4163_v36, %v4169_v54  ;;  %4204 = vst [vmem:[#allocation2 + $0x70] sm:$0x1] %v4203_v31  ;;  %v4213_v15 = vrot.slane %v4211_v19, 4 }
 0x2c6   :  { %v4232_v26 = vld [vmem:[#allocation2 + $0x78] sm:$0x1]  ;;  %v4264_v6 = vld [vmem:[#allocation2 + $0x80] sm:$0x1]  ;;  %v4267_v51 = vld [vmem:[#allocation3 + $0x14] sm:$0xe]  ;;  %v4194_v7 = vsel %vm11532_vm13, %v13069_v27, %v4193_v63 }
 0x2c7   :  { %v13124_v18 = vld [vmem:[#allocation3 + $0x14] sm:$0xe]  ;;  %4172 = vst [vmem:[#allocation2 + $0x68] sm:$0x3] %v4166_v60  ;;  %4135 = vst [vmem:[#allocation2 + $0x3c] sm:$0x8] %v4134_v59  ;;  %v4152_v22 = vsel %vm11475_vm5, %v4147_v43, %v4151_v57  ;;  %v4218_v25 = vsel %vm11647_vm4, %v4213_v15, %v4217_v55 }
 0x2c8   :  { %v4224_v40 = vrot.slane %v4222_v3, 7  ;;  %v4292_v5 = vld [vmem:[#allocation3 + $0x14] sm:$0xc]  ;;  %4171 = vst [vmem:[#allocation2 + $0x44] sm:$0x8] %v4170_v34  ;;  %v4244_v17 = vshrl.u32 %v4241_v0, 16 }
 0x2c9   :  { %4216 = vst [vmem:[#allocation2 + $0x50] sm:$0xc] %v4212_v12  ;;  %v4293_v1 = vld [vmem:[#allocation3 + $0x18] sm:$0x1]  ;;  %4240 = vst [vmem:[#allocation2 + $0x7c] sm:$0x1] %v4239_v9 }
 0x2ca   :  { %v4295_v52 = vld [vmem:[#allocation2 + $0x8c] sm:$0x1]  ;;  %v4247_v41 = vshll.u32 %v4241_v0, 16  ;;  %v4253_v38 = vshll.u32 %v4242_v21, 16  ;;  %4201 = vst [vmem:[#allocation2 + $0x4c] sm:$0xc] %v4194_v7  ;;  %v4227_v56 = vor.u32 %v4225_v30, %v4224_v40 }
 0x2cb   :  { %4294 = vst [vmem:[#allocation2 + $0x68] sm:$0xc] %v4292_v5  ;;  %v4298_v27 = vld [vmem:[#allocation3 + $0x18] sm:$0x7]  ;;  %v4155_v36 = vld [vmem:[#allocation2 + $0x40] sm:$0x8]  ;;  %v4296_v60 = vsel %vm11647_vm4, %v4293_v1, %v4295_v52 }
 0x2cc   :  { %v4228_v39 = vrot.slane %v4224_v40, 4  ;;  %v4257_v10 = vshrl.u32 %v4242_v21, 16  ;;  %4158 = vst [vmem:[#allocation2 + $0x64] sm:$0x3] %v4152_v22  ;;  %v4303_v57 = vld [vmem:[#allocation3 + $0x18] sm:$0xe]  ;;  %v4156_v50 = vsel %vm11356_vm11, %v13104_v44, %v4155_v36 }
 0x2cd   :  { %4219 = vst [vmem:[#allocation2 + $0x74] sm:$0x1] %v4218_v25  ;;  %v4246_v47 = vrot.slane %v4244_v17, 4  ;;  %v4249_v29 = vrot.slane %v4247_v41, 5  ;;  %v4255_v13 = vrot.slane %v4253_v38, 5  ;;  %v4269_v16 = vrot.slane %v4267_v51, 7 }
 0x2ce   :  { %v4317_v49 = vld [vmem:[#allocation3 + $0x18] sm:$0xe]  ;;  %4157 = vst [vmem:[#allocation2 + $0x40] sm:$0x8] %v4156_v50  ;;  %v4233_v24 = vsel %vm11647_vm4, %v4228_v39, %v4232_v26  ;;  %v4265_v23 = vsel %vm11647_vm4, %v4257_v10, %v4264_v6  ;;  %v4279_v19 = vshrl.u32 %v13124_v18, 16  ;;  %v4282_v21 = vshll.u32 %v13124_v18, 16 }
 0x2cf   :  { %4231 = vst [vmem:[#allocation2 + $0x54] sm:$0xc] %v4227_v56  ;;  %v4300_v55 = vld [vmem:[#allocation2 + $0x6c] sm:$0x7]  ;;  %v4325_v3 = vld [vmem:[#allocation3 + $0x1c] sm:$0x7]  ;;  %v4250_v44 = vor.u32 %v4249_v29, %v4246_v47 }
 0x2d0   :  { %4234 = vst [vmem:[#allocation2 + $0x78] sm:$0x1] %v4233_v24  ;;  %4266 = vst [vmem:[#allocation2 + $0x80] sm:$0x1] %v4265_v23  ;;  %v4274_v0 = vld [vmem:[#allocation2 + $0x84] sm:$0x1]  ;;  %v4301_v54 = vsel %vm13137_vm1, %v4298_v27, %v4300_v55 }
 0x2d1   :  { %v4289_v42 = vld [vmem:[#allocation2 + $0x88] sm:$0x1]  ;;  %v4270_v63 = vrot.slane %v4269_v16, 4  ;;  %v4281_v31 = vrot.slane %v4279_v19, 7  ;;  %4273 = vst [vmem:[#allocation2 + $0x60] sm:$0xc] %v4269_v16 }
 0x2d2   :  { %4297 = vst [vmem:[#allocation2 + $0x8c] sm:$0x1] %v4296_v60  ;;  %v4305_v30 = vshrl.u32 %v4303_v57, 16  ;;  %v4308_v59 = vshll.u32 %v4303_v57, 16  ;;  %v4337_v43 = vld [vmem:[#allocation3 + $0x1c] sm:$0x7] }
 0x2d3   :  { %4302 = vst [vmem:[#allocation2 + $0x6c] sm:$0x7] %v4301_v54  ;;  %v4251_v34 = vrot.slane %v4250_v44, 4  ;;  %v9268_v12 = vrot.slane %v4317_v49, 9  ;;  %v4327_v26 = vshrl.u32 %v4325_v3, 16  ;;  %v4330_v6 = vshll.u32 %v4325_v3, 16 }
 0x2d4   :  { %v4341_v51 = vld [vmem:[#allocation3 + $0x1c] sm:$0xe]  ;;  %v4275_v18 = vsel %vm11647_vm4, %v4270_v63, %v4274_v0  ;;  %v4284_v7 = vor.u32 %v4282_v21, %v4281_v31  ;;  %v4285_v15 = vrot.slane %v4281_v31, 4  ;;  %v4307_v40 = vrot.slane %v4305_v30, 4  ;;  %v4338_v9 = vld [vmem:[#allocation2 + $0x7c] sm:$0x7] }
 0x2d5   :  { %v4383_v5 = vld [vmem:[#allocation3 + $0x1c] sm:$0x7]  ;;  %v4256_v1 = vsel %vm11532_vm13, %v4251_v34, %v4255_v13  ;;  %4276 = vst [vmem:[#allocation2 + $0x84] sm:$0x1] %v4275_v18  ;;  %v4310_v52 = vrot.slane %v4308_v59, 5  ;;  %v4329_v22 = vrot.slane %v4327_v26, 7  ;;  %v4339_v17 = vsel %vm13137_vm1, %v4337_v43, %v4338_v9 }
 0x2d6   :  { %v4393_v41 = vld [vmem:[#allocation3 + $0x1c] sm:$0x7]  ;;  %v4290_v38 = vsel %vm11647_vm4, %v4285_v15, %v4289_v42  ;;  %4263 = vst [vmem:[#allocation2 + $0x5c] sm:$0xc] %v4256_v1  ;;  %4288 = vst [vmem:[#allocation2 + $0x64] sm:$0xc] %v4284_v7 }
 0x2d7   :  { %v4322_v27 = vld [vmem:[#allocation2 + $0x74] sm:$0x7]  ;;  %v4343_v36 = vshrl.u32 %v4341_v51, 16  ;;  %v4346_v25 = vshll.u32 %v4341_v51, 16  ;;  %4340 = vst [vmem:[#allocation2 + $0x7c] sm:$0x7] %v4339_v17  ;;  %v4311_v56 = vor.u32 %v4310_v52, %v4307_v40  ;;  %v4332_v10 = vor.u32 %v4330_v6, %v4329_v22 }
 0x2d8   :  { %4291 = vst [vmem:[#allocation2 + $0x88] sm:$0x1] %v4290_v38  ;;  %v4323_v39 = vsel %vm13137_vm1, %v9268_v12, %v4322_v27  ;;  %v4385_v57 = vrot.slane %v4383_v5, 5  ;;  %v4390_v50 = vld [vmem:[#allocation2 + $0x90] sm:$0x3]  ;;  %v10826_v24 = vld [vmem:[#allocation6 + $0x2c0] sm:$0xff]  }
 0x2d9   :  { %v4409_v47 = vld [vmem:[#allocation3 + $0x1c] sm:$0xe]  ;;  %v4334_v29 = vld [vmem:[#allocation2 + $0x78] sm:$0x7]  ;;  %v4345_v13 = vrot.slane %v4343_v36, 4  ;;  %v4348_v49 = vrot.slane %v4346_v25, 5 }
 0x2da   :  { %4324 = vst [vmem:[#allocation2 + $0x74] sm:$0x7] %v4323_v39  ;;  %v4312_v23 = vrot.slane %v4311_v56, 4  ;;  %v4335_v16 = vsel %vm13137_vm1, %v4332_v10, %v4334_v29  ;;  %v4386_v19 = vrot.slane %v4385_v57, 4  ;;  %v4395_v55 = vshrl.u32 %v4393_v41, 16  ;;  %v10827_v21 = vld [vmem:[#allocation6 + $0x308] sm:$0xff]  }
 0x2db   :  { %v4416_v3 = vld [vmem:[#allocation2 + $0x98] sm:$0x3]  ;;  %4389 = vst [vmem:[#allocation2 + $0x6c] sm:$0x8] %v4385_v57  ;;  %v10816_v44 = vld [vmem:[#allocation2 + $0x4] ss:$36 sps:$4 sm:$0xff]   ;;  %v4349_v60 = vor.u32 %v4348_v49, %v4345_v13 }
 0x2dc   :  { %v3817_v0 = vld [vmem:[#allocation3 + $0x8] sm:$0x7]  ;;  %v4314_v42 = vld [vmem:[#allocation2 + $0x70] sm:$0x7]  ;;  %v4398_v54 = vshll.u32 %v4393_v41, 16  ;;  %v4411_v63 = vrot.slane %v4409_v47, 6  ;;  %v4391_v43 = vsel %vm14004_vm0, %v4386_v19, %v4390_v50  ;;  %5733 = vmatprep.mubr.bf16.mxu1 %v10816_v44 }
 0x2dd   :  { %4336 = vst [vmem:[#allocation2 + $0x78] sm:$0x7] %v4335_v16  ;;  %v10820_v31 = vld [vmem:[#allocation2] ss:$36 sps:$4 sm:$0xff]   ;;  %v4315_v30 = vsel %vm13137_vm1, %v4312_v23, %v4314_v42  ;;  %v4397_v34 = vrot.slane %v4395_v55, 5  ;;  %v4350_v6 = vrot.slane %v4349_v60, 4 }
 0x2de   :  { %v3914_v12 = vld [vmem:[#allocation3 + $0x8] sm:$0x7]  ;;  %v3866_v26 = vld [vmem:[#allocation3 + $0x8] sm:$0x8]  ;;  %v4352_v51 = vld [vmem:[#allocation2 + $0x80] sm:$0x7]  ;;  %5734 = vmatmul.mubr.bf16.vlgmr.msra.gmra.mrb[56].mxu1 %v10820_v31 }
 0x2df   :  { %v4400_v18 = vrot.slane %v4398_v54, 6  ;;  %v4412_v7 = vrot.slane %v4411_v63, 4  ;;  %4316 = vst [vmem:[#allocation2 + $0x70] sm:$0x7] %v4315_v30  ;;  %4392 = vst [vmem:[#allocation2 + $0x90] sm:$0x3] %v4391_v43  ;;  %10041 = vmatpush3.bf16.msra.mxu1 %v10826_v24  ;;  %v4353_v17 = vsel %vm13137_vm1, %v4350_v6, %v4352_v51 }
 0x2e0   :  { %4415 = vst [vmem:[#allocation2 + $0x74] sm:$0x8] %v4411_v63  ;;  %v3565_v15 = vmax.f32 %v13047_v8, 0.0  ;;  %v4406_v40 = vld [vmem:[#allocation2 + $0x94] sm:$0x3]  ;;  %v3566_v9 = vmax.f32 %v13051_v32, 0.0  ;;  %10042 = vmatprep.subr.bf16.mxu1 %v10827_v21 }
 0x2e1   :  { %v3567_v5 = vmax.f32 %v13055_v46, 0.0  ;;  %v3568_v1 = vmax.f32 %v13058_v45, 0.0  ;;  %v3569_v52 = vmax.f32 %v13063_v2, 0.0  ;;  %v10830_v22 = vld [vmem:[#allocation6 + $0x2c8] sm:$0xff]   ;;  %v4401_v41 = vor.u32 %v4400_v18, %v4397_v34  ;;  %v10832_v27 = vld [vmem:[#allocation6 + $0x310] sm:$0xff]   ;;  %v3554_v32 = vpop.f32.mrb[82].mxu0 }
 0x2e2   :  { %v4417_v38 = vsel %vm14004_vm0, %v4412_v7, %v4416_v3  ;;  %v3819_v8 = vshrl.u32 %v3817_v0, 16  ;;  %v3867_v36 = vld [vmem:[#allocation3 + $0xc] sm:$0x3]  ;;  %4354 = vst [vmem:[#allocation2 + $0x80] sm:$0x7] %v4353_v17  ;;  %v9719_v46 = vpack.c.bf16 %v3566_v9, %v3565_v15  ;;  %v3822_v2 = vshll.u32 %v3817_v0, 16 }
 0x2e3   :  { %4418 = vst [vmem:[#allocation2 + $0x98] sm:$0x3] %v4417_v38  ;;  %v9724_v45 = vpack.c.bf16 %v3568_v1, %v3567_v5  ;;  %v9685_v25 = vpack.c.bf16 %v3569_v52, %v3569_v52  ;;  %v3918_v56 = vld [vmem:[#allocation2 + $0x2c] sm:$0xe]  ;;  %v3834_v39 = vld [vmem:[#allocation3 + $0xc] sm:$0x1]  ;;  %10043 = vmatpush3.bf16.msra.mxu1 %v10830_v22 }
 0x2e4   :  { %v4402_v10 = vrot.slane %v4401_v41, 4  ;;  %4405 = vst [vmem:[#allocation2 + $0x70] sm:$0x8] %v4401_v41  ;;  %v3821_v57 = vrot.slane %v3819_v8, 5  ;;  %v3916_v50 = vrot.slane %v3914_v12, 7  ;;  %v9256_v47 = vrot.slane %v3866_v26, 9  ;;  %10044 = vmatprep.subr.bf16.mxu1 %v10832_v27 }
 0x2e5   :  { %3838 = vst [vmem:[#allocation2 + $0x3c] sm:$0x1] %v3834_v39  ;;  %9749 = vst [vmem:[#allocation3 + $0x20] sm:$0xff] %v9719_v46   ;;  %v3824_v29 = vrot.slane %v3822_v2, 6  ;;  %v10834_v13 = vld [vmem:[#allocation6 + $0x2d0] sm:$0xff]   ;;  %v3872_v49 = vrot.slane %v3867_v36, 5 }
 0x2e6   :  { %9750 = vst [vmem:[#allocation3 + $0x28] sm:$0xff] %v9724_v45   ;;  %3635 = vst [vmem:[#allocation3 + $0x30] sm:$0x1] %v9685_v25  ;;  %v3877_v24 = vld [vmem:[#allocation2 + $0x20] sm:$0xc]  ;;  %v4407_v23 = vsel %vm14004_vm0, %v4402_v10, %v4406_v40  ;;  %v3919_v55 = vsel %vm12955_vm6, %v3916_v50, %v3918_v56  ;;  %v10470_v3 = vpop.f32.mrb[83].mxu0  ;;  %vm14022_vm6 = vnez %v13983_v28 }
 0x2e7   :  { %v3829_v16 = vld [vmem:[#allocation2 + $0x14] sm:$0xc]  ;;  %v10835_v19 = vld [vmem:[#allocation6 + $0x318] sm:$0xff]   ;;  %4408 = vst [vmem:[#allocation2 + $0x94] sm:$0x3] %v4407_v23  ;;  %v3825_v44 = vor.u32 %v3824_v29, %v3821_v57  ;;  %v3873_v0 = vsel %vm11369_vm12, %v9256_v47, %v3872_v49  ;;  %v3874_v21 = vrot.slane %v3872_v49, 4  ;;  %10045 = vmatpush3.bf16.msra.mxu1 %v10834_v13 }
 0x2e8   :  { %3920 = vst [vmem:[#allocation2 + $0x2c] sm:$0xe] %v3919_v55  ;;  %v3878_v42 = vsel %vm11508_vm15, %v3873_v0, %v3877_v24  ;;  %v10837_v63 = vld [vmem:[#allocation6 + $0x2d8] sm:$0xff]   ;;  %v4471_v11 = vld [vmem:[#allocation2 + $0xa8] sm:$0x3]  ;;  %10046 = vmatprep.subr.bf16.mxu1 %v10835_v19  ;;  %v10845_v40 = vld [vmem:[#allocation6 + $0x328] sm:$0xff]  }
 0x2e9   :  { %v3826_v60 = vrot.slane %v3825_v44, 4  ;;  %v3830_v54 = vsel %vm11508_vm15, %v3825_v44, %v3829_v16  ;;  %3879 = vst [vmem:[#allocation2 + $0x20] sm:$0xc] %v3878_v42  ;;  %3880 = vst [vmem:[#allocation2 + $0x44] sm:$0x1] %v3874_v21  ;;  %v10841_v31 = vld [vmem:[#allocation6 + $0x320] sm:$0xff]  }
 0x2ea   :  { %3831 = vst [vmem:[#allocation2 + $0x14] sm:$0xc] %v3830_v54  ;;  %v13189_v30 = vld [vmem:[#allocation3 + $0x8] sm:$0x8]  ;;  %v10824_v34 = vld [vmem:[#allocation2 + $0x48] ss:$36 sps:$4 sm:$0xff]  }
 0x2eb   :  { %3832 = vst [vmem:[#allocation2 + $0x38] sm:$0x1] %v3826_v60  ;;  %v10822_v43 = vld [vmem:[#allocation2 + $0x4c] ss:$36 sps:$4 sm:$0xff]   ;;  %10047 = vmatpush3.bf16.msra.mxu1 %v10837_v63  ;;  %v10844_v7 = vld [vmem:[#allocation6 + $0x2e0] sm:$0xff]   ;;  %v3842_v9 = vshrl.u32 %v13189_v30, 16 }
 0x2ec   :  { %v4355_v12 = vld [vmem:[#allocation3 + $0x1c] sm:$0x8]  ;;  %v4468_v51 = vld [vmem:[#allocation3 + $0x20] sm:$0x8]  ;;  %v4469_v18 = vld [vmem:[#allocation3 + $0x24] sm:$0x3]  ;;  %5741 = vmatprep.mubr.bf16.mxu1 %v10822_v43  ;;  %10048 = vmatprep.subr.bf16.mxu1 %v10841_v31 }
 0x2ed   :  { %v13191_v26 = vld [vmem:[#allocation3 + $0x1c] sm:$0x8]  ;;  %4470 = vst [vmem:[#allocation2 + $0x84] sm:$0x8] %v4468_v51  ;;  %v4472_v15 = vsel %vm14004_vm0, %v4469_v18, %v4471_v11  ;;  %5742 = vmatmul.mubr.bf16.gmra.mrb[60].mxu1 %v10824_v34  ;;  %v9269_v5 = vrot.slane %v4355_v12, 11  ;;  %v10851_v45 = vld [vmem:[#allocation6 + $0x330] sm:$0xff]  }
 0x2ee   :  { %v13193_v6 = vld [vmem:[#allocation3 + $0x1c] sm:$0x8]  ;;  %v4422_v1 = vshrl.u32 %v13191_v26, 16  ;;  %4473 = vst [vmem:[#allocation2 + $0xa8] sm:$0x3] %v4472_v15  ;;  %v13202_v25 = vrot.slane %v3842_v9, 4 }
 0x2ef   :  { %v9272_v52 = vrot.slane %v13193_v6, 10  ;;  %v10847_v22 = vld [vmem:[#allocation6 + $0x2e8] sm:$0xff]   ;;  %v13200_v17 = vld [vmem:[#allocation3 + $0xc] sm:$0x3]  ;;  %v4356_v41 = vld [vmem:[#allocation3 + $0x20] sm:$0x3]  ;;  %10049 = vmatpush3.bf16.msra.mxu1 %v10844_v7 }
 0x2f0   :  { %v4420_v38 = vld [vmem:[#allocation3 + $0x20] sm:$0x3]  ;;  %v4474_v36 = vld [vmem:[#allocation3 + $0x20] sm:$0x8]  ;;  %v4475_v32 = vld [vmem:[#allocation3 + $0x24] sm:$0x3]  ;;  %10050 = vmatprep.subr.bf16.mxu1 %v10845_v40 }
 0x2f1   :  { %v4442_v8 = vld [vmem:[#allocation3 + $0x20] sm:$0x7]  ;;  %v4449_v46 = vld [vmem:[#allocation2 + $0xa0] sm:$0x3]  ;;  %v3845_v2 = vshll.u32 %v13189_v30, 16  ;;  %v3851_v56 = vshll.u32 %v13200_v17, 16 }
 0x2f2   :  { %v4452_v27 = vld [vmem:[#allocation3 + $0x20] sm:$0x7]  ;;  %v3855_v39 = vshrl.u32 %v13200_v17, 16  ;;  %v4364_v10 = vld [vmem:[#allocation2 + $0x84] sm:$0x7]  ;;  %v4361_v57 = vrot.slane %v4356_v41, 7 }
 0x2f3   :  { %v4427_v50 = vshll.u32 %v4420_v38, 16  ;;  %v4431_v47 = vshrl.u32 %v4420_v38, 16  ;;  %v4444_v29 = vrot.slane %v4442_v8, 5  ;;  %v10854_v13 = vld [vmem:[#allocation6 + $0x2f0] sm:$0xff]   ;;  %v4454_v24 = vshrl.u32 %v4452_v27, 16  ;;  %10051 = vmatpush3.bf16.msra.mxu1 %v10847_v22  ;;  %v10858_v31 = vld [vmem:[#allocation6 + $0x338] sm:$0xff]  }
 0x2f4   :  { %v4497_v49 = vld [vmem:[#allocation3 + $0x24] sm:$0x7]  ;;  %v4457_v23 = vshll.u32 %v4452_v27, 16  ;;  %v4477_v16 = vshrl.u32 %v4474_v36, 16  ;;  %v4482_v19 = vshll.u32 %v4475_v32, 16  ;;  %v4362_v3 = vsel %vm11484_vm3, %v9269_v5, %v4361_v57  ;;  %10052 = vmatprep.subr.bf16.mxu1 %v10851_v45  ;;  %v10860_v22 = vld [vmem:[#allocation6 + $0x2f8] sm:$0xff]  }
 0x2f5   :  { %v4539_v55 = vld [vmem:[#allocation3 + $0x20] sm:$0x8]  ;;  %v13209_v44 = vrot.slane %v4427_v50, 5  ;;  %v4433_v0 = vrot.slane %v4431_v47, 4  ;;  %v4445_v21 = vrot.slane %v4444_v29, 4  ;;  %v4365_v60 = vsel %vm13137_vm1, %v4362_v3, %v4364_v10  ;;  %v10863_v41 = vld [vmem:[#allocation6 + $0x400] sm:$0xff]  }
 0x2f6   :  { %4448 = vst [vmem:[#allocation2 + $0x7c] sm:$0x8] %v4444_v29  ;;  %v4439_v42 = vld [vmem:[#allocation2 + $0x9c] sm:$0x3]  ;;  %v4456_v54 = vrot.slane %v4454_v24, 5  ;;  %v4459_v63 = vrot.slane %v4457_v23, 6 }
 0x2f7   :  { %v4484_v11 = vrot.slane %v4482_v19, 5  ;;  %v4465_v30 = vld [vmem:[#allocation2 + $0xa4] sm:$0x3]  ;;  %v4504_v43 = vld [vmem:[#allocation2 + $0xb0] sm:$0x3]  ;;  %v4434_v12 = vor.u32 %v4433_v0, %v13209_v44  ;;  %v4450_v51 = vsel %vm14004_vm0, %v4445_v21, %v4449_v46  ;;  %v4486_v18 = vshrl.u32 %v4475_v32, 16  ;;  %10053 = vmatpush3.bf16.msra.mxu1 %v10854_v13 }
 0x2f8   :  { %v4540_v34 = vld [vmem:[#allocation3 + $0x24] sm:$0x3]  ;;  %v4499_v7 = vrot.slane %v4497_v49, 5  ;;  %4366 = vst [vmem:[#allocation2 + $0x84] sm:$0x7] %v4365_v60  ;;  %v4460_v40 = vor.u32 %v4459_v63, %v4456_v54  ;;  %v4542_v5 = vshrl.u32 %v4539_v55, 16  ;;  %10054 = vmatprep.subr.bf16.mxu1 %v10858_v31 }
 0x2f9   :  { %v4563_v15 = vld [vmem:[#allocation3 + $0x20] sm:$0x8]  ;;  %4451 = vst [vmem:[#allocation2 + $0xa0] sm:$0x3] %v4450_v51  ;;  %v4485_v9 = vsel %vm11532_vm13, %v4477_v16, %v4484_v11  ;;  %v13218_v38 = vrot.slane %v3845_v2, 5  ;;  %v4435_v27 = vrot.slane %v4434_v12, 4 }
 0x2fa   :  { %v4564_v8 = vld [vmem:[#allocation3 + $0x24] sm:$0x3]  ;;  %v4488_v36 = vrot.slane %v4486_v18, 4  ;;  %4493 = vst [vmem:[#allocation2 + $0x88] sm:$0x8] %v4485_v9  ;;  %v4500_v45 = vrot.slane %v4499_v7, 4 }
 0x2fb   :  { %4503 = vst [vmem:[#allocation2 + $0x8c] sm:$0x8] %v4499_v7  ;;  %v4545_v32 = vshll.u32 %v4539_v55, 16  ;;  %v4494_v46 = vld [vmem:[#allocation2 + $0xac] sm:$0x3]  ;;  %v4461_v57 = vrot.slane %v4460_v40, 4  ;;  %v4440_v24 = vsel %vm14004_vm0, %v4435_v27, %v4439_v42  ;;  %10055 = vmatpush3.bf16.msra.mxu1 %v10860_v22 }
 0x2fc   :  { %v4575_v10 = vld [vmem:[#allocation3 + $0x24] sm:$0x7]  ;;  %4464 = vst [vmem:[#allocation2 + $0x80] sm:$0x8] %v4460_v40  ;;  %v4544_v50 = vrot.slane %v4542_v5, 5  ;;  %v4551_v47 = vshrl.u32 %v4540_v34, 16  ;;  %v4489_v23 = vor.u32 %v4488_v36, %v4484_v11  ;;  %v4505_v16 = vsel %vm14004_vm0, %v4500_v45, %v4504_v43  ;;  %10120 = vmatprep.subr.bf16.mxu1 %v10863_v41 }
 0x2fd   :  { %v13220_v29 = vrot.slane %v3851_v56, 5  ;;  %v4636_v49 = vld [vmem:[#allocation3 + $0x20] sm:$0x8]  ;;  %v4637_v2 = vld [vmem:[#allocation3 + $0x24] sm:$0x3]  ;;  %v4547_v19 = vrot.slane %v4545_v32, 6  ;;  %v4466_v3 = vsel %vm14004_vm0, %v4461_v57, %v4465_v30 }
 0x2fe   :  { %v4645_v13 = vld [vmem:[#allocation2 + $0xb4] sm:$0x7]  ;;  %v4648_v55 = vld [vmem:[#allocation3 + $0x20] sm:$0x8]  ;;  %4441 = vst [vmem:[#allocation2 + $0x9c] sm:$0x3] %v4440_v24 }
 0x2ff   :  { %4506 = vst [vmem:[#allocation2 + $0xb0] sm:$0x3] %v4505_v16  ;;  %v4553_v0 = vrot.slane %v4551_v47, 5  ;;  %v4554_v56 = vshll.u32 %v4540_v34, 16  ;;  %v9273_v21 = vrot.slane %v4563_v15, 10  ;;  %v4490_v63 = vrot.slane %v4489_v23, 4 }
 0x300   :  { %v4668_v60 = vld [vmem:[#allocation2 + $0xbc] sm:$0x7]  ;;  %v4649_v54 = vld [vmem:[#allocation3 + $0x24] sm:$0x3]  ;;  %4467 = vst [vmem:[#allocation2 + $0xa4] sm:$0x3] %v4466_v3  ;;  %v4548_v42 = vor.u32 %v4547_v19, %v4544_v50 }
 0x301   :  { %v4569_v11 = vrot.slane %v4564_v8, 6  ;;  %v4577_v31 = vshrl.u32 %v4575_v10, 16  ;;  %v4667_v43 = vld [vmem:[#allocation3 + $0x24] sm:$0x7]  ;;  %v4556_v12 = vrot.slane %v4554_v56, 6  ;;  %v4580_v51 = vshll.u32 %v4575_v10, 16 }
 0x302   :  { %v9276_v18 = vrot.slane %v4636_v49, 11  ;;  %v4642_v7 = vrot.slane %v4637_v2, 7  ;;  %v4495_v30 = vsel %vm14004_vm0, %v4490_v63, %v4494_v46  ;;  %v4549_v40 = vrot.slane %v4548_v42, 4  ;;  %v4572_v15 = vld [vmem:[#allocation2 + $0xa0] sm:$0xe] }
 0x303   :  { %v4570_v34 = vsel %vm11413_vm8, %v9273_v21, %v4569_v11  ;;  %v4579_v9 = vrot.slane %v4577_v31, 6  ;;  %v4588_v5 = vld [vmem:[#allocation3 + $0x24] sm:$0xc]  ;;  %4496 = vst [vmem:[#allocation2 + $0xac] sm:$0x3] %v4495_v30  ;;  %v4557_v8 = vor.u32 %v4556_v12, %v4553_v0  ;;  %v4582_v36 = vrot.slane %v4580_v51, 7 }
 0x304   :  { %v4573_v22 = vsel %vm11635_vm14, %v4570_v34, %v4572_v15  ;;  %v4643_v45 = vsel %vm11484_vm3, %v9276_v18, %v4642_v7  ;;  %v4589_v41 = vld [vmem:[#allocation3 + $0x28] sm:$0x1]  ;;  %v4600_v32 = vld [vmem:[#allocation3 + $0x24] sm:$0x8]  ;;  %v4651_v10 = vshrl.u32 %v4648_v55, 16  ;;  %v4656_v57 = vshrl.u32 %v4649_v54, 16 }
 0x305   :  { %4574 = vst [vmem:[#allocation2 + $0xa0] sm:$0xe] %v4573_v22  ;;  %v4646_v46 = vsel %vm11434_vm9, %v4643_v45, %v4645_v13  ;;  %v4659_v50 = vshll.u32 %v4649_v54, 16  ;;  %v4601_v47 = vld [vmem:[#allocation3 + $0x28] sm:$0x3]  ;;  %v4558_v49 = vsel %vm11348_vm10, %v4549_v40, %v4557_v8  ;;  %v4583_v2 = vor.u32 %v4582_v36, %v4579_v9 }
 0x306   :  { %4647 = vst [vmem:[#allocation2 + $0xb4] sm:$0x7] %v4646_v46  ;;  %v4669_v24 = vsel %vm11434_vm9, %v4667_v43, %v4668_v60  ;;  %v9274_v23 = vrot.slane %v4588_v5, 9  ;;  %v4624_v16 = vld [vmem:[#allocation3 + $0x24] sm:$0x8]  ;;  %v9277_v13 = vrot.slane %v4651_v10, 11 }
 0x307   :  { %v4625_v19 = vld [vmem:[#allocation3 + $0x28] sm:$0x3]  ;;  %v4671_v3 = vld [vmem:[#allocation3 + $0x24] sm:$0xc]  ;;  %v4658_v55 = vrot.slane %v4656_v57, 7  ;;  %v4594_v54 = vrot.slane %v4589_v41, 5 }
 0x308   :  { %v4775_v0 = vld [vmem:[#allocation3 + $0x28] sm:$0x1]  ;;  %v4664_v56 = vld [vmem:[#allocation2 + $0xb8] sm:$0x7]  ;;  %v4560_v21 = vld [vmem:[#allocation2 + $0x9c] sm:$0xe] }
 0x309   :  { %4670 = vst [vmem:[#allocation2 + $0xbc] sm:$0x7] %v4669_v24  ;;  %v4603_v63 = vshrl.u32 %v4600_v32, 16  ;;  %4779 = vst [vmem:[#allocation2 + $0xd8] sm:$0x1] %v4775_v0  ;;  %v4561_v42 = vsel %vm11635_vm14, %v4558_v49, %v4560_v21  ;;  %v4606_v31 = vshll.u32 %v4600_v32, 16  ;;  %v4661_v51 = vor.u32 %v4659_v50, %v4658_v55 }
 0x30a   :  { %v4585_v11 = vld [vmem:[#allocation2 + $0xa4] sm:$0xe]  ;;  %v4612_v12 = vshrl.u32 %v4601_v47, 16  ;;  %v4615_v60 = vshll.u32 %v4601_v47, 16  ;;  %4562 = vst [vmem:[#allocation2 + $0x9c] sm:$0xe] %v4561_v42  ;;  %v4595_v18 = vsel %vm11369_vm12, %v9274_v23, %v4594_v54 }
 0x30b   :  { %v4586_v43 = vsel %vm11635_vm14, %v4583_v2, %v4585_v11  ;;  %v4597_v7 = vld [vmem:[#allocation2 + $0xa8] sm:$0xe]  ;;  %v4605_v30 = vrot.slane %v4603_v63, 5  ;;  %v4672_v40 = vld [vmem:[#allocation3 + $0x28] sm:$0x1]  ;;  %v4608_v15 = vrot.slane %v4606_v31, 6  ;;  %v4662_v45 = vsel %vm14022_vm6, %v9277_v13, %v4661_v51 }
 0x30c   :  { %4587 = vst [vmem:[#allocation2 + $0xa4] sm:$0xe] %v4586_v43  ;;  %v4598_v34 = vsel %vm11635_vm14, %v4595_v18, %v4597_v7  ;;  %v4614_v9 = vrot.slane %v4612_v12, 5  ;;  %v4617_v5 = vrot.slane %v4615_v60, 6  ;;  %v4695_v8 = vld [vmem:[#allocation3 + $0x24] sm:$0x8]  ;;  %v4665_v57 = vsel %vm11434_vm9, %v4662_v45, %v4664_v56 }
 0x30d   :  { %v13250_v22 = vld [vmem:[#allocation3 + $0x20] sm:$0x3]  ;;  %v4774_v36 = vld [vmem:[#allocation3 + $0x24] sm:$0xc]  ;;  %v9275_v41 = vrot.slane %v4624_v16, 10  ;;  %v4630_v32 = vrot.slane %v4625_v19, 6  ;;  %v4609_v50 = vor.u32 %v4608_v15, %v4605_v30 }
 0x30e   :  { %v4633_v46 = vld [vmem:[#allocation2 + $0xb0] sm:$0xe]  ;;  %v4674_v10 = vshrl.u32 %v4671_v3, 16  ;;  %4599 = vst [vmem:[#allocation2 + $0xa8] sm:$0xe] %v4598_v34  ;;  %v4618_v47 = vor.u32 %v4617_v5, %v4614_v9  ;;  %v4677_v49 = vshll.u32 %v4671_v3, 16 }
 0x30f   :  { %v4696_v2 = vld [vmem:[#allocation3 + $0x28] sm:$0x3]  ;;  %4666 = vst [vmem:[#allocation2 + $0xb8] sm:$0x7] %v4665_v57  ;;  %v4776_v23 = vld [vmem:[#allocation2 + $0xb4] sm:$0xc]  ;;  %v4631_v0 = vsel %vm11413_vm8, %v9275_v41, %v4630_v32 }
 0x310   :  { %v4708_v24 = vld [vmem:[#allocation3 + $0x28] sm:$0x3]  ;;  %v4676_v21 = vrot.slane %v4674_v10, 6  ;;  %v4683_v13 = vshrl.u32 %v4672_v40, 16  ;;  %v4686_v16 = vshll.u32 %v4672_v40, 16  ;;  %v4777_v55 = vsel %vm11508_vm15, %v4774_v36, %v4776_v23 }
 0x311   :  { %v4704_v19 = vld [vmem:[#allocation2 + $0xc4] sm:$0x7]  ;;  %v4610_v54 = vrot.slane %v4609_v50, 4  ;;  %v4621_v63 = vld [vmem:[#allocation2 + $0xac] sm:$0xe]  ;;  %v4634_v56 = vsel %vm11635_vm14, %v4631_v0, %v4633_v46  ;;  %v4679_v3 = vrot.slane %v4677_v49, 7  ;;  %v3848_v23 = vor.u32 %v13218_v38, %v13202_v25 }
 0x312   :  { %v4707_v42 = vld [vmem:[#allocation3 + $0x24] sm:$0x8]  ;;  %4778 = vst [vmem:[#allocation2 + $0xb4] sm:$0xc] %v4777_v55  ;;  %v4685_v11 = vrot.slane %v4683_v13, 6  ;;  %v4688_v31 = vrot.slane %v4686_v16, 7 }
 0x313   :  { %v9278_v12 = vrot.slane %v4695_v8, 11  ;;  %v4701_v60 = vrot.slane %v4696_v2, 7  ;;  %v4726_v43 = vld [vmem:[#allocation3 + $0x28] sm:$0xc]  ;;  %4635 = vst [vmem:[#allocation2 + $0xb0] sm:$0xe] %v4634_v56  ;;  %v4619_v18 = vsel %vm11348_vm10, %v4610_v54, %v4618_v47  ;;  %v4680_v7 = vor.u32 %v4679_v3, %v4676_v21 }
 0x314   :  { %v4513_v51 = vrot.slane %v13250_v22, 6  ;;  %v4715_v30 = vshrl.u32 %v4708_v24, 16  ;;  %v4727_v40 = vld [vmem:[#allocation3 + $0x2c] sm:$0x1]  ;;  %v4622_v15 = vsel %vm11635_vm14, %v4619_v18, %v4621_v63  ;;  %v4710_v5 = vshrl.u32 %v4707_v42, 16  ;;  %v10864_v38 = vld [vmem:[#allocation6 + $0x470] sm:$0xff]  }
 0x315   :  { %v4843_v34 = vld [vmem:[#allocation3 + $0x2c] sm:$0x1]  ;;  %v4702_v9 = vsel %vm11484_vm3, %v9278_v12, %v4701_v60  ;;  %v4735_v8 = vld [vmem:[#allocation2 + $0xcc] sm:$0x7]  ;;  %v4738_v36 = vld [vmem:[#allocation3 + $0x28] sm:$0xc]  ;;  %v4689_v22 = vor.u32 %v4688_v31, %v4685_v11 }
 0x316   :  { %v13269_v45 = vld [vmem:[#allocation3 + $0x2c] sm:$0x1]  ;;  %4847 = vst [vmem:[#allocation2 + $0xe8] sm:$0x1] %v4843_v34  ;;  %v4705_v41 = vsel %vm11434_vm9, %v4702_v9, %v4704_v19  ;;  %v4717_v32 = vrot.slane %v4715_v30, 7  ;;  %v13275_v57 = vrot.slane %v3855_v39, 4  ;;  %v13283_v17 = vsel %vm11413_vm8, %v9272_v52, %v4513_v51 }
 0x317   :  { %v4762_v46 = vld [vmem:[#allocation3 + $0x28] sm:$0x8]  ;;  %v4763_v10 = vld [vmem:[#allocation3 + $0x2c] sm:$0x3]  ;;  %4623 = vst [vmem:[#allocation2 + $0xac] sm:$0xe] %v4622_v15 }
 0x318   :  { %v9280_v50 = vrot.slane %v4726_v43, 10  ;;  %v4732_v47 = vrot.slane %v4727_v40, 6  ;;  %v4780_v49 = vld [vmem:[#allocation3 + $0x24] sm:$0x8]  ;;  %v4781_v2 = vld [vmem:[#allocation3 + $0x28] sm:$0x3] }
 0x319   :  { %4706 = vst [vmem:[#allocation2 + $0xc4] sm:$0x7] %v4705_v41  ;;  %v4681_v0 = vrot.slane %v4680_v7, 4  ;;  %v4718_v21 = vshll.u32 %v4708_v24, 16  ;;  %v4741_v13 = vshrl.u32 %v4738_v36, 16  ;;  %v4744_v16 = vshll.u32 %v4738_v36, 16 }
 0x31a   :  { %v4807_v19 = vld [vmem:[#allocation3 + $0x24] sm:$0x8]  ;;  %v13285_v39 = vrot.slane %v4710_v5, 11  ;;  %v4733_v55 = vsel %vm11413_vm8, %v9280_v50, %v4732_v47  ;;  %v9281_v54 = vrot.slane %v4762_v46, 11  ;;  %v4771_v63 = vld [vmem:[#allocation2 + $0xd4] sm:$0x7] }
 0x31b   :  { %v4808_v56 = vld [vmem:[#allocation3 + $0x28] sm:$0x3]  ;;  %v4906_v3 = vld [vmem:[#allocation3 + $0x30] sm:$0x1]  ;;  %v13291_v24 = vsel %vm11475_vm5, %v4681_v0, %v4689_v22  ;;  %v13293_v42 = vor.u32 %v4718_v21, %v4717_v32  ;;  %v4736_v6 = vsel %vm11434_vm9, %v4733_v55, %v4735_v8  ;;  %v4750_v52 = vshrl.u32 %v13269_v45, 16  ;;  %v10836_v12 = vld [vmem:[#allocation6 + $0x448] sm:$0xff]  }
 0x31c   :  { %4910 = vst [vmem:[#allocation2 + $0xf8] sm:$0x1] %v4906_v3  ;;  %v10818_v11 = vld [vmem:[#allocation2 + $0x14] ss:$36 sps:$4 sm:$0xff]   ;;  %v4753_v60 = vshll.u32 %v13269_v45, 16  ;;  %v4768_v43 = vrot.slane %v4763_v10, 7 }
 0x31d   :  { %v10821_v31 = vld [vmem:[#allocation2 + $0x10] ss:$36 sps:$4 sm:$0xff]   ;;  %v4783_v51 = vshrl.u32 %v4780_v49, 16  ;;  %v4786_v18 = vshll.u32 %v4780_v49, 16  ;;  %4737 = vst [vmem:[#allocation2 + $0xcc] sm:$0x7] %v4736_v6  ;;  %5861 = vmatprep.mubr.bf16.mxu0 %v10818_v11  ;;  %v4721_v21 = vsel %vm14022_vm6, %v13285_v39, %v13293_v42 }
 0x31e   :  { %v10828_v7 = vld [vmem:[#allocation2 + $0x5c] ss:$36 sps:$4 sm:$0xff]   ;;  %v13299_v30 = vrot.slane %v4741_v13, 6  ;;  %v13301_v40 = vrot.slane %v4744_v16, 7  ;;  %v4792_v34 = vshll.u32 %v4781_v2, 16  ;;  %v4796_v15 = vshrl.u32 %v4781_v2, 16  ;;  %5862 = vmatmul.mubr.bf16.vlgmr.msra.gmra.mrb[84].mxu0 %v10821_v31 }
 0x31f   :  { %v13303_v9 = vld [vmem:[#allocation3 + $0x28] sm:$0xc]  ;;  %v4769_v5 = vsel %vm11484_vm3, %v9281_v54, %v4768_v43  ;;  %v4785_v8 = vrot.slane %v4783_v51, 4  ;;  %v4788_v36 = vrot.slane %v4786_v18, 5  ;;  %v9282_v22 = vrot.slane %v4807_v19, 9  ;;  %5869 = vmatprep.mubr.bf16.mxu0 %v10828_v7  ;;  %v11112_v2 = vld [vmem:[#allocation6 + $0x440] sm:$0xff]  }
 0x320   :  { %v4772_v41 = vsel %vm11434_vm9, %v4769_v5, %v4771_v63  ;;  %v4794_v32 = vrot.slane %v4792_v34, 5  ;;  %v4798_v46 = vrot.slane %v4796_v15, 4  ;;  %v4813_v10 = vrot.slane %v4808_v56, 5  ;;  %v4818_v50 = vld [vmem:[#allocation2 + $0xbc] sm:$0xc]  ;;  %10472 = vmatpush3.bf16.msra.mxu0 %v11112_v2  ;;  %v10842_v0 = vld [vmem:[#allocation6 + $0x450] sm:$0xff]  }
 0x321   :  { %v4823_v47 = vld [vmem:[#allocation3 + $0x2c] sm:$0x1]  ;;  %v4848_v49 = vld [vmem:[#allocation3 + $0x28] sm:$0x8]  ;;  %v13313_v13 = vrot.slane %v4750_v52, 6  ;;  %v4789_v16 = vor.u32 %v4788_v36, %v4785_v8  ;;  %v4825_v55 = vshrl.u32 %v13303_v9, 16  ;;  %10473 = vmatprep.subr.bf16.mxu0 %v10836_v12  ;;  %v4747_v63 = vor.u32 %v13301_v40, %v13299_v30 }
 0x322   :  { %v4803_v19 = vld [vmem:[#allocation2 + $0xb8] sm:$0xc]  ;;  %v4849_v54 = vld [vmem:[#allocation3 + $0x2c] sm:$0x3]  ;;  %4773 = vst [vmem:[#allocation2 + $0xd4] sm:$0x7] %v4772_v41  ;;  %v4799_v56 = vor.u32 %v4798_v46, %v4794_v32  ;;  %v4814_v3 = vsel %vm11369_vm12, %v9282_v22, %v4813_v10 }
 0x323   :  { %v4815_v6 = vrot.slane %v4813_v10, 4  ;;  %v13320_v11 = vld [vmem:[#allocation3 + $0x2c] sm:$0xe]  ;;  %v4790_v52 = vrot.slane %v4789_v16, 4  ;;  %v4819_v43 = vsel %vm11508_vm15, %v4814_v3, %v4818_v50  ;;  %v13326_v51 = vrot.slane %v4825_v55, 7 }
 0x324   :  { %v13322_v31 = vld [vmem:[#allocation3 + $0x2c] sm:$0xc]  ;;  %v4851_v18 = vshrl.u32 %v4848_v49, 16  ;;  %v13328_v7 = vld [vmem:[#allocation3 + $0x30] sm:$0x1]  ;;  %v4800_v40 = vrot.slane %v4799_v56, 4  ;;  %10474 = vmatpush3.bf16.msra.mxu0 %v10836_v12 }
 0x325   :  { %v10831_v34 = vld [vmem:[#allocation2 + $0x58] ss:$36 sps:$4 sm:$0xff]   ;;  %v4516_v30 = vld [vmem:[#allocation2 + $0x90] sm:$0xe]  ;;  %v4854_v15 = vshll.u32 %v4848_v49, 16  ;;  %v4860_v5 = vshll.u32 %v4849_v54, 16  ;;  %v4795_v22 = vsel %vm11532_vm13, %v4790_v52, %v4794_v32  ;;  %10475 = vmatprep.subr.bf16.mxu0 %v10842_v0 }
 0x326   :  { %v4864_v8 = vshrl.u32 %v4849_v54, 16  ;;  %4820 = vst [vmem:[#allocation2 + $0xbc] sm:$0xc] %v4819_v43  ;;  %4821 = vst [vmem:[#allocation2 + $0xe0] sm:$0x1] %v4815_v6  ;;  %v4831_v41 = vrot.slane %v13326_v51, 4  ;;  %v4804_v49 = vsel %vm11508_vm15, %v4795_v22, %v4803_v19  ;;  %5870 = vmatmul.mubr.bf16.gmra.mrb[88].mxu0 %v10831_v34 }
 0x327   :  { %v4519_v36 = vld [vmem:[#allocation3 + $0x20] sm:$0x7]  ;;  %v4833_v46 = vshll.u32 %v4823_v47, 16  ;;  %v13333_v10 = vrot.slane %v4851_v18, 4  ;;  %v10846_v50 = vld [vmem:[#allocation6 + $0x458] sm:$0xff]   ;;  %v13337_v16 = vrot.slane %v4854_v15, 5 }
 0x328   :  { %v4723_v2 = vld [vmem:[#allocation2 + $0xc8] sm:$0x7]  ;;  %v13339_v55 = vrot.slane %v4860_v5, 5  ;;  %v4866_v12 = vrot.slane %v4864_v8, 4  ;;  %4806 = vst [vmem:[#allocation2 + $0xdc] sm:$0x1] %v4800_v40  ;;  %10476 = vmatpush3.bf16.msra.mxu0 %v10842_v0 }
 0x329   :  { %v4755_v32 = vrot.slane %v4753_v60, 7  ;;  %v4835_v47 = vsel %vm14022_vm6, %v4831_v41, %v4833_v46  ;;  %v4877_v54 = vrot.slane %v13320_v11, 7  ;;  %v4888_v56 = vshrl.u32 %v13322_v31, 16  ;;  %4805 = vst [vmem:[#allocation2 + $0xb8] sm:$0xc] %v4804_v49  ;;  %v13347_v19 = vld [vmem:[#allocation6 + $0x460] sm:$0xff]   ;;  %10477 = vmatprep.subr.bf16.mxu0 %v10846_v50 }
 0x32a   :  { %v4844_v3 = vld [vmem:[#allocation2 + $0xc4] sm:$0xc]  ;;  %v4380_v6 = vld [vmem:[#allocation2 + $0x8c] sm:$0x7]  ;;  %v4748_v52 = vrot.slane %v4747_v63, 4  ;;  %v4867_v18 = vor.u32 %v4866_v12, %v13339_v55  ;;  %v4896_v45 = vshll.u32 %v13328_v7, 16  ;;  %v4517_v60 = vsel %vm11635_vm14, %v13283_v17, %v4516_v30 }
 0x32b   :  { %v4842_v43 = vld [vmem:[#allocation3 + $0x28] sm:$0xc]  ;;  %4841 = vst [vmem:[#allocation2 + $0xe4] sm:$0x1] %v4835_v47  ;;  %v4064_v40 = vld [vmem:[#allocation2 + $0x2c] sm:$0x8]  ;;  %v4857_v7 = vor.u32 %v13337_v16, %v13333_v10  ;;  %v4724_v17 = vsel %vm11434_vm9, %v4721_v21, %v4723_v2  ;;  %v3858_v16 = vor.u32 %v13275_v57, %v13220_v29  ;;  %v4756_v39 = vor.u32 %v4755_v32, %v13313_v13 }
 0x32c   :  { %v4878_v34 = vrot.slane %v4877_v54, 4  ;;  %v13356_v15 = vrot.slane %v4888_v56, 7  ;;  %4518 = vst [vmem:[#allocation2 + $0x90] sm:$0xe] %v4517_v60  ;;  %v4521_v5 = vshrl.u32 %v4519_v36, 16  ;;  %v4524_v63 = vshll.u32 %v4519_v36, 16  ;;  %10478 = vmatpush3.bf16.msra.mxu0 %v10846_v50 }
 0x32d   :  { %v4062_v8 = vld [vmem:[#allocation3 + $0x8] sm:$0x8]  ;;  %v4379_v22 = vld [vmem:[#allocation3 + $0x20] sm:$0x7]  ;;  %v4868_v41 = vrot.slane %v4867_v18, 4  ;;  %v4845_v0 = vsel %vm11508_vm15, %v4842_v43, %v4844_v3  ;;  %v4430_v2 = vsel %vm11532_vm13, %v4422_v1, %v13209_v44  ;;  %10479 = vmatprep.subr.bf16.mxu0 %v13347_v19  ;;  %v10859_v32 = vld [vmem:[#allocation6 + $0x468] sm:$0xff]  }
 0x32e   :  { %v4532_v30 = vld [vmem:[#allocation3 + $0x20] sm:$0x7]  ;;  %v4692_v36 = vld [vmem:[#allocation2 + $0xc0] sm:$0x7]  ;;  %v4894_v46 = vrot.slane %v13356_v15, 4  ;;  %v4523_v49 = vrot.slane %v4521_v5, 6  ;;  %v4065_v21 = vsel %vm11356_vm11, %v4062_v8, %v4064_v40  ;;  %v4381_v47 = vsel %vm13137_vm1, %v4379_v22, %v4380_v6 }
 0x32f   :  { %4884 = vst [vmem:[#allocation2 + $0xf0] sm:$0x1] %v4878_v34  ;;  %v4526_v12 = vrot.slane %v4524_v63, 7  ;;  %4725 = vst [vmem:[#allocation2 + $0xc8] sm:$0x7] %v4724_v17  ;;  %v4534_v26 = vrot.slane %v4532_v30, 7  ;;  %v4693_v1 = vsel %vm11434_vm9, %v13291_v24, %v4692_v36  ;;  %v4757_v6 = vsel %vm11475_vm5, %v4748_v52, %v4756_v39 }
 0x330   :  { %4846 = vst [vmem:[#allocation2 + $0xc4] sm:$0xc] %v4845_v0  ;;  %v4907_v10 = vld [vmem:[#allocation2 + $0xd4] sm:$0xc]  ;;  %4874 = vst [vmem:[#allocation2 + $0xec] sm:$0x1] %v4868_v41  ;;  %v4898_v13 = vsel %vm14022_vm6, %v4894_v46, %v4896_v45  ;;  %10480 = vmatpush3.bf16.msra.mxu0 %v13347_v19 }
 0x331   :  { %v4529_v42 = vld [vmem:[#allocation2 + $0x94] sm:$0xe]  ;;  %v4536_v56 = vld [vmem:[#allocation2 + $0x98] sm:$0xe]  ;;  %v3862_v3 = vld [vmem:[#allocation2 + $0x1c] sm:$0xc]  ;;  %v4527_v50 = vor.u32 %v4526_v12, %v4523_v49  ;;  %10481 = vmatprep.subr.bf16.mxu0 %v10859_v32 }
 0x332   :  { %v4367_v57 = vld [vmem:[#allocation3 + $0x20] sm:$0x7]  ;;  %v4905_v43 = vld [vmem:[#allocation3 + $0x2c] sm:$0xc]  ;;  %4066 = vst [vmem:[#allocation2 + $0x2c] sm:$0x8] %v4065_v21  ;;  %v4537_v24 = vsel %vm11635_vm14, %v4534_v26, %v4536_v56 }
 0x333   :  { %4438 = vst [vmem:[#allocation2 + $0x78] sm:$0x8] %v4430_v2  ;;  %4382 = vst [vmem:[#allocation2 + $0x8c] sm:$0x7] %v4381_v47  ;;  %v4759_v44 = vld [vmem:[#allocation2 + $0xd0] sm:$0x7]  ;;  %v4908_v45 = vsel %vm11508_vm15, %v4905_v43, %v4907_v10  ;;  %v4530_v34 = vsel %vm11635_vm14, %v4527_v50, %v4529_v42 }
 0x334   :  { %v4858_v18 = vrot.slane %v4857_v7, 4  ;;  %4904 = vst [vmem:[#allocation2 + $0xf4] sm:$0x1] %v4898_v13  ;;  %4694 = vst [vmem:[#allocation2 + $0xc0] sm:$0x7] %v4693_v1  ;;  %v3849_v60 = vrot.slane %v3848_v23, 4  ;;  %v4760_v8 = vsel %vm11434_vm9, %v4757_v6, %v4759_v44  ;;  %10482 = vmatpush3.bf16.msra.mxu0 %v10859_v32 }
 0x335   :  { %v4881_v40 = vld [vmem:[#allocation2 + $0xcc] sm:$0xc]  ;;  %4909 = vst [vmem:[#allocation2 + $0xd4] sm:$0xc] %v4908_v45  ;;  %v3859_v5 = vrot.slane %v3858_v16, 4  ;;  %v4369_v52 = vshrl.u32 %v4367_v57, 16  ;;  %10483 = vmatprep.subr.bf16.mxu0 %v10864_v38  ;;  %vm14026_vm14 = vmmov %vm14016_vm2 }
 0x336   :  { %4531 = vst [vmem:[#allocation2 + $0x94] sm:$0xe] %v4530_v34  ;;  %4538 = vst [vmem:[#allocation2 + $0x98] sm:$0xe] %v4537_v24  ;;  %v3854_v63 = vsel %vm11532_vm13, %v3849_v60, %v13220_v29  ;;  %v4372_v25 = vshll.u32 %v4367_v57, 16  ;;  %v4882_v19 = vsel %vm11508_vm15, %v4877_v54, %v4881_v40  ;;  %v4863_v29 = vsel %vm11532_vm13, %v4858_v18, %v13339_v55  ;;  %v10870_v54 = vld [vmem:[#allocation6 + $0x478] sm:$0xff]  }
 0x337   :  { %v3863_v23 = vsel %vm11508_vm15, %v3854_v63, %v3862_v3  ;;  %3865 = vst [vmem:[#allocation2 + $0x40] sm:$0x1] %v3859_v5  ;;  %v4371_v27 = vrot.slane %v4369_v52, 7  ;;  %v4871_v22 = vld [vmem:[#allocation2 + $0xc8] sm:$0xc]  ;;  %v4828_v7 = vshll.u32 %v13303_v9, 16 }
 0x338   :  { %3864 = vst [vmem:[#allocation2 + $0x1c] sm:$0xc] %v3863_v23  ;;  %4761 = vst [vmem:[#allocation2 + $0xd0] sm:$0x7] %v4760_v8  ;;  %v4872_v41 = vsel %vm11508_vm15, %v4863_v29, %v4871_v22  ;;  %v4376_v11 = vld [vmem:[#allocation2 + $0x88] sm:$0x7]  ;;  %10484 = vmatpush3.bf16.msra.mxu0 %v10864_v38 }
 0x339   :  { %4883 = vst [vmem:[#allocation2 + $0xcc] sm:$0xc] %v4882_v19  ;;  %v4374_v48 = vor.u32 %v4372_v25, %v4371_v27  ;;  %4873 = vst [vmem:[#allocation2 + $0xc8] sm:$0xc] %v4872_v41  ;;  %v4830_v17 = vor.u32 %v4828_v7, %v13326_v51  ;;  %v4941_v0 = vld [vmem:[#allocation2 + $0xd8] sm:$0x11]  ;;  %10485 = vmatprep.subr.bf16.mxu0 %v10870_v54 }
 0x33a   :  { %v4891_v36 = vshll.u32 %v13322_v31, 16  ;;  %v10840_v46 = vld [vmem:[#allocation2 + $0x90] ss:$36 sps:$4 sm:$0xff]   ;;  %v9312_v51 = vcombine.high %v4941_v0, %v4941_v0  ;;  %v4943_v53 = vld [vmem:[#allocation2 + $0xe8] sm:$0x11]  ;;  %v9311_v21 = vcombine.low %v4941_v0, %v4941_v0  ;;  %v10879_v44 = vld [vmem:[#allocation6 + $0x418] sm:$0xff]  }
 0x33b   :  { %v4377_v55 = vsel %vm13137_vm1, %v4374_v48, %v4376_v11  ;;  %v4838_v30 = vld [vmem:[#allocation2 + $0xc0] sm:$0xc]  ;;  %v9316_v42 = vcombine.high %v4943_v53, %v4943_v53  ;;  %v9315_v2 = vcombine.low %v4943_v53, %v4943_v53  ;;  %v10867_v56 = vld [vmem:[#allocation6 + $0x3c0] sm:$0xff]   ;;  %v10869_v57 = vld [vmem:[#allocation6 + $0x408] sm:$0xff]   ;;  %vm6170_vm9 = vcmask 1042433  }
 0x33c   :  { %4378 = vst [vmem:[#allocation2 + $0x88] sm:$0x7] %v4377_v55  ;;  %v4839_v49 = vsel %vm11508_vm15, %v4830_v17, %v4838_v30  ;;  %v4893_v12 = vor.u32 %v4891_v36, %v13356_v15  ;;  %v10852_v39 = vld [vmem:[#allocation2 + $0xa0] ss:$36 sps:$4 sm:$0xff]   ;;  %10486 = vmatpush3.bf16.msra.mxu0 %v10870_v54  ;;  %v10855_v15 = vld [vmem:[#allocation2 + $0xc] ss:$36 sps:$4 sm:$0xff]  }
 0x33d   :  { %v10838_v9 = vld [vmem:[#allocation2 + $0x94] ss:$36 sps:$4 sm:$0xff]   ;;  %4840 = vst [vmem:[#allocation2 + $0xc0] sm:$0xc] %v4839_v49  ;;  %v10868_v47 = vld [vmem:[#allocation2 + $0x20] ss:$36 sps:$4 sm:$0xff]  }
 0x33e   :  { %5749 = vmatprep.mubr.bf16.mxu1 %v10838_v9  ;;  %v10861_v3 = vld [vmem:[#allocation2 + $0x8] ss:$36 sps:$4 sm:$0xff]   ;;  %v10865_v43 = vld [vmem:[#allocation2 + $0x54] ss:$36 sps:$4 sm:$0xff]   ;;  %v10880_v18 = vld [vmem:[#allocation6 + $0x3d8] sm:$0xff]  }
 0x33f   :  { %5750 = vmatmul.mubr.bf16.gmra.mrb[64].mxu1 %v10840_v46  ;;  %v4901_v10 = vld [vmem:[#allocation2 + $0xd0] sm:$0xc]  ;;  %v10873_v13 = vld [vmem:[#allocation6 + $0x410] sm:$0xff]   ;;  %v10874_v50 = vld [vmem:[#allocation2 + $0x68] ss:$36 sps:$4 sm:$0xff]  }
 0x340   :  { %5757 = vmatprep.mubr.bf16.mxu1 %v9312_v51  ;;  %v10848_v16 = vld [vmem:[#allocation2 + $0xa4] ss:$36 sps:$4 sm:$0xff]   ;;  %v4902_v31 = vsel %vm11508_vm15, %v4893_v12, %v4901_v10  ;;  %v10878_v32 = vld [vmem:[#allocation2 + $0xb0] ss:$36 sps:$4 sm:$0xff]   ;;  %v10881_v24 = vld [vmem:[#allocation2 + $0x98] ss:$36 sps:$4 sm:$0xff]  }
 0x341   :  { %4903 = vst [vmem:[#allocation2 + $0xd0] sm:$0xc] %v4902_v31  ;;  %5877 = vmatprep.mubr.bf16.mxu0 %v10848_v16  ;;  %v10877_v26 = vld [vmem:[#allocation6 + $0x3d0] sm:$0xff]   ;;  %v10882_v45 = vld [vmem:[#allocation6 + $0x420] sm:$0xff]   ;;  %v10886_v5 = vld [vmem:[#allocation6 + $0x428] sm:$0xff]  }
 0x342   :  { %5878 = vmatmul.mubr.bf16.gmra.mrb[92].mxu0 %v10852_v39  ;;  %v10872_v1 = vld [vmem:[#allocation2 + $0x50] ss:$36 sps:$4 sm:$0xff]   ;;  %v10883_v60 = vld [vmem:[#allocation2 + $0xf8] ss:$0 sps:$4 sm:$0x11]   ;;  %v10885_v34 = vld [vmem:[#allocation6 + $0x3e0] sm:$0xff]  }
 0x343   :  { %5885 = vmatprep.mubr.bf16.mxu0 %v9316_v42  ;;  %v4942_v40 = vld [vmem:[#allocation2 + $0xe0] sm:$0x11]  ;;  %v10887_v63 = vld [vmem:[#allocation6 + $0x3e8] sm:$0xff]   ;;  %v10889_v25 = vld [vmem:[#allocation6 + $0x430] sm:$0xff]   ;;  %vm14023_vm1 = vsmask.f32 7942 }
 0x344   :  { %v10875_v6 = vld [vmem:[#allocation2 + $0x9c] ss:$36 sps:$4 sm:$0xff]   ;;  %v9314_v52 = vcombine.high %v4942_v40, %v4942_v40  ;;  %v10890_v38 = vld [vmem:[#allocation6 + $0x3f0] sm:$0xff]   ;;  %v9313_v23 = vcombine.low %v4942_v40, %v4942_v40  ;;  %v10896_v22 = vld [vmem:[#allocation2 + $0x64] ss:$36 sps:$4 sm:$0xff]  }
 0x345   :  { %v10893_v27 = vld [vmem:[#allocation6 + $0x438] sm:$0xff]   ;;  %v4944_v48 = vld [vmem:[#allocation2 + $0xf0] sm:$0x11]  ;;  %v10901_v11 = vld [vmem:[#allocation2 + $0xa8] ss:$36 sps:$4 sm:$0xff]  }
 0x346   :  { %v10891_v8 = vld [vmem:[#allocation2 + $0x1c] ss:$36 sps:$4 sm:$0xff]   ;;  %v9318_v17 = vcombine.high %v4944_v48, %v4944_v48  ;;  %v9317_v54 = vcombine.low %v4944_v48, %v4944_v48  ;;  %vm13542_vm15 = vmand %vm6170_vm9, %vm14023_vm1 }
 0x347   :  { %5758 = vmatmul.mubr.bf16.gmra.mrb[68].mxu1 %v9311_v21  ;;  %v10894_v19 = vld [vmem:[#allocation6 + $0x3f8] sm:$0xff]  }
 0x348   :  { %5797 = vmatprep.mubr.bf16.mxu1 %v10855_v15  ;;  %v10895_v29 = vld [vmem:[#allocation2 + $0x18] ss:$36 sps:$4 sm:$0xff]   ;;  %v10898_v7 = vld [vmem:[#allocation2 + $0x60] ss:$36 sps:$4 sm:$0xff]   ;;  %v10899_v41 = vld [vmem:[#allocation2 + $0xac] ss:$36 sps:$4 sm:$0xff]  }
 0x34a   :  { %5886 = vmatmul.mubr.bf16.gmra.mrb[96].mxu0 %v9315_v2 }
 0x34b   :  { %10487 = vmatprep.mubr.bf16.mxu0 %v10868_v47 }
 0x34f   :  { %5798 = vmatmul.mubr.bf16.vlgmr.msra.gmra.mrb[72].mxu1 %v10861_v3 }
 0x350   :  { %5805 = vmatprep.mubr.bf16.mxu1 %v10865_v43  ;;  %10121 = vmatpush3.bf16.msra.mxu1 %v10867_v56 }
 0x351   :  { %10122 = vmatprep.subr.bf16.mxu1 %v10869_v57 }
 0x352   :  { %10488 = vmatmul.mubr.bf16.vlgmr.msra.gmra.mrb[100].mxu0 %v10874_v50  ;;  %v10905_v50 = vld [vmem:[#allocation6 + $0x4c0] sm:$0xff]  }
 0x353   :  { %10491 = vmatprep.mubr.bf16.mxu0 %v10878_v32  ;;  %v10906_v32 = vld [vmem:[#allocation6 + $0x500] sm:$0xff]  }
 0x354   :  { %10123 = vmatpush3.bf16.msra.mxu1 %v10871_v37 }
 0x355   :  { %10124 = vmatprep.subr.bf16.mxu1 %v10873_v13  ;;  %v10904_v13 = vld [vmem:[#allocation6 + $0x540] sm:$0xff]  }
 0x356   :  { %10200 = vmatprep.subr.bf16.mxu0 %v10904_v13 }
 0x357   :  { %5806 = vmatmul.mubr.bf16.gmra.mrb[76].mxu1 %v10872_v1  ;;  %10201 = vmatpush3.bf16.msra.mxu0 %v10906_v32  ;;  %v10928_v32 = vld [vmem:[#allocation6 + $0x570] sm:$0xff]  }
 0x358   :  { %5813 = vmatprep.mubr.bf16.mxu1 %v10875_v6  ;;  %10125 = vmatpush3.bf16.msra.mxu1 %v10877_v26  ;;  %v10907_v26 = vld [vmem:[#allocation6 + $0x480] sm:$0xff]  }
 0x359   :  { %10126 = vmatprep.subr.bf16.mxu1 %v10879_v44  ;;  %v10908_v44 = vld [vmem:[#allocation6 + $0x548] sm:$0xff]  }
 0x35a   :  { %10492 = vmatmul.mubr.bf16.gmra.mrb[104].mxu0 %v10883_v60  ;;  %10202 = vmatprep.subr.bf16.mxu0 %v10908_v44 }
 0x35c   :  { %10127 = vmatpush3.bf16.msra.mxu1 %v10880_v18  ;;  %v10909_v18 = vld [vmem:[#allocation6 + $0x4c8] sm:$0xff]  }
 0x35d   :  { %10128 = vmatprep.subr.bf16.mxu1 %v10882_v45  ;;  %v10910_v45 = vld [vmem:[#allocation6 + $0x508] sm:$0xff]  }
 0x35e   :  { %10203 = vmatpush3.bf16.msra.mxu0 %v10910_v45 }
 0x35f   :  { %5814 = vmatmul.mubr.bf16.gmra.mrb[80].mxu1 %v10881_v24 }
 0x360   :  { %5821 = vmatprep.mubr.bf16.mxu1 %v9314_v52  ;;  %10129 = vmatpush3.bf16.msra.mxu1 %v10885_v34  ;;  %v10911_v34 = vld [vmem:[#allocation6 + $0x488] sm:$0xff]  }
 0x361   :  { %10130 = vmatprep.subr.bf16.mxu1 %v10886_v5 }
 0x364   :  { %10131 = vmatpush3.bf16.msra.mxu1 %v10887_v63  ;;  %v10912_v63 = vld [vmem:[#allocation6 + $0x550] sm:$0xff]  }
 0x365   :  { %10132 = vmatprep.subr.bf16.mxu1 %v10889_v25  ;;  %10204 = vmatprep.subr.bf16.mxu0 %v10912_v63 }
 0x367   :  { %5822 = vmatmul.mubr.bf16.gmra.mrb[84].mxu1 %v9313_v23  ;;  %v10914_v23 = vld [vmem:[#allocation6 + $0x510] sm:$0xff]  }
 0x368   :  { %10133 = vmatpush3.bf16.msra.mxu1 %v10890_v38  ;;  %5925 = vmatprep.mubr.bf16.mxu1 %v10891_v8  ;;  %v10913_v38 = vld [vmem:[#allocation6 + $0x4d0] sm:$0xff]  }
 0x369   :  { %10134 = vmatprep.subr.bf16.mxu1 %v10893_v27  ;;  %10205 = vmatpush3.bf16.msra.mxu0 %v10914_v23 }
 0x36c   :  { %10135 = vmatpush3.bf16.msra.mxu1 %v10894_v19  ;;  %v10915_v19 = vld [vmem:[#allocation6 + $0x490] sm:$0xff]  }
 0x36d   :  { %10172 = vmatprep.subr.bf16.mxu1 %v10905_v50  ;;  %v10927_v50 = vld [vmem:[#allocation6 + $0x4a8] sm:$0xff]  }
 0x36f   :  { %5926 = vmatmul.mubr.bf16.vlgmr.msra.gmra.mrb[88].mxu1 %v10895_v29 }
 0x370   :  { %5933 = vmatprep.mubr.bf16.mxu1 %v10896_v22  ;;  %10173 = vmatpush3.bf16.msra.mxu1 %v10907_v26 }
 0x371   :  { %10174 = vmatprep.subr.bf16.mxu1 %v10909_v18 }
 0x374   :  { %10175 = vmatpush3.bf16.msra.mxu1 %v10911_v34 }
 0x375   :  { %10176 = vmatprep.subr.bf16.mxu1 %v10913_v38  ;;  %v10932_v38 = vld [vmem:[#allocation6 + $0x578] sm:$0xff]  }
 0x377   :  { %5934 = vmatmul.mubr.bf16.gmra.mrb[92].mxu1 %v10898_v7 }
 0x378   :  { %5941 = vmatprep.mubr.bf16.mxu1 %v10899_v41  ;;  %10177 = vmatpush3.bf16.msra.mxu1 %v10915_v19  ;;  %v10916_v41 = vld [vmem:[#allocation6 + $0x558] sm:$0xff]  }
 0x379   :  { %10206 = vmatprep.subr.bf16.mxu0 %v10916_v41 }
 0x37f   :  { %5942 = vmatmul.mubr.bf16.gmra.mrb[96].mxu1 %v10901_v11  ;;  %v10917_v11 = vld [vmem:[#allocation6 + $0x4d8] sm:$0xff]  }
 0x380   :  { %5949 = vmatprep.mubr.bf16.mxu1 %v9318_v17  ;;  %v10918_v17 = vld [vmem:[#allocation6 + $0x518] sm:$0xff]   ;;  %10178 = vmatprep.subr.bf16.mxu1 %v10917_v11 }
 0x381   :  { %10207 = vmatpush3.bf16.msra.mxu0 %v10918_v17  ;;  %v10935_v11 = vld [vmem:[#allocation6 + $0x4b8] sm:$0xff]   ;;  %v10939_v17 = vld [vmem:[#allocation6 + $0x640] sm:$0xff]  }
 0x387   :  { %5950 = vmatmul.mubr.bf16.gmra.mrb[100].mxu1 %v9317_v54 }
 0x3b1   :  { %v10016_v55 = vpop.f32.mrb[56].mxu1 }
 0x3b2   :  { %v10017_v0 = vpop.f32.mrb[57].mxu1 }
 0x3b3   :  { %v13426_v30 = vadd.f32 %v10017_v0, %v10016_v55  ;;  %v10019_v36 = vpop.f32.mrb[58].mxu1  ;;  %v10919_v0 = vld [vmem:[#allocation6 + $0x498] sm:$0xff]  }
 0x3b4   :  { %v10020_v9 = vpop.f32.mrb[59].mxu1  ;;  %10179 = vmatpush3.bf16.msra.mxu1 %v10919_v0  ;;  %v10943_v0 = vld [vmem:[#allocation6 + $0x5c0] sm:$0xff]  }
 0x3b5   :  { %v13428_v46 = vadd.f32 %v10020_v9, %v10019_v36 }
 0x3c0   :  { %v10022_v49 = vpop.f32.mrb[60].mxu1 }
 0x3c1   :  { %v10023_v12 = vpop.f32.mrb[61].mxu1 }
 0x3c2   :  { %v13430_v51 = vadd.f32 %v10023_v12, %v10022_v49  ;;  %v10025_v53 = vpop.f32.mrb[62].mxu1  ;;  %v10920_v49 = vld [vmem:[#allocation6 + $0x560] sm:$0xff]  }
 0x3c3   :  { %v10026_v10 = vpop.f32.mrb[63].mxu1  ;;  %v10921_v12 = vld [vmem:[#allocation6 + $0x4e0] sm:$0xff]   ;;  %10208 = vmatprep.subr.bf16.mxu0 %v10920_v49 }
 0x3c4   :  { %v13432_v16 = vadd.f32 %v10026_v10, %v10025_v53  ;;  %v10922_v53 = vld [vmem:[#allocation6 + $0x520] sm:$0xff]   ;;  %10180 = vmatprep.subr.bf16.mxu1 %v10921_v12 }
 0x3c5   :  { %10209 = vmatpush3.bf16.msra.mxu0 %v10922_v53 }
 0x3f1   :  { %v10096_v39 = vpop.f32.mrb[84].mxu0 }
 0x3f2   :  { %v10097_v31 = vpop.f32.mrb[85].mxu0 }
 0x3f3   :  { %v13434_v42 = vadd.f32 %v10097_v31, %v10096_v39  ;;  %v10099_v21 = vpop.f32.mrb[86].mxu0  ;;  %v10923_v39 = vld [vmem:[#allocation6 + $0x4a0] sm:$0xff]   ;;  %v10924_v31 = vld [vmem:[#allocation6 + $0x568] sm:$0xff]  }
 0x3f4   :  { %v10100_v15 = vpop.f32.mrb[87].mxu0  ;;  %10181 = vmatpush3.bf16.msra.mxu1 %v10923_v39  ;;  %10210 = vmatprep.subr.bf16.mxu0 %v10924_v31 }
 0x3f5   :  { %v13436_v2 = vadd.f32 %v10100_v15, %v10099_v21  ;;  %v10925_v21 = vld [vmem:[#allocation6 + $0x4e8] sm:$0xff]  }
 0x3f6   :  { %10182 = vmatprep.subr.bf16.mxu1 %v10925_v21 }
 0x3f8   :  { %10183 = vmatpush3.bf16.msra.mxu1 %v10927_v50 }
 0x3f9   :  { %v10102_v47 = vpop.f32.mrb[88].mxu0 }
 0x3fa   :  { %v10103_v56 = vpop.f32.mrb[89].mxu0 }
 0x3fb   :  { %v13438_v3 = vadd.f32 %v10103_v56, %v10102_v47  ;;  %v10105_v57 = vpop.f32.mrb[90].mxu0  ;;  %v13454_v56 = vld [vmem:[#allocation8 + $0x1] ss:$0 sm:$0xff] }
 0x3fc   :  { %v10106_v43 = vpop.f32.mrb[91].mxu0  ;;  %v5736_v44 = vadd.f32 %v13426_v30, %v13454_v56  ;;  %v5739_v34 = vadd.f32 %v13428_v46, %v13454_v56  ;;  %v10933_v30 = vld [vmem:[#allocation6 + $0x4f8] sm:$0xff]  }
 0x3fd   :  { %v13440_v37 = vadd.f32 %v10106_v43, %v10105_v57  ;;  %v10926_v43 = vld [vmem:[#allocation6 + $0x528] sm:$0xff]   ;;  %v10934_v46 = vld [vmem:[#allocation6 + $0x538] sm:$0xff]  }
 0x3fe   :  { %10211 = vmatpush3.bf16.msra.mxu0 %v10926_v43 }
 0x3ff   :  { %10212 = vmatprep.subr.bf16.mxu0 %v10928_v32 }
 0x412   :  { %v10028_v1 = vpop.f32.mrb[64].mxu1 }
 0x413   :  { %v10029_v6 = vpop.f32.mrb[65].mxu1 }
 0x414   :  { %v13442_v60 = vadd.f32 %v10029_v6, %v10028_v1  ;;  %v10031_v40 = vpop.f32.mrb[66].mxu1  ;;  %v10929_v1 = vld [vmem:[#allocation6 + $0x4f0] sm:$0xff]  }
 0x415   :  { %v10032_v24 = vpop.f32.mrb[67].mxu1  ;;  %v10108_v52 = vpop.f32.mrb[92].mxu0  ;;  %10184 = vmatprep.subr.bf16.mxu1 %v10929_v1 }
 0x416   :  { %v13444_v5 = vadd.f32 %v10032_v24, %v10031_v40  ;;  %v10109_v25 = vpop.f32.mrb[93].mxu0  ;;  %v10930_v40 = vld [vmem:[#allocation6 + $0x530] sm:$0xff]  }
 0x417   :  { %v13446_v27 = vadd.f32 %v10109_v25, %v10108_v52  ;;  %v10111_v8 = vpop.f32.mrb[94].mxu0  ;;  %v10931_v25 = vld [vmem:[#allocation6 + $0x4b0] sm:$0xff]   ;;  %10213 = vmatpush3.bf16.msra.mxu0 %v10930_v40 }
 0x418   :  { %v10112_v29 = vpop.f32.mrb[95].mxu0  ;;  %10185 = vmatpush3.bf16.msra.mxu1 %v10931_v25  ;;  %10214 = vmatprep.subr.bf16.mxu0 %v10932_v38  ;;  %v5755_v1 = vadd.f32 %v13444_v5, %v13454_v56 }
 0x419   :  { %v13448_v7 = vadd.f32 %v10112_v29, %v10111_v8  ;;  %10186 = vmatprep.subr.bf16.mxu1 %v10933_v30 }
 0x41a   :  { %v10034_v22 = vpop.f32.mrb[68].mxu1 }
 0x41b   :  { %v10035_v48 = vpop.f32.mrb[69].mxu1  ;;  %10215 = vmatpush3.bf16.msra.mxu0 %v10934_v46 }
 0x41c   :  { %v13450_v54 = vadd.f32 %v10035_v48, %v10034_v22  ;;  %v10037_v55 = vpop.f32.mrb[70].mxu1  ;;  %10187 = vmatpush3.bf16.msra.mxu1 %v10935_v11  ;;  %10256 = vmatprep.subr.bf16.mxu0 %v10939_v17 }
 0x41d   :  { %v10038_v36 = vpop.f32.mrb[71].mxu1  ;;  %v10114_v9 = vpop.f32.mrb[96].mxu0  ;;  %10228 = vmatprep.subr.bf16.mxu1 %v10943_v0 }
 0x41e   :  { %v10115_v10 = vpop.f32.mrb[97].mxu0  ;;  %v5744_v36 = vadd.f32 %v13430_v51, %v13454_v56 }
 0x41f   :  { %v13452_v15 = vadd.f32 %v10115_v10, %v10114_v9  ;;  %v10117_v47 = vpop.f32.mrb[98].mxu0 }
 0x420   :  { %v10118_v57 = vpop.f32.mrb[99].mxu0 }
 0x422   :  { %v10056_v13 = vpop.f32.mrb[72].mxu1 }
 0x423   :  { %v10057_v26 = vpop.f32.mrb[73].mxu1 }
 0x424   :  { %v10058_v6 = vadd.f32 %v10057_v26, %v10056_v13  ;;  %v10059_v18 = vpop.f32.mrb[74].mxu1 }
 0x425   :  { %v10060_v45 = vpop.f32.mrb[75].mxu1  ;;  %v13460_v63 = vpop.f32.mrb[100].mxu0 }
 0x426   :  { %v5800_v24 = vadd.f32 %v10058_v6, %v5736_v44  ;;  %v10061_v52 = vadd.f32 %v10060_v45, %v10059_v18  ;;  %v13462_v23 = vpop.f32.mrb[101].mxu0 }
 0x427   :  { %v13464_v19 = vpop.f32.mrb[102].mxu0 }
 0x428   :  { %v5803_v8 = vadd.f32 %v10061_v52, %v5739_v34  ;;  %v5864_v29 = vadd.f32 %v13434_v42, %v5800_v24  ;;  %v5994_v22 = vpop.f32.mrb[103].mxu0  ;;  %v5747_v42 = vadd.f32 %v13432_v16, %v13454_v56  ;;  %v5752_v16 = vadd.f32 %v13442_v60, %v13454_v56 }
 0x42a   :  { %v10062_v41 = vpop.f32.mrb[76].mxu1  ;;  %v5867_v48 = vadd.f32 %v13436_v2, %v5803_v8 }
 0x42b   :  { %v10063_v55 = vpop.f32.mrb[77].mxu1 }
 0x42c   :  { %v10064_v9 = vadd.f32 %v10063_v55, %v10062_v41  ;;  %v10065_v49 = vpop.f32.mrb[78].mxu1 }
 0x42d   :  { %v10066_v12 = vpop.f32.mrb[79].mxu1  ;;  %v13472_v2 = vpop.f32.mrb[104].mxu0 }
 0x42e   :  { %v5808_v53 = vadd.f32 %v10064_v9, %v5744_v36  ;;  %v10067_v10 = vadd.f32 %v10066_v12, %v10065_v49  ;;  %v13474_v39 = vpop.f32.mrb[105].mxu0 }
 0x42f   :  { %v10494_v21 = vpop.f32.mrb[106].mxu0 }
 0x430   :  { %v5811_v31 = vadd.f32 %v10067_v10, %v5747_v42  ;;  %v5872_v51 = vadd.f32 %v13438_v3, %v5808_v53  ;;  %v13477_v47 = vpop.f32.mrb[107].mxu0 }
 0x432   :  { %v10068_v57 = vpop.f32.mrb[80].mxu1  ;;  %v5875_v43 = vadd.f32 %v13440_v37, %v5811_v31  ;;  %v5760_v37 = vadd.f32 %v13450_v54, %v13454_v56 }
 0x433   :  { %v10069_v13 = vpop.f32.mrb[81].mxu1 }
 0x434   :  { %v10070_v50 = vadd.f32 %v10069_v13, %v10068_v57  ;;  %v10071_v32 = vpop.f32.mrb[82].mxu1 }
 0x435   :  { %v10072_v26 = vpop.f32.mrb[83].mxu1 }
 0x436   :  { %v5816_v44 = vadd.f32 %v10070_v50, %v5752_v16  ;;  %v10073_v6 = vadd.f32 %v10072_v26, %v10071_v32  ;;  %v6065_v50 = vld [vmem:[#allocation2] sm:$0x3] }
 0x438   :  { %v5819_v18 = vadd.f32 %v10073_v6, %v5755_v1  ;;  %v5880_v3 = vadd.f32 %v13446_v27, %v5816_v44 }
 0x43a   :  { %v10074_v45 = vpop.f32.mrb[84].mxu1  ;;  %v5883_v40 = vadd.f32 %v13448_v7, %v5819_v18  ;;  %v6087_v18 = vld [vmem:[#allocation2 + $0x8] sm:$0x3] }
 0x43b   :  { %v10075_v34 = vpop.f32.mrb[85].mxu1 }
 0x43c   :  { %v10076_v24 = vadd.f32 %v10075_v34, %v10074_v45  ;;  %v10077_v60 = vpop.f32.mrb[86].mxu1 }
 0x43d   :  { %v10078_v52 = vpop.f32.mrb[87].mxu1 }
 0x43e   :  { %v5824_v25 = vadd.f32 %v10076_v24, %v5760_v37 }
 0x440   :  { %v13489_v38 = vadd.f32 %v13452_v15, %v5824_v25 }
 0x442   :  { %v10136_v5 = vpop.f32.mrb[88].mxu1 }
 0x443   :  { %v10137_v30 = vpop.f32.mrb[89].mxu1 }
 0x444   :  { %v10138_v8 = vadd.f32 %v10137_v30, %v10136_v5  ;;  %v10139_v46 = vpop.f32.mrb[90].mxu1 }
 0x445   :  { %v10140_v41 = vpop.f32.mrb[91].mxu1 }
 0x446   :  { %v5928_v27 = vadd.f32 %v10138_v8, %v5864_v29  ;;  %v10141_v11 = vadd.f32 %v10140_v41, %v10139_v46 }
 0x448   :  { %v5992_v7 = vadd.f32 %v13462_v23, %v5928_v27  ;;  %v5931_v17 = vadd.f32 %v10141_v11, %v5867_v48 }
 0x44a   :  { %v5995_v55 = vadd.f32 %v5994_v22, %v5931_v17  ;;  %v10142_v0 = vpop.f32.mrb[92].mxu1  ;;  %v6021_v56 = vmax.f32 %v5992_v7, 0.0 }
 0x44b   :  { %v10143_v54 = vpop.f32.mrb[93].mxu1 }
 0x44c   :  { %v6022_v36 = vmax.f32 %v5995_v55, 0.0  ;;  %v10144_v9 = vadd.f32 %v10143_v54, %v10142_v0  ;;  %v10145_v49 = vpop.f32.mrb[94].mxu1  ;;  %v6113_v55 = vld [vmem:[#allocation2 + $0x10] sm:$0x3] }
 0x44d   :  { %v10146_v12 = vpop.f32.mrb[95].mxu1 }
 0x44e   :  { %v9729_v15 = vpack.c.bf16 %v6022_v36, %v6021_v56  ;;  %v5936_v42 = vadd.f32 %v10144_v9, %v5872_v51  ;;  %v10147_v53 = vadd.f32 %v10146_v12, %v10145_v49  ;;  %v6079_v49 = vld [vmem:[#allocation2 + $0x4] sm:$0x3] }
 0x450   :  { %9730 = vst [vmem:[#allocation4] sm:$0xff] %v9729_v15   ;;  %v6000_v10 = vadd.f32 %v13460_v63, %v5936_v42  ;;  %v5939_v31 = vadd.f32 %v10147_v53, %v5875_v43 }
 0x452   :  { %v6003_v29 = vadd.f32 %v13464_v19, %v5939_v31  ;;  %v10148_v21 = vpop.f32.mrb[96].mxu1  ;;  %v6023_v48 = vmax.f32 %v6000_v10, 0.0  ;;  %v6140_v10 = vld [vmem:[#allocation2 + $0x18] sm:$0x3] }
 0x453   :  { %v10149_v23 = vpop.f32.mrb[97].mxu1 }
 0x454   :  { %v6024_v22 = vmax.f32 %v6003_v29, 0.0  ;;  %v10150_v57 = vadd.f32 %v10149_v23, %v10148_v21  ;;  %v10151_v13 = vpop.f32.mrb[98].mxu1  ;;  %v6101_v21 = vld [vmem:[#allocation2 + $0xc] sm:$0x3] }
 0x455   :  { %v10152_v16 = vpop.f32.mrb[99].mxu1 }
 0x456   :  { %v9734_v32 = vpack.c.bf16 %v6024_v22, %v6023_v48  ;;  %v5944_v26 = vadd.f32 %v10150_v57, %v5880_v3  ;;  %v10153_v1 = vadd.f32 %v10152_v16, %v10151_v13  ;;  %v6162_v57 = vld [vmem:[#allocation2 + $0x20] sm:$0x3] }
 0x457   :  { %v6064_v44 = vld [vmem:[#allocation4] sm:$0x3]  ;;  %v6090_v34 = vld [vmem:[#allocation4] sm:$0xc]  ;;  %v6105_v52 = vld [vmem:[#allocation4 + $0x4] sm:$0x1] }
 0x458   :  { %v6068_v51 = vld [vmem:[#allocation4] sm:$0x3]  ;;  %v6066_v63 = vsel %vm14004_vm0, %v6064_v44, %v6065_v50  ;;  %9751 = vst [vmem:[#allocation4 + $0x8] sm:$0xff] %v9734_v32   ;;  %v6092_v37 = vshrl.u32 %v6090_v34, 16  ;;  %v6095_v24 = vshll.u32 %v6090_v34, 16  ;;  %v13497_v3 = vadd.f32 %v13474_v39, %v5944_v26 }
 0x459   :  { %v6082_v6 = vld [vmem:[#allocation4] sm:$0x6]  ;;  %v6070_v43 = vshrl.u32 %v6068_v51, 16  ;;  %v6073_v19 = vshll.u32 %v6068_v51, 16  ;;  %v6104_v60 = vld [vmem:[#allocation4] sm:$0x8]  ;;  %v5947_v25 = vadd.f32 %v10153_v1, %v5883_v40 }
 0x45a   :  { %v9399_v45 = vrot.slane %v6082_v6, 9  ;;  %6067 = vst [vmem:[#allocation2] sm:$0x3] %v6066_v63  ;;  %v9400_v46 = vrot.slane %v6104_v60, 11  ;;  %v6116_v41 = vld [vmem:[#allocation4] sm:$0x8] }
 0x45b   :  { %v6072_v5 = vrot.slane %v6070_v43, 4  ;;  %v6075_v30 = vrot.slane %v6073_v19, 5  ;;  %v13501_v27 = vpop.f32.mrb[100].mxu1  ;;  %v6094_v11 = vrot.slane %v6092_v37, 6  ;;  %v6097_v7 = vrot.slane %v6095_v24, 7 }
 0x45c   :  { %v6088_v8 = vsel %vm14004_vm0, %v9399_v45, %v6087_v18  ;;  %v6110_v17 = vrot.slane %v6105_v52, 7  ;;  %v6117_v0 = vld [vmem:[#allocation4 + $0x4] sm:$0x1]  ;;  %v6119_v56 = vshrl.u32 %v6116_v41, 16  ;;  %v6135_v36 = vld [vmem:[#allocation4 + $0x4] sm:$0x6]  ;;  %v13504_v9 = vadd.f32 %v13477_v47, %v5947_v25 }
 0x45d   :  { %6089 = vst [vmem:[#allocation2 + $0x8] sm:$0x3] %v6088_v8  ;;  %v6076_v54 = vor.u32 %v6075_v30, %v6072_v5  ;;  %v6124_v39 = vshrl.u32 %v6117_v0, 16  ;;  %v6143_v40 = vld [vmem:[#allocation4 + $0x4] sm:$0x6]  ;;  %v6098_v12 = vor.u32 %v6097_v7, %v6094_v11  ;;  %v6127_v42 = vshll.u32 %v6117_v0, 16 }
 0x45e   :  { %v6111_v15 = vsel %vm11484_vm3, %v9400_v46, %v6110_v17  ;;  %v9402_v53 = vrot.slane %v6135_v36, 9  ;;  %v6157_v31 = vld [vmem:[#allocation4 + $0x4] sm:$0xc]  ;;  %v6145_v22 = vshrl.u32 %v6143_v40, 16  ;;  %v6175_v13 = vld [vmem:[#allocation4] sm:$0x8] }
 0x45f   :  { %v6077_v29 = vrot.slane %v6076_v54, 4  ;;  %v6114_v23 = vsel %vm14004_vm0, %v6111_v15, %v6113_v55  ;;  %v6126_v48 = vrot.slane %v6124_v39, 7  ;;  %v13510_v47 = vpop.f32.mrb[101].mxu1  ;;  %v6099_v16 = vrot.slane %v6098_v12, 4  ;;  %v6176_v1 = vld [vmem:[#allocation4 + $0x4] sm:$0x1] }
 0x460   :  { %6115 = vst [vmem:[#allocation2 + $0x10] sm:$0x3] %v6114_v23  ;;  %v6141_v50 = vsel %vm14004_vm0, %v9402_v53, %v6140_v10  ;;  %v6148_v32 = vshll.u32 %v6143_v40, 16  ;;  %v9403_v26 = vrot.slane %v6157_v31, 10  ;;  %v10157_v44 = vpop.f32.mrb[102].mxu1  ;;  %v9401_v6 = vrot.slane %v6119_v56, 11 }
 0x461   :  { %v6080_v51 = vsel %vm14004_vm0, %v6077_v29, %v6079_v49  ;;  %v6129_v18 = vor.u32 %v6127_v42, %v6126_v48  ;;  %v6132_v63 = vld [vmem:[#allocation2 + $0x14] sm:$0x3]  ;;  %v6147_v43 = vrot.slane %v6145_v22, 5  ;;  %v13516_v19 = vld [vmem:[#allocation4] sm:$0xc]  ;;  %v6102_v34 = vsel %vm14004_vm0, %v6099_v16, %v6101_v21  ;;  %v10158_v41 = vpop.f32.mrb[103].mxu1 }
 0x462   :  { %v13518_v45 = vld [vmem:[#allocation4] sm:$0x8]  ;;  %6142 = vst [vmem:[#allocation2 + $0x18] sm:$0x3] %v6141_v50  ;;  %v6150_v37 = vrot.slane %v6148_v32, 6  ;;  %v6163_v24 = vsel %vm14004_vm0, %v9403_v26, %v6162_v57  ;;  %v6178_v60 = vshrl.u32 %v6175_v13, 16  ;;  %v10156_v35 = vadd.f32 %v13510_v47, %v13501_v27 }
 0x463   :  { %v13524_v52 = vld [vmem:[#allocation4 + $0x4] sm:$0x1]  ;;  %v13526_v25 = vld [vmem:[#allocation4 + $0x4] sm:$0x6]  ;;  %6081 = vst [vmem:[#allocation2 + $0x4] sm:$0x3] %v6080_v51  ;;  %v6130_v5 = vsel %vm14022_vm6, %v9401_v6, %v6129_v18 }
 0x464   :  { %v6181_v30 = vshll.u32 %v6175_v13, 16  ;;  %v6187_v8 = vshll.u32 %v6176_v1, 16  ;;  %v6223_v46 = vld [vmem:[#allocation4 + $0x4] sm:$0xc]  ;;  %6103 = vst [vmem:[#allocation2 + $0xc] sm:$0x3] %v6102_v34  ;;  %v6133_v11 = vsel %vm14004_vm0, %v6130_v5, %v6132_v63  ;;  %v6151_v7 = vor.u32 %v6150_v37, %v6147_v43 }
 0x465   :  { %6164 = vst [vmem:[#allocation2 + $0x20] sm:$0x3] %v6163_v24  ;;  %v6180_v17 = vrot.slane %v6178_v60, 5  ;;  %v6269_v55 = vld [vmem:[#allocation4 + $0x4] sm:$0x6]  ;;  %v9404_v54 = vrot.slane %v13516_v19, 9 }
 0x466   :  { %v6154_v0 = vld [vmem:[#allocation2 + $0x1c] sm:$0x3]  ;;  %v6183_v56 = vrot.slane %v6181_v30, 6  ;;  %v9405_v39 = vrot.slane %v13518_v45, 10  ;;  %v6209_v36 = vshrl.u32 %v13526_v25, 16  ;;  %v6152_v12 = vrot.slane %v6151_v7, 4 }
 0x467   :  { %v6219_v40 = vld [vmem:[#allocation4 + $0x4] sm:$0x6]  ;;  %v13535_v49 = vld [vmem:[#allocation4 + $0x4] sm:$0x8]  ;;  %6134 = vst [vmem:[#allocation2 + $0x14] sm:$0x3] %v6133_v11 }
 0x468   :  { %v13537_v15 = vrot.slane %v6187_v8, 6  ;;  %v6201_v42 = vrot.slane %v13524_v52, 6  ;;  %v6225_v53 = vshrl.u32 %v6223_v46, 16  ;;  %v6279_v10 = vld [vmem:[#allocation4 + $0x4] sm:$0x6]  ;;  %v6184_v29 = vor.u32 %v6183_v56, %v6180_v17 }
 0x469   :  { %v6220_v21 = vld [vmem:[#allocation2 + $0x10] sm:$0x6]  ;;  %v6228_v23 = vshll.u32 %v6223_v46, 16  ;;  %v6271_v48 = vrot.slane %v6269_v55, 6  ;;  %v6295_v22 = vld [vmem:[#allocation4 + $0x4] sm:$0xc]  ;;  %v6155_v57 = vsel %vm14004_vm0, %v6152_v12, %v6154_v0 }
 0x46a   :  { %v6211_v13 = vrot.slane %v6209_v36, 7  ;;  %v6212_v16 = vshll.u32 %v13526_v25, 16  ;;  %v6221_v50 = vsel %vm13542_vm15, %v6219_v40, %v6220_v21  ;;  %v6276_v32 = vld [vmem:[#allocation2 + $0x24] sm:$0x1]  ;;  %v6281_v1 = vshrl.u32 %v6279_v10, 16 }
 0x46b   :  { %v6272_v26 = vrot.slane %v6271_v48, 4  ;;  %v13551_v44 = vld [vmem:[#allocation4 + $0x4] sm:$0x8]  ;;  %6156 = vst [vmem:[#allocation2 + $0x1c] sm:$0x3] %v6155_v57  ;;  %v13555_v6 = vrot.slane %v6225_v53, 4  ;;  %v13570_v11 = vsel %vm11413_vm8, %v9405_v39, %v6201_v42 }
 0x46c   :  { %6222 = vst [vmem:[#allocation2 + $0x10] sm:$0x6] %v6221_v50  ;;  %6275 = vst [vmem:[#allocation2] sm:$0x8] %v6271_v48  ;;  %v13553_v51 = vld [vmem:[#allocation4 + $0x8] sm:$0x3]  ;;  %v13572_v7 = vor.u32 %v6212_v16, %v6211_v13 }
 0x46d   :  { %v9406_v59 = vrot.slane %v13535_v49, 10  ;;  %v6284_v18 = vshll.u32 %v6279_v10, 16  ;;  %v6297_v63 = vrot.slane %v6295_v22, 7  ;;  %v13558_v43 = vld [vmem:[#allocation4 + $0x8] sm:$0x1]  ;;  %v13560_v45 = vrot.slane %v6184_v29, 4 }
 0x46e   :  { %v13562_v34 = vrot.slane %v6228_v23, 5  ;;  %v6277_v37 = vsel %vm11647_vm4, %v6272_v26, %v6276_v32  ;;  %v6283_v24 = vrot.slane %v6281_v1, 6  ;;  %v6302_v60 = vld [vmem:[#allocation2 + $0x2c] sm:$0x1]  ;;  %v6306_v52 = vld [vmem:[#allocation4 + $0x8] sm:$0x1] }
 0x46f   :  { %6278 = vst [vmem:[#allocation2 + $0x24] sm:$0x1] %v6277_v37  ;;  %v6286_v25 = vrot.slane %v6284_v18, 7  ;;  %v6292_v5 = vld [vmem:[#allocation2 + $0x28] sm:$0x1]  ;;  %v6298_v30 = vrot.slane %v6297_v63, 4 }
 0x470   :  { %v6308_v8 = vshrl.u32 %v13551_v44, 16  ;;  %6301 = vst [vmem:[#allocation2 + $0x8] sm:$0x8] %v6297_v63  ;;  %v6251_v46 = vshrl.u32 %v13553_v51, 16  ;;  %v6327_v41 = vld [vmem:[#allocation4 + $0x8] sm:$0x3]  ;;  %v6231_v1 = vor.u32 %v13562_v34, %v13555_v6 }
 0x471   :  { %v6288_v17 = vrot.slane %v6283_v24, 4  ;;  %v6243_v55 = vrot.slane %v13558_v43, 6  ;;  %v6337_v0 = vld [vmem:[#allocation4 + $0x8] sm:$0x3]  ;;  %v6353_v56 = vld [vmem:[#allocation4 + $0x8] sm:$0xc]  ;;  %v6287_v36 = vor.u32 %v6286_v25, %v6283_v24  ;;  %v6303_v40 = vsel %vm11647_vm4, %v6298_v30, %v6302_v60 }
 0x472   :  { %v6254_v12 = vshll.u32 %v13553_v51, 16  ;;  %v6313_v53 = vshll.u32 %v6306_v52, 16  ;;  %v6363_v10 = vld [vmem:[#allocation4 + $0x8] sm:$0xc]  ;;  %6304 = vst [vmem:[#allocation2 + $0x2c] sm:$0x1] %v6303_v40 }
 0x473   :  { %v6378_v29 = vld [vmem:[#allocation4 + $0x8] sm:$0x8]  ;;  %v6293_v39 = vsel %vm11647_vm4, %v6288_v17, %v6292_v5  ;;  %v13580_v42 = vrot.slane %v6251_v46, 6  ;;  %v6317_v21 = vshrl.u32 %v6306_v52, 16  ;;  %v6324_v23 = vld [vmem:[#allocation2 + $0x30] sm:$0x1] }
 0x474   :  { %v6329_v48 = vrot.slane %v6327_v41, 5  ;;  %6380 = vst [vmem:[#allocation2 + $0x20] sm:$0x8] %v6378_v29  ;;  %6294 = vst [vmem:[#allocation2 + $0x28] sm:$0x1] %v6293_v39  ;;  %v6315_v22 = vrot.slane %v6313_v53, 5 }
 0x475   :  { %6291 = vst [vmem:[#allocation2 + $0x4] sm:$0x8] %v6287_v36  ;;  %v6334_v57 = vld [vmem:[#allocation2 + $0x34] sm:$0x1]  ;;  %v6339_v13 = vshrl.u32 %v6337_v0, 16  ;;  %v6342_v16 = vshll.u32 %v6337_v0, 16  ;;  %v6325_v44 = vsel %vm11647_vm4, %v6317_v21, %v6324_v23 }
 0x476   :  { %v6355_v50 = vrot.slane %v6353_v56, 7  ;;  %v6379_v32 = vld [vmem:[#allocation4 + $0xc] sm:$0x1]  ;;  %v6381_v26 = vld [vmem:[#allocation2 + $0x44] sm:$0x1]  ;;  %v6330_v51 = vrot.slane %v6329_v48, 4  ;;  %v6316_v52 = vsel %vm11532_vm13, %v6308_v8, %v6315_v22 }
 0x477   :  { %v6360_v18 = vld [vmem:[#allocation2 + $0x3c] sm:$0x1]  ;;  %v6365_v63 = vshrl.u32 %v6363_v10, 16  ;;  %v6384_v37 = vld [vmem:[#allocation4 + $0xc] sm:$0x3]  ;;  %vm14027_vm0 = vcmask 1041408   ;;  %v6382_v56 = vsel %vm11647_vm4, %v6379_v32, %v6381_v26 }
 0x478   :  { %vm13588_vm2 = vmand %vm14027_vm0, %vm14026_vm14  ;;  %v6389_v60 = vld [vmem:[#allocation4 + $0xc] sm:$0x6]  ;;  %6333 = vst [vmem:[#allocation2 + $0x10] sm:$0x8] %v6329_v48  ;;  %v6341_v25 = vrot.slane %v6339_v13, 5  ;;  %v6344_v5 = vrot.slane %v6342_v16, 6  ;;  %v6335_v41 = vsel %vm11647_vm4, %v6330_v51, %v6334_v57 }
 0x479   :  { %6326 = vst [vmem:[#allocation2 + $0x30] sm:$0x1] %v6325_v44  ;;  %v6356_v30 = vrot.slane %v6355_v50, 4  ;;  %v6403_v46 = vld [vmem:[#allocation4 + $0xc] sm:$0x6]  ;;  %v6367_v17 = vrot.slane %v6365_v63, 7 }
 0x47a   :  { %6359 = vst [vmem:[#allocation2 + $0x18] sm:$0x8] %v6355_v50  ;;  %v6368_v0 = vshll.u32 %v6363_v10, 16  ;;  %v6386_v36 = vld [vmem:[#allocation2 + $0x24] sm:$0x3]  ;;  %v6345_v61 = vor.u32 %v6344_v5, %v6341_v25  ;;  %v6346_v8 = vrot.slane %v6341_v25, 4 }
 0x47b   :  { %v6411_v40 = vld [vmem:[#allocation4 + $0xc] sm:$0x8]  ;;  %6323 = vst [vmem:[#allocation2 + $0xc] sm:$0x8] %v6316_v52  ;;  %6336 = vst [vmem:[#allocation2 + $0x34] sm:$0x1] %v6335_v41  ;;  %v6361_v29 = vsel %vm11647_vm4, %v6356_v30, %v6360_v18  ;;  %v6387_v21 = vsel %vm13588_vm2, %v6384_v37, %v6386_v36 }
 0x47c   :  { %v6350_v53 = vld [vmem:[#allocation2 + $0x38] sm:$0x1]  ;;  %v6375_v39 = vld [vmem:[#allocation2 + $0x40] sm:$0x1]  ;;  %6383 = vst [vmem:[#allocation2 + $0x44] sm:$0x1] %v6382_v56  ;;  %v6370_v10 = vor.u32 %v6368_v0, %v6367_v17 }
 0x47d   :  { %v13602_v23 = vld [vmem:[#allocation4 + $0x8] sm:$0x3]  ;;  %6362 = vst [vmem:[#allocation2 + $0x3c] sm:$0x1] %v6361_v29  ;;  %v6371_v48 = vrot.slane %v6367_v17, 4  ;;  %v6391_v22 = vshrl.u32 %v6389_v60, 16  ;;  %v6351_v16 = vsel %vm11647_vm4, %v6346_v8, %v6350_v53 }
 0x47e   :  { %v6394_v57 = vshll.u32 %v6389_v60, 16  ;;  %6388 = vst [vmem:[#allocation2 + $0x24] sm:$0x3] %v6387_v21  ;;  %v6256_v13 = vrot.slane %v6254_v12, 7  ;;  %v9409_v50 = vrot.slane %v6403_v46, 9  ;;  %v6414_v26 = vshrl.u32 %v6411_v40, 16 }
 0x47f   :  { %v6408_v32 = vld [vmem:[#allocation2 + $0x2c] sm:$0x3]  ;;  %6349 = vst [vmem:[#allocation2 + $0x14] sm:$0x8] %v6345_v61  ;;  %6352 = vst [vmem:[#allocation2 + $0x38] sm:$0x1] %v6351_v16  ;;  %v6376_v44 = vsel %vm11647_vm4, %v6371_v48, %v6375_v39  ;;  %v6190_v12 = vsel %vm11348_vm10, %v13560_v45, %v13537_v15  ;;  %v6244_v60 = vsel %vm11413_vm8, %v9406_v59, %v6243_v55 }
 0x480   :  { %v6393_v51 = vrot.slane %v6391_v22, 4  ;;  %v6396_v18 = vrot.slane %v6394_v57, 5  ;;  %v6417_v63 = vshll.u32 %v6411_v40, 16  ;;  %6374 = vst [vmem:[#allocation2 + $0x1c] sm:$0x8] %v6370_v10  ;;  %v6264_v52 = vrot.slane %v13602_v23, 7 }
 0x481   :  { %v6204_v37 = vld [vmem:[#allocation2 + $0x8] sm:$0x6]  ;;  %6377 = vst [vmem:[#allocation2 + $0x40] sm:$0x1] %v6376_v44  ;;  %v6409_v25 = vsel %vm13588_vm2, %v9409_v50, %v6408_v32  ;;  %v6216_v5 = vld [vmem:[#allocation2 + $0xc] sm:$0x6]  ;;  %v6257_v49 = vor.u32 %v6256_v13, %v13580_v42 }
 0x482   :  { %v6397_v30 = vor.u32 %v6396_v18, %v6393_v51  ;;  %v6400_v46 = vld [vmem:[#allocation2 + $0x28] sm:$0x3]  ;;  %v6416_v41 = vrot.slane %v6414_v26, 6  ;;  %6410 = vst [vmem:[#allocation2 + $0x2c] sm:$0x3] %v6409_v25  ;;  %v6025_v15 = vmax.f32 %v13497_v3, 0.0  ;;  %v6205_v59 = vsel %vm13542_vm15, %v13570_v11, %v6204_v37 }
 0x483   :  { %v6026_v43 = vmax.f32 %v13504_v9, 0.0  ;;  %v6217_v45 = vsel %vm13542_vm15, %v13572_v7, %v6216_v5  ;;  %v6172_v55 = vld [vmem:[#allocation2] sm:$0x6]  ;;  %v6192_v17 = vld [vmem:[#allocation2 + $0x4] sm:$0x6]  ;;  %v6419_v3 = vrot.slane %v6417_v63, 7  ;;  %v5952_v11 = vadd.f32 %v10156_v35, %v13489_v38 }
 0x484   :  { %v6246_v0 = vld [vmem:[#allocation2 + $0x18] sm:$0x6]  ;;  %v6398_v56 = vrot.slane %v6397_v30, 4  ;;  %6206 = vst [vmem:[#allocation2 + $0x8] sm:$0x6] %v6205_v59  ;;  %v6173_v27 = vsel %vm13542_vm15, %v9404_v54, %v6172_v55  ;;  %v6232_v9 = vrot.slane %v6231_v1, 4  ;;  %v6193_v7 = vsel %vm13542_vm15, %v6190_v12, %v6192_v17 }
 0x485   :  { %v9739_v36 = vpack.c.bf16 %v6026_v43, %v6025_v15  ;;  %6218 = vst [vmem:[#allocation2 + $0xc] sm:$0x6] %v6217_v45  ;;  %v6498_v47 = vld [vmem:[#allocation4 + $0xc] sm:$0x8]  ;;  %6174 = vst [vmem:[#allocation2] sm:$0x6] %v6173_v27  ;;  %v6247_v42 = vsel %vm13542_vm15, %v6244_v60, %v6246_v0  ;;  %v6016_v38 = vadd.f32 %v13472_v2, %v5952_v11 }
 0x486   :  { %v6259_v40 = vld [vmem:[#allocation2 + $0x1c] sm:$0x6]  ;;  %v6401_v19 = vsel %vm13588_vm2, %v6398_v56, %v6400_v46  ;;  %6194 = vst [vmem:[#allocation2 + $0x4] sm:$0x6] %v6193_v7  ;;  %6248 = vst [vmem:[#allocation2 + $0x18] sm:$0x6] %v6247_v42  ;;  %v6420_v8 = vor.u32 %v6419_v3, %v6416_v41 }
 0x487   :  { %9752 = vst [vmem:[#allocation4 + $0x10] sm:$0xff] %v9739_v36   ;;  %v6260_v54 = vsel %vm13542_vm15, %v6257_v49, %v6259_v40  ;;  %v6234_v6 = vld [vmem:[#allocation2 + $0x14] sm:$0x6]  ;;  %v6266_v34 = vld [vmem:[#allocation2 + $0x20] sm:$0x6]  ;;  %v6501_v39 = vshrl.u32 %v6498_v47, 16 }
 0x488   :  { %6402 = vst [vmem:[#allocation2 + $0x28] sm:$0x3] %v6401_v19  ;;  %6261 = vst [vmem:[#allocation2 + $0x1c] sm:$0x6] %v6260_v54  ;;  %v6235_v1 = vsel %vm13542_vm15, %v6232_v9, %v6234_v6  ;;  %v6267_v61 = vsel %vm13542_vm15, %v6264_v52, %v6266_v34  ;;  %v6431_v53 = vld [vmem:[#allocation4 + $0xc] sm:$0x8] }
 0x489   :  { %v6485_v29 = vld [vmem:[#allocation4 + $0xc] sm:$0x8]  ;;  %6236 = vst [vmem:[#allocation2 + $0x14] sm:$0x6] %v6235_v1  ;;  %6268 = vst [vmem:[#allocation2 + $0x20] sm:$0x6] %v6267_v61 }
 0x48a   :  { %v6027_v21 = vmax.f32 %v6016_v38, 0.0  ;;  %v9410_v23 = vrot.slane %v6431_v53, 11  ;;  %v9413_v10 = vrot.slane %v6485_v29, 9  ;;  %v6421_v22 = vrot.slane %v6420_v8, 4  ;;  %v6440_v2 = vld [vmem:[#allocation2 + $0x34] sm:$0x3] }
 0x48b   :  { %v13653_v57 = vrot.slane %v6501_v39, 9  ;;  %v6460_v13 = vld [vmem:[#allocation2 + $0x3c] sm:$0x3]  ;;  %v6482_v63 = vld [vmem:[#allocation2 + $0x44] sm:$0x3]  ;;  %vm14031_vm13 = vcmask 1043458  }
 0x48c   :  { %v9692_v48 = vpack.c.bf16 %v6027_v21, %v6027_v21  ;;  %v6452_v37 = vld [vmem:[#allocation2 + $0x38] sm:$0x3]  ;;  %v6428_v17 = vld [vmem:[#allocation2 + $0x30] sm:$0x3]  ;;  %v6495_v3 = vld [vmem:[#allocation2 + $0x24] sm:$0xc] }
 0x48d   :  { %vm14030_vm8 = vsmask.f32 3328  ;;  %v6538_v42 = vld [vmem:[#allocation2 + $0x34] sm:$0xc]  ;;  %v6522_v34 = vld [vmem:[#allocation2 + $0x2c] sm:$0xc] }
 0x48e   :  { %v6412_v16 = vld [vmem:[#allocation4 + $0x10] sm:$0x1]  ;;  %6063 = vst [vmem:[#allocation4 + $0x18] sm:$0x1] %v9692_v48  ;;  %v6455_v18 = vld [vmem:[#allocation4 + $0x10] sm:$0x6] }
 0x48f   :  { %v6432_v50 = vld [vmem:[#allocation4 + $0x10] sm:$0x1]  ;;  %v6423_v31 = vshll.u32 %v6412_v16, 16  ;;  %v9411_v12 = vrot.slane %v6455_v18, 9  ;;  %v6463_v60 = vld [vmem:[#allocation4 + $0x10] sm:$0xc] }
 0x490   :  { %v6443_v32 = vld [vmem:[#allocation4 + $0x10] sm:$0x3]  ;;  %v6437_v26 = vrot.slane %v6432_v50, 7  ;;  %v6477_v52 = vld [vmem:[#allocation4 + $0x10] sm:$0xc]  ;;  %v6465_v46 = vshrl.u32 %v6463_v60, 16 }
 0x491   :  { %v6445_v44 = vshrl.u32 %v6443_v32, 16  ;;  %v6448_v51 = vshll.u32 %v6443_v32, 16  ;;  %v6425_v25 = vrot.slane %v6423_v31, 7  ;;  %v6486_v41 = vld [vmem:[#allocation4 + $0x10] sm:$0x1]  ;;  %v6461_v43 = vsel %vm13588_vm2, %v9411_v12, %v6460_v13 }
 0x492   :  { %v6438_v5 = vsel %vm11484_vm3, %v9410_v23, %v6437_v26  ;;  %v6468_v49 = vshll.u32 %v6463_v60, 16  ;;  %v9412_v35 = vrot.slane %v6477_v52, 10  ;;  %v6499_v59 = vld [vmem:[#allocation4 + $0x10] sm:$0x1]  ;;  %v6467_v20 = vrot.slane %v6465_v46, 5  ;;  %vm13669_vm3 = vmand %vm14031_vm13, %vm14030_vm8 }
 0x493   :  { %v6447_v30 = vrot.slane %v6445_v44, 7  ;;  %v6441_v15 = vsel %vm13588_vm2, %v6438_v5, %v6440_v2  ;;  %v6518_v45 = vld [vmem:[#allocation4 + $0x10] sm:$0x3]  ;;  %v6426_v55 = vsel %vm11475_vm5, %v6421_v22, %v6425_v25  ;;  %v6491_v56 = vrot.slane %v6486_v41, 5  ;;  %6462 = vst [vmem:[#allocation2 + $0x3c] sm:$0x3] %v6461_v43  ;;  %vm14034_vm5 = vmmov %vm14026_vm14 }
 0x494   :  { %v6525_v36 = vld [vmem:[#allocation4 + $0x10] sm:$0x6]  ;;  %6442 = vst [vmem:[#allocation2 + $0x34] sm:$0x3] %v6441_v15  ;;  %v6429_v27 = vsel %vm13588_vm2, %v6426_v55, %v6428_v17  ;;  %v6470_v9 = vrot.slane %v6468_v49, 6  ;;  %v6483_v47 = vsel %vm13588_vm2, %v9412_v35, %v6482_v63  ;;  %v6506_v11 = vshrl.u32 %v6499_v59, 16 }
 0x495   :  { %v6450_v0 = vor.u32 %v6448_v51, %v6447_v30  ;;  %v6537_v7 = vld [vmem:[#allocation4 + $0x10] sm:$0xc]  ;;  %v6492_v19 = vsel %vm11369_vm12, %v9413_v10, %v6491_v56  ;;  %v6509_v54 = vshll.u32 %v6499_v59, 16  ;;  %v6520_v6 = vrot.slane %v6518_v45, 6  ;;  %6430 = vst [vmem:[#allocation2 + $0x30] sm:$0x3] %v6429_v27 }
 0x496   :  { %v6541_v38 = vld [vmem:[#allocation4 + $0x10] sm:$0xc]  ;;  %6484 = vst [vmem:[#allocation2 + $0x44] sm:$0x3] %v6483_v47  ;;  %v6471_v1 = vor.u32 %v6470_v9, %v6467_v20  ;;  %v6496_v61 = vsel %vm13669_vm3, %v6492_v19, %v6495_v3  ;;  %v6508_v8 = vrot.slane %v6506_v11, 5  ;;  %v6527_v53 = vshrl.u32 %v6525_v36, 16 }
 0x497   :  { %v6453_v40 = vsel %vm13588_vm2, %v6450_v0, %v6452_v37  ;;  %v6555_v29 = vld [vmem:[#allocation4 + $0x14] sm:$0x3]  ;;  %v6474_v21 = vld [vmem:[#allocation2 + $0x40] sm:$0x3]  ;;  %v6511_v23 = vrot.slane %v6509_v54, 6  ;;  %v6523_v4 = vsel %vm13669_vm3, %v6520_v6, %v6522_v34  ;;  %v6530_v10 = vshll.u32 %v6525_v36, 16 }
 0x498   :  { %v6562_v39 = vld [vmem:[#allocation4 + $0x14] sm:$0x3]  ;;  %6454 = vst [vmem:[#allocation2 + $0x38] sm:$0x3] %v6453_v40  ;;  %v6539_v48 = vsel %vm13669_vm3, %v6537_v7, %v6538_v42  ;;  %6497 = vst [vmem:[#allocation2 + $0x24] sm:$0xc] %v6496_v61 }
 0x499   :  { %v6472_v22 = vrot.slane %v6471_v1, 4  ;;  %v6529_v2 = vrot.slane %v6527_v53, 7  ;;  %v6543_v13 = vshrl.u32 %v6541_v38, 16  ;;  %v6546_v16 = vshll.u32 %v6541_v38, 16  ;;  %v6559_v50 = vld [vmem:[#allocation2 + $0x3c] sm:$0xc] }
 0x49a   :  { %6524 = vst [vmem:[#allocation2 + $0x2c] sm:$0xc] %v6523_v4  ;;  %6540 = vst [vmem:[#allocation2 + $0x34] sm:$0xc] %v6539_v48  ;;  %v6512_v32 = vor.u32 %v6511_v23, %v6508_v8  ;;  %v6515_v31 = vld [vmem:[#allocation2 + $0x28] sm:$0xc] }
 0x49b   :  { %v6534_v26 = vld [vmem:[#allocation2 + $0x30] sm:$0xc]  ;;  %v6557_v44 = vrot.slane %v6555_v29, 6  ;;  %v6564_v51 = vshrl.u32 %v6562_v39, 16  ;;  %v6567_v18 = vshll.u32 %v6562_v39, 16  ;;  %v6475_v37 = vsel %vm13588_vm2, %v6472_v22, %v6474_v21 }
 0x49c   :  { %v6575_v63 = vld [vmem:[#allocation4 + $0x14] sm:$0x6]  ;;  %v6532_v12 = vor.u32 %v6530_v10, %v6529_v2  ;;  %v6545_v60 = vrot.slane %v6543_v13, 4  ;;  %v6548_v52 = vrot.slane %v6546_v16, 5  ;;  %v13685_v25 = vld [vmem:[#allocation4 + $0x10] sm:$0x6]  ;;  %v6513_v30 = vsel %vm11348_vm10, %v13653_v57, %v6512_v32 }
 0x49d   :  { %v6592_v5 = vld [vmem:[#allocation4 + $0x10] sm:$0xc]  ;;  %v6560_v46 = vsel %vm13669_vm3, %v6557_v44, %v6559_v50  ;;  %v6566_v41 = vrot.slane %v6564_v51, 6  ;;  %v6569_v15 = vrot.slane %v6567_v18, 7  ;;  %v6579_v43 = vld [vmem:[#allocation2 + $0x44] sm:$0xc]  ;;  %v6516_v35 = vsel %vm13669_vm3, %v6513_v30, %v6515_v31 }
 0x49e   :  { %v13692_v49 = vld [vmem:[#allocation4 + $0x10] sm:$0xc]  ;;  %v6618_v24 = vld [vmem:[#allocation4 + $0x14] sm:$0x3]  ;;  %6476 = vst [vmem:[#allocation2 + $0x40] sm:$0x3] %v6475_v37  ;;  %v6535_v59 = vsel %vm13669_vm3, %v6532_v12, %v6534_v26  ;;  %v6549_v45 = vor.u32 %v6548_v52, %v6545_v60 }
 0x49f   :  { %v6572_v55 = vld [vmem:[#allocation2 + $0x40] sm:$0xc]  ;;  %v6577_v58 = vrot.slane %v6575_v63, 7  ;;  %v13698_v57 = vld [vmem:[#allocation4 + $0x14] sm:$0x3]  ;;  %v6570_v56 = vor.u32 %v6569_v15, %v6566_v41  ;;  %v6584_v3 = vrot.slane %v13685_v25, 6 }
 0x4a0   :  { %v6644_v17 = vld [vmem:[#allocation4 + $0x14] sm:$0x6]  ;;  %6561 = vst [vmem:[#allocation2 + $0x3c] sm:$0xc] %v6560_v46  ;;  %v6690_v0 = vld [vmem:[#allocation4 + $0x18] sm:$0x1] }
 0x4a1   :  { %v6552_v20 = vld [vmem:[#allocation2 + $0x38] sm:$0xc]  ;;  %v6594_v36 = vshll.u32 %v6592_v5, 16  ;;  %v6597_v27 = vshrl.u32 %v6592_v5, 16  ;;  %v6660_v9 = vld [vmem:[#allocation4 + $0x14] sm:$0xc]  ;;  %v6580_v11 = vsel %vm13669_vm3, %v6577_v58, %v6579_v43  ;;  %v6573_v19 = vsel %vm13669_vm3, %v6570_v56, %v6572_v55 }
 0x4a2   :  { %6517 = vst [vmem:[#allocation2 + $0x28] sm:$0xc] %v6516_v35  ;;  %6536 = vst [vmem:[#allocation2 + $0x30] sm:$0xc] %v6535_v59  ;;  %v6550_v47 = vrot.slane %v6549_v45, 4  ;;  %v6610_v7 = vrot.slane %v13692_v49, 7 }
 0x4a3   :  { %6694 = vst [vmem:[#allocation2 + $0x68] sm:$0x1] %v6690_v0  ;;  %v6620_v42 = vshll.u32 %v6618_v24, 16  ;;  %v13704_v40 = vld [vmem:[#allocation4 + $0x14] sm:$0x8]  ;;  %v6585_v54 = vrot.slane %v6584_v3, 4 }
 0x4a4   :  { %v6596_v6 = vrot.slane %v6594_v36, 7  ;;  %v6599_v34 = vrot.slane %v6597_v27, 6  ;;  %6581 = vst [vmem:[#allocation2 + $0x44] sm:$0xc] %v6580_v11  ;;  %v6671_v38 = vld [vmem:[#allocation4 + $0x18] sm:$0x1]  ;;  %v6553_v1 = vsel %vm13669_vm3, %v6550_v47, %v6552_v20 }
 0x4a5   :  { %v6611_v61 = vrot.slane %v6610_v7, 4  ;;  %v6622_v8 = vrot.slane %v6620_v42, 5  ;;  %v6623_v53 = vshrl.u32 %v6618_v24, 16  ;;  %6574 = vst [vmem:[#allocation2 + $0x40] sm:$0xc] %v6573_v19  ;;  %v6636_v21 = vrot.slane %v13698_v57, 5 }
 0x4a6   :  { %v6588_v29 = vld [vmem:[#allocation2 + $0x24] sm:$0x8]  ;;  %v6600_v39 = vor.u32 %v6599_v34, %v6596_v6  ;;  %v6646_v23 = vshll.u32 %v6644_v17, 16  ;;  %v6649_v4 = vshrl.u32 %v6644_v17, 16  ;;  %6554 = vst [vmem:[#allocation2 + $0x38] sm:$0xc] %v6553_v1 }
 0x4a7   :  { %6591 = vst [vmem:[#allocation2 + $0x48] sm:$0x1] %v6585_v54  ;;  %v6614_v10 = vld [vmem:[#allocation2 + $0x2c] sm:$0x8]  ;;  %v6625_v48 = vrot.slane %v6623_v53, 4  ;;  %v6662_v22 = vrot.slane %v6660_v9, 7  ;;  %v6589_v25 = vsel %vm11356_vm11, %v6584_v3, %v6588_v29 }
 0x4a8   :  { %v6673_v2 = vshll.u32 %v13704_v40, 16  ;;  %v6675_v14 = vshrl.u32 %v13704_v40, 16  ;;  %6617 = vst [vmem:[#allocation2 + $0x50] sm:$0x1] %v6611_v61  ;;  %v6640_v13 = vld [vmem:[#allocation2 + $0x34] sm:$0x8]  ;;  %v6615_v60 = vsel %vm11356_vm11, %v6610_v7, %v6614_v10 }
 0x4a9   :  { %v6601_v16 = vrot.slane %v6600_v39, 4  ;;  %v6637_v50 = vrot.slane %v6636_v21, 4  ;;  %v6648_v32 = vrot.slane %v6646_v23, 6  ;;  %v6651_v31 = vrot.slane %v6649_v4, 5  ;;  %v6666_v26 = vld [vmem:[#allocation2 + $0x3c] sm:$0x8] }
 0x4aa   :  { %v6626_v44 = vor.u32 %v6625_v48, %v6622_v8  ;;  %v6663_v51 = vrot.slane %v6662_v22, 4  ;;  %v9415_v18 = vrot.slane %v6675_v14, 11  ;;  %v6680_v63 = vshll.u32 %v6671_v38, 16  ;;  %v6630_v37 = vld [vmem:[#allocation2 + $0x30] sm:$0x8]  ;;  %v10944_v57 = vld [vmem:[#allocation6 + $0x600] sm:$0xff]  }
 0x4ab   :  { %v6652_v12 = vor.u32 %v6651_v31, %v6648_v32  ;;  %6607 = vst [vmem:[#allocation2 + $0x4c] sm:$0x1] %v6601_v16  ;;  %6643 = vst [vmem:[#allocation2 + $0x58] sm:$0x1] %v6637_v50  ;;  %v6631_v52 = vsel %vm11356_vm11, %v6622_v8, %v6630_v37  ;;  %v6604_v5 = vld [vmem:[#allocation2 + $0x28] sm:$0x8]  ;;  %v6667_v43 = vsel %vm11356_vm11, %v6662_v22, %v6666_v26 }
 0x4ac   :  { %v6627_v30 = vrot.slane %v6626_v44, 4  ;;  %v6689_v46 = vld [vmem:[#allocation4 + $0x14] sm:$0x8]  ;;  %6669 = vst [vmem:[#allocation2 + $0x60] sm:$0x1] %v6663_v51  ;;  %v6682_v41 = vsel %vm14022_vm6, %v9415_v18, %v6680_v63  ;;  %v6605_v15 = vsel %vm11356_vm11, %v6596_v6, %v6604_v5  ;;  %v6641_v59 = vsel %vm11356_vm11, %v6636_v21, %v6640_v13  ;;  %v10946_v17 = vld [vmem:[#allocation6 + $0x580] sm:$0xff]  }
 0x4ad   :  { %6616 = vst [vmem:[#allocation2 + $0x2c] sm:$0x8] %v6615_v60  ;;  %6632 = vst [vmem:[#allocation2 + $0x30] sm:$0x8] %v6631_v52  ;;  %v6691_v49 = vld [vmem:[#allocation2 + $0x44] sm:$0x8] }
 0x4ae   :  { %6590 = vst [vmem:[#allocation2 + $0x24] sm:$0x8] %v6589_v25  ;;  %v6653_v24 = vrot.slane %v6652_v12, 4  ;;  %6688 = vst [vmem:[#allocation2 + $0x64] sm:$0x1] %v6682_v41  ;;  %v6692_v28 = vsel %vm11356_vm11, %v6689_v46, %v6691_v49  ;;  %v10948_v9 = vld [vmem:[#allocation6 + $0x648] sm:$0xff]  }
 0x4af   :  { %6606 = vst [vmem:[#allocation2 + $0x28] sm:$0x8] %v6605_v15  ;;  %6668 = vst [vmem:[#allocation2 + $0x3c] sm:$0x8] %v6667_v43  ;;  %v6685_v35 = vld [vmem:[#allocation2 + $0x40] sm:$0x8] }
 0x4b0   :  { %6633 = vst [vmem:[#allocation2 + $0x54] sm:$0x1] %v6627_v30  ;;  %v6686_v45 = vsel %vm11356_vm11, %v6673_v2, %v6685_v35  ;;  %6642 = vst [vmem:[#allocation2 + $0x34] sm:$0x8] %v6641_v59  ;;  %v6656_v55 = vld [vmem:[#allocation2 + $0x38] sm:$0x8] }
 0x4b1   :  { %6693 = vst [vmem:[#allocation2 + $0x44] sm:$0x8] %v6692_v28  ;;  %6659 = vst [vmem:[#allocation2 + $0x5c] sm:$0x1] %v6653_v24  ;;  %v6657_v58 = vsel %vm11356_vm11, %v6648_v32, %v6656_v55  ;;  %v10949_v11 = vld [vmem:[#allocation6 + $0x5c8] sm:$0xff]   ;;  %v10952_v40 = vld [vmem:[#allocation6 + $0x650] sm:$0xff]  }
 0x4b2   :  { %6687 = vst [vmem:[#allocation2 + $0x40] sm:$0x8] %v6686_v45  ;;  %6658 = vst [vmem:[#allocation2 + $0x38] sm:$0x8] %v6657_v58  ;;  %v6705_v0 = vld [vmem:[#allocation2 + $0x48] sm:$0x11] }
 0x4b3   :  { %v9427_v7 = vcombine.high %v6705_v0, %v6705_v0  ;;  %v10951_v42 = vld [vmem:[#allocation6 + $0x588] sm:$0xff]   ;;  %v10954_v19 = vld [vmem:[#allocation6 + $0x5d0] sm:$0xff]   ;;  %v9426_v38 = vcombine.low %v6705_v0, %v6705_v0  ;;  %v10964_v1 = vld [vmem:[#allocation6 + $0x658] sm:$0xff]   ;;  %vm14035_vm10 = vcmask 1040384   ;;  %vm14038_vm12 = vmmov 0  }
 0x4b4   :  { %v10936_v20 = vld [vmem:[#allocation2 + $0x8] ss:$36 sps:$4 sm:$0xff]   ;;  %v10955_v54 = vld [vmem:[#allocation6 + $0x610] sm:$0xff]   ;;  %v10965_v8 = vld [vmem:[#allocation6 + $0x5d8] sm:$0xff]  }
 0x4b5   :  { %v10938_v56 = vld [vmem:[#allocation2 + $0xc] ss:$36 sps:$4 sm:$0xff]   ;;  %v10940_v3 = vld [vmem:[#allocation2] ss:$36 sps:$4 sm:$0xff]   ;;  %v10957_v34 = vld [vmem:[#allocation6 + $0x590] sm:$0xff]  }
 0x4b6   :  { %v10942_v36 = vld [vmem:[#allocation2 + $0x4] ss:$36 sps:$4 sm:$0xff]   ;;  %7453 = vmatprep.mubr.bf16.mxu0 %v10938_v56  ;;  %v10966_v29 = vld [vmem:[#allocation6 + $0x618] sm:$0xff]   ;;  %v10972_v48 = vld [vmem:[#allocation6 + $0x668] sm:$0xff]  }
 0x4b7   :  { %v6706_v27 = vld [vmem:[#allocation2 + $0x50] sm:$0x11]  ;;  %7405 = vmatprep.mubr.bf16.mxu1 %v10942_v36  ;;  %7454 = vmatmul.mubr.bf16.vlgmr.msra.gmra.mrb[108].mxu0 %v10936_v20  ;;  %v10967_v39 = vld [vmem:[#allocation6 + $0x598] sm:$0xff]   ;;  %v10968_v21 = vld [vmem:[#allocation6 + $0x660] sm:$0xff]  }
 0x4b8   :  { %v9429_v47 = vcombine.high %v6706_v27, %v6706_v27  ;;  %10257 = vmatpush3.bf16.msra.mxu0 %v10944_v57  ;;  %7406 = vmatmul.mubr.bf16.vlgmr.msra.gmra.mrb[104].mxu1 %v10940_v3  ;;  %v9428_v6 = vcombine.low %v6706_v27, %v6706_v27  ;;  %v10969_v23 = vld [vmem:[#allocation6 + $0x5e0] sm:$0xff]   ;;  %v10973_v22 = vld [vmem:[#allocation6 + $0x5e8] sm:$0xff]   ;;  %v10976_v13 = vld [vmem:[#allocation6 + $0x670] sm:$0xff]  }
 0x4b9   :  { %10229 = vmatpush3.bf16.msra.mxu1 %v10946_v17  ;;  %7413 = vmatprep.mubr.bf16.mxu1 %v9427_v7  ;;  %v10960_v61 = vld [vmem:[#allocation2 + $0x1c] ss:$36 sps:$4 sm:$0xff]   ;;  %v10963_v53 = vld [vmem:[#allocation2 + $0x14] ss:$36 sps:$4 sm:$0xff]   ;;  %v10970_v4 = vld [vmem:[#allocation6 + $0x620] sm:$0xff]  }
 0x4ba   :  { %7461 = vmatprep.mubr.bf16.mxu0 %v9429_v47  ;;  %10258 = vmatprep.subr.bf16.mxu0 %v10948_v9  ;;  %v10971_v10 = vld [vmem:[#allocation6 + $0x5a0] sm:$0xff]   ;;  %v10974_v2 = vld [vmem:[#allocation6 + $0x628] sm:$0xff]   ;;  %v10977_v16 = vld [vmem:[#allocation6 + $0x5f0] sm:$0xff]  }
 0x4bb   :  { %10230 = vmatprep.subr.bf16.mxu1 %v10949_v11  ;;  %v10975_v14 = vld [vmem:[#allocation6 + $0x5a8] sm:$0xff]   ;;  %v10978_v50 = vld [vmem:[#allocation6 + $0x630] sm:$0xff]   ;;  %v10980_v31 = vld [vmem:[#allocation6 + $0x678] sm:$0xff]  }
 0x4bc   :  { %10259 = vmatpush3.bf16.msra.mxu0 %v10950_v62  ;;  %v10979_v32 = vld [vmem:[#allocation6 + $0x5b0] sm:$0xff]   ;;  %v10981_v26 = vld [vmem:[#allocation6 + $0x5f8] sm:$0xff]   ;;  %v10985_v18 = vld [vmem:[#allocation6 + $0x680] sm:$0xff]  }
 0x4bd   :  { %10231 = vmatpush3.bf16.msra.mxu1 %v10951_v42  ;;  %10260 = vmatprep.subr.bf16.mxu0 %v10952_v40  ;;  %v10982_v44 = vld [vmem:[#allocation6 + $0x638] sm:$0xff]   ;;  %v10961_v60 = vld [vmem:[#allocation2 + $0x10] ss:$36 sps:$4 sm:$0xff]   ;;  %v10993_v49 = vld [vmem:[#allocation6 + $0x6a0] sm:$0xff]  }
 0x4be   :  { %10232 = vmatprep.subr.bf16.mxu1 %v10954_v19  ;;  %v10983_v51 = vld [vmem:[#allocation6 + $0x5b8] sm:$0xff]   ;;  %v10987_v25 = vld [vmem:[#allocation6 + $0x688] sm:$0xff]   ;;  %v10990_v30 = vld [vmem:[#allocation6 + $0x690] sm:$0xff]  }
 0x4bf   :  { %7462 = vmatmul.mubr.bf16.gmra.mrb[112].mxu0 %v9428_v6  ;;  %v6708_v63 = vld [vmem:[#allocation2 + $0x60] sm:$0x11]  ;;  %v6707_v37 = vld [vmem:[#allocation2 + $0x58] sm:$0x11]  ;;  %v10994_v24 = vld [vmem:[#allocation6 + $0x6a8] sm:$0xff]  }
 0x4c0   :  { %10261 = vmatpush3.bf16.msra.mxu0 %v10955_v54  ;;  %7414 = vmatmul.mubr.bf16.gmra.mrb[108].mxu1 %v9426_v38  ;;  %v10958_v12 = vld [vmem:[#allocation2 + $0x18] ss:$36 sps:$4 sm:$0xff]   ;;  %v9433_v52 = vcombine.high %v6708_v63, %v6708_v63  ;;  %v9431_v5 = vcombine.high %v6707_v37, %v6707_v37  ;;  %v9432_v46 = vcombine.low %v6708_v63, %v6708_v63  ;;  %v10991_v43 = vld [vmem:[#allocation2 + $0x20] ss:$36 sps:$4 sm:$0xff]   ;;  %v11002_v17 = vld [vmem:[#allocation6 + $0x708] sm:$0xff]  }
 0x4c1   :  { %10233 = vmatpush3.bf16.msra.mxu1 %v10957_v34  ;;  %7549 = vmatprep.mubr.bf16.mxu0 %v10960_v61  ;;  %v9430_v41 = vcombine.low %v6707_v37, %v6707_v37  ;;  %v10992_v15 = vld [vmem:[#allocation6 + $0x698] sm:$0xff]   ;;  %v10995_v35 = vld [vmem:[#allocation6 + $0x6b0] sm:$0xff]   ;;  %v10997_v28 = vld [vmem:[#allocation2 + $0x68] ss:$0 sps:$4 sm:$0x11]  }
 0x4c2   :  { %7501 = vmatprep.mubr.bf16.mxu1 %v10963_v53  ;;  %10262 = vmatprep.subr.bf16.mxu0 %v10964_v1  ;;  %v10996_v59 = vld [vmem:[#allocation6 + $0x6b8] sm:$0xff]   ;;  %v10998_v45 = vld [vmem:[#allocation6 + $0x700] sm:$0xff]   ;;  %v11004_v0 = vld [vmem:[#allocation6 + $0x788] sm:$0xff]  }
 0x4c3   :  { %10234 = vmatprep.subr.bf16.mxu1 %v10965_v8  ;;  %v10999_v55 = vld [vmem:[#allocation6 + $0x6c0] sm:$0xff]   ;;  %v11003_v20 = vld [vmem:[#allocation6 + $0x6c8] sm:$0xff]   ;;  %v11006_v3 = vld [vmem:[#allocation6 + $0x710] sm:$0xff]  }
 0x4c4   :  { %10263 = vmatpush3.bf16.msra.mxu0 %v10966_v29  ;;  %v11000_v58 = vld [vmem:[#allocation6 + $0x780] sm:$0xff]   ;;  %v11005_v56 = vld [vmem:[#allocation6 + $0x748] sm:$0xff]   ;;  %v11008_v36 = vld [vmem:[#allocation6 + $0x790] sm:$0xff]  }
 0x4c5   :  { %10235 = vmatpush3.bf16.msra.mxu1 %v10967_v39  ;;  %10264 = vmatprep.subr.bf16.mxu0 %v10968_v21  ;;  %v11001_v57 = vld [vmem:[#allocation6 + $0x740] sm:$0xff]   ;;  %v11007_v27 = vld [vmem:[#allocation6 + $0x6d0] sm:$0xff]   ;;  %v11010_v47 = vld [vmem:[#allocation6 + $0x718] sm:$0xff]  }
 0x4c6   :  { %10236 = vmatprep.subr.bf16.mxu1 %v10969_v23  ;;  %v11009_v9 = vld [vmem:[#allocation6 + $0x750] sm:$0xff]   ;;  %v11012_v11 = vld [vmem:[#allocation6 + $0x798] sm:$0xff]   ;;  %v11014_v42 = vld [vmem:[#allocation6 + $0x720] sm:$0xff]  }
 0x4c7   :  { %v11011_v7 = vld [vmem:[#allocation6 + $0x6d8] sm:$0xff]   ;;  %v11016_v40 = vld [vmem:[#allocation6 + $0x7a0] sm:$0xff]   ;;  %v11018_v6 = vld [vmem:[#allocation6 + $0x728] sm:$0xff]  }
 0x4c8   :  { %10265 = vmatpush3.bf16.msra.mxu0 %v10970_v4  ;;  %v11013_v62 = vld [vmem:[#allocation6 + $0x758] sm:$0xff]   ;;  %v11015_v19 = vld [vmem:[#allocation6 + $0x6e0] sm:$0xff]   ;;  %v11020_v34 = vld [vmem:[#allocation6 + $0x7a8] sm:$0xff]  }
 0x4c9   :  { %10237 = vmatpush3.bf16.msra.mxu1 %v10971_v10  ;;  %10266 = vmatprep.subr.bf16.mxu0 %v10972_v48  ;;  %v11017_v54 = vld [vmem:[#allocation6 + $0x760] sm:$0xff]   ;;  %v11019_v38 = vld [vmem:[#allocation6 + $0x6e8] sm:$0xff]   ;;  %v11022_v61 = vld [vmem:[#allocation6 + $0x730] sm:$0xff]  }
 0x4ca   :  { %10238 = vmatprep.subr.bf16.mxu1 %v10973_v22  ;;  %v11021_v1 = vld [vmem:[#allocation6 + $0x768] sm:$0xff]   ;;  %v11024_v8 = vld [vmem:[#allocation6 + $0x7b0] sm:$0xff]   ;;  %v11026_v39 = vld [vmem:[#allocation6 + $0x738] sm:$0xff]  }
 0x4cb   :  { %v11023_v53 = vld [vmem:[#allocation6 + $0x6f0] sm:$0xff]   ;;  %v11028_v21 = vld [vmem:[#allocation6 + $0x7b8] sm:$0xff]   ;;  %v11032_v10 = vld [vmem:[#allocation6 + $0x800] sm:$0xff]  }
 0x4cc   :  { %10267 = vmatpush3.bf16.msra.mxu0 %v10974_v2  ;;  %v11025_v29 = vld [vmem:[#allocation6 + $0x770] sm:$0xff]   ;;  %v11027_v23 = vld [vmem:[#allocation6 + $0x6f8] sm:$0xff]   ;;  %v11038_v48 = vld [vmem:[#allocation6 + $0x880] sm:$0xff]  }
 0x4cd   :  { %10239 = vmatpush3.bf16.msra.mxu1 %v10975_v14  ;;  %10268 = vmatprep.subr.bf16.mxu0 %v10976_v13  ;;  %v11029_v4 = vld [vmem:[#allocation6 + $0x778] sm:$0xff]   ;;  %vm13743_vm11 = vmand %vm14035_vm10, %vm14034_vm5 }
 0x4ce   :  { %10240 = vmatprep.subr.bf16.mxu1 %v10977_v16  ;;  %v9416_v16 = vld [vmem:[#allocation8 + $0x2] ss:$0 sm:$0xff] }
 0x4d0   :  { %10269 = vmatpush3.bf16.msra.mxu0 %v10978_v50 }
 0x4d1   :  { %10241 = vmatpush3.bf16.msra.mxu1 %v10979_v32  ;;  %10270 = vmatprep.subr.bf16.mxu0 %v10980_v31 }
 0x4d2   :  { %10242 = vmatprep.subr.bf16.mxu1 %v10981_v26 }
 0x4d4   :  { %10271 = vmatpush3.bf16.msra.mxu0 %v10982_v44 }
 0x4d5   :  { %10243 = vmatpush3.bf16.msra.mxu1 %v10983_v51  ;;  %10294 = vmatprep.subr.bf16.mxu0 %v10998_v45 }
 0x4d6   :  { %10495 = vmatprep.subr.bf16.mxu1 %v10985_v18 }
 0x4d7   :  { %7550 = vmatmul.mubr.bf16.vlgmr.msra.gmra.mrb[116].mxu0 %v10958_v12 }
 0x4d8   :  { %7502 = vmatmul.mubr.bf16.vlgmr.msra.gmra.mrb[112].mxu1 %v10961_v60  ;;  %7557 = vmatprep.mubr.bf16.mxu0 %v9433_v52 }
 0x4d9   :  { %7509 = vmatprep.mubr.bf16.mxu1 %v9431_v5  ;;  %10496 = vmatpush3.bf16.msra.mxu1 %v10985_v18 }
 0x4da   :  { %10497 = vmatprep.subr.bf16.mxu1 %v10987_v25  ;;  %10295 = vmatpush3.bf16.msra.mxu0 %v10999_v55 }
 0x4db   :  { %10296 = vmatprep.subr.bf16.mxu0 %v11002_v17 }
 0x4dd   :  { %10498 = vmatpush3.bf16.msra.mxu1 %v10987_v25 }
 0x4de   :  { %10499 = vmatprep.subr.bf16.mxu1 %v10990_v30  ;;  %10297 = vmatpush3.bf16.msra.mxu0 %v11003_v20 }
 0x4df   :  { %7558 = vmatmul.mubr.bf16.gmra.mrb[120].mxu0 %v9432_v46  ;;  %10298 = vmatprep.subr.bf16.mxu0 %v11006_v3 }
 0x4e0   :  { %7510 = vmatmul.mubr.bf16.gmra.mrb[116].mxu1 %v9430_v41 }
 0x4e1   :  { %10500 = vmatpush3.bf16.msra.mxu1 %v10990_v30  ;;  %10511 = vmatprep.mubr.bf16.mxu1 %v10991_v43 }
 0x4e2   :  { %10501 = vmatprep.subr.bf16.mxu1 %v10992_v15  ;;  %10299 = vmatpush3.bf16.msra.mxu0 %v11007_v27 }
 0x4e3   :  { %10300 = vmatprep.subr.bf16.mxu0 %v11010_v47 }
 0x4e5   :  { %10502 = vmatpush3.bf16.msra.mxu1 %v10992_v15 }
 0x4e6   :  { %10503 = vmatprep.subr.bf16.mxu1 %v10993_v49  ;;  %10301 = vmatpush3.bf16.msra.mxu0 %v11011_v7 }
 0x4e7   :  { %10302 = vmatprep.subr.bf16.mxu0 %v11014_v42 }
 0x4e9   :  { %10504 = vmatpush3.bf16.msra.mxu1 %v10993_v49 }
 0x4ea   :  { %10505 = vmatprep.subr.bf16.mxu1 %v10994_v24  ;;  %10303 = vmatpush3.bf16.msra.mxu0 %v11015_v19 }
 0x4eb   :  { %10304 = vmatprep.subr.bf16.mxu0 %v11018_v6 }
 0x4ed   :  { %10506 = vmatpush3.bf16.msra.mxu1 %v10994_v24 }
 0x4ee   :  { %10507 = vmatprep.subr.bf16.mxu1 %v10995_v35  ;;  %10305 = vmatpush3.bf16.msra.mxu0 %v11019_v38 }
 0x4ef   :  { %10306 = vmatprep.subr.bf16.mxu0 %v11022_v61 }
 0x4f1   :  { %10508 = vmatpush3.bf16.msra.mxu1 %v10995_v35 }
 0x4f2   :  { %10509 = vmatprep.subr.bf16.mxu1 %v10996_v59  ;;  %10307 = vmatpush3.bf16.msra.mxu0 %v11023_v53 }
 0x4f3   :  { %10308 = vmatprep.subr.bf16.mxu0 %v11026_v39 }
 0x4f5   :  { %10510 = vmatpush3.bf16.msra.mxu1 %v10996_v59 }
 0x4f6   :  { %10316 = vmatprep.subr.bf16.mxu1 %v11000_v58  ;;  %10309 = vmatpush3.bf16.msra.mxu0 %v11027_v23 }
 0x4f7   :  { %10338 = vmatprep.subr.bf16.mxu0 %v11032_v10 }
 0x4f8   :  { %10512 = vmatmul.mubr.bf16.vlgmr.msra.gmra.mrb[120].mxu1 %v10997_v28 }
 0x4f9   :  { %10317 = vmatpush3.bf16.msra.mxu1 %v11001_v57 }
 0x4fa   :  { %10318 = vmatprep.subr.bf16.mxu1 %v11004_v0 }
 0x4fd   :  { %10319 = vmatpush3.bf16.msra.mxu1 %v11005_v56 }
 0x4fe   :  { %10320 = vmatprep.subr.bf16.mxu1 %v11008_v36 }
 0x501   :  { %10321 = vmatpush3.bf16.msra.mxu1 %v11009_v9 }
 0x502   :  { %10322 = vmatprep.subr.bf16.mxu1 %v11012_v11 }
 0x505   :  { %10323 = vmatpush3.bf16.msra.mxu1 %v11013_v62 }
 0x506   :  { %10324 = vmatprep.subr.bf16.mxu1 %v11016_v40 }
 0x509   :  { %10325 = vmatpush3.bf16.msra.mxu1 %v11017_v54 }
 0x50a   :  { %10326 = vmatprep.subr.bf16.mxu1 %v11020_v34 }
 0x50d   :  { %10327 = vmatpush3.bf16.msra.mxu1 %v11021_v1 }
 0x50e   :  { %10328 = vmatprep.subr.bf16.mxu1 %v11024_v8 }
 0x511   :  { %10329 = vmatpush3.bf16.msra.mxu1 %v11025_v29 }
 0x512   :  { %10330 = vmatprep.subr.bf16.mxu1 %v11028_v21 }
 0x515   :  { %10331 = vmatpush3.bf16.msra.mxu1 %v11029_v4 }
 0x516   :  { %10360 = vmatprep.subr.bf16.mxu1 %v11038_v48 }
 0x58a   :  { %v10216_v22 = vpop.f32.mrb[108].mxu0 }
 0x58b   :  { %v10188_v2 = vpop.f32.mrb[104].mxu1  ;;  %v10217_v14 = vpop.f32.mrb[109].mxu0 }
 0x58c   :  { %v10218_v13 = vadd.f32 %v10217_v14, %v10216_v22  ;;  %v10189_v50 = vpop.f32.mrb[105].mxu1  ;;  %v10219_v32 = vpop.f32.mrb[110].mxu0 }
 0x58d   :  { %v10190_v31 = vadd.f32 %v10189_v50, %v10188_v2  ;;  %v10191_v26 = vpop.f32.mrb[106].mxu1  ;;  %v10220_v44 = vpop.f32.mrb[111].mxu0 }
 0x58e   :  { %v10221_v51 = vadd.f32 %v10220_v44, %v10219_v32  ;;  %v10192_v18 = vpop.f32.mrb[107].mxu1 }
 0x58f   :  { %v7408_v63 = vadd.f32 %v10190_v31, %v9416_v16  ;;  %v10193_v37 = vadd.f32 %v10192_v18, %v10191_v26  ;;  %v7633_v31 = vld [vmem:[#allocation2] sm:$0x1]  ;;  %v7643_v18 = vld [vmem:[#allocation2 + $0x4] sm:$0x1] }
 0x591   :  { %v7411_v12 = vadd.f32 %v10193_v37, %v9416_v16  ;;  %v7456_v60 = vadd.f32 %v10218_v13, %v7408_v63 }
 0x592   :  { %v10222_v52 = vpop.f32.mrb[112].mxu0 }
 0x593   :  { %v10194_v25 = vpop.f32.mrb[108].mxu1  ;;  %v10223_v5 = vpop.f32.mrb[113].mxu0  ;;  %v7459_v30 = vadd.f32 %v10221_v51, %v7411_v12  ;;  %v7651_v12 = vld [vmem:[#allocation2 + $0x8] sm:$0x1] }
 0x594   :  { %v10224_v46 = vadd.f32 %v10223_v5, %v10222_v52  ;;  %v10195_v41 = vpop.f32.mrb[109].mxu1  ;;  %v10225_v15 = vpop.f32.mrb[114].mxu0 }
 0x595   :  { %v10196_v43 = vadd.f32 %v10195_v41, %v10194_v25  ;;  %v10197_v49 = vpop.f32.mrb[110].mxu1  ;;  %v10226_v24 = vpop.f32.mrb[115].mxu0 }
 0x596   :  { %v10198_v35 = vpop.f32.mrb[111].mxu1  ;;  %v7661_v49 = vld [vmem:[#allocation2 + $0xc] sm:$0x1]  ;;  %v7669_v24 = vld [vmem:[#allocation2 + $0x10] sm:$0x1] }
 0x597   :  { %v7416_v59 = vadd.f32 %v10196_v43, %v9416_v16 }
 0x599   :  { %v7464_v28 = vadd.f32 %v10224_v46, %v7416_v59 }
 0x5aa   :  { %v10272_v45 = vpop.f32.mrb[116].mxu0 }
 0x5ab   :  { %v10244_v55 = vpop.f32.mrb[112].mxu1  ;;  %v10273_v58 = vpop.f32.mrb[117].mxu0 }
 0x5ac   :  { %v10274_v57 = vadd.f32 %v10273_v58, %v10272_v45  ;;  %v10245_v17 = vpop.f32.mrb[113].mxu1  ;;  %v10275_v0 = vpop.f32.mrb[118].mxu0  ;;  %v7679_v45 = vld [vmem:[#allocation2 + $0x14] sm:$0x1]  ;;  %v7687_v58 = vld [vmem:[#allocation2 + $0x18] sm:$0x1] }
 0x5ad   :  { %v10246_v20 = vadd.f32 %v10245_v17, %v10244_v55  ;;  %v10247_v56 = vpop.f32.mrb[114].mxu1  ;;  %v10276_v3 = vpop.f32.mrb[119].mxu0 }
 0x5ae   :  { %v10277_v36 = vadd.f32 %v10276_v3, %v10275_v0  ;;  %v10248_v27 = vpop.f32.mrb[115].mxu1 }
 0x5af   :  { %v7504_v9 = vadd.f32 %v10246_v20, %v7456_v60  ;;  %v10249_v47 = vadd.f32 %v10248_v27, %v10247_v56 }
 0x5b1   :  { %v7507_v11 = vadd.f32 %v10249_v47, %v7459_v30  ;;  %v7552_v7 = vadd.f32 %v10274_v57, %v7504_v9  ;;  %v7701_v57 = vld [vmem:[#allocation2 + $0x20] sm:$0x1] }
 0x5b2   :  { %v10278_v62 = vpop.f32.mrb[120].mxu0 }
 0x5b3   :  { %v10250_v42 = vpop.f32.mrb[116].mxu1  ;;  %v10279_v40 = vpop.f32.mrb[121].mxu0  ;;  %v7555_v19 = vadd.f32 %v10277_v36, %v7507_v11 }
 0x5b4   :  { %v10280_v54 = vadd.f32 %v10279_v40, %v10278_v62  ;;  %v10251_v6 = vpop.f32.mrb[117].mxu1  ;;  %v10281_v34 = vpop.f32.mrb[122].mxu0 }
 0x5b5   :  { %v10252_v38 = vadd.f32 %v10251_v6, %v10250_v42  ;;  %v10253_v1 = vpop.f32.mrb[118].mxu1  ;;  %v10282_v61 = vpop.f32.mrb[123].mxu0 }
 0x5b6   :  { %v10254_v8 = vpop.f32.mrb[119].mxu1 }
 0x5b7   :  { %v7512_v53 = vadd.f32 %v10252_v38, %v7464_v28 }
 0x5b9   :  { %v7560_v29 = vadd.f32 %v10280_v54, %v7512_v53  ;;  %v7697_v53 = vld [vmem:[#allocation2 + $0x1c] sm:$0x1] }
 0x5cb   :  { %v10513_v39 = vpop.f32.mrb[120].mxu1 }
 0x5cc   :  { %v7608_v21 = vadd.f32 %v10513_v39, %v7560_v29  ;;  %v7599_v23 = vpop.f32.mrb[121].mxu1 }
 0x5cd   :  { %v7600_v4 = vadd.f32 %v7599_v23, %v7552_v7  ;;  %v10514_v10 = vpop.f32.mrb[122].mxu1 }
 0x5ce   :  { %v7615_v48 = vmax.f32 %v7608_v21, 0.0  ;;  %v7602_v22 = vpop.f32.mrb[123].mxu1 }
 0x5cf   :  { %v7603_v2 = vadd.f32 %v7602_v22, %v7555_v19  ;;  %v7613_v13 = vmax.f32 %v7600_v4, 0.0 }
 0x5d0   :  { %v9695_v14 = vpack.c.bf16 %v7615_v48, %v7615_v48 }
 0x5d1   :  { %v7614_v16 = vmax.f32 %v7603_v2, 0.0 }
 0x5d2   :  { %7631 = vst [vmem:[#allocation3 + $0x8] sm:$0x1] %v9695_v14 }
 0x5d3   :  { %v9744_v50 = vpack.c.bf16 %v7614_v16, %v7613_v13 }
 0x5d5   :  { %9745 = vst [vmem:[#allocation3] sm:$0xff] %v9744_v50  }
 0x5dc   :  { %v7632_v32 = vld [vmem:[#allocation3] sm:$0x1]  ;;  %v7646_v63 = vld [vmem:[#allocation3] sm:$0x2]  ;;  %v7709_v25 = vld [vmem:[#allocation3 + $0x4] sm:$0x2] }
 0x5dd   :  { %v7636_v26 = vld [vmem:[#allocation3] sm:$0x1]  ;;  %v7634_v44 = vsel %vm11647_vm4, %v7632_v32, %v7633_v31  ;;  %v9511_v37 = vrot.slane %v7646_v63, 9  ;;  %v7654_v60 = vld [vmem:[#allocation3] sm:$0x2]  ;;  %v7711_v59 = vshll.u32 %v7709_v25, 16 }
 0x5de   :  { %v7638_v51 = vshrl.u32 %v7636_v26, 16  ;;  %7635 = vst [vmem:[#allocation2] sm:$0x1] %v7634_v44  ;;  %v7656_v5 = vshrl.u32 %v7654_v60, 16  ;;  %v7664_v30 = vld [vmem:[#allocation3] sm:$0x4] }
 0x5df   :  { %v7652_v46 = vsel %vm11647_vm4, %v9511_v37, %v7651_v12  ;;  %v9513_v41 = vrot.slane %v7664_v30, 10  ;;  %v7672_v15 = vld [vmem:[#allocation3] sm:$0x4]  ;;  %v7682_v55 = vld [vmem:[#allocation3] sm:$0x8]  ;;  %v9517_v6 = vrot.slane %v7711_v59, 9 }
 0x5e0   :  { %v7644_v52 = vsel %vm11647_vm4, %v7638_v51, %v7643_v18  ;;  %7653 = vst [vmem:[#allocation2 + $0x8] sm:$0x1] %v7652_v46  ;;  %v9512_v43 = vrot.slane %v7656_v5, 9  ;;  %v7674_v35 = vshrl.u32 %v7672_v15, 16  ;;  %v7727_v20 = vld [vmem:[#allocation3 + $0x4] sm:$0x4] }
 0x5e1   :  { %7645 = vst [vmem:[#allocation2 + $0x4] sm:$0x1] %v7644_v52  ;;  %v7670_v28 = vsel %vm11647_vm4, %v9513_v41, %v7669_v24  ;;  %v9515_v3 = vrot.slane %v7682_v55, 11  ;;  %v7690_v36 = vld [vmem:[#allocation3] sm:$0x8]  ;;  %v7729_v34 = vshll.u32 %v7727_v20, 16 }
 0x5e2   :  { %v7662_v0 = vsel %vm11647_vm4, %v9512_v43, %v7661_v49  ;;  %7671 = vst [vmem:[#allocation2 + $0x10] sm:$0x1] %v7670_v28  ;;  %v9514_v56 = vrot.slane %v7674_v35, 10  ;;  %v7719_v27 = vld [vmem:[#allocation3 + $0x4] sm:$0x2]  ;;  %v7692_v9 = vshrl.u32 %v7690_v36, 16 }
 0x5e3   :  { %7663 = vst [vmem:[#allocation2 + $0xc] sm:$0x1] %v7662_v0  ;;  %v7700_v47 = vld [vmem:[#allocation3 + $0x4] sm:$0x1]  ;;  %v7745_v42 = vld [vmem:[#allocation3 + $0x4] sm:$0x8]  ;;  %v7688_v40 = vsel %vm11647_vm4, %v9515_v3, %v7687_v58 }
 0x5e4   :  { %v7704_v11 = vld [vmem:[#allocation3 + $0x4] sm:$0x1]  ;;  %v7680_v62 = vsel %vm11647_vm4, %v9514_v56, %v7679_v45  ;;  %v7702_v19 = vsel %vm11647_vm4, %v7700_v47, %v7701_v57  ;;  %v7737_v38 = vld [vmem:[#allocation3 + $0x4] sm:$0x4]  ;;  %7689 = vst [vmem:[#allocation2 + $0x18] sm:$0x1] %v7688_v40 }
 0x5e5   :  { %v7706_v7 = vld [vmem:[#allocation2] sm:$0x1]  ;;  %7681 = vst [vmem:[#allocation2 + $0x14] sm:$0x1] %v7680_v62  ;;  %v9516_v1 = vrot.slane %v7692_v9, 11  ;;  %v9518_v8 = vrot.slane %v7719_v27, 9 }
 0x5e6   :  { %v7707_v54 = vsel %vm13743_vm11, %v7704_v11, %v7706_v7  ;;  %7703 = vst [vmem:[#allocation2 + $0x20] sm:$0x1] %v7702_v19  ;;  %v7747_v21 = vshll.u32 %v7745_v42, 16  ;;  %v9520_v10 = vrot.slane %v7737_v38, 10  ;;  %v7755_v48 = vld [vmem:[#allocation3 + $0x4] sm:$0x8] }
 0x5e7   :  { %7708 = vst [vmem:[#allocation2] sm:$0x1] %v7707_v54  ;;  %v7724_v39 = vld [vmem:[#allocation2 + $0x8] sm:$0x1]  ;;  %v7698_v23 = vsel %vm11647_vm4, %v9516_v1, %v7697_v53  ;;  %v9519_v22 = vrot.slane %v7729_v34, 10  ;;  %v9522_v50 = vrot.slane %v7755_v48, 11 }
 0x5e8   :  { %v7716_v61 = vld [vmem:[#allocation2 + $0x4] sm:$0x1]  ;;  %v7725_v4 = vsel %vm13743_vm11, %v9518_v8, %v7724_v39  ;;  %7699 = vst [vmem:[#allocation2 + $0x1c] sm:$0x1] %v7698_v23  ;;  %v9521_v33 = vrot.slane %v7747_v21, 11  ;;  %v11040_v41 = vld [vmem:[#allocation6 + $0x808] sm:$0xff]  }
 0x5e9   :  { %v7717_v29 = vsel %vm13743_vm11, %v9517_v6, %v7716_v61  ;;  %7726 = vst [vmem:[#allocation2 + $0x8] sm:$0x1] %v7725_v4  ;;  %v7742_v2 = vld [vmem:[#allocation2 + $0x10] sm:$0x1]  ;;  %v7763_v32 = vld [vmem:[#allocation3 + $0x8] sm:$0x1] }
 0x5ea   :  { %7718 = vst [vmem:[#allocation2 + $0x4] sm:$0x1] %v7717_v29  ;;  %v7734_v14 = vld [vmem:[#allocation2 + $0xc] sm:$0x1]  ;;  %v7743_v13 = vsel %vm13743_vm11, %v9520_v10, %v7742_v2  ;;  %v7771_v31 = vld [vmem:[#allocation3 + $0x8] sm:$0x1] }
 0x5eb   :  { %v7735_v16 = vsel %vm13743_vm11, %v9519_v22, %v7734_v14  ;;  %7744 = vst [vmem:[#allocation2 + $0x10] sm:$0x1] %v7743_v13  ;;  %v7760_v44 = vld [vmem:[#allocation2 + $0x18] sm:$0x1]  ;;  %v7765_v12 = vshll.u32 %v7763_v32, 16  ;;  %v11033_v30 = vld [vmem:[#allocation6 + $0x7c0] sm:$0xff]  }
 0x5ec   :  { %7736 = vst [vmem:[#allocation2 + $0xc] sm:$0x1] %v7735_v16  ;;  %v7752_v26 = vld [vmem:[#allocation2 + $0x14] sm:$0x1]  ;;  %v7761_v63 = vsel %vm13743_vm11, %v9522_v50, %v7760_v44  ;;  %v11039_v24 = vld [vmem:[#allocation6 + $0x840] sm:$0xff]   ;;  %v11043_v35 = vld [vmem:[#allocation6 + $0x7c8] sm:$0xff]  }
 0x5ed   :  { %v7772_v51 = vld [vmem:[#allocation2 + $0x20] sm:$0x1]  ;;  %v7753_v18 = vsel %vm13743_vm11, %v9521_v33, %v7752_v26  ;;  %7762 = vst [vmem:[#allocation2 + $0x18] sm:$0x1] %v7761_v63  ;;  %v11044_v28 = vld [vmem:[#allocation6 + $0x888] sm:$0xff]   ;;  %v11046_v55 = vld [vmem:[#allocation6 + $0x810] sm:$0xff]  }
 0x5ee   :  { %v7773_v37 = vsel %vm13743_vm11, %v7771_v31, %v7772_v51  ;;  %7754 = vst [vmem:[#allocation2 + $0x14] sm:$0x1] %v7753_v18  ;;  %v11045_v57 = vld [vmem:[#allocation6 + $0x848] sm:$0xff]   ;;  %v11047_v0 = vld [vmem:[#allocation6 + $0x7d0] sm:$0xff]   ;;  %v11050_v56 = vld [vmem:[#allocation6 + $0x818] sm:$0xff]  }
 0x5ef   :  { %7774 = vst [vmem:[#allocation2 + $0x20] sm:$0x1] %v7773_v37  ;;  %v7768_v52 = vld [vmem:[#allocation2 + $0x1c] sm:$0x1]  ;;  %v11048_v20 = vld [vmem:[#allocation6 + $0x890] sm:$0xff]   ;;  %v11054_v9 = vld [vmem:[#allocation6 + $0x820] sm:$0xff]  }
 0x5f0   :  { %v7769_v46 = vsel %vm13743_vm11, %v7765_v12, %v7768_v52  ;;  %v11049_v3 = vld [vmem:[#allocation6 + $0x850] sm:$0xff]   ;;  %v11051_v36 = vld [vmem:[#allocation6 + $0x7d8] sm:$0xff]   ;;  %v11055_v11 = vld [vmem:[#allocation6 + $0x7e0] sm:$0xff]  }
 0x5f1   :  { %v7775_v60 = vld [vmem:[#allocation2] sm:$0x11]  ;;  %7770 = vst [vmem:[#allocation2 + $0x1c] sm:$0x1] %v7769_v46  ;;  %v11058_v62 = vld [vmem:[#allocation6 + $0x828] sm:$0xff]   ;;  %v11062_v54 = vld [vmem:[#allocation6 + $0x830] sm:$0xff]  }
 0x5f2   :  { %v9524_v25 = vcombine.low %v7775_v60, %v7775_v60  ;;  %v9525_v5 = vcombine.high %v7775_v60, %v7775_v60  ;;  %v11052_v27 = vld [vmem:[#allocation6 + $0x898] sm:$0xff]   ;;  %v11056_v7 = vld [vmem:[#allocation6 + $0x8a0] sm:$0xff]   ;;  %v11059_v40 = vld [vmem:[#allocation6 + $0x7e8] sm:$0xff]  }
 0x5f3   :  { %v7776_v15 = vld [vmem:[#allocation2 + $0x8] sm:$0x11]  ;;  %v11053_v47 = vld [vmem:[#allocation6 + $0x858] sm:$0xff]   ;;  %v11063_v34 = vld [vmem:[#allocation6 + $0x7f0] sm:$0xff]  }
 0x5f4   :  { %8429 = vmatprep.mubr.bf16.mxu0 %v9525_v5  ;;  %v9526_v43 = vcombine.low %v7776_v15, %v7776_v15  ;;  %v9527_v49 = vcombine.high %v7776_v15, %v7776_v15  ;;  %v11057_v42 = vld [vmem:[#allocation6 + $0x860] sm:$0xff]   ;;  %v11060_v19 = vld [vmem:[#allocation6 + $0x8a8] sm:$0xff]   ;;  %v11064_v38 = vld [vmem:[#allocation6 + $0x8b0] sm:$0xff]  }
 0x5f5   :  { %8430 = vmatmul.mubr.bf16.vlgmr.msra.gmra.mrb[124].mxu0 %v9524_v25  ;;  %v13775_v59 = vld [vmem:[#allocation2 + $0x10] sm:$0x11]  ;;  %v11066_v1 = vld [vmem:[#allocation6 + $0x838] sm:$0xff]   ;;  %v11070_v39 = vld [vmem:[#allocation6 + $0x8c0] sm:$0xff]  }
 0x5f6   :  { %10339 = vmatpush3.bf16.msra.mxu0 %v11033_v30  ;;  %8469 = vmatprep.mubr.bf16.mxu1 %v9527_v49  ;;  %v9529_v45 = vcombine.high %v13775_v59, %v13775_v59  ;;  %v11061_v6 = vld [vmem:[#allocation6 + $0x868] sm:$0xff]   ;;  %v11065_v61 = vld [vmem:[#allocation6 + $0x870] sm:$0xff]   ;;  %v11067_v8 = vld [vmem:[#allocation6 + $0x7f8] sm:$0xff]   ;;  %v9528_v21 = vcombine.low %v13775_v59, %v13775_v59 }
 0x5f7   :  { %10340 = vmatprep.subr.bf16.mxu0 %v11040_v41  ;;  %8470 = vmatmul.mubr.bf16.vlgmr.msra.gmra.mrb[124].mxu1 %v9526_v43  ;;  %v11068_v53 = vld [vmem:[#allocation6 + $0x8b8] sm:$0xff]   ;;  %v11071_v10 = vld [vmem:[#allocation6 + $0x8c8] sm:$0xff]   ;;  %v11072_v48 = vld [vmem:[#allocation6 + $0x8d0] sm:$0xff]  }
 0x5f8   :  { %8509 = vmatprep.mubr.bf16.mxu0 %v9529_v45  ;;  %10361 = vmatpush3.bf16.msra.mxu1 %v11039_v24  ;;  %v13779_v58 = vld [vmem:[#allocation2 + $0x18] sm:$0x11]  ;;  %v11074_v2 = vld [vmem:[#allocation6 + $0x8e0] sm:$0xff]   ;;  %v11075_v14 = vld [vmem:[#allocation6 + $0x8e8] sm:$0xff]  }
 0x5f9   :  { %v9531_v17 = vcombine.high %v13779_v58, %v13779_v58  ;;  %10362 = vmatprep.subr.bf16.mxu1 %v11044_v28  ;;  %v11069_v29 = vld [vmem:[#allocation6 + $0x878] sm:$0xff]   ;;  %v9530_v4 = vcombine.low %v13779_v58, %v13779_v58  ;;  %v11076_v13 = vld [vmem:[#allocation6 + $0x8f0] sm:$0xff]   ;;  %v11080_v32 = vld [vmem:[%s13941_s3 + $0x8] sm:$0xff]  }
 0x5fa   :  { %10341 = vmatpush3.bf16.msra.mxu0 %v11043_v35  ;;  %v13785_v23 = vld [vmem:[#allocation5] sm:$0xff]  ;;  %v11081_v31 = vld [vmem:[%s13941_s3 + $0x10] sm:$0xff]   ;;  %v11084_v51 = vld [vmem:[%s13941_s3 + $0x28] sm:$0xff]  }
 0x5fb   :  { %10342 = vmatprep.subr.bf16.mxu0 %v11046_v55  ;;  %8549 = vmatprep.mubr.bf16.mxu1 %v9531_v17  ;;  %v11073_v22 = vld [vmem:[#allocation6 + $0x8d8] sm:$0xff]   ;;  %v11085_v18 = vld [vmem:[%s13941_s3 + $0x30] sm:$0xff]   ;;  %v11088_v12 = vld [vmem:[%s13941_s3 + $0x48] sm:$0xff]  }
 0x5fc   :  { %10363 = vmatpush3.bf16.msra.mxu1 %v11045_v57  ;;  %v11077_v16 = vld [vmem:[#allocation6 + $0x8f8] sm:$0xff]   ;;  %v11089_v60 = vld [vmem:[%s13941_s3 + $0x50] sm:$0xff]   ;;  %v11092_v5 = vld [vmem:[%s13941_s3 + $0x68] sm:$0xff]  }
 0x5fd   :  { %10364 = vmatprep.subr.bf16.mxu1 %v11048_v20  ;;  %v11078_v33 = vld [vmem:[#allocation2 + $0x20] ss:$0 sps:$4 sm:$0x11]   ;;  %v11082_v26 = vld [vmem:[%s13941_s3 + $0x18] sm:$0xff]   ;;  %v9523_v46 = vld [vmem:[#allocation8 + $0x3] ss:$0 sm:$0xff] }
 0x5fe   :  { %10343 = vmatpush3.bf16.msra.mxu0 %v11047_v0  ;;  %v11079_v50 = vld [vmem:[%s13941_s3] sm:$0xff]   ;;  %v11086_v63 = vld [vmem:[%s13941_s3 + $0x38] sm:$0xff]  }
 0x5ff   :  { %10344 = vmatprep.subr.bf16.mxu0 %v11050_v56  ;;  %v11083_v44 = vld [vmem:[%s13941_s3 + $0x20] sm:$0xff]   ;;  %v11090_v52 = vld [vmem:[%s13941_s3 + $0x58] sm:$0xff]  }
 0x600   :  { %10365 = vmatpush3.bf16.msra.mxu1 %v11049_v3  ;;  %v11087_v37 = vld [vmem:[%s13941_s3 + $0x40] sm:$0xff]  }
 0x601   :  { %10366 = vmatprep.subr.bf16.mxu1 %v11052_v27  ;;  %v11091_v25 = vld [vmem:[%s13941_s3 + $0x60] sm:$0xff]  }
 0x602   :  { %10345 = vmatpush3.bf16.msra.mxu0 %v11051_v36 }
 0x603   :  { %10346 = vmatprep.subr.bf16.mxu0 %v11054_v9 }
 0x604   :  { %10367 = vmatpush3.bf16.msra.mxu1 %v11053_v47 }
 0x605   :  { %10368 = vmatprep.subr.bf16.mxu1 %v11056_v7 }
 0x606   :  { %10347 = vmatpush3.bf16.msra.mxu0 %v11055_v11 }
 0x607   :  { %10348 = vmatprep.subr.bf16.mxu0 %v11058_v62 }
 0x608   :  { %10369 = vmatpush3.bf16.msra.mxu1 %v11057_v42 }
 0x609   :  { %10370 = vmatprep.subr.bf16.mxu1 %v11060_v19 }
 0x60a   :  { %10349 = vmatpush3.bf16.msra.mxu0 %v11059_v40 }
 0x60b   :  { %10350 = vmatprep.subr.bf16.mxu0 %v11062_v54 }
 0x60c   :  { %10371 = vmatpush3.bf16.msra.mxu1 %v11061_v6 }
 0x60d   :  { %10372 = vmatprep.subr.bf16.mxu1 %v11064_v38 }
 0x60e   :  { %10351 = vmatpush3.bf16.msra.mxu0 %v11063_v34 }
 0x60f   :  { %10352 = vmatprep.subr.bf16.mxu0 %v11066_v1  ;;  %v11093_v1 = vld [vmem:[%s13941_s3 + $0x70] sm:$0xff]  }
 0x610   :  { %10373 = vmatpush3.bf16.msra.mxu1 %v11065_v61  ;;  %v11094_v61 = vld [vmem:[%s13941_s3 + $0x78] sm:$0xff]  }
 0x611   :  { %10374 = vmatprep.subr.bf16.mxu1 %v11068_v53  ;;  %v11096_v53 = vld [vmem:[%s13941_s3 + $0x88] sm:$0xff]  }
 0x612   :  { %10353 = vmatpush3.bf16.msra.mxu0 %v11067_v8  ;;  %v11095_v8 = vld [vmem:[%s13941_s3 + $0x80] sm:$0xff]  }
 0x613   :  { %10515 = vmatprep.subr.bf16.mxu0 %v13785_v23 }
 0x614   :  { %10375 = vmatpush3.bf16.msra.mxu1 %v11069_v29  ;;  %v11097_v29 = vld [vmem:[%s13941_s3 + $0x90] sm:$0xff]  }
 0x615   :  { %8510 = vmatmul.mubr.bf16.vlgmr.msra.gmra.mrb[128].mxu0 %v9528_v21  ;;  %10535 = vmatprep.subr.bf16.mxu1 %v13785_v23  ;;  %v11099_v21 = vld [vmem:[%s13941_s3 + $0xa0] sm:$0xff]  }
 0x616   :  { %10516 = vmatpush3.bf16.msra.mxu0 %v11070_v39  ;;  %10531 = vmatprep.mubr.msk.bf16.mxu0 %vm14038_vm12, %v13785_v23  ;;  %v11098_v39 = vld [vmem:[%s13941_s3 + $0x98] sm:$0xff]  }
 0x617   :  { %10517 = vmatprep.subr.bf16.mxu0 %v13785_v23  ;;  %8550 = vmatmul.mubr.bf16.vlgmr.msra.gmra.mrb[128].mxu1 %v9530_v4  ;;  %v11100_v4 = vld [vmem:[%s13941_s3 + $0xa8] sm:$0xff]  }
 0x618   :  { %10551 = vmatprep.mubr.msk.bf16.mxu1 %vm14038_vm12, %v13785_v23  ;;  %10536 = vmatpush3.bf16.msra.mxu1 %v11079_v50  ;;  %v11101_v50 = vld [vmem:[%s13941_s3 + $0xb0] sm:$0xff]  }
 0x619   :  { %10537 = vmatprep.subr.bf16.mxu1 %v13785_v23 }
 0x61a   :  { %10518 = vmatpush3.bf16.msra.mxu0 %v11071_v10  ;;  %v9605_v10 = vld [vmem:[#allocation10] ss:$0 sm:$0xff] }
 0x61b   :  { %10519 = vmatprep.subr.bf16.mxu0 %v13785_v23 }
 0x61c   :  { %10538 = vmatpush3.bf16.msra.mxu1 %v11080_v32  ;;  %v11102_v32 = vld [vmem:[%s13941_s3 + $0xb8] sm:$0xff]  }
 0x61d   :  { %10539 = vmatprep.subr.bf16.mxu1 %v13785_v23 }
 0x61e   :  { %10520 = vmatpush3.bf16.msra.mxu0 %v11072_v48 }
 0x61f   :  { %10521 = vmatprep.subr.bf16.mxu0 %v13785_v23 }
 0x620   :  { %10540 = vmatpush3.bf16.msra.mxu1 %v11081_v31  ;;  %v11103_v31 = vld [vmem:[%s13943_s5] sm:$0xff]  }
 0x621   :  { %10541 = vmatprep.subr.bf16.mxu1 %v13785_v23 }
 0x622   :  { %10522 = vmatpush3.bf16.msra.mxu0 %v11073_v22 }
 0x623   :  { %10523 = vmatprep.subr.bf16.mxu0 %v13785_v23 }
 0x624   :  { %10542 = vmatpush3.bf16.msra.mxu1 %v11082_v26  ;;  %v11104_v26 = vld [vmem:[%s13943_s5 + $0x8] sm:$0xff]  }
 0x625   :  { %10543 = vmatprep.subr.bf16.mxu1 %v13785_v23 }
 0x626   :  { %10524 = vmatpush3.bf16.msra.mxu0 %v11074_v2 }
 0x627   :  { %10525 = vmatprep.subr.bf16.mxu0 %v13785_v23 }
 0x628   :  { %10544 = vmatpush3.bf16.msra.mxu1 %v11083_v44  ;;  %v11105_v44 = vld [vmem:[%s13943_s5 + $0x10] sm:$0xff]  }
 0x629   :  { %10545 = vmatprep.subr.bf16.mxu1 %v13785_v23 }
 0x62a   :  { %10526 = vmatpush3.bf16.msra.mxu0 %v11075_v14 }
 0x62b   :  { %10527 = vmatprep.subr.bf16.mxu0 %v13785_v23 }
 0x62c   :  { %10546 = vmatpush3.bf16.msra.mxu1 %v11084_v51  ;;  %v11106_v51 = vld [vmem:[%s13943_s5 + $0x18] sm:$0xff]  }
 0x62d   :  { %10547 = vmatprep.subr.bf16.mxu1 %v13785_v23 }
 0x62e   :  { %10528 = vmatpush3.bf16.msra.mxu0 %v11076_v13 }
 0x62f   :  { %10529 = vmatprep.subr.bf16.mxu0 %v13785_v23 }
 0x630   :  { %10548 = vmatpush3.bf16.msra.mxu1 %v11085_v18  ;;  %v11107_v18 = vld [vmem:[%s13943_s5 + $0x20] sm:$0xff]  }
 0x631   :  { %10549 = vmatprep.subr.bf16.mxu1 %v13785_v23 }
 0x632   :  { %10530 = vmatpush3.bf16.msra.mxu0 %v11077_v16 }
 0x633   :  { %10555 = vmatprep.subr.bf16.mxu0 %v13785_v23 }
 0x634   :  { %10550 = vmatpush3.bf16.msra.mxu1 %v11086_v63  ;;  %v11108_v63 = vld [vmem:[%s13943_s5 + $0x28] sm:$0xff]  }
 0x635   :  { %10532 = vmatmul.mubr.bf16.vlgmr.msra.gmra.mrb[132].mxu0 %v11078_v33  ;;  %10575 = vmatprep.subr.bf16.mxu1 %v13785_v23 }
 0x636   :  { %10571 = vmatprep.mubr.msk.bf16.mxu0 %vm14038_vm12, %v13785_v23  ;;  %10556 = vmatpush3.bf16.msra.mxu0 %v11087_v37  ;;  %v9630_v37 = vld [vmem:[#allocation10 + $0x1] ss:$0 sm:$0xff] }
 0x637   :  { %10557 = vmatprep.subr.bf16.mxu0 %v13785_v23 }
 0x63a   :  { %10558 = vmatpush3.bf16.msra.mxu0 %v11088_v12 }
 0x63b   :  { %10559 = vmatprep.subr.bf16.mxu0 %v13785_v23 }
 0x63e   :  { %10560 = vmatpush3.bf16.msra.mxu0 %v11089_v60 }
 0x63f   :  { %10561 = vmatprep.subr.bf16.mxu0 %v13785_v23 }
 0x642   :  { %10562 = vmatpush3.bf16.msra.mxu0 %v11090_v52 }
 0x643   :  { %10563 = vmatprep.subr.bf16.mxu0 %v13785_v23 }
 0x646   :  { %10564 = vmatpush3.bf16.msra.mxu0 %v11091_v25 }
 0x647   :  { %10565 = vmatprep.subr.bf16.mxu0 %v13785_v23 }
 0x64a   :  { %10566 = vmatpush3.bf16.msra.mxu0 %v11092_v5 }
 0x64b   :  { %10567 = vmatprep.subr.bf16.mxu0 %v13785_v23 }
 0x64e   :  { %10568 = vmatpush3.bf16.msra.mxu0 %v11093_v1 }
 0x64f   :  { %10569 = vmatprep.subr.bf16.mxu0 %v13785_v23 }
 0x652   :  { %10570 = vmatpush3.bf16.msra.mxu0 %v11094_v61 }
 0x653   :  { %10595 = vmatprep.subr.bf16.mxu0 %v13785_v23 }
 0x6c8   :  { %v10310_v30 = vpop.f32.mrb[124].mxu0 }
 0x6c9   :  { %v10311_v41 = vpop.f32.mrb[125].mxu0 }
 0x6ca   :  { %v10312_v15 = vadd.f32 %v10311_v41, %v10310_v30  ;;  %v10313_v43 = vpop.f32.mrb[126].mxu0  ;;  %v10332_v35 = vpop.f32.mrb[124].mxu1  ;;  %v11109_v41 = vld [vmem:[%s13943_s5 + $0x30] sm:$0xff]  }
 0x6cb   :  { %v10314_v49 = vpop.f32.mrb[127].mxu0  ;;  %v10333_v59 = vpop.f32.mrb[125].mxu1  ;;  %v9655_v43 = vld [vmem:[#allocation10 + $0x2] ss:$0 sm:$0xff] }
 0x6cc   :  { %v8432_v24 = vadd.f32 %v10312_v15, %v9523_v46  ;;  %v10334_v28 = vadd.f32 %v10333_v59, %v10332_v35  ;;  %v10335_v45 = vpop.f32.mrb[126].mxu1  ;;  %v11110_v15 = vld [vmem:[%s13943_s5 + $0x38] sm:$0xff]  }
 0x6cd   :  { %v10336_v55 = vpop.f32.mrb[127].mxu1 }
 0x6ce   :  { %v8472_v58 = vadd.f32 %v10334_v28, %v8432_v24 }
 0x6e8   :  { %v10354_v57 = vpop.f32.mrb[128].mxu0 }
 0x6e9   :  { %v10355_v17 = vpop.f32.mrb[129].mxu0 }
 0x6ea   :  { %v10356_v0 = vadd.f32 %v10355_v17, %v10354_v57  ;;  %v10357_v20 = vpop.f32.mrb[130].mxu0  ;;  %v10376_v56 = vpop.f32.mrb[128].mxu1 }
 0x6eb   :  { %v10358_v3 = vpop.f32.mrb[131].mxu0  ;;  %v10377_v27 = vpop.f32.mrb[129].mxu1 }
 0x6ec   :  { %v8512_v36 = vadd.f32 %v10356_v0, %v8472_v58  ;;  %v10378_v9 = vadd.f32 %v10377_v27, %v10376_v56  ;;  %v10379_v47 = vpop.f32.mrb[130].mxu1  ;;  %v9664_v58 = vld [vmem:[#allocation11] ss:$0 sm:$0xff] }
 0x6ed   :  { %v10380_v11 = vpop.f32.mrb[131].mxu1 }
 0x6ee   :  { %v8552_v7 = vadd.f32 %v10378_v9, %v8512_v36 }
 0x708   :  { %v8591_v62 = vpop.f32.mrb[132].mxu0 }
 0x709   :  { %v8592_v42 = vadd.f32 %v8591_v62, %v8552_v7  ;;  %v10533_v40 = vpop.f32.mrb[133].mxu0 }
 0x70a   :  { %v8594_v19 = vpop.f32.mrb[134].mxu0 }
 0x70b   :  { %v8597_v54 = vmax.f32 %v8592_v42, 0.0  ;;  %v10534_v6 = vpop.f32.mrb[135].mxu0 }
 0x70d   :  { %8599 = vst [vmem:[#allocation5] sm:$0x3] %v8597_v54 }
 0x714   :  { %v8600_v34 = vld [vmem:[#allocation5] sm:$0xff] }
 0x715   :  { %v8601_v38 = vpack.c.bf16 %v8600_v34, %v8600_v34 }
 0x717   :  { %10552 = vmatmul.mubr.bf16.vlgmr.msra.gmra.mrb[132].mxu1 %v8601_v38 }
 0x718   :  { %10591 = vmatprep.mubr.msk.bf16.mxu1 %vm14038_vm12, %v13785_v23  ;;  %10576 = vmatpush3.bf16.msra.mxu1 %v11095_v8 }
 0x719   :  { %10577 = vmatprep.subr.bf16.mxu1 %v13785_v23 }
 0x71c   :  { %10578 = vmatpush3.bf16.msra.mxu1 %v11096_v53 }
 0x71d   :  { %10579 = vmatprep.subr.bf16.mxu1 %v13785_v23 }
 0x720   :  { %10580 = vmatpush3.bf16.msra.mxu1 %v11097_v29 }
 0x721   :  { %10581 = vmatprep.subr.bf16.mxu1 %v13785_v23 }
 0x724   :  { %10582 = vmatpush3.bf16.msra.mxu1 %v11098_v39 }
 0x725   :  { %10583 = vmatprep.subr.bf16.mxu1 %v13785_v23 }
 0x728   :  { %10584 = vmatpush3.bf16.msra.mxu1 %v11099_v21 }
 0x729   :  { %10585 = vmatprep.subr.bf16.mxu1 %v13785_v23 }
 0x72c   :  { %10586 = vmatpush3.bf16.msra.mxu1 %v11100_v4 }
 0x72d   :  { %10587 = vmatprep.subr.bf16.mxu1 %v13785_v23 }
 0x730   :  { %10588 = vmatpush3.bf16.msra.mxu1 %v11101_v50 }
 0x731   :  { %10589 = vmatprep.subr.bf16.mxu1 %v13785_v23 }
 0x734   :  { %10590 = vmatpush3.bf16.msra.mxu1 %v11102_v32 }
 0x7ea   :  { %v8707_v48 = vpop.f32.mrb[132].mxu1 }
 0x7eb   :  { %v8708_v22 = vadd.f32 %v9605_v10, %v8707_v48  ;;  %v10553_v2 = vpop.f32.mrb[133].mxu1 }
 0x7ec   :  { %v8710_v14 = vpop.f32.mrb[134].mxu1 }
 0x7ed   :  { %v8713_v13 = vmax.f32 %v8708_v22, 0.0  ;;  %v10554_v16 = vpop.f32.mrb[135].mxu1 }
 0x7ef   :  { %v8714_v33 = vpack.c.bf16 %v8713_v13, %v8713_v13 }
 0x7f1   :  { %10572 = vmatmul.mubr.bf16.vlgmr.msra.gmra.mrb[136].mxu0 %v8714_v33 }
 0x7f2   :  { %10611 = vmatprep.mubr.msk.bf16.mxu0 %vm14038_vm12, %v13785_v23  ;;  %10596 = vmatpush3.bf16.msra.mxu0 %v11103_v31 }
 0x7f3   :  { %10597 = vmatprep.subr.bf16.mxu0 %v13785_v23 }
 0x7f6   :  { %10598 = vmatpush3.bf16.msra.mxu0 %v11104_v26 }
 0x7f7   :  { %10599 = vmatprep.subr.bf16.mxu0 %v13785_v23 }
 0x7fa   :  { %10600 = vmatpush3.bf16.msra.mxu0 %v11105_v44 }
 0x7fb   :  { %10601 = vmatprep.subr.bf16.mxu0 %v13785_v23 }
 0x7fe   :  { %10602 = vmatpush3.bf16.msra.mxu0 %v11106_v51 }
 0x7ff   :  { %10603 = vmatprep.subr.bf16.mxu0 %v13785_v23 }
 0x802   :  { %10604 = vmatpush3.bf16.msra.mxu0 %v11107_v18 }
 0x803   :  { %10605 = vmatprep.subr.bf16.mxu0 %v13785_v23 }
 0x806   :  { %10606 = vmatpush3.bf16.msra.mxu0 %v11108_v63 }
 0x807   :  { %10607 = vmatprep.subr.bf16.mxu0 %v13785_v23 }
 0x80a   :  { %10608 = vmatpush3.bf16.msra.mxu0 %v11109_v41 }
 0x80b   :  { %10609 = vmatprep.subr.bf16.mxu0 %v13785_v23 }
 0x80e   :  { %10610 = vmatpush3.bf16.msra.mxu0 %v11110_v15 }
 0x8c4   :  { %v8822_v12 = vpop.f32.mrb[136].mxu0 }
 0x8c5   :  { %v8823_v60 = vadd.f32 %v9630_v37, %v8822_v12  ;;  %v10573_v52 = vpop.f32.mrb[137].mxu0 }
 0x8c6   :  { %v8825_v25 = vpop.f32.mrb[138].mxu0 }
 0x8c7   :  { %v8828_v5 = vmax.f32 %v8823_v60, 0.0  ;;  %v10574_v30 = vpop.f32.mrb[139].mxu0 }
 0x8c9   :  { %v8829_v46 = vpack.c.bf16 %v8828_v5, %v8828_v5 }
 0x8cb   :  { %10592 = vmatmul.mubr.bf16.vlgmr.msra.gmra.mrb[136].mxu1 %v8829_v46 }
 0x99e   :  { %v8937_v49 = vpop.f32.mrb[136].mxu1 }
 0x99f   :  { %v8938_v24 = vadd.f32 %v9655_v43, %v8937_v49  ;;  %v10593_v35 = vpop.f32.mrb[137].mxu1 }
 0x9a0   :  { %v8940_v59 = vpop.f32.mrb[138].mxu1 }
 0x9a1   :  { %v8943_v28 = vmax.f32 %v8938_v24, 0.0  ;;  %v10594_v45 = vpop.f32.mrb[139].mxu1 }
 0x9a3   :  { %v8944_v55 = vpack.c.bf16 %v8943_v28, %v8943_v28 }
 0x9a5   :  { %10612 = vmatmul.mubr.bf16.vlgmr.msra.gmra.mrb[140].mxu0 %v8944_v55 }
 0xa78   :  { %v9050_v57 = vpop.f32.mrb[140].mxu0 }
 0xa79   :  { %v9051_v17 = vadd.f32 %v9664_v58, %v9050_v57  ;;  %v10613_v0 = vpop.f32.mrb[141].mxu0 }
 0xa7a   :  { %v9053_v20 = vpop.f32.mrb[142].mxu0 }
 0xa7b   :  { %9056 = vst [vmem:[%s13945_s7] sm:$0xff] %v9051_v17  ;;  %v10614_v23 = vpop.f32.mrb[143].mxu0 }
 0xa7c   :  { %9061 = vsyncpa [#allocation7], 1 }
 0xa7d   :  { %9062 = vsyncpa [#allocation9], 1 }
 0xa7e   :  { %9063 = vsyncpa [#allocation12], 1 }

</bundles_post_ra>
